<compile_context>
chip_gen: v7x
topology: tpu7x:2x2x1
jax: 0.10.0
libtpu: 0.0.40
codegen_flags: <defaults>
</compile_context>

<pallas_src>
import jax
import jax.numpy as jnp
from jax.experimental import pallas as pl
from jax.experimental.pallas import tpu as pltpu

# ---------------------------------------------------------------------------
# Geometry (Linear(800) = 32*5*5 => the net implies 3x32x32 inputs).
# ---------------------------------------------------------------------------
KH1, KW1, CIN1, COUT1 = 9, 9, 3, 24
KH2, KW2, CIN2, COUT2 = 3, 3, 24, 32
K1, K2 = KH1 * KW1 * CIN1, KH2 * KW2 * CIN2          # 243, 216
KP = 256                                             # padded contraction dim
H_IN = W_IN = 32
HP1 = WP1 = (H_IN - KH1 + 1) // 2                    # 12
M1 = HP1 * WP1                                       # 144 pooled positions
HP2 = WP2 = (HP1 - KH2 + 1) // 2                     # 5
M2 = HP2 * WP2                                       # 25 pooled positions
NFC1, NFC2, NOUT = 108, 72, 10
NP = 128                                             # padded FC width


# ---------------------------------------------------------------------------
# Pallas kernels
# ---------------------------------------------------------------------------
def conv1_kernel(p_ref, w_ref, b_ref, o_ref):
    """conv1 (stacked matmul) + bias + ReLU + 2x2 maxpool for one batch block.

    p_ref: (4*BB*M1, KP) bf16   im2col patch rows ordered (pool-group, image, pos)
    w_ref: (KP, 24)      bf16
    b_ref: (1, 24)       f32
    o_ref: (BB*M1, 24)   bf16   pooled activation, rows ordered (image, pos)
    """
    gm = o_ref.shape[0]                               # BB * M1 rows per group
    acc = jnp.dot(p_ref[...], w_ref[...], preferred_element_type=jnp.float32)
    # relu(max_g(dot_g) + b) == max_g(relu(dot_g + b)) since b is shared and
    # relu is monotone -> matches PyTorch conv -> ReLU -> MaxPool ordering.
    pooled = jnp.maximum(
        jnp.maximum(acc[0 * gm:1 * gm], acc[1 * gm:2 * gm]),
        jnp.maximum(acc[2 * gm:3 * gm], acc[3 * gm:4 * gm]))
    o_ref[...] = jnp.maximum(pooled + b_ref[...], 0.0).astype(o_ref.dtype)


def conv2_fc_kernel(p_ref, w2_ref, b2_ref, w3_ref, b3_ref, w4_ref, b4_ref,
                    w5_ref, b5_ref, o_ref):
    """conv2 + bias + ReLU + 2x2 maxpool fused with the whole FC tail.

    p_ref : (4*M2*BB, KP) bf16  conv2 patches, rows ordered (pool-group, pos, image)
    w2_ref: (KP, 32) bf16,  b2_ref: (1, 32) f32
    w3_ref: (M2, 32, NP) bf16   fc1 weights regrouped by conv position
    b3_ref: (1, NP) f32
    w4_ref: (NP, NP) bf16, b4_ref: (1, NP) f32
    w5_ref: (NP, NOUT) bf16, b5_ref: (1, NOUT) f32
    o_ref : (BB, NOUT) f32
    """
    BB = o_ref.shape[0]
    mb = M2 * BB
    acc = jnp.dot(p_ref[...], w2_ref[...], preferred_element_type=jnp.float32)
    pooled = jnp.maximum(
        jnp.maximum(acc[0 * mb:1 * mb], acc[1 * mb:2 * mb]),
        jnp.maximum(acc[2 * mb:3 * mb], acc[3 * mb:4 * mb]))   # (M2*BB, 32)
    act = jnp.maximum(pooled + b2_ref[...], 0.0)               # f32, rows (pos, image)

    # fc1: flatten over (conv position, channel) == sum_m act_m @ W3[m].
    # Position-wise dots avoid any (BB,25,32)->(BB,800) cross-tile relayout.
    a0 = act[0:BB, :].astype(jnp.bfloat16)
    h = jnp.dot(a0, w3_ref[0], preferred_element_type=jnp.float32)
    for m in range(1, M2):
        a_m = act[m * BB:(m + 1) * BB, :].astype(jnp.bfloat16)  # (BB, 32)
        h = h + jnp.dot(a_m, w3_ref[m], preferred_element_type=jnp.float32)
    h = jnp.maximum(h + b3_ref[...], 0.0).astype(jnp.bfloat16)  # (BB, 128)
    h = jnp.dot(h, w4_ref[...], preferred_element_type=jnp.float32)
    h = jnp.maximum(h + b4_ref[...], 0.0).astype(jnp.bfloat16)  # (BB, 128)
    h = jnp.dot(h, w5_ref[...], preferred_element_type=jnp.float32)
    o_ref[...] = jnp.maximum(h + b5_ref[...], 0.0)               # (BB, 10)


# ---------------------------------------------------------------------------
# XLA-side glue (im2col grouped by 2x2 pool window)
# ---------------------------------------------------------------------------
def _im2col_pooled(x, kh, kw):
    """x: (B,H,W,C) -> (B, 4, Hp*Wp, kh*kw*C).  Group g = 2*oi + oj holds the
    patch for conv-output position (2*hp+oi, 2*wp+oj); feature order (di,dj,c)."""
    B, H, W, C = x.shape
    Hp, Wp = (H - kh + 1) // 2, (W - kw + 1) // 2
    groups = []
    for oi in (0, 1):
        for oj in (0, 1):
            feats = []
            for di in range(kh):
                for dj in range(kw):
                    r0, c0 = oi + di, oj + dj
                    feats.append(x[:, r0:r0 + 2 * Hp:2, c0:c0 + 2 * Wp:2, :])
            groups.append(
                jnp.concatenate(feats, axis=-1).reshape(B, 1, Hp * Wp, kh * kw * C))
    return jnp.concatenate(groups, axis=1)


def _compiler_params():
    return pltpu.CompilerParams(
        dimension_semantics=("parallel",),            # v7x: 2 TCs split batch blocks
        vmem_limit_bytes=48 * 1024 * 1024)            # < v7x 64 MiB physical VMEM


def _pick_bb(B):
    """Images per grid step: multiple of 8, big enough to fill MXU sublanes,
    small enough to keep >= 2 blocks (v7x megacore) and fit v7x VMEM."""
    for bb in (32, 16, 8):
        if B >= 2 * bb:
            return bb
    return 8


# ---------------------------------------------------------------------------
# Stage wrappers
# ---------------------------------------------------------------------------
def conv1_relu_pool(x_nhwc, w, b, bb):
    """(Bp,32,32,3) bf16 -> (Bp,12,12,24) bf16, Bp a multiple of bb."""
    Bp = x_nhwc.shape[0]
    nblk = Bp // bb
    p = _im2col_pooled(x_nhwc, KH1, KW1)                       # (Bp,4,144,243)
    p = jnp.pad(p, ((0, 0), (0, 0), (0, 0), (0, KP - K1)))     # K -> 256
    # Per-block row order: (pool-group g, image b, position m).
    p = p.reshape(nblk, bb, 4, M1, KP).transpose(0, 2, 1, 3, 4)
    p = p.reshape(nblk * 4 * bb * M1, KP)
    out = pl.pallas_call(
        conv1_kernel,
        out_shape=jax.ShapeDtypeStruct((Bp * M1, COUT1), jnp.bfloat16),
        grid=(nblk,),
        in_specs=[
            pl.BlockSpec((4 * bb * M1, KP), lambda i: (i, 0)),
            pl.BlockSpec((KP, COUT1), lambda i: (0, 0)),       # weights resident
            pl.BlockSpec((1, COUT1), lambda i: (0, 0)),        # bias resident
        ],
        out_specs=pl.BlockSpec((bb * M1, COUT1), lambda i: (i, 0)),
        compiler_params=_compiler_params(),
    )(p, w, b)
    return out.reshape(Bp, HP1, WP1, COUT1)


def conv2_fc(x1_nhwc, prm, bb):
    """(Bp,12,12,24) bf16 -> (Bp,10) f32 (conv2+ReLU+pool+FC tail fused)."""
    Bp = x1_nhwc.shape[0]
    nblk = Bp // bb
    p = _im2col_pooled(x1_nhwc, KH2, KW2)                      # (Bp,4,25,216)
    p = jnp.pad(p, ((0, 0), (0, 0), (0, 0), (0, KP - K2)))     # K -> 256
    # Per-block row order: (pool-group g, position m, image b).
    p = p.reshape(nblk, bb, 4, M2, KP).transpose(0, 2, 3, 1, 4)
    p = p.reshape(nblk * 4 * M2 * bb, KP)
    resident = lambda shape: pl.BlockSpec(shape, lambda i: tuple(0 for _ in shape))
    return pl.pallas_call(
        conv2_fc_kernel,
        out_shape=jax.ShapeDtypeStruct((Bp, NOUT), jnp.float32),
        grid=(nblk,),
        in_specs=[
            pl.BlockSpec((4 * M2 * bb, KP), lambda i: (i, 0)),
            resident((KP, COUT2)), resident((1, COUT2)),
            resident((M2, COUT2, NP)), resident((1, NP)),
            resident((NP, NP)), resident((1, NP)),
            resident((NP, NOUT)), resident((1, NOUT)),
        ],
        out_specs=pl.BlockSpec((bb, NOUT), lambda i: (i, 0)),
        compiler_params=_compiler_params(),
    )(p, prm["w2"], prm["b2"], prm["w3"], prm["b3"],
      prm["w4"], prm["b4"], prm["w5"], prm["b5"])


# ---------------------------------------------------------------------------
# Parameters
# ---------------------------------------------------------------------------
def init_params(key):
    """PyTorch-shaped parameters (Conv OIHW, Linear (out, in))."""
    ks = jax.random.split(key, 10)
    s = 0.05
    return {
        "w1": s * jax.random.normal(ks[0], (COUT1, CIN1, KH1, KW1), jnp.float32),
        "b1": s * jax.random.normal(ks[1], (COUT1,), jnp.float32),
        "w2": s * jax.random.normal(ks[2], (COUT2, CIN2, KH2, KW2), jnp.float32),
        "b2": s * jax.random.normal(ks[3], (COUT2,), jnp.float32),
        "w3": s * jax.random.normal(ks[4], (NFC1, 800), jnp.float32),
        "b3": s * jax.random.normal(ks[5], (NFC1,), jnp.float32),
        "w4": s * jax.random.normal(ks[6], (NFC2, NFC1), jnp.float32),
        "b4": s * jax.random.normal(ks[7], (NFC2,), jnp.float32),
        "w5": s * jax.random.normal(ks[8], (NOUT, NFC2), jnp.float32),
        "b5": s * jax.random.normal(ks[9], (NOUT,), jnp.float32),
    }


def prepare_params(p):
    """One-time relayout: OIHW -> (di,dj,cin,out), zero-pad K to 256 and the FC
    widths to 128, and regroup fc1 rows from PyTorch's (c,h,w) flatten order to
    per-conv-position (m, c) so the kernel never reshapes activations."""
    w1 = jnp.transpose(p["w1"], (2, 3, 1, 0)).reshape(K1, COUT1)
    w1 = jnp.pad(w1, ((0, KP - K1), (0, 0))).astype(jnp.bfloat16)
    w2 = jnp.transpose(p["w2"], (2, 3, 1, 0)).reshape(K2, COUT2)
    w2 = jnp.pad(w2, ((0, KP - K2), (0, 0))).astype(jnp.bfloat16)
    # fc1: W3[n, c*25 + h*5 + w]  ->  w3_3d[m=h*5+w, c, n], out dim 108 -> 128.
    w3 = jnp.transpose(p["w3"].reshape(NFC1, COUT2, HP2, WP2), (2, 3, 1, 0))
    w3 = w3.reshape(M2, COUT2, NFC1)
    w3 = jnp.pad(w3, ((0, 0), (0, 0), (0, NP - NFC1))).astype(jnp.bfloat16)
    w4 = jnp.pad(p["w4"].T, ((0, NP - NFC1), (0, NP - NFC2))).astype(jnp.bfloat16)
    w5 = jnp.pad(p["w5"].T, ((0, NP - NFC2), (0, 0))).astype(jnp.bfloat16)
    return {
        "w1": w1, "b1": p["b1"].reshape(1, COUT1).astype(jnp.float32),
        "w2": w2, "b2": p["b2"].reshape(1, COUT2).astype(jnp.float32),
        "w3": w3,
        "b3": jnp.pad(p["b3"], (0, NP - NFC1)).reshape(1, NP).astype(jnp.float32),
        "w4": w4,
        "b4": jnp.pad(p["b4"], (0, NP - NFC2)).reshape(1, NP).astype(jnp.float32),
        "w5": w5, "b5": p["b5"].reshape(1, NOUT).astype(jnp.float32),
    }


@jax.jit
def mynet_forward(x_nchw, prm):
    B = x_nchw.shape[0]
    bb = _pick_bb(B)
    Bp = ((B + bb - 1) // bb) * bb
    x = jnp.transpose(x_nchw, (0, 2, 3, 1)).astype(jnp.bfloat16)   # NHWC bf16
    if Bp != B:
        x = jnp.pad(x, ((0, Bp - B), (0, 0), (0, 0), (0, 0)))
    x1 = conv1_relu_pool(x, prm["w1"], prm["b1"], bb)              # (Bp,12,12,24)
    out = conv2_fc(x1, prm, bb)                                    # (Bp, 10) f32
    return out[:B]


if __name__ == "__main__":
    key = jax.random.PRNGKey(0)
    k_x, k_p = jax.random.split(key)
    # Linear(800) = 32*5*5  =>  the forward implies 3x32x32 inputs.
    x = jax.random.normal(k_x, (2, 3, 32, 32), jnp.float32)
    params = prepare_params(init_params(k_p))
    out = jax.block_until_ready(mynet_forward(x, params))
    assert out.shape == (2, 10), out.shape
    assert bool(jnp.all(out >= 0.0))  # final ReLU
    print("KERNEL_OK")
</pallas_src>

<mosaic_0001>
module attributes {stable_mosaic.version = 11 : i64} {
  func.func @conv1_kernel(%arg0: i32, %arg1: memref<4608x256xbf16, #tpu.memory_space<vmem>>, %arg2: memref<256x24xbf16, #tpu.memory_space<vmem>>, %arg3: memref<1x24xf32, #tpu.memory_space<vmem>>, %arg4: memref<1152x24xbf16, #tpu.memory_space<vmem>>) attributes {dimension_semantics = [#tpu.dimension_semantics<parallel>], iteration_bounds = array<i64: 1>, scalar_prefetch = 0 : i64, scratch_operands = 0 : i64, tpu.core_type = #tpu.core_type<tc>, window_params = [{transform_indices = @transform_0, window_bounds = array<i64: 4608, 256>}, {pipeline_mode = #tpu.pipeline_mode<synchronous>, transform_indices = @transform_1, window_bounds = array<i64: 256, 24>}, {pipeline_mode = #tpu.pipeline_mode<synchronous>, transform_indices = @transform_2, window_bounds = array<i64: 1, 24>}, {transform_indices = @transform_3, window_bounds = array<i64: 1152, 24>}]} {
    %c0 = arith.constant 0 : index
    %c0_0 = arith.constant 0 : index
    %0 = vector.load %arg1[%c0, %c0_0] : memref<4608x256xbf16, #tpu.memory_space<vmem>>, vector<4608x256xbf16>
    %c0_1 = arith.constant 0 : index
    %c0_2 = arith.constant 0 : index
    %1 = vector.load %arg2[%c0_1, %c0_2] : memref<256x24xbf16, #tpu.memory_space<vmem>>, vector<256x24xbf16>
    %cst = arith.constant dense<0.000000e+00> : vector<4608x24xf32>
    %2 = tpu.matmul %0, %1, %cst {dimension_numbers = #tpu.dot_dimension_numbers<[1], [0], [0], [1], [0, 0, 1, 1], [], []>} : vector<4608x256xbf16>, vector<256x24xbf16>, vector<4608x24xf32> -> vector<4608x24xf32>
    %3 = vector.extract_strided_slice %2 {offsets = [0, 0], sizes = [1152, 24], strides = [1, 1]} : vector<4608x24xf32> to vector<1152x24xf32>
    %4 = vector.extract_strided_slice %2 {offsets = [1152, 0], sizes = [1152, 24], strides = [1, 1]} : vector<4608x24xf32> to vector<1152x24xf32>
    %5 = arith.maximumf %3, %4 : vector<1152x24xf32>
    %6 = vector.extract_strided_slice %2 {offsets = [2304, 0], sizes = [1152, 24], strides = [1, 1]} : vector<4608x24xf32> to vector<1152x24xf32>
    %7 = vector.extract_strided_slice %2 {offsets = [3456, 0], sizes = [1152, 24], strides = [1, 1]} : vector<4608x24xf32> to vector<1152x24xf32>
    %8 = arith.maximumf %6, %7 : vector<1152x24xf32>
    %9 = arith.maximumf %5, %8 : vector<1152x24xf32>
    %c0_3 = arith.constant 0 : index
    %c0_4 = arith.constant 0 : index
    %10 = vector.load %arg3[%c0_3, %c0_4] : memref<1x24xf32, #tpu.memory_space<vmem>>, vector<1x24xf32>
    %11 = vector.broadcast %10 : vector<1x24xf32> to vector<1152x24xf32>
    %12 = arith.addf %9, %11 : vector<1152x24xf32>
    %cst_5 = arith.constant 0.000000e+00 : f32
    %13 = vector.broadcast %cst_5 : f32 to vector<1152x24xf32>
    %14 = arith.maximumf %12, %13 : vector<1152x24xf32>
    %15 = arith.truncf %14 : vector<1152x24xf32> to vector<1152x24xbf16>
    %c0_6 = arith.constant 0 : index
    %c0_7 = arith.constant 0 : index
    %16 = vector.load %arg4[%c0_6, %c0_7] : memref<1152x24xbf16, #tpu.memory_space<vmem>>, vector<1152x24xbf16>
    tpu.vector_store %arg4[%c0_6, %c0_7], %15 {strides = array<i32>} : memref<1152x24xbf16, #tpu.memory_space<vmem>>, vector<1152x24xbf16>,
    return
  }
  func.func @transform_0(%arg0: i32) -> (i32, i32) {
    %c0_i32 = arith.constant 0 : i32
    %c0_i32_0 = arith.constant 0 : i32
    return %arg0, %c0_i32 : i32, i32
  }
  func.func @transform_1(%arg0: i32) -> (i32, i32) {
    %c0_i32 = arith.constant 0 : i32
    %c0_i32_0 = arith.constant 0 : i32
    %c0_i32_1 = arith.constant 0 : i32
    return %c0_i32, %c0_i32_0 : i32, i32
  }
  func.func @transform_2(%arg0: i32) -> (i32, i32) {
    %c0_i32 = arith.constant 0 : i32
    %c0_i32_0 = arith.constant 0 : i32
    %c0_i32_1 = arith.constant 0 : i32
    return %c0_i32, %c0_i32_0 : i32, i32
  }
  func.func @transform_3(%arg0: i32) -> (i32, i32) {
    %c0_i32 = arith.constant 0 : i32
    %c0_i32_0 = arith.constant 0 : i32
    return %arg0, %c0_i32 : i32, i32
  }
}

module attributes {stable_mosaic.version = 11 : i64} {
  func.func @conv2_fc_kernel(%arg0: i32, %arg1: memref<800x256xbf16, #tpu.memory_space<vmem>>, %arg2: memref<256x32xbf16, #tpu.memory_space<vmem>>, %arg3: memref<1x32xf32, #tpu.memory_space<vmem>>, %arg4: memref<25x32x128xbf16, #tpu.memory_space<vmem>>, %arg5: memref<1x128xf32, #tpu.memory_space<vmem>>, %arg6: memref<128x128xbf16, #tpu.memory_space<vmem>>, %arg7: memref<1x128xf32, #tpu.memory_space<vmem>>, %arg8: memref<128x10xbf16, #tpu.memory_space<vmem>>, %arg9: memref<1x10xf32, #tpu.memory_space<vmem>>, %arg10: memref<8x10xf32, #tpu.memory_space<vmem>>) attributes {dimension_semantics = [#tpu.dimension_semantics<parallel>], iteration_bounds = array<i64: 1>, scalar_prefetch = 0 : i64, scratch_operands = 0 : i64, tpu.core_type = #tpu.core_type<tc>, window_params = [{transform_indices = @transform_0, window_bounds = array<i64: 800, 256>}, {pipeline_mode = #tpu.pipeline_mode<synchronous>, transform_indices = @transform_1, window_bounds = array<i64: 256, 32>}, {pipeline_mode = #tpu.pipeline_mode<synchronous>, transform_indices = @transform_2, window_bounds = array<i64: 1, 32>}, {pipeline_mode = #tpu.pipeline_mode<synchronous>, transform_indices = @transform_3, window_bounds = array<i64: 25, 32, 128>}, {pipeline_mode = #tpu.pipeline_mode<synchronous>, transform_indices = @transform_4, window_bounds = array<i64: 1, 128>}, {pipeline_mode = #tpu.pipeline_mode<synchronous>, transform_indices = @transform_5, window_bounds = array<i64: 128, 128>}, {pipeline_mode = #tpu.pipeline_mode<synchronous>, transform_indices = @transform_6, window_bounds = array<i64: 1, 128>}, {pipeline_mode = #tpu.pipeline_mode<synchronous>, transform_indices = @transform_7, window_bounds = array<i64: 128, 10>}, {pipeline_mode = #tpu.pipeline_mode<synchronous>, transform_indices = @transform_8, window_bounds = array<i64: 1, 10>}, {transform_indices = @transform_9, window_bounds = array<i64: 8, 10>}]} {
    %c0 = arith.constant 0 : index
    %c0_0 = arith.constant 0 : index
    %0 = vector.load %arg1[%c0, %c0_0] : memref<800x256xbf16, #tpu.memory_space<vmem>>, vector<800x256xbf16>
    %c0_1 = arith.constant 0 : index
    %c0_2 = arith.constant 0 : index
    %1 = vector.load %arg2[%c0_1, %c0_2] : memref<256x32xbf16, #tpu.memory_space<vmem>>, vector<256x32xbf16>
    %cst = arith.constant dense<0.000000e+00> : vector<800x32xf32>
    %2 = tpu.matmul %0, %1, %cst {dimension_numbers = #tpu.dot_dimension_numbers<[1], [0], [0], [1], [0, 0, 1, 1], [], []>} : vector<800x256xbf16>, vector<256x32xbf16>, vector<800x32xf32> -> vector<800x32xf32>
    %3 = vector.extract_strided_slice %2 {offsets = [0, 0], sizes = [200, 32], strides = [1, 1]} : vector<800x32xf32> to vector<200x32xf32>
    %4 = vector.extract_strided_slice %2 {offsets = [200, 0], sizes = [200, 32], strides = [1, 1]} : vector<800x32xf32> to vector<200x32xf32>
    %5 = arith.maximumf %3, %4 : vector<200x32xf32>
    %6 = vector.extract_strided_slice %2 {offsets = [400, 0], sizes = [200, 32], strides = [1, 1]} : vector<800x32xf32> to vector<200x32xf32>
    %7 = vector.extract_strided_slice %2 {offsets = [600, 0], sizes = [200, 32], strides = [1, 1]} : vector<800x32xf32> to vector<200x32xf32>
    %8 = arith.maximumf %6, %7 : vector<200x32xf32>
    %9 = arith.maximumf %5, %8 : vector<200x32xf32>
    %c0_3 = arith.constant 0 : index
    %c0_4 = arith.constant 0 : index
    %10 = vector.load %arg3[%c0_3, %c0_4] : memref<1x32xf32, #tpu.memory_space<vmem>>, vector<1x32xf32>
    %11 = vector.broadcast %10 : vector<1x32xf32> to vector<200x32xf32>
    %12 = arith.addf %9, %11 : vector<200x32xf32>
    %cst_5 = arith.constant 0.000000e+00 : f32
    %13 = vector.broadcast %cst_5 : f32 to vector<200x32xf32>
    %14 = arith.maximumf %12, %13 : vector<200x32xf32>
    %15 = vector.extract_strided_slice %14 {offsets = [0, 0], sizes = [8, 32], strides = [1, 1]} : vector<200x32xf32> to vector<8x32xf32>
    %16 = arith.truncf %15 : vector<8x32xf32> to vector<8x32xbf16>
    %c0_6 = arith.constant 0 : index
    %c0_7 = arith.constant 0 : index
    %c0_8 = arith.constant 0 : index
    %17 = vector.load %arg4[%c0_6, %c0_7, %c0_8] : memref<25x32x128xbf16, #tpu.memory_space<vmem>>, vector<1x32x128xbf16>
    %18 = vector.shape_cast %17 : vector<1x32x128xbf16> to vector<32x128xbf16>
    %cst_9 = arith.constant dense<0.000000e+00> : vector<8x128xf32>
    %19 = tpu.matmul %16, %18, %cst_9 {dimension_numbers = #tpu.dot_dimension_numbers<[1], [0], [0], [1], [0, 0, 1, 1], [], []>} : vector<8x32xbf16>, vector<32x128xbf16>, vector<8x128xf32> -> vector<8x128xf32>
    %20 = vector.extract_strided_slice %14 {offsets = [8, 0], sizes = [8, 32], strides = [1, 1]} : vector<200x32xf32> to vector<8x32xf32>
    %21 = arith.truncf %20 : vector<8x32xf32> to vector<8x32xbf16>
    %c1 = arith.constant 1 : index
    %c0_10 = arith.constant 0 : index
    %c0_11 = arith.constant 0 : index
    %22 = vector.load %arg4[%c1, %c0_10, %c0_11] : memref<25x32x128xbf16, #tpu.memory_space<vmem>>, vector<1x32x128xbf16>
    %23 = vector.shape_cast %22 : vector<1x32x128xbf16> to vector<32x128xbf16>
    %cst_12 = arith.constant dense<0.000000e+00> : vector<8x128xf32>
    %24 = tpu.matmul %21, %23, %cst_12 {dimension_numbers = #tpu.dot_dimension_numbers<[1], [0], [0], [1], [0, 0, 1, 1], [], []>} : vector<8x32xbf16>, vector<32x128xbf16>, vector<8x128xf32> -> vector<8x128xf32>
    %25 = arith.addf %19, %24 : vector<8x128xf32>
    %26 = vector.extract_strided_slice %14 {offsets = [16, 0], sizes = [8, 32], strides = [1, 1]} : vector<200x32xf32> to vector<8x32xf32>
    %27 = arith.truncf %26 : vector<8x32xf32> to vector<8x32xbf16>
    %c2 = arith.constant 2 : index
    %c0_13 = arith.constant 0 : index
    %c0_14 = arith.constant 0 : index
    %28 = vector.load %arg4[%c2, %c0_13, %c0_14] : memref<25x32x128xbf16, #tpu.memory_space<vmem>>, vector<1x32x128xbf16>
    %29 = vector.shape_cast %28 : vector<1x32x128xbf16> to vector<32x128xbf16>
    %cst_15 = arith.constant dense<0.000000e+00> : vector<8x128xf32>
    %30 = tpu.matmul %27, %29, %cst_15 {dimension_numbers = #tpu.dot_dimension_numbers<[1], [0], [0], [1], [0, 0, 1, 1], [], []>} : vector<8x32xbf16>, vector<32x128xbf16>, vector<8x128xf32> -> vector<8x128xf32>
    %31 = arith.addf %25, %30 : vector<8x128xf32>
    %32 = vector.extract_strided_slice %14 {offsets = [24, 0], sizes = [8, 32], strides = [1, 1]} : vector<200x32xf32> to vector<8x32xf32>
    %33 = arith.truncf %32 : vector<8x32xf32> to vector<8x32xbf16>
    %c3 = arith.constant 3 : index
    %c0_16 = arith.constant 0 : index
    %c0_17 = arith.constant 0 : index
    %34 = vector.load %arg4[%c3, %c0_16, %c0_17] : memref<25x32x128xbf16, #tpu.memory_space<vmem>>, vector<1x32x128xbf16>
    %35 = vector.shape_cast %34 : vector<1x32x128xbf16> to vector<32x128xbf16>
    %cst_18 = arith.constant dense<0.000000e+00> : vector<8x128xf32>
    %36 = tpu.matmul %33, %35, %cst_18 {dimension_numbers = #tpu.dot_dimension_numbers<[1], [0], [0], [1], [0, 0, 1, 1], [], []>} : vector<8x32xbf16>, vector<32x128xbf16>, vector<8x128xf32> -> vector<8x128xf32>
    %37 = arith.addf %31, %36 : vector<8x128xf32>
    %38 = vector.extract_strided_slice %14 {offsets = [32, 0], sizes = [8, 32], strides = [1, 1]} : vector<200x32xf32> to vector<8x32xf32>
    %39 = arith.truncf %38 : vector<8x32xf32> to vector<8x32xbf16>
    %c4 = arith.constant 4 : index
    %c0_19 = arith.constant 0 : index
    %c0_20 = arith.constant 0 : index
    %40 = vector.load %arg4[%c4, %c0_19, %c0_20] : memref<25x32x128xbf16, #tpu.memory_space<vmem>>, vector<1x32x128xbf16>
    %41 = vector.shape_cast %40 : vector<1x32x128xbf16> to vector<32x128xbf16>
    %cst_21 = arith.constant dense<0.000000e+00> : vector<8x128xf32>
    %42 = tpu.matmul %39, %41, %cst_21 {dimension_numbers = #tpu.dot_dimension_numbers<[1], [0], [0], [1], [0, 0, 1, 1], [], []>} : vector<8x32xbf16>, vector<32x128xbf16>, vector<8x128xf32> -> vector<8x128xf32>
    %43 = arith.addf %37, %42 : vector<8x128xf32>
    %44 = vector.extract_strided_slice %14 {offsets = [40, 0], sizes = [8, 32], strides = [1, 1]} : vector<200x32xf32> to vector<8x32xf32>
    %45 = arith.truncf %44 : vector<8x32xf32> to vector<8x32xbf16>
    %c5 = arith.constant 5 : index
    %c0_22 = arith.constant 0 : index
    %c0_23 = arith.constant 0 : index
    %46 = vector.load %arg4[%c5, %c0_22, %c0_23] : memref<25x32x128xbf16, #tpu.memory_space<vmem>>, vector<1x32x128xbf16>
    %47 = vector.shape_cast %46 : vector<1x32x128xbf16> to vector<32x128xbf16>
    %cst_24 = arith.constant dense<0.000000e+00> : vector<8x128xf32>
    %48 = tpu.matmul %45, %47, %cst_24 {dimension_numbers = #tpu.dot_dimension_numbers<[1], [0], [0], [1], [0, 0, 1, 1], [], []>} : vector<8x32xbf16>, vector<32x128xbf16>, vector<8x128xf32> -> vector<8x128xf32>
    %49 = arith.addf %43, %48 : vector<8x128xf32>
    %50 = vector.extract_strided_slice %14 {offsets = [48, 0], sizes = [8, 32], strides = [1, 1]} : vector<200x32xf32> to vector<8x32xf32>
    %51 = arith.truncf %50 : vector<8x32xf32> to vector<8x32xbf16>
    %c6 = arith.constant 6 : index
    %c0_25 = arith.constant 0 : index
    %c0_26 = arith.constant 0 : index
    %52 = vector.load %arg4[%c6, %c0_25, %c0_26] : memref<25x32x128xbf16, #tpu.memory_space<vmem>>, vector<1x32x128xbf16>
    %53 = vector.shape_cast %52 : vector<1x32x128xbf16> to vector<32x128xbf16>
    %cst_27 = arith.constant dense<0.000000e+00> : vector<8x128xf32>
    %54 = tpu.matmul %51, %53, %cst_27 {dimension_numbers = #tpu.dot_dimension_numbers<[1], [0], [0], [1], [0, 0, 1, 1], [], []>} : vector<8x32xbf16>, vector<32x128xbf16>, vector<8x128xf32> -> vector<8x128xf32>
    %55 = arith.addf %49, %54 : vector<8x128xf32>
    %56 = vector.extract_strided_slice %14 {offsets = [56, 0], sizes = [8, 32], strides = [1, 1]} : vector<200x32xf32> to vector<8x32xf32>
    %57 = arith.truncf %56 : vector<8x32xf32> to vector<8x32xbf16>
    %c7 = arith.constant 7 : index
    %c0_28 = arith.constant 0 : index
    %c0_29 = arith.constant 0 : index
    %58 = vector.load %arg4[%c7, %c0_28, %c0_29] : memref<25x32x128xbf16, #tpu.memory_space<vmem>>, vector<1x32x128xbf16>
    %59 = vector.shape_cast %58 : vector<1x32x128xbf16> to vector<32x128xbf16>
    %cst_30 = arith.constant dense<0.000000e+00> : vector<8x128xf32>
    %60 = tpu.matmul %57, %59, %cst_30 {dimension_numbers = #tpu.dot_dimension_numbers<[1], [0], [0], [1], [0, 0, 1, 1], [], []>} : vector<8x32xbf16>, vector<32x128xbf16>, vector<8x128xf32> -> vector<8x128xf32>
    %61 = arith.addf %55, %60 : vector<8x128xf32>
    %62 = vector.extract_strided_slice %14 {offsets = [64, 0], sizes = [8, 32], strides = [1, 1]} : vector<200x32xf32> to vector<8x32xf32>
    %63 = arith.truncf %62 : vector<8x32xf32> to vector<8x32xbf16>
    %c8 = arith.constant 8 : index
    %c0_31 = arith.constant 0 : index
    %c0_32 = arith.constant 0 : index
    %64 = vector.load %arg4[%c8, %c0_31, %c0_32] : memref<25x32x128xbf16, #tpu.memory_space<vmem>>, vector<1x32x128xbf16>
    %65 = vector.shape_cast %64 : vector<1x32x128xbf16> to vector<32x128xbf16>
    %cst_33 = arith.constant dense<0.000000e+00> : vector<8x128xf32>
    %66 = tpu.matmul %63, %65, %cst_33 {dimension_numbers = #tpu.dot_dimension_numbers<[1], [0], [0], [1], [0, 0, 1, 1], [], []>} : vector<8x32xbf16>, vector<32x128xbf16>, vector<8x128xf32> -> vector<8x128xf32>
    %67 = arith.addf %61, %66 : vector<8x128xf32>
    %68 = vector.extract_strided_slice %14 {offsets = [72, 0], sizes = [8, 32], strides = [1, 1]} : vector<200x32xf32> to vector<8x32xf32>
    %69 = arith.truncf %68 : vector<8x32xf32> to vector<8x32xbf16>
    %c9 = arith.constant 9 : index
    %c0_34 = arith.constant 0 : index
    %c0_35 = arith.constant 0 : index
    %70 = vector.load %arg4[%c9, %c0_34, %c0_35] : memref<25x32x128xbf16, #tpu.memory_space<vmem>>, vector<1x32x128xbf16>
    %71 = vector.shape_cast %70 : vector<1x32x128xbf16> to vector<32x128xbf16>
    %cst_36 = arith.constant dense<0.000000e+00> : vector<8x128xf32>
    %72 = tpu.matmul %69, %71, %cst_36 {dimension_numbers = #tpu.dot_dimension_numbers<[1], [0], [0], [1], [0, 0, 1, 1], [], []>} : vector<8x32xbf16>, vector<32x128xbf16>, vector<8x128xf32> -> vector<8x128xf32>
    %73 = arith.addf %67, %72 : vector<8x128xf32>
    %74 = vector.extract_strided_slice %14 {offsets = [80, 0], sizes = [8, 32], strides = [1, 1]} : vector<200x32xf32> to vector<8x32xf32>
    %75 = arith.truncf %74 : vector<8x32xf32> to vector<8x32xbf16>
    %c10 = arith.constant 10 : index
    %c0_37 = arith.constant 0 : index
    %c0_38 = arith.constant 0 : index
    %76 = vector.load %arg4[%c10, %c0_37, %c0_38] : memref<25x32x128xbf16, #tpu.memory_space<vmem>>, vector<1x32x128xbf16>
    %77 = vector.shape_cast %76 : vector<1x32x128xbf16> to vector<32x128xbf16>
    %cst_39 = arith.constant dense<0.000000e+00> : vector<8x128xf32>
    %78 = tpu.matmul %75, %77, %cst_39 {dimension_numbers = #tpu.dot_dimension_numbers<[1], [0], [0], [1], [0, 0, 1, 1], [], []>} : vector<8x32xbf16>, vector<32x128xbf16>, vector<8x128xf32> -> vector<8x128xf32>
    %79 = arith.addf %73, %78 : vector<8x128xf32>
    %80 = vector.extract_strided_slice %14 {offsets = [88, 0], sizes = [8, 32], strides = [1, 1]} : vector<200x32xf32> to vector<8x32xf32>
    %81 = arith.truncf %80 : vector<8x32xf32> to vector<8x32xbf16>
    %c11 = arith.constant 11 : index
    %c0_40 = arith.constant 0 : index
    %c0_41 = arith.constant 0 : index
    %82 = vector.load %arg4[%c11, %c0_40, %c0_41] : memref<25x32x128xbf16, #tpu.memory_space<vmem>>, vector<1x32x128xbf16>
    %83 = vector.shape_cast %82 : vector<1x32x128xbf16> to vector<32x128xbf16>
    %cst_42 = arith.constant dense<0.000000e+00> : vector<8x128xf32>
    %84 = tpu.matmul %81, %83, %cst_42 {dimension_numbers = #tpu.dot_dimension_numbers<[1], [0], [0], [1], [0, 0, 1, 1], [], []>} : vector<8x32xbf16>, vector<32x128xbf16>, vector<8x128xf32> -> vector<8x128xf32>
    %85 = arith.addf %79, %84 : vector<8x128xf32>
    %86 = vector.extract_strided_slice %14 {offsets = [96, 0], sizes = [8, 32], strides = [1, 1]} : vector<200x32xf32> to vector<8x32xf32>
    %87 = arith.truncf %86 : vector<8x32xf32> to vector<8x32xbf16>
    %c12 = arith.constant 12 : index
    %c0_43 = arith.constant 0 : index
    %c0_44 = arith.constant 0 : index
    %88 = vector.load %arg4[%c12, %c0_43, %c0_44] : memref<25x32x128xbf16, #tpu.memory_space<vmem>>, vector<1x32x128xbf16>
    %89 = vector.shape_cast %88 : vector<1x32x128xbf16> to vector<32x128xbf16>
    %cst_45 = arith.constant dense<0.000000e+00> : vector<8x128xf32>
    %90 = tpu.matmul %87, %89, %cst_45 {dimension_numbers = #tpu.dot_dimension_numbers<[1], [0], [0], [1], [0, 0, 1, 1], [], []>} : vector<8x32xbf16>, vector<32x128xbf16>, vector<8x128xf32> -> vector<8x128xf32>
    %91 = arith.addf %85, %90 : vector<8x128xf32>
    %92 = vector.extract_strided_slice %14 {offsets = [104, 0], sizes = [8, 32], strides = [1, 1]} : vector<200x32xf32> to vector<8x32xf32>
    %93 = arith.truncf %92 : vector<8x32xf32> to vector<8x32xbf16>
    %c13 = arith.constant 13 : index
    %c0_46 = arith.constant 0 : index
    %c0_47 = arith.constant 0 : index
    %94 = vector.load %arg4[%c13, %c0_46, %c0_47] : memref<25x32x128xbf16, #tpu.memory_space<vmem>>, vector<1x32x128xbf16>
    %95 = vector.shape_cast %94 : vector<1x32x128xbf16> to vector<32x128xbf16>
    %cst_48 = arith.constant dense<0.000000e+00> : vector<8x128xf32>
    %96 = tpu.matmul %93, %95, %cst_48 {dimension_numbers = #tpu.dot_dimension_numbers<[1], [0], [0], [1], [0, 0, 1, 1], [], []>} : vector<8x32xbf16>, vector<32x128xbf16>, vector<8x128xf32> -> vector<8x128xf32>
    %97 = arith.addf %91, %96 : vector<8x128xf32>
    %98 = vector.extract_strided_slice %14 {offsets = [112, 0], sizes = [8, 32], strides = [1, 1]} : vector<200x32xf32> to vector<8x32xf32>
    %99 = arith.truncf %98 : vector<8x32xf32> to vector<8x32xbf16>
    %c14 = arith.constant 14 : index
    %c0_49 = arith.constant 0 : index
    %c0_50 = arith.constant 0 : index
    %100 = vector.load %arg4[%c14, %c0_49, %c0_50] : memref<25x32x128xbf16, #tpu.memory_space<vmem>>, vector<1x32x128xbf16>
    %101 = vector.shape_cast %100 : vector<1x32x128xbf16> to vector<32x128xbf16>
    %cst_51 = arith.constant dense<0.000000e+00> : vector<8x128xf32>
    %102 = tpu.matmul %99, %101, %cst_51 {dimension_numbers = #tpu.dot_dimension_numbers<[1], [0], [0], [1], [0, 0, 1, 1], [], []>} : vector<8x32xbf16>, vector<32x128xbf16>, vector<8x128xf32> -> vector<8x128xf32>
    %103 = arith.addf %97, %102 : vector<8x128xf32>
    %104 = vector.extract_strided_slice %14 {offsets = [120, 0], sizes = [8, 32], strides = [1, 1]} : vector<200x32xf32> to vector<8x32xf32>
    %105 = arith.truncf %104 : vector<8x32xf32> to vector<8x32xbf16>
    %c15 = arith.constant 15 : index
    %c0_52 = arith.constant 0 : index
    %c0_53 = arith.constant 0 : index
    %106 = vector.load %arg4[%c15, %c0_52, %c0_53] : memref<25x32x128xbf16, #tpu.memory_space<vmem>>, vector<1x32x128xbf16>
    %107 = vector.shape_cast %106 : vector<1x32x128xbf16> to vector<32x128xbf16>
    %cst_54 = arith.constant dense<0.000000e+00> : vector<8x128xf32>
    %108 = tpu.matmul %105, %107, %cst_54 {dimension_numbers = #tpu.dot_dimension_numbers<[1], [0], [0], [1], [0, 0, 1, 1], [], []>} : vector<8x32xbf16>, vector<32x128xbf16>, vector<8x128xf32> -> vector<8x128xf32>
    %109 = arith.addf %103, %108 : vector<8x128xf32>
    %110 = vector.extract_strided_slice %14 {offsets = [128, 0], sizes = [8, 32], strides = [1, 1]} : vector<200x32xf32> to vector<8x32xf32>
    %111 = arith.truncf %110 : vector<8x32xf32> to vector<8x32xbf16>
    %c16 = arith.constant 16 : index
    %c0_55 = arith.constant 0 : index
    %c0_56 = arith.constant 0 : index
    %112 = vector.load %arg4[%c16, %c0_55, %c0_56] : memref<25x32x128xbf16, #tpu.memory_space<vmem>>, vector<1x32x128xbf16>
    %113 = vector.shape_cast %112 : vector<1x32x128xbf16> to vector<32x128xbf16>
    %cst_57 = arith.constant dense<0.000000e+00> : vector<8x128xf32>
    %114 = tpu.matmul %111, %113, %cst_57 {dimension_numbers = #tpu.dot_dimension_numbers<[1], [0], [0], [1], [0, 0, 1, 1], [], []>} : vector<8x32xbf16>, vector<32x128xbf16>, vector<8x128xf32> -> vector<8x128xf32>
    %115 = arith.addf %109, %114 : vector<8x128xf32>
    %116 = vector.extract_strided_slice %14 {offsets = [136, 0], sizes = [8, 32], strides = [1, 1]} : vector<200x32xf32> to vector<8x32xf32>
    %117 = arith.truncf %116 : vector<8x32xf32> to vector<8x32xbf16>
    %c17 = arith.constant 17 : index
    %c0_58 = arith.constant 0 : index
    %c0_59 = arith.constant 0 : index
    %118 = vector.load %arg4[%c17, %c0_58, %c0_59] : memref<25x32x128xbf16, #tpu.memory_space<vmem>>, vector<1x32x128xbf16>
    %119 = vector.shape_cast %118 : vector<1x32x128xbf16> to vector<32x128xbf16>
    %cst_60 = arith.constant dense<0.000000e+00> : vector<8x128xf32>
    %120 = tpu.matmul %117, %119, %cst_60 {dimension_numbers = #tpu.dot_dimension_numbers<[1], [0], [0], [1], [0, 0, 1, 1], [], []>} : vector<8x32xbf16>, vector<32x128xbf16>, vector<8x128xf32> -> vector<8x128xf32>
    %121 = arith.addf %115, %120 : vector<8x128xf32>
    %122 = vector.extract_strided_slice %14 {offsets = [144, 0], sizes = [8, 32], strides = [1, 1]} : vector<200x32xf32> to vector<8x32xf32>
    %123 = arith.truncf %122 : vector<8x32xf32> to vector<8x32xbf16>
    %c18 = arith.constant 18 : index
    %c0_61 = arith.constant 0 : index
    %c0_62 = arith.constant 0 : index
    %124 = vector.load %arg4[%c18, %c0_61, %c0_62] : memref<25x32x128xbf16, #tpu.memory_space<vmem>>, vector<1x32x128xbf16>
    %125 = vector.shape_cast %124 : vector<1x32x128xbf16> to vector<32x128xbf16>
    %cst_63 = arith.constant dense<0.000000e+00> : vector<8x128xf32>
    %126 = tpu.matmul %123, %125, %cst_63 {dimension_numbers = #tpu.dot_dimension_numbers<[1], [0], [0], [1], [0, 0, 1, 1], [], []>} : vector<8x32xbf16>, vector<32x128xbf16>, vector<8x128xf32> -> vector<8x128xf32>
    %127 = arith.addf %121, %126 : vector<8x128xf32>
    %128 = vector.extract_strided_slice %14 {offsets = [152, 0], sizes = [8, 32], strides = [1, 1]} : vector<200x32xf32> to vector<8x32xf32>
    %129 = arith.truncf %128 : vector<8x32xf32> to vector<8x32xbf16>
    %c19 = arith.constant 19 : index
    %c0_64 = arith.constant 0 : index
    %c0_65 = arith.constant 0 : index
    %130 = vector.load %arg4[%c19, %c0_64, %c0_65] : memref<25x32x128xbf16, #tpu.memory_space<vmem>>, vector<1x32x128xbf16>
    %131 = vector.shape_cast %130 : vector<1x32x128xbf16> to vector<32x128xbf16>
    %cst_66 = arith.constant dense<0.000000e+00> : vector<8x128xf32>
    %132 = tpu.matmul %129, %131, %cst_66 {dimension_numbers = #tpu.dot_dimension_numbers<[1], [0], [0], [1], [0, 0, 1, 1], [], []>} : vector<8x32xbf16>, vector<32x128xbf16>, vector<8x128xf32> -> vector<8x128xf32>
    %133 = arith.addf %127, %132 : vector<8x128xf32>
    %134 = vector.extract_strided_slice %14 {offsets = [160, 0], sizes = [8, 32], strides = [1, 1]} : vector<200x32xf32> to vector<8x32xf32>
    %135 = arith.truncf %134 : vector<8x32xf32> to vector<8x32xbf16>
    %c20 = arith.constant 20 : index
    %c0_67 = arith.constant 0 : index
    %c0_68 = arith.constant 0 : index
    %136 = vector.load %arg4[%c20, %c0_67, %c0_68] : memref<25x32x128xbf16, #tpu.memory_space<vmem>>, vector<1x32x128xbf16>
    %137 = vector.shape_cast %136 : vector<1x32x128xbf16> to vector<32x128xbf16>
    %cst_69 = arith.constant dense<0.000000e+00> : vector<8x128xf32>
    %138 = tpu.matmul %135, %137, %cst_69 {dimension_numbers = #tpu.dot_dimension_numbers<[1], [0], [0], [1], [0, 0, 1, 1], [], []>} : vector<8x32xbf16>, vector<32x128xbf16>, vector<8x128xf32> -> vector<8x128xf32>
    %139 = arith.addf %133, %138 : vector<8x128xf32>
    %140 = vector.extract_strided_slice %14 {offsets = [168, 0], sizes = [8, 32], strides = [1, 1]} : vector<200x32xf32> to vector<8x32xf32>
    %141 = arith.truncf %140 : vector<8x32xf32> to vector<8x32xbf16>
    %c21 = arith.constant 21 : index
    %c0_70 = arith.constant 0 : index
    %c0_71 = arith.constant 0 : index
    %142 = vector.load %arg4[%c21, %c0_70, %c0_71] : memref<25x32x128xbf16, #tpu.memory_space<vmem>>, vector<1x32x128xbf16>
    %143 = vector.shape_cast %142 : vector<1x32x128xbf16> to vector<32x128xbf16>
    %cst_72 = arith.constant dense<0.000000e+00> : vector<8x128xf32>
    %144 = tpu.matmul %141, %143, %cst_72 {dimension_numbers = #tpu.dot_dimension_numbers<[1], [0], [0], [1], [0, 0, 1, 1], [], []>} : vector<8x32xbf16>, vector<32x128xbf16>, vector<8x128xf32> -> vector<8x128xf32>
    %145 = arith.addf %139, %144 : vector<8x128xf32>
    %146 = vector.extract_strided_slice %14 {offsets = [176, 0], sizes = [8, 32], strides = [1, 1]} : vector<200x32xf32> to vector<8x32xf32>
    %147 = arith.truncf %146 : vector<8x32xf32> to vector<8x32xbf16>
    %c22 = arith.constant 22 : index
    %c0_73 = arith.constant 0 : index
    %c0_74 = arith.constant 0 : index
    %148 = vector.load %arg4[%c22, %c0_73, %c0_74] : memref<25x32x128xbf16, #tpu.memory_space<vmem>>, vector<1x32x128xbf16>
    %149 = vector.shape_cast %148 : vector<1x32x128xbf16> to vector<32x128xbf16>
    %cst_75 = arith.constant dense<0.000000e+00> : vector<8x128xf32>
    %150 = tpu.matmul %147, %149, %cst_75 {dimension_numbers = #tpu.dot_dimension_numbers<[1], [0], [0], [1], [0, 0, 1, 1], [], []>} : vector<8x32xbf16>, vector<32x128xbf16>, vector<8x128xf32> -> vector<8x128xf32>
    %151 = arith.addf %145, %150 : vector<8x128xf32>
    %152 = vector.extract_strided_slice %14 {offsets = [184, 0], sizes = [8, 32], strides = [1, 1]} : vector<200x32xf32> to vector<8x32xf32>
    %153 = arith.truncf %152 : vector<8x32xf32> to vector<8x32xbf16>
    %c23 = arith.constant 23 : index
    %c0_76 = arith.constant 0 : index
    %c0_77 = arith.constant 0 : index
    %154 = vector.load %arg4[%c23, %c0_76, %c0_77] : memref<25x32x128xbf16, #tpu.memory_space<vmem>>, vector<1x32x128xbf16>
    %155 = vector.shape_cast %154 : vector<1x32x128xbf16> to vector<32x128xbf16>
    %cst_78 = arith.constant dense<0.000000e+00> : vector<8x128xf32>
    %156 = tpu.matmul %153, %155, %cst_78 {dimension_numbers = #tpu.dot_dimension_numbers<[1], [0], [0], [1], [0, 0, 1, 1], [], []>} : vector<8x32xbf16>, vector<32x128xbf16>, vector<8x128xf32> -> vector<8x128xf32>
    %157 = arith.addf %151, %156 : vector<8x128xf32>
    %158 = vector.extract_strided_slice %14 {offsets = [192, 0], sizes = [8, 32], strides = [1, 1]} : vector<200x32xf32> to vector<8x32xf32>
    %159 = arith.truncf %158 : vector<8x32xf32> to vector<8x32xbf16>
    %c24 = arith.constant 24 : index
    %c0_79 = arith.constant 0 : index
    %c0_80 = arith.constant 0 : index
    %160 = vector.load %arg4[%c24, %c0_79, %c0_80] : memref<25x32x128xbf16, #tpu.memory_space<vmem>>, vector<1x32x128xbf16>
    %161 = vector.shape_cast %160 : vector<1x32x128xbf16> to vector<32x128xbf16>
    %cst_81 = arith.constant dense<0.000000e+00> : vector<8x128xf32>
    %162 = tpu.matmul %159, %161, %cst_81 {dimension_numbers = #tpu.dot_dimension_numbers<[1], [0], [0], [1], [0, 0, 1, 1], [], []>} : vector<8x32xbf16>, vector<32x128xbf16>, vector<8x128xf32> -> vector<8x128xf32>
    %163 = arith.addf %157, %162 : vector<8x128xf32>
    %c0_82 = arith.constant 0 : index
    %c0_83 = arith.constant 0 : index
    %164 = vector.load %arg5[%c0_82, %c0_83] : memref<1x128xf32, #tpu.memory_space<vmem>>, vector<1x128xf32>
    %165 = vector.broadcast %164 : vector<1x128xf32> to vector<8x128xf32>
    %166 = arith.addf %163, %165 : vector<8x128xf32>
    %cst_84 = arith.constant 0.000000e+00 : f32
    %167 = vector.broadcast %cst_84 : f32 to vector<8x128xf32>
    %168 = arith.maximumf %166, %167 : vector<8x128xf32>
    %169 = arith.truncf %168 : vector<8x128xf32> to vector<8x128xbf16>
    %c0_85 = arith.constant 0 : index
    %c0_86 = arith.constant 0 : index
    %170 = vector.load %arg6[%c0_85, %c0_86] : memref<128x128xbf16, #tpu.memory_space<vmem>>, vector<128x128xbf16>
    %cst_87 = arith.constant dense<0.000000e+00> : vector<8x128xf32>
    %171 = tpu.matmul %169, %170, %cst_87 {dimension_numbers = #tpu.dot_dimension_numbers<[1], [0], [0], [1], [0, 0, 1, 1], [], []>} : vector<8x128xbf16>, vector<128x128xbf16>, vector<8x128xf32> -> vector<8x128xf32>
    %c0_88 = arith.constant 0 : index
    %c0_89 = arith.constant 0 : index
    %172 = vector.load %arg7[%c0_88, %c0_89] : memref<1x128xf32, #tpu.memory_space<vmem>>, vector<1x128xf32>
    %173 = vector.broadcast %172 : vector<1x128xf32> to vector<8x128xf32>
    %174 = arith.addf %171, %173 : vector<8x128xf32>
    %cst_90 = arith.constant 0.000000e+00 : f32
    %175 = vector.broadcast %cst_90 : f32 to vector<8x128xf32>
    %176 = arith.maximumf %174, %175 : vector<8x128xf32>
    %177 = arith.truncf %176 : vector<8x128xf32> to vector<8x128xbf16>
    %c0_91 = arith.constant 0 : index
    %c0_92 = arith.constant 0 : index
    %178 = vector.load %arg8[%c0_91, %c0_92] : memref<128x10xbf16, #tpu.memory_space<vmem>>, vector<128x10xbf16>
    %cst_93 = arith.constant dense<0.000000e+00> : vector<8x10xf32>
    %179 = tpu.matmul %177, %178, %cst_93 {dimension_numbers = #tpu.dot_dimension_numbers<[1], [0], [0], [1], [0, 0, 1, 1], [], []>} : vector<8x128xbf16>, vector<128x10xbf16>, vector<8x10xf32> -> vector<8x10xf32>
    %c0_94 = arith.constant 0 : index
    %c0_95 = arith.constant 0 : index
    %180 = vector.load %arg9[%c0_94, %c0_95] : memref<1x10xf32, #tpu.memory_space<vmem>>, vector<1x10xf32>
    %181 = vector.broadcast %180 : vector<1x10xf32> to vector<8x10xf32>
    %182 = arith.addf %179, %181 : vector<8x10xf32>
    %cst_96 = arith.constant 0.000000e+00 : f32
    %183 = vector.broadcast %cst_96 : f32 to vector<8x10xf32>
    %184 = arith.maximumf %182, %183 : vector<8x10xf32>
    %c0_97 = arith.constant 0 : index
    %c0_98 = arith.constant 0 : index
    %185 = vector.load %arg10[%c0_97, %c0_98] : memref<8x10xf32, #tpu.memory_space<vmem>>, vector<8x10xf32>
    tpu.vector_store %arg10[%c0_97, %c0_98], %184 {strides = array<i32>} : memref<8x10xf32, #tpu.memory_space<vmem>>, vector<8x10xf32>,
    return
  }
  func.func @transform_0(%arg0: i32) -> (i32, i32) {
    %c0_i32 = arith.constant 0 : i32
    %c0_i32_0 = arith.constant 0 : i32
    return %arg0, %c0_i32 : i32, i32
  }
  func.func @transform_1(%arg0: i32) -> (i32, i32) {
    %c0_i32 = arith.constant 0 : i32
    %c0_i32_0 = arith.constant 0 : i32
    %c0_i32_1 = arith.constant 0 : i32
    return %c0_i32, %c0_i32_0 : i32, i32
  }
  func.func @transform_2(%arg0: i32) -> (i32, i32) {
    %c0_i32 = arith.constant 0 : i32
    %c0_i32_0 = arith.constant 0 : i32
    %c0_i32_1 = arith.constant 0 : i32
    return %c0_i32, %c0_i32_0 : i32, i32
  }
  func.func @transform_3(%arg0: i32) -> (i32, i32, i32) {
    %c0_i32 = arith.constant 0 : i32
    %c0_i32_0 = arith.constant 0 : i32
    %c0_i32_1 = arith.constant 0 : i32
    %c0_i32_2 = arith.constant 0 : i32
    return %c0_i32, %c0_i32_0, %c0_i32_1 : i32, i32, i32
  }
  func.func @transform_4(%arg0: i32) -> (i32, i32) {
    %c0_i32 = arith.constant 0 : i32
    %c0_i32_0 = arith.constant 0 : i32
    %c0_i32_1 = arith.constant 0 : i32
    return %c0_i32, %c0_i32_0 : i32, i32
  }
  func.func @transform_5(%arg0: i32) -> (i32, i32) {
    %c0_i32 = arith.constant 0 : i32
    %c0_i32_0 = arith.constant 0 : i32
    %c0_i32_1 = arith.constant 0 : i32
    return %c0_i32, %c0_i32_0 : i32, i32
  }
  func.func @transform_6(%arg0: i32) -> (i32, i32) {
    %c0_i32 = arith.constant 0 : i32
    %c0_i32_0 = arith.constant 0 : i32
    %c0_i32_1 = arith.constant 0 : i32
    return %c0_i32, %c0_i32_0 : i32, i32
  }
  func.func @transform_7(%arg0: i32) -> (i32, i32) {
    %c0_i32 = arith.constant 0 : i32
    %c0_i32_0 = arith.constant 0 : i32
    %c0_i32_1 = arith.constant 0 : i32
    return %c0_i32, %c0_i32_0 : i32, i32
  }
  func.func @transform_8(%arg0: i32) -> (i32, i32) {
    %c0_i32 = arith.constant 0 : i32
    %c0_i32_0 = arith.constant 0 : i32
    %c0_i32_1 = arith.constant 0 : i32
    return %c0_i32, %c0_i32_0 : i32, i32
  }
  func.func @transform_9(%arg0: i32) -> (i32, i32) {
    %c0_i32 = arith.constant 0 : i32
    %c0_i32_0 = arith.constant 0 : i32
    return %arg0, %c0_i32 : i32, i32
  }
}

</mosaic_0001>

<bundles_post_ra>
// kernel: mynet_forward.2
= control target key start
LH: loop header
LB: loop body
LE: loop exit
PB: predicated region body
PF: predicated region fallthrough
CT: control target
= control target key end

     0   :  { %v9185_v0 = vmov 0   ;;  %vm7239_vm0 = vcmask 191488   ;;  %s12618_s1 = inlined_call_operand.vmem [shape: bf16[256,24], index: 1, kind: input, shape index: {}]   ;;  %s12619_s0 = inlined_call_operand.vmem [shape: bf16[4608,256], index: 0, kind: input, shape index: {}]   ;;  %s12620_s2 = inlined_call_operand.vmem [shape: f32[1,24], index: 2, kind: input, shape index: {}]   ;;  %s12621_s3 = inlined_call_operand.vmem [shape: bf16[1152,24], index: 3, kind: output, shape index: {}]  }
   0x1   :  { %3599 = vmatprep.subr.bf16.mxu0 %v9185_v0  ;;  %8269 = vmatprep.subr.bf16.mxu1 %v9185_v0  ;;  %v8302_v1 = vld [vmem:[%s12618_s1] sm:$0xff]   ;;  %v8303_v2 = vld [vmem:[%s12618_s1 + $0x8] sm:$0xff]   ;;  %v8304_v3 = vld [vmem:[%s12618_s1 + $0x10] sm:$0xff]  }
   0x2   :  { %3600 = vmatpush1.bf16.msra.mxu0 %v8302_v1  ;;  %8285 = vmatpush1.bf16.msra.mxu1 %v8302_v1  ;;  %v8305_v4 = vld [vmem:[%s12618_s1 + $0x18] sm:$0xff]   ;;  %v8306_v5 = vld [vmem:[%s12618_s1 + $0x20] sm:$0xff]   ;;  %v8307_v7 = vld [vmem:[%s12618_s1 + $0x28] sm:$0xff]  }
   0x3   :  { %3601 = vmatprep.subr.bf16.mxu0 %v9185_v0  ;;  %8270 = vmatprep.subr.bf16.mxu1 %v9185_v0  ;;  %v8320_v6 = vld [vmem:[%s12619_s0 + $0x4] ss:$8 sps:$4 sm:$0xff]   ;;  %v8308_v9 = vld [vmem:[%s12618_s1 + $0x30] sm:$0xff]   ;;  %v8309_v10 = vld [vmem:[%s12618_s1 + $0x38] sm:$0xff]  }
   0x4   :  { %v8323_v8 = vld [vmem:[%s12619_s0 + $0x904] ss:$8 sps:$4 sm:$0xff]   ;;  %3631 = vmatprep.mubr.bf16.mxu0 %v8320_v6  ;;  %v8312_v13 = vld [vmem:[%s12618_s1 + $0x50] sm:$0xff]   ;;  %v8313_v14 = vld [vmem:[%s12618_s1 + $0x58] sm:$0xff]  }
   0x5   :  { %4783 = vmatprep.mubr.bf16.mxu1 %v8323_v8  ;;  %v8310_v11 = vld [vmem:[%s12618_s1 + $0x40] sm:$0xff]   ;;  %v8311_v12 = vld [vmem:[%s12618_s1 + $0x48] sm:$0xff]   ;;  %v8316_v17 = vld [vmem:[%s12618_s1 + $0x70] sm:$0xff]  }
   0x6   :  { %3602 = vmatpush1.bf16.msra.mxu0 %v8303_v2  ;;  %8286 = vmatpush1.bf16.msra.mxu1 %v8303_v2  ;;  %v8314_v15 = vld [vmem:[%s12618_s1 + $0x60] sm:$0xff]   ;;  %v8315_v16 = vld [vmem:[%s12618_s1 + $0x68] sm:$0xff]   ;;  %v8317_v18 = vld [vmem:[%s12618_s1 + $0x78] sm:$0xff]  }
   0x7   :  { %3603 = vmatprep.subr.bf16.mxu0 %v9185_v0  ;;  %8271 = vmatprep.subr.bf16.mxu1 %v9185_v0  ;;  %v8318_v19 = vld [vmem:[%s12619_s0] ss:$8 sps:$4 sm:$0xff]   ;;  %v8324_v21 = vld [vmem:[%s12619_s0 + $0x14] ss:$8 sps:$4 sm:$0xff]   ;;  %v8328_v23 = vld [vmem:[%s12619_s0 + $0x10] ss:$8 sps:$4 sm:$0xff]  }
   0x8   :  { %v8321_v20 = vld [vmem:[%s12619_s0 + $0x900] ss:$8 sps:$4 sm:$0xff]   ;;  %v8326_v22 = vld [vmem:[%s12619_s0 + $0x914] ss:$8 sps:$4 sm:$0xff]   ;;  %v8329_v24 = vld [vmem:[%s12619_s0 + $0x910] ss:$8 sps:$4 sm:$0xff]  }
   0x9   :  { %v8330_v25 = vld [vmem:[%s12619_s0 + $0x24] ss:$8 sps:$4 sm:$0xff]   ;;  %v8334_v27 = vld [vmem:[%s12619_s0 + $0x20] ss:$8 sps:$4 sm:$0xff]   ;;  %v8336_v29 = vld [vmem:[%s12619_s0 + $0x34] ss:$8 sps:$4 sm:$0xff]  }
   0xa   :  { %3604 = vmatpush1.bf16.msra.mxu0 %v8304_v3  ;;  %8287 = vmatpush1.bf16.msra.mxu1 %v8304_v3  ;;  %v8332_v26 = vld [vmem:[%s12619_s0 + $0x924] ss:$8 sps:$4 sm:$0xff]   ;;  %v8335_v28 = vld [vmem:[%s12619_s0 + $0x920] ss:$8 sps:$4 sm:$0xff]   ;;  %v8338_v30 = vld [vmem:[%s12619_s0 + $0x934] ss:$8 sps:$4 sm:$0xff]  }
   0xb   :  { %3605 = vmatprep.subr.bf16.mxu0 %v9185_v0  ;;  %8272 = vmatprep.subr.bf16.mxu1 %v9185_v0  ;;  %v8340_v31 = vld [vmem:[%s12619_s0 + $0x30] ss:$8 sps:$4 sm:$0xff]   ;;  %v8342_v33 = vld [vmem:[%s12619_s0 + $0x44] ss:$8 sps:$4 sm:$0xff]   ;;  %v8346_v35 = vld [vmem:[%s12619_s0 + $0x40] ss:$8 sps:$4 sm:$0xff]  }
   0xc   :  { %v8341_v32 = vld [vmem:[%s12619_s0 + $0x930] ss:$8 sps:$4 sm:$0xff]   ;;  %v8344_v34 = vld [vmem:[%s12619_s0 + $0x944] ss:$8 sps:$4 sm:$0xff]   ;;  %v8347_v36 = vld [vmem:[%s12619_s0 + $0x940] ss:$8 sps:$4 sm:$0xff]  }
   0xd   :  { %v8348_v37 = vld [vmem:[%s12619_s0 + $0x54] ss:$8 sps:$4 sm:$0xff]   ;;  %v8352_v39 = vld [vmem:[%s12619_s0 + $0x50] ss:$8 sps:$4 sm:$0xff]   ;;  %v8354_v41 = vld [vmem:[%s12619_s0 + $0x64] ss:$8 sps:$4 sm:$0xff]  }
   0xe   :  { %3606 = vmatpush1.bf16.msra.mxu0 %v8305_v4  ;;  %8288 = vmatpush1.bf16.msra.mxu1 %v8305_v4  ;;  %v8350_v38 = vld [vmem:[%s12619_s0 + $0x954] ss:$8 sps:$4 sm:$0xff]   ;;  %v8353_v40 = vld [vmem:[%s12619_s0 + $0x950] ss:$8 sps:$4 sm:$0xff]   ;;  %v8356_v42 = vld [vmem:[%s12619_s0 + $0x964] ss:$8 sps:$4 sm:$0xff]  }
   0xf   :  { %3607 = vmatprep.subr.bf16.mxu0 %v9185_v0  ;;  %8273 = vmatprep.subr.bf16.mxu1 %v9185_v0  ;;  %v8358_v43 = vld [vmem:[%s12619_s0 + $0x60] ss:$8 sps:$4 sm:$0xff]   ;;  %v8360_v45 = vld [vmem:[%s12619_s0 + $0x74] ss:$8 sps:$4 sm:$0xff]   ;;  %v8364_v47 = vld [vmem:[%s12619_s0 + $0x70] ss:$8 sps:$4 sm:$0xff]  }
  0x10   :  { %v8359_v44 = vld [vmem:[%s12619_s0 + $0x960] ss:$8 sps:$4 sm:$0xff]   ;;  %v8362_v46 = vld [vmem:[%s12619_s0 + $0x974] ss:$8 sps:$4 sm:$0xff]   ;;  %v8365_v48 = vld [vmem:[%s12619_s0 + $0x970] ss:$8 sps:$4 sm:$0xff]  }
  0x11   :  { %v8366_v49 = vld [vmem:[%s12619_s0 + $0x84] ss:$8 sps:$4 sm:$0xff]   ;;  %v8370_v51 = vld [vmem:[%s12619_s0 + $0x80] ss:$8 sps:$4 sm:$0xff]   ;;  %v8372_v53 = vld [vmem:[%s12619_s0 + $0x94] ss:$8 sps:$4 sm:$0xff]  }
  0x12   :  { %3608 = vmatpush1.bf16.msra.mxu0 %v8306_v5  ;;  %8289 = vmatpush1.bf16.msra.mxu1 %v8306_v5  ;;  %v8368_v50 = vld [vmem:[%s12619_s0 + $0x984] ss:$8 sps:$4 sm:$0xff]   ;;  %v8371_v52 = vld [vmem:[%s12619_s0 + $0x980] ss:$8 sps:$4 sm:$0xff]   ;;  %v8374_v54 = vld [vmem:[%s12619_s0 + $0x994] ss:$8 sps:$4 sm:$0xff]  }
  0x13   :  { %3609 = vmatprep.subr.bf16.mxu0 %v9185_v0  ;;  %8274 = vmatprep.subr.bf16.mxu1 %v9185_v0  ;;  %v8376_v55 = vld [vmem:[%s12619_s0 + $0x90] ss:$8 sps:$4 sm:$0xff]   ;;  %v8378_v57 = vld [vmem:[%s12619_s0 + $0xa4] ss:$8 sps:$4 sm:$0xff]   ;;  %v8382_v59 = vld [vmem:[%s12619_s0 + $0xa0] ss:$8 sps:$4 sm:$0xff]  }
  0x14   :  { %v8377_v56 = vld [vmem:[%s12619_s0 + $0x990] ss:$8 sps:$4 sm:$0xff]   ;;  %v8380_v58 = vld [vmem:[%s12619_s0 + $0x9a4] ss:$8 sps:$4 sm:$0xff]   ;;  %v8383_v60 = vld [vmem:[%s12619_s0 + $0x9a0] ss:$8 sps:$4 sm:$0xff]  }
  0x15   :  { %v8384_v61 = vld [vmem:[%s12619_s0 + $0xb4] ss:$8 sps:$4 sm:$0xff]   ;;  %v8388_v63 = vld [vmem:[%s12619_s0 + $0xb0] ss:$8 sps:$4 sm:$0xff]   ;;  %v8390_v1 = vld [vmem:[%s12619_s0 + $0xc4] ss:$8 sps:$4 sm:$0xff]  }
  0x16   :  { %3610 = vmatpush1.bf16.msra.mxu0 %v8307_v7  ;;  %8290 = vmatpush1.bf16.msra.mxu1 %v8307_v7  ;;  %v8386_v62 = vld [vmem:[%s12619_s0 + $0x9b4] ss:$8 sps:$4 sm:$0xff]   ;;  %v8392_v2 = vld [vmem:[%s12619_s0 + $0x9c4] ss:$8 sps:$4 sm:$0xff]   ;;  %v8394_v3 = vld [vmem:[%s12619_s0 + $0xc0] ss:$8 sps:$4 sm:$0xff]  }
  0x17   :  { %3611 = vmatprep.subr.bf16.mxu0 %v9185_v0  ;;  %8275 = vmatprep.subr.bf16.mxu1 %v9185_v0  ;;  %v8395_v4 = vld [vmem:[%s12619_s0 + $0x9c0] ss:$8 sps:$4 sm:$0xff]   ;;  %v8396_v5 = vld [vmem:[%s12619_s0 + $0xd4] ss:$8 sps:$4 sm:$0xff]   ;;  %v8400_v7 = vld [vmem:[%s12619_s0 + $0xd0] ss:$8 sps:$4 sm:$0xff]  }
  0x18   :  { %v8398_v6 = vld [vmem:[%s12619_s0 + $0x9d4] ss:$8 sps:$4 sm:$0xff]   ;;  %v8401_v8 = vld [vmem:[%s12619_s0 + $0x9d0] ss:$8 sps:$4 sm:$0xff]  }
  0x1a   :  { %3612 = vmatpush1.bf16.msra.mxu0 %v8308_v9  ;;  %8291 = vmatpush1.bf16.msra.mxu1 %v8308_v9  ;;  %v8402_v9 = vld [vmem:[%s12619_s0 + $0xe4] ss:$8 sps:$4 sm:$0xff]  }
  0x1b   :  { %3613 = vmatprep.subr.bf16.mxu0 %v9185_v0  ;;  %8276 = vmatprep.subr.bf16.mxu1 %v9185_v0 }
  0x1e   :  { %3614 = vmatpush1.bf16.msra.mxu0 %v8309_v10  ;;  %8292 = vmatpush1.bf16.msra.mxu1 %v8309_v10  ;;  %v8404_v10 = vld [vmem:[%s12619_s0 + $0x9e4] ss:$8 sps:$4 sm:$0xff]  }
  0x1f   :  { %3615 = vmatprep.subr.bf16.mxu0 %v9185_v0  ;;  %8277 = vmatprep.subr.bf16.mxu1 %v9185_v0 }
  0x22   :  { %3616 = vmatpush1.bf16.msra.mxu0 %v8310_v11  ;;  %8293 = vmatpush1.bf16.msra.mxu1 %v8310_v11  ;;  %v8406_v11 = vld [vmem:[%s12619_s0 + $0xe0] ss:$8 sps:$4 sm:$0xff]  }
  0x23   :  { %3617 = vmatprep.subr.bf16.mxu0 %v9185_v0  ;;  %8278 = vmatprep.subr.bf16.mxu1 %v9185_v0 }
  0x26   :  { %3618 = vmatpush1.bf16.msra.mxu0 %v8311_v12  ;;  %8294 = vmatpush1.bf16.msra.mxu1 %v8311_v12  ;;  %v8407_v12 = vld [vmem:[%s12619_s0 + $0x9e0] ss:$8 sps:$4 sm:$0xff]  }
  0x27   :  { %3619 = vmatprep.subr.bf16.mxu0 %v9185_v0  ;;  %8279 = vmatprep.subr.bf16.mxu1 %v9185_v0 }
  0x2a   :  { %3620 = vmatpush1.bf16.msra.mxu0 %v8312_v13  ;;  %8295 = vmatpush1.bf16.msra.mxu1 %v8312_v13  ;;  %v8408_v13 = vld [vmem:[%s12619_s0 + $0xf4] ss:$8 sps:$4 sm:$0xff]  }
  0x2b   :  { %3621 = vmatprep.subr.bf16.mxu0 %v9185_v0  ;;  %8280 = vmatprep.subr.bf16.mxu1 %v9185_v0 }
  0x2e   :  { %3622 = vmatpush1.bf16.msra.mxu0 %v8313_v14  ;;  %8296 = vmatpush1.bf16.msra.mxu1 %v8313_v14  ;;  %v8410_v14 = vld [vmem:[%s12619_s0 + $0x9f4] ss:$8 sps:$4 sm:$0xff]  }
  0x2f   :  { %3623 = vmatprep.subr.bf16.mxu0 %v9185_v0  ;;  %8281 = vmatprep.subr.bf16.mxu1 %v9185_v0 }
  0x32   :  { %3624 = vmatpush1.bf16.msra.mxu0 %v8314_v15  ;;  %8297 = vmatpush1.bf16.msra.mxu1 %v8314_v15  ;;  %v8412_v15 = vld [vmem:[%s12619_s0 + $0xf0] ss:$8 sps:$4 sm:$0xff]  }
  0x33   :  { %3625 = vmatprep.subr.bf16.mxu0 %v9185_v0  ;;  %8282 = vmatprep.subr.bf16.mxu1 %v9185_v0 }
  0x36   :  { %3626 = vmatpush1.bf16.msra.mxu0 %v8315_v16  ;;  %8298 = vmatpush1.bf16.msra.mxu1 %v8315_v16  ;;  %v8413_v16 = vld [vmem:[%s12619_s0 + $0x9f0] ss:$8 sps:$4 sm:$0xff]  }
  0x37   :  { %3627 = vmatprep.subr.bf16.mxu0 %v9185_v0  ;;  %8283 = vmatprep.subr.bf16.mxu1 %v9185_v0 }
  0x3a   :  { %3628 = vmatpush1.bf16.msra.mxu0 %v8316_v17  ;;  %8299 = vmatpush1.bf16.msra.mxu1 %v8316_v17  ;;  %v8414_v17 = vld [vmem:[%s12619_s0 + $0x104] ss:$8 sps:$4 sm:$0xff]  }
  0x3b   :  { %3629 = vmatprep.subr.bf16.mxu0 %v9185_v0  ;;  %8284 = vmatprep.subr.bf16.mxu1 %v9185_v0  ;;  %v8389_v0 = vld [vmem:[%s12619_s0 + $0x9b0] ss:$8 sps:$4 sm:$0xff]  }
  0x3e   :  { %3630 = vmatpush1.bf16.msra.mxu0 %v8317_v18  ;;  %8300 = vmatpush1.bf16.msra.mxu1 %v8317_v18  ;;  %v8416_v18 = vld [vmem:[%s12619_s0 + $0xa04] ss:$8 sps:$4 sm:$0xff]  }
  0x41   :  { %3632 = vmatmul.mubr.bf16.vlgmr.msra.gmra.mrb[0].mxu0 %v8318_v19  ;;  %4784 = vmatmul.mubr.bf16.vlgmr.msra.gmra.mrb[0].mxu1 %v8321_v20  ;;  %v8418_v19 = vld [vmem:[%s12619_s0 + $0x100] ss:$8 sps:$4 sm:$0xff]  }
  0x42   :  { %3639 = vmatprep.mubr.bf16.mxu0 %v8324_v21  ;;  %4791 = vmatprep.mubr.bf16.mxu1 %v8326_v22  ;;  %v8419_v20 = vld [vmem:[%s12619_s0 + $0xa00] ss:$8 sps:$4 sm:$0xff]   ;;  %v8420_v21 = vld [vmem:[%s12619_s0 + $0x114] ss:$8 sps:$4 sm:$0xff]  }
  0x43   :  { %v8422_v22 = vld [vmem:[%s12619_s0 + $0xa14] ss:$8 sps:$4 sm:$0xff]  }
  0x49   :  { %3640 = vmatmul.mubr.bf16.gmra.mrb[4].mxu0 %v8328_v23  ;;  %4792 = vmatmul.mubr.bf16.gmra.mrb[4].mxu1 %v8329_v24  ;;  %v8424_v23 = vld [vmem:[%s12619_s0 + $0x110] ss:$8 sps:$4 sm:$0xff]  }
  0x4a   :  { %3647 = vmatprep.mubr.bf16.mxu0 %v8330_v25  ;;  %4799 = vmatprep.mubr.bf16.mxu1 %v8332_v26  ;;  %v8425_v24 = vld [vmem:[%s12619_s0 + $0xa10] ss:$8 sps:$4 sm:$0xff]   ;;  %v8426_v25 = vld [vmem:[%s12619_s0 + $0x124] ss:$8 sps:$4 sm:$0xff]  }
  0x4b   :  { %v8428_v26 = vld [vmem:[%s12619_s0 + $0xa24] ss:$8 sps:$4 sm:$0xff]  }
  0x51   :  { %3648 = vmatmul.mubr.bf16.gmra.mrb[8].mxu0 %v8334_v27  ;;  %4800 = vmatmul.mubr.bf16.gmra.mrb[8].mxu1 %v8335_v28  ;;  %v8430_v27 = vld [vmem:[%s12619_s0 + $0x120] ss:$8 sps:$4 sm:$0xff]  }
  0x52   :  { %3655 = vmatprep.mubr.bf16.mxu0 %v8336_v29  ;;  %4807 = vmatprep.mubr.bf16.mxu1 %v8338_v30  ;;  %v8431_v28 = vld [vmem:[%s12619_s0 + $0xa20] ss:$8 sps:$4 sm:$0xff]   ;;  %v8432_v29 = vld [vmem:[%s12619_s0 + $0x134] ss:$8 sps:$4 sm:$0xff]  }
  0x53   :  { %v8434_v30 = vld [vmem:[%s12619_s0 + $0xa34] ss:$8 sps:$4 sm:$0xff]  }
  0x59   :  { %3656 = vmatmul.mubr.bf16.gmra.mrb[12].mxu0 %v8340_v31  ;;  %4808 = vmatmul.mubr.bf16.gmra.mrb[12].mxu1 %v8341_v32  ;;  %v8436_v31 = vld [vmem:[%s12619_s0 + $0x130] ss:$8 sps:$4 sm:$0xff]  }
  0x5a   :  { %3663 = vmatprep.mubr.bf16.mxu0 %v8342_v33  ;;  %4815 = vmatprep.mubr.bf16.mxu1 %v8344_v34  ;;  %v8437_v32 = vld [vmem:[%s12619_s0 + $0xa30] ss:$8 sps:$4 sm:$0xff]   ;;  %v8438_v33 = vld [vmem:[%s12619_s0 + $0x144] ss:$8 sps:$4 sm:$0xff]  }
  0x5b   :  { %v8440_v34 = vld [vmem:[%s12619_s0 + $0xa44] ss:$8 sps:$4 sm:$0xff]  }
  0x61   :  { %3664 = vmatmul.mubr.bf16.gmra.mrb[16].mxu0 %v8346_v35  ;;  %4816 = vmatmul.mubr.bf16.gmra.mrb[16].mxu1 %v8347_v36  ;;  %v8442_v35 = vld [vmem:[%s12619_s0 + $0x140] ss:$8 sps:$4 sm:$0xff]  }
  0x62   :  { %3671 = vmatprep.mubr.bf16.mxu0 %v8348_v37  ;;  %4823 = vmatprep.mubr.bf16.mxu1 %v8350_v38  ;;  %v8443_v36 = vld [vmem:[%s12619_s0 + $0xa40] ss:$8 sps:$4 sm:$0xff]   ;;  %v8444_v37 = vld [vmem:[%s12619_s0 + $0x154] ss:$8 sps:$4 sm:$0xff]  }
  0x63   :  { %v8446_v38 = vld [vmem:[%s12619_s0 + $0xa54] ss:$8 sps:$4 sm:$0xff]  }
  0x69   :  { %3672 = vmatmul.mubr.bf16.gmra.mrb[20].mxu0 %v8352_v39  ;;  %4824 = vmatmul.mubr.bf16.gmra.mrb[20].mxu1 %v8353_v40  ;;  %v8448_v39 = vld [vmem:[%s12619_s0 + $0x150] ss:$8 sps:$4 sm:$0xff]  }
  0x6a   :  { %3679 = vmatprep.mubr.bf16.mxu0 %v8354_v41  ;;  %4831 = vmatprep.mubr.bf16.mxu1 %v8356_v42  ;;  %v8449_v40 = vld [vmem:[%s12619_s0 + $0xa50] ss:$8 sps:$4 sm:$0xff]   ;;  %v8450_v41 = vld [vmem:[%s12619_s0 + $0x164] ss:$8 sps:$4 sm:$0xff]  }
  0x6b   :  { %v8452_v42 = vld [vmem:[%s12619_s0 + $0xa64] ss:$8 sps:$4 sm:$0xff]  }
  0x71   :  { %3680 = vmatmul.mubr.bf16.gmra.mrb[24].mxu0 %v8358_v43  ;;  %4832 = vmatmul.mubr.bf16.gmra.mrb[24].mxu1 %v8359_v44  ;;  %v8454_v43 = vld [vmem:[%s12619_s0 + $0x160] ss:$8 sps:$4 sm:$0xff]  }
  0x72   :  { %3687 = vmatprep.mubr.bf16.mxu0 %v8360_v45  ;;  %4839 = vmatprep.mubr.bf16.mxu1 %v8362_v46  ;;  %v8455_v44 = vld [vmem:[%s12619_s0 + $0xa60] ss:$8 sps:$4 sm:$0xff]   ;;  %v8456_v45 = vld [vmem:[%s12619_s0 + $0x174] ss:$8 sps:$4 sm:$0xff]  }
  0x73   :  { %v8458_v46 = vld [vmem:[%s12619_s0 + $0xa74] ss:$8 sps:$4 sm:$0xff]  }
  0x79   :  { %3688 = vmatmul.mubr.bf16.gmra.mrb[28].mxu0 %v8364_v47  ;;  %4840 = vmatmul.mubr.bf16.gmra.mrb[28].mxu1 %v8365_v48  ;;  %v8460_v47 = vld [vmem:[%s12619_s0 + $0x170] ss:$8 sps:$4 sm:$0xff]  }
  0x7a   :  { %3695 = vmatprep.mubr.bf16.mxu0 %v8366_v49  ;;  %4847 = vmatprep.mubr.bf16.mxu1 %v8368_v50  ;;  %v8461_v48 = vld [vmem:[%s12619_s0 + $0xa70] ss:$8 sps:$4 sm:$0xff]   ;;  %v8462_v49 = vld [vmem:[%s12619_s0 + $0x184] ss:$8 sps:$4 sm:$0xff]  }
  0x7b   :  { %v8464_v50 = vld [vmem:[%s12619_s0 + $0xa84] ss:$8 sps:$4 sm:$0xff]  }
  0x81   :  { %3696 = vmatmul.mubr.bf16.gmra.mrb[32].mxu0 %v8370_v51  ;;  %4848 = vmatmul.mubr.bf16.gmra.mrb[32].mxu1 %v8371_v52  ;;  %v8466_v51 = vld [vmem:[%s12619_s0 + $0x180] ss:$8 sps:$4 sm:$0xff]  }
  0x82   :  { %3703 = vmatprep.mubr.bf16.mxu0 %v8372_v53  ;;  %4855 = vmatprep.mubr.bf16.mxu1 %v8374_v54  ;;  %v8467_v52 = vld [vmem:[%s12619_s0 + $0xa80] ss:$8 sps:$4 sm:$0xff]   ;;  %v8468_v53 = vld [vmem:[%s12619_s0 + $0x194] ss:$8 sps:$4 sm:$0xff]  }
  0x83   :  { %v8470_v54 = vld [vmem:[%s12619_s0 + $0xa94] ss:$8 sps:$4 sm:$0xff]  }
  0x89   :  { %3704 = vmatmul.mubr.bf16.gmra.mrb[36].mxu0 %v8376_v55  ;;  %4856 = vmatmul.mubr.bf16.gmra.mrb[36].mxu1 %v8377_v56  ;;  %v8472_v55 = vld [vmem:[%s12619_s0 + $0x190] ss:$8 sps:$4 sm:$0xff]  }
  0x8a   :  { %3711 = vmatprep.mubr.bf16.mxu0 %v8378_v57  ;;  %4863 = vmatprep.mubr.bf16.mxu1 %v8380_v58  ;;  %v8473_v56 = vld [vmem:[%s12619_s0 + $0xa90] ss:$8 sps:$4 sm:$0xff]   ;;  %v8474_v57 = vld [vmem:[%s12619_s0 + $0x1a4] ss:$8 sps:$4 sm:$0xff]  }
  0x8b   :  { %v8476_v58 = vld [vmem:[%s12619_s0 + $0xaa4] ss:$8 sps:$4 sm:$0xff]  }
  0x91   :  { %3712 = vmatmul.mubr.bf16.gmra.mrb[40].mxu0 %v8382_v59  ;;  %4864 = vmatmul.mubr.bf16.gmra.mrb[40].mxu1 %v8383_v60  ;;  %v8478_v59 = vld [vmem:[%s12619_s0 + $0x1a0] ss:$8 sps:$4 sm:$0xff]  }
  0x92   :  { %3719 = vmatprep.mubr.bf16.mxu0 %v8384_v61  ;;  %4871 = vmatprep.mubr.bf16.mxu1 %v8386_v62  ;;  %v8479_v60 = vld [vmem:[%s12619_s0 + $0xaa0] ss:$8 sps:$4 sm:$0xff]   ;;  %v8480_v61 = vld [vmem:[%s12619_s0 + $0x1b4] ss:$8 sps:$4 sm:$0xff]  }
  0x93   :  { %v8482_v62 = vld [vmem:[%s12619_s0 + $0xab4] ss:$8 sps:$4 sm:$0xff]  }
  0x99   :  { %3720 = vmatmul.mubr.bf16.gmra.mrb[44].mxu0 %v8388_v63  ;;  %4872 = vmatmul.mubr.bf16.gmra.mrb[44].mxu1 %v8389_v0 }
  0x9a   :  { %3727 = vmatprep.mubr.bf16.mxu0 %v8390_v1  ;;  %4879 = vmatprep.mubr.bf16.mxu1 %v8392_v2 }
  0xa1   :  { %3728 = vmatmul.mubr.bf16.gmra.mrb[48].mxu0 %v8394_v3  ;;  %4880 = vmatmul.mubr.bf16.gmra.mrb[48].mxu1 %v8395_v4  ;;  %v8484_v3 = vld [vmem:[%s12619_s0 + $0x1b0] ss:$8 sps:$4 sm:$0xff]  }
  0xa2   :  { %3735 = vmatprep.mubr.bf16.mxu0 %v8396_v5  ;;  %4887 = vmatprep.mubr.bf16.mxu1 %v8398_v6  ;;  %v8485_v4 = vld [vmem:[%s12619_s0 + $0xab0] ss:$8 sps:$4 sm:$0xff]  }
  0xa9   :  { %3736 = vmatmul.mubr.bf16.gmra.mrb[52].mxu0 %v8400_v7  ;;  %4888 = vmatmul.mubr.bf16.gmra.mrb[52].mxu1 %v8401_v8  ;;  %v8486_v7 = vld [vmem:[%s12619_s0 + $0x1c4] ss:$8 sps:$4 sm:$0xff]  }
  0xaa   :  { %3743 = vmatprep.mubr.bf16.mxu0 %v8402_v9  ;;  %4895 = vmatprep.mubr.bf16.mxu1 %v8404_v10  ;;  %v8488_v8 = vld [vmem:[%s12619_s0 + $0xac4] ss:$8 sps:$4 sm:$0xff]  }
  0xb1   :  { %3744 = vmatmul.mubr.bf16.gmra.mrb[56].mxu0 %v8406_v11  ;;  %4896 = vmatmul.mubr.bf16.gmra.mrb[56].mxu1 %v8407_v12 }
  0xb2   :  { %3751 = vmatprep.mubr.bf16.mxu0 %v8408_v13  ;;  %4903 = vmatprep.mubr.bf16.mxu1 %v8410_v14 }
  0xb9   :  { %3752 = vmatmul.mubr.bf16.gmra.mrb[60].mxu0 %v8412_v15  ;;  %4904 = vmatmul.mubr.bf16.gmra.mrb[60].mxu1 %v8413_v16  ;;  %v8490_v15 = vld [vmem:[%s12619_s0 + $0x1c0] ss:$8 sps:$4 sm:$0xff]  }
  0xba   :  { %3759 = vmatprep.mubr.bf16.mxu0 %v8414_v17  ;;  %4911 = vmatprep.mubr.bf16.mxu1 %v8416_v18  ;;  %v8491_v16 = vld [vmem:[%s12619_s0 + $0xac0] ss:$8 sps:$4 sm:$0xff]  }
  0xc1   :  { %3760 = vmatmul.mubr.bf16.gmra.mrb[64].mxu0 %v8418_v19  ;;  %4912 = vmatmul.mubr.bf16.gmra.mrb[64].mxu1 %v8419_v20  ;;  %v8492_v19 = vld [vmem:[%s12619_s0 + $0x1d4] ss:$8 sps:$4 sm:$0xff]  }
  0xc2   :  { %3767 = vmatprep.mubr.bf16.mxu0 %v8420_v21  ;;  %4919 = vmatprep.mubr.bf16.mxu1 %v8422_v22  ;;  %v8494_v20 = vld [vmem:[%s12619_s0 + $0xad4] ss:$8 sps:$4 sm:$0xff]  }
  0xc9   :  { %3768 = vmatmul.mubr.bf16.gmra.mrb[68].mxu0 %v8424_v23  ;;  %4920 = vmatmul.mubr.bf16.gmra.mrb[68].mxu1 %v8425_v24 }
  0xca   :  { %3775 = vmatprep.mubr.bf16.mxu0 %v8426_v25  ;;  %4927 = vmatprep.mubr.bf16.mxu1 %v8428_v26 }
  0xd1   :  { %3776 = vmatmul.mubr.bf16.gmra.mrb[72].mxu0 %v8430_v27  ;;  %4928 = vmatmul.mubr.bf16.gmra.mrb[72].mxu1 %v8431_v28  ;;  %v8496_v27 = vld [vmem:[%s12619_s0 + $0x1d0] ss:$8 sps:$4 sm:$0xff]  }
  0xd2   :  { %3783 = vmatprep.mubr.bf16.mxu0 %v8432_v29  ;;  %4935 = vmatprep.mubr.bf16.mxu1 %v8434_v30  ;;  %v8497_v28 = vld [vmem:[%s12619_s0 + $0xad0] ss:$8 sps:$4 sm:$0xff]  }
  0xd9   :  { %3784 = vmatmul.mubr.bf16.gmra.mrb[76].mxu0 %v8436_v31  ;;  %4936 = vmatmul.mubr.bf16.gmra.mrb[76].mxu1 %v8437_v32  ;;  %v8498_v31 = vld [vmem:[%s12619_s0 + $0x1e4] ss:$8 sps:$4 sm:$0xff]  }
  0xda   :  { %3791 = vmatprep.mubr.bf16.mxu0 %v8438_v33  ;;  %4943 = vmatprep.mubr.bf16.mxu1 %v8440_v34  ;;  %v8500_v32 = vld [vmem:[%s12619_s0 + $0xae4] ss:$8 sps:$4 sm:$0xff]  }
  0xe1   :  { %3792 = vmatmul.mubr.bf16.gmra.mrb[80].mxu0 %v8442_v35  ;;  %4944 = vmatmul.mubr.bf16.gmra.mrb[80].mxu1 %v8443_v36 }
  0xe2   :  { %3799 = vmatprep.mubr.bf16.mxu0 %v8444_v37  ;;  %4951 = vmatprep.mubr.bf16.mxu1 %v8446_v38 }
  0xe9   :  { %3800 = vmatmul.mubr.bf16.gmra.mrb[84].mxu0 %v8448_v39  ;;  %4952 = vmatmul.mubr.bf16.gmra.mrb[84].mxu1 %v8449_v40  ;;  %v8502_v39 = vld [vmem:[%s12619_s0 + $0x1e0] ss:$8 sps:$4 sm:$0xff]  }
  0xea   :  { %3807 = vmatprep.mubr.bf16.mxu0 %v8450_v41  ;;  %4959 = vmatprep.mubr.bf16.mxu1 %v8452_v42  ;;  %v8503_v40 = vld [vmem:[%s12619_s0 + $0xae0] ss:$8 sps:$4 sm:$0xff]  }
  0xf1   :  { %3808 = vmatmul.mubr.bf16.gmra.mrb[88].mxu0 %v8454_v43  ;;  %4960 = vmatmul.mubr.bf16.gmra.mrb[88].mxu1 %v8455_v44  ;;  %v8504_v43 = vld [vmem:[%s12619_s0 + $0x1f4] ss:$8 sps:$4 sm:$0xff]  }
  0xf2   :  { %3815 = vmatprep.mubr.bf16.mxu0 %v8456_v45  ;;  %4967 = vmatprep.mubr.bf16.mxu1 %v8458_v46  ;;  %v8506_v44 = vld [vmem:[%s12619_s0 + $0xaf4] ss:$8 sps:$4 sm:$0xff]  }
  0xf9   :  { %3816 = vmatmul.mubr.bf16.gmra.mrb[92].mxu0 %v8460_v47  ;;  %4968 = vmatmul.mubr.bf16.gmra.mrb[92].mxu1 %v8461_v48 }
  0xfa   :  { %3823 = vmatprep.mubr.bf16.mxu0 %v8462_v49  ;;  %4975 = vmatprep.mubr.bf16.mxu1 %v8464_v50 }
 0x101   :  { %3824 = vmatmul.mubr.bf16.gmra.mrb[96].mxu0 %v8466_v51  ;;  %4976 = vmatmul.mubr.bf16.gmra.mrb[96].mxu1 %v8467_v52  ;;  %v8508_v51 = vld [vmem:[%s12619_s0 + $0x1f0] ss:$8 sps:$4 sm:$0xff]  }
 0x102   :  { %3831 = vmatprep.mubr.bf16.mxu0 %v8468_v53  ;;  %4983 = vmatprep.mubr.bf16.mxu1 %v8470_v54  ;;  %v8509_v52 = vld [vmem:[%s12619_s0 + $0xaf0] ss:$8 sps:$4 sm:$0xff]  }
 0x109   :  { %3832 = vmatmul.mubr.bf16.gmra.mrb[100].mxu0 %v8472_v55  ;;  %4984 = vmatmul.mubr.bf16.gmra.mrb[100].mxu1 %v8473_v56  ;;  %v8510_v55 = vld [vmem:[%s12619_s0 + $0x204] ss:$8 sps:$4 sm:$0xff]  }
 0x10a   :  { %3839 = vmatprep.mubr.bf16.mxu0 %v8474_v57  ;;  %4991 = vmatprep.mubr.bf16.mxu1 %v8476_v58  ;;  %v8512_v56 = vld [vmem:[%s12619_s0 + $0xb04] ss:$8 sps:$4 sm:$0xff]  }
 0x111   :  { %3840 = vmatmul.mubr.bf16.gmra.mrb[104].mxu0 %v8478_v59  ;;  %4992 = vmatmul.mubr.bf16.gmra.mrb[104].mxu1 %v8479_v60 }
 0x112   :  { %3847 = vmatprep.mubr.bf16.mxu0 %v8480_v61  ;;  %4999 = vmatprep.mubr.bf16.mxu1 %v8482_v62 }
 0x114   :  { %v9616_v63 = vpop.f32.mrb[0].mxu0  ;;  %v9618_v0 = vpop.f32.mrb[0].mxu1 }
 0x115   :  { %v3635_v1 = vpop.f32.mrb[1].mxu0  ;;  %v4787_v2 = vpop.f32.mrb[1].mxu1 }
 0x116   :  { %v9626_v5 = vpop.f32.mrb[2].mxu0  ;;  %v9628_v6 = vpop.f32.mrb[2].mxu1  ;;  %v8514_v1 = vld [vmem:[%s12619_s0 + $0x200] ss:$8 sps:$4 sm:$0xff]  }
 0x117   :  { %v3638_v9 = vpop.f32.mrb[3].mxu0  ;;  %v4790_v10 = vpop.f32.mrb[3].mxu1  ;;  %v8515_v2 = vld [vmem:[%s12619_s0 + $0xb00] ss:$8 sps:$4 sm:$0xff]  }
 0x119   :  { %3848 = vmatmul.mubr.bf16.gmra.mrb[108].mxu0 %v8484_v3  ;;  %5000 = vmatmul.mubr.bf16.gmra.mrb[108].mxu1 %v8485_v4 }
 0x11a   :  { %3855 = vmatprep.mubr.bf16.mxu0 %v8486_v7  ;;  %5007 = vmatprep.mubr.bf16.mxu1 %v8488_v8  ;;  %v8516_v7 = vld [vmem:[%s12619_s0 + $0x214] ss:$8 sps:$4 sm:$0xff]  }
 0x11b   :  { %v8518_v8 = vld [vmem:[%s12619_s0 + $0xb14] ss:$8 sps:$4 sm:$0xff]  }
 0x11c   :  { %v9636_v11 = vpop.f32.mrb[4].mxu0  ;;  %v9638_v12 = vpop.f32.mrb[4].mxu1 }
 0x11d   :  { %v3643_v13 = vpop.f32.mrb[5].mxu0  ;;  %v4795_v14 = vpop.f32.mrb[5].mxu1 }
 0x11e   :  { %v9646_v17 = vpop.f32.mrb[6].mxu0  ;;  %v9648_v18 = vpop.f32.mrb[6].mxu1 }
 0x11f   :  { %v3646_v21 = vpop.f32.mrb[7].mxu0  ;;  %v4798_v22 = vpop.f32.mrb[7].mxu1 }
 0x121   :  { %3856 = vmatmul.mubr.bf16.gmra.mrb[112].mxu0 %v8490_v15  ;;  %5008 = vmatmul.mubr.bf16.gmra.mrb[112].mxu1 %v8491_v16 }
 0x122   :  { %3863 = vmatprep.mubr.bf16.mxu0 %v8492_v19  ;;  %5015 = vmatprep.mubr.bf16.mxu1 %v8494_v20  ;;  %v8520_v19 = vld [vmem:[%s12619_s0 + $0x210] ss:$8 sps:$4 sm:$0xff]  }
 0x123   :  { %v8521_v20 = vld [vmem:[%s12619_s0 + $0xb10] ss:$8 sps:$4 sm:$0xff]  }
 0x124   :  { %v9656_v23 = vpop.f32.mrb[8].mxu0  ;;  %v9658_v24 = vpop.f32.mrb[8].mxu1 }
 0x125   :  { %v3651_v25 = vpop.f32.mrb[9].mxu0  ;;  %v4803_v26 = vpop.f32.mrb[9].mxu1 }
 0x126   :  { %v9666_v29 = vpop.f32.mrb[10].mxu0  ;;  %v9668_v30 = vpop.f32.mrb[10].mxu1  ;;  %v8522_v25 = vld [vmem:[%s12619_s0 + $0x224] ss:$8 sps:$4 sm:$0xff]  }
 0x127   :  { %v3654_v33 = vpop.f32.mrb[11].mxu0  ;;  %v4806_v34 = vpop.f32.mrb[11].mxu1  ;;  %v8524_v26 = vld [vmem:[%s12619_s0 + $0xb24] ss:$8 sps:$4 sm:$0xff]  }
 0x129   :  { %3864 = vmatmul.mubr.bf16.gmra.mrb[116].mxu0 %v8496_v27  ;;  %5016 = vmatmul.mubr.bf16.gmra.mrb[116].mxu1 %v8497_v28 }
 0x12a   :  { %3871 = vmatprep.mubr.bf16.mxu0 %v8498_v31  ;;  %5023 = vmatprep.mubr.bf16.mxu1 %v8500_v32 }
 0x12c   :  { %v9676_v35 = vpop.f32.mrb[12].mxu0  ;;  %v9678_v36 = vpop.f32.mrb[12].mxu1 }
 0x12d   :  { %v3659_v37 = vpop.f32.mrb[13].mxu0  ;;  %v4811_v38 = vpop.f32.mrb[13].mxu1 }
 0x12e   :  { %v9686_v41 = vpop.f32.mrb[14].mxu0  ;;  %v9688_v42 = vpop.f32.mrb[14].mxu1  ;;  %v8526_v37 = vld [vmem:[%s12619_s0 + $0x220] ss:$8 sps:$4 sm:$0xff]  }
 0x12f   :  { %v3662_v45 = vpop.f32.mrb[15].mxu0  ;;  %v4814_v46 = vpop.f32.mrb[15].mxu1  ;;  %v8527_v38 = vld [vmem:[%s12619_s0 + $0xb20] ss:$8 sps:$4 sm:$0xff]  }
 0x131   :  { %3872 = vmatmul.mubr.bf16.gmra.mrb[120].mxu0 %v8502_v39  ;;  %5024 = vmatmul.mubr.bf16.gmra.mrb[120].mxu1 %v8503_v40 }
 0x132   :  { %3879 = vmatprep.mubr.bf16.mxu0 %v8504_v43  ;;  %5031 = vmatprep.mubr.bf16.mxu1 %v8506_v44  ;;  %v8528_v43 = vld [vmem:[%s12619_s0 + $0x234] ss:$8 sps:$4 sm:$0xff]  }
 0x133   :  { %v8530_v44 = vld [vmem:[%s12619_s0 + $0xb34] ss:$8 sps:$4 sm:$0xff]  }
 0x134   :  { %v9696_v47 = vpop.f32.mrb[16].mxu0  ;;  %v9698_v48 = vpop.f32.mrb[16].mxu1 }
 0x135   :  { %v3667_v49 = vpop.f32.mrb[17].mxu0  ;;  %v4819_v50 = vpop.f32.mrb[17].mxu1 }
 0x136   :  { %v9706_v53 = vpop.f32.mrb[18].mxu0  ;;  %v9708_v54 = vpop.f32.mrb[18].mxu1 }
 0x137   :  { %v3670_v57 = vpop.f32.mrb[19].mxu0  ;;  %v4822_v58 = vpop.f32.mrb[19].mxu1 }
 0x139   :  { %3880 = vmatmul.mubr.bf16.gmra.mrb[124].mxu0 %v8508_v51  ;;  %5032 = vmatmul.mubr.bf16.gmra.mrb[124].mxu1 %v8509_v52 }
 0x13a   :  { %3887 = vmatprep.mubr.bf16.mxu0 %v8510_v55  ;;  %5039 = vmatprep.mubr.bf16.mxu1 %v8512_v56  ;;  %v8532_v55 = vld [vmem:[%s12619_s0 + $0x230] ss:$8 sps:$4 sm:$0xff]  }
 0x13b   :  { %v8533_v56 = vld [vmem:[%s12619_s0 + $0xb30] ss:$8 sps:$4 sm:$0xff]  }
 0x13c   :  { %v9716_v59 = vpop.f32.mrb[20].mxu0  ;;  %v9718_v60 = vpop.f32.mrb[20].mxu1 }
 0x13d   :  { %v3675_v61 = vpop.f32.mrb[21].mxu0  ;;  %v4827_v62 = vpop.f32.mrb[21].mxu1 }
 0x13e   :  { %v9726_v3 = vpop.f32.mrb[22].mxu0  ;;  %v9728_v4 = vpop.f32.mrb[22].mxu1  ;;  %v8534_v61 = vld [vmem:[%s12619_s0 + $0x244] ss:$8 sps:$4 sm:$0xff]  }
 0x13f   :  { %v3678_v9 = vpop.f32.mrb[23].mxu0  ;;  %v4830_v10 = vpop.f32.mrb[23].mxu1  ;;  %v8536_v62 = vld [vmem:[%s12619_s0 + $0xb44] ss:$8 sps:$4 sm:$0xff]  }
 0x141   :  { %3888 = vmatmul.mubr.bf16.gmra.mrb[128].mxu0 %v8514_v1  ;;  %5040 = vmatmul.mubr.bf16.gmra.mrb[128].mxu1 %v8515_v2 }
 0x142   :  { %3895 = vmatprep.mubr.bf16.mxu0 %v8516_v7  ;;  %5047 = vmatprep.mubr.bf16.mxu1 %v8518_v8 }
 0x144   :  { %v9736_v13 = vpop.f32.mrb[24].mxu0  ;;  %v9738_v14 = vpop.f32.mrb[24].mxu1 }
 0x145   :  { %v3683_v15 = vpop.f32.mrb[25].mxu0  ;;  %v4835_v16 = vpop.f32.mrb[25].mxu1 }
 0x146   :  { %v9746_v21 = vpop.f32.mrb[26].mxu0  ;;  %v9748_v22 = vpop.f32.mrb[26].mxu1  ;;  %v8538_v15 = vld [vmem:[%s12619_s0 + $0x240] ss:$8 sps:$4 sm:$0xff]  }
 0x147   :  { %v3686_v27 = vpop.f32.mrb[27].mxu0  ;;  %v4838_v28 = vpop.f32.mrb[27].mxu1  ;;  %v8539_v16 = vld [vmem:[%s12619_s0 + $0xb40] ss:$8 sps:$4 sm:$0xff]  }
 0x149   :  { %3896 = vmatmul.mubr.bf16.gmra.mrb[132].mxu0 %v8520_v19  ;;  %5048 = vmatmul.mubr.bf16.gmra.mrb[132].mxu1 %v8521_v20 }
 0x14a   :  { %3903 = vmatprep.mubr.bf16.mxu0 %v8522_v25  ;;  %5055 = vmatprep.mubr.bf16.mxu1 %v8524_v26  ;;  %v8540_v25 = vld [vmem:[%s12619_s0 + $0x254] ss:$8 sps:$4 sm:$0xff]  }
 0x14b   :  { %v8542_v26 = vld [vmem:[%s12619_s0 + $0xb54] ss:$8 sps:$4 sm:$0xff]  }
 0x14c   :  { %v9756_v31 = vpop.f32.mrb[28].mxu0  ;;  %v9758_v32 = vpop.f32.mrb[28].mxu1 }
 0x14d   :  { %v3691_v33 = vpop.f32.mrb[29].mxu0  ;;  %v4843_v34 = vpop.f32.mrb[29].mxu1 }
 0x14e   :  { %v9766_v39 = vpop.f32.mrb[30].mxu0  ;;  %v9768_v40 = vpop.f32.mrb[30].mxu1 }
 0x14f   :  { %v3694_v45 = vpop.f32.mrb[31].mxu0  ;;  %v4846_v46 = vpop.f32.mrb[31].mxu1 }
 0x151   :  { %3904 = vmatmul.mubr.bf16.gmra.mrb[136].mxu0 %v8526_v37  ;;  %5056 = vmatmul.mubr.bf16.gmra.mrb[136].mxu1 %v8527_v38 }
 0x152   :  { %3911 = vmatprep.mubr.bf16.mxu0 %v8528_v43  ;;  %5063 = vmatprep.mubr.bf16.mxu1 %v8530_v44  ;;  %v8544_v43 = vld [vmem:[%s12619_s0 + $0x250] ss:$8 sps:$4 sm:$0xff]  }
 0x153   :  { %v8545_v44 = vld [vmem:[%s12619_s0 + $0xb50] ss:$8 sps:$4 sm:$0xff]  }
 0x154   :  { %v9776_v49 = vpop.f32.mrb[32].mxu0  ;;  %v9778_v50 = vpop.f32.mrb[32].mxu1 }
 0x155   :  { %v3699_v51 = vpop.f32.mrb[33].mxu0  ;;  %v4851_v52 = vpop.f32.mrb[33].mxu1 }
 0x156   :  { %v9786_v57 = vpop.f32.mrb[34].mxu0  ;;  %v9788_v58 = vpop.f32.mrb[34].mxu1  ;;  %v8546_v51 = vld [vmem:[%s12619_s0 + $0x264] ss:$8 sps:$4 sm:$0xff]  }
 0x157   :  { %v3702_v1 = vpop.f32.mrb[35].mxu0  ;;  %v4854_v2 = vpop.f32.mrb[35].mxu1  ;;  %v8548_v52 = vld [vmem:[%s12619_s0 + $0xb64] ss:$8 sps:$4 sm:$0xff]  }
 0x159   :  { %3912 = vmatmul.mubr.bf16.gmra.mrb[140].mxu0 %v8532_v55  ;;  %5064 = vmatmul.mubr.bf16.gmra.mrb[140].mxu1 %v8533_v56 }
 0x15a   :  { %3919 = vmatprep.mubr.bf16.mxu0 %v8534_v61  ;;  %5071 = vmatprep.mubr.bf16.mxu1 %v8536_v62 }
 0x15c   :  { %v9796_v7 = vpop.f32.mrb[36].mxu0  ;;  %v9798_v8 = vpop.f32.mrb[36].mxu1 }
 0x15d   :  { %v3707_v9 = vpop.f32.mrb[37].mxu0  ;;  %v4859_v10 = vpop.f32.mrb[37].mxu1 }
 0x15e   :  { %v9806_v19 = vpop.f32.mrb[38].mxu0  ;;  %v9808_v20 = vpop.f32.mrb[38].mxu1  ;;  %v8550_v9 = vld [vmem:[%s12619_s0 + $0x260] ss:$8 sps:$4 sm:$0xff]  }
 0x15f   :  { %v3710_v27 = vpop.f32.mrb[39].mxu0  ;;  %v4862_v28 = vpop.f32.mrb[39].mxu1  ;;  %v8551_v10 = vld [vmem:[%s12619_s0 + $0xb60] ss:$8 sps:$4 sm:$0xff]  }
 0x161   :  { %3920 = vmatmul.mubr.bf16.gmra.mrb[144].mxu0 %v8538_v15  ;;  %5072 = vmatmul.mubr.bf16.gmra.mrb[144].mxu1 %v8539_v16 }
 0x162   :  { %3927 = vmatprep.mubr.bf16.mxu0 %v8540_v25  ;;  %5079 = vmatprep.mubr.bf16.mxu1 %v8542_v26  ;;  %v8552_v25 = vld [vmem:[%s12619_s0 + $0x274] ss:$8 sps:$4 sm:$0xff]  }
 0x163   :  { %v8554_v26 = vld [vmem:[%s12619_s0 + $0xb74] ss:$8 sps:$4 sm:$0xff]  }
 0x164   :  { %v9816_v33 = vpop.f32.mrb[40].mxu0  ;;  %v9818_v34 = vpop.f32.mrb[40].mxu1 }
 0x165   :  { %v3715_v37 = vpop.f32.mrb[41].mxu0  ;;  %v4867_v38 = vpop.f32.mrb[41].mxu1 }
 0x166   :  { %v9826_v45 = vpop.f32.mrb[42].mxu0  ;;  %v9828_v46 = vpop.f32.mrb[42].mxu1 }
 0x167   :  { %v3718_v55 = vpop.f32.mrb[43].mxu0  ;;  %v4870_v56 = vpop.f32.mrb[43].mxu1 }
 0x169   :  { %3928 = vmatmul.mubr.bf16.gmra.mrb[148].mxu0 %v8544_v43  ;;  %5080 = vmatmul.mubr.bf16.gmra.mrb[148].mxu1 %v8545_v44 }
 0x16a   :  { %3935 = vmatprep.mubr.bf16.mxu0 %v8546_v51  ;;  %5087 = vmatprep.mubr.bf16.mxu1 %v8548_v52  ;;  %v8556_v51 = vld [vmem:[%s12619_s0 + $0x270] ss:$8 sps:$4 sm:$0xff]  }
 0x16b   :  { %v8557_v52 = vld [vmem:[%s12619_s0 + $0xb70] ss:$8 sps:$4 sm:$0xff]  }
 0x16c   :  { %v9836_v61 = vpop.f32.mrb[44].mxu0  ;;  %v9838_v62 = vpop.f32.mrb[44].mxu1 }
 0x16d   :  { %v3723_v1 = vpop.f32.mrb[45].mxu0  ;;  %v4875_v2 = vpop.f32.mrb[45].mxu1 }
 0x16e   :  { %v9846_v15 = vpop.f32.mrb[46].mxu0  ;;  %v9848_v16 = vpop.f32.mrb[46].mxu1  ;;  %v8558_v1 = vld [vmem:[%s12619_s0 + $0x284] ss:$8 sps:$4 sm:$0xff]  }
 0x16f   :  { %12622 = vst [vmem:[#allocation2_spill] sm:$0xff] %v9846_v15  ;;  %12623 = vst [vmem:[#allocation3_spill] sm:$0xff] %v9848_v16  ;;  %v3726_v27 = vpop.f32.mrb[47].mxu0  ;;  %v4878_v28 = vpop.f32.mrb[47].mxu1  ;;  %v8560_v2 = vld [vmem:[%s12619_s0 + $0xb84] ss:$8 sps:$4 sm:$0xff]  }
 0x171   :  { %3936 = vmatmul.mubr.bf16.gmra.mrb[152].mxu0 %v8550_v9  ;;  %5088 = vmatmul.mubr.bf16.gmra.mrb[152].mxu1 %v8551_v10 }
 0x172   :  { %3943 = vmatprep.mubr.bf16.mxu0 %v8552_v25  ;;  %5095 = vmatprep.mubr.bf16.mxu1 %v8554_v26 }
 0x174   :  { %v9856_v37 = vpop.f32.mrb[48].mxu0  ;;  %v9858_v38 = vpop.f32.mrb[48].mxu1 }
 0x175   :  { %12624 = vst [vmem:[#allocation4_spill] sm:$0xff] %v9856_v37  ;;  %12625 = vst [vmem:[#allocation5_spill] sm:$0xff] %v9858_v38  ;;  %v3731_v43 = vpop.f32.mrb[49].mxu0  ;;  %v4883_v44 = vpop.f32.mrb[49].mxu1 }
 0x176   :  { %v9866_v55 = vpop.f32.mrb[50].mxu0  ;;  %v9868_v56 = vpop.f32.mrb[50].mxu1  ;;  %v8562_v43 = vld [vmem:[%s12619_s0 + $0x280] ss:$8 sps:$4 sm:$0xff]  }
 0x177   :  { %12626 = vst [vmem:[#allocation6_spill] sm:$0xff] %v9866_v55  ;;  %12627 = vst [vmem:[#allocation7_spill] sm:$0xff] %v9868_v56  ;;  %v3734_v9 = vpop.f32.mrb[51].mxu0  ;;  %v4886_v10 = vpop.f32.mrb[51].mxu1  ;;  %v8563_v44 = vld [vmem:[%s12619_s0 + $0xb80] ss:$8 sps:$4 sm:$0xff]  }
 0x179   :  { %3944 = vmatmul.mubr.bf16.gmra.mrb[156].mxu0 %v8556_v51  ;;  %5096 = vmatmul.mubr.bf16.gmra.mrb[156].mxu1 %v8557_v52  ;;  %v8564_v52 = vld [vmem:[%s12619_s0 + $0x294] ss:$8 sps:$4 sm:$0xff]  }
 0x17a   :  { %3951 = vmatprep.mubr.bf16.mxu0 %v8558_v1  ;;  %5103 = vmatprep.mubr.bf16.mxu1 %v8560_v2  ;;  %v8566_v1 = vld [vmem:[%s12619_s0 + $0xb94] ss:$8 sps:$4 sm:$0xff]  }
 0x17c   :  { %v9876_v25 = vpop.f32.mrb[52].mxu0  ;;  %v9878_v26 = vpop.f32.mrb[52].mxu1 }
 0x17d   :  { %12628 = vst [vmem:[#allocation8_spill] sm:$0xff] %v9876_v25  ;;  %12629 = vst [vmem:[#allocation9_spill] sm:$0xff] %v9878_v26  ;;  %v3739_v27 = vpop.f32.mrb[53].mxu0  ;;  %v4891_v28 = vpop.f32.mrb[53].mxu1  ;;  %v8568_v26 = vld [vmem:[%s12619_s0 + $0x290] ss:$8 sps:$4 sm:$0xff]  }
 0x17e   :  { %v9886_v9 = vpop.f32.mrb[54].mxu0  ;;  %v9888_v51 = vpop.f32.mrb[54].mxu1  ;;  %v8569_v25 = vld [vmem:[%s12619_s0 + $0xb90] ss:$8 sps:$4 sm:$0xff]  }
 0x17f   :  { %12630 = vst [vmem:[#allocation10_spill] sm:$0xff] %v9886_v9  ;;  %12631 = vst [vmem:[#allocation11_spill] sm:$0xff] %v9888_v51  ;;  %v3742_v2 = vpop.f32.mrb[55].mxu0  ;;  %v4894_v10 = vpop.f32.mrb[55].mxu1 }
 0x181   :  { %3952 = vmatmul.mubr.bf16.gmra.mrb[160].mxu0 %v8562_v43  ;;  %5104 = vmatmul.mubr.bf16.gmra.mrb[160].mxu1 %v8563_v44  ;;  %v8570_v44 = vld [vmem:[%s12619_s0 + $0x2a4] ss:$8 sps:$4 sm:$0xff]  }
 0x182   :  { %3959 = vmatprep.mubr.bf16.mxu0 %v8564_v52  ;;  %5111 = vmatprep.mubr.bf16.mxu1 %v8566_v1 }
 0x184   :  { %v9896_v27 = vpop.f32.mrb[56].mxu0  ;;  %v9898_v28 = vpop.f32.mrb[56].mxu1 }
 0x185   :  { %12632 = vst [vmem:[#allocation12_spill] sm:$0xff] %v9896_v27  ;;  %12633 = vst [vmem:[#allocation13_spill] sm:$0xff] %v9898_v28  ;;  %v3747_v9 = vpop.f32.mrb[57].mxu0  ;;  %v4899_v51 = vpop.f32.mrb[57].mxu1  ;;  %v8574_v28 = vld [vmem:[%s12619_s0 + $0x2a0] ss:$8 sps:$4 sm:$0xff]  }
 0x186   :  { %v9906_v2 = vpop.f32.mrb[58].mxu0  ;;  %v9908_v43 = vpop.f32.mrb[58].mxu1  ;;  %v8572_v9 = vld [vmem:[%s12619_s0 + $0xba4] ss:$8 sps:$4 sm:$0xff]   ;;  %v8575_v27 = vld [vmem:[%s12619_s0 + $0xba0] ss:$8 sps:$4 sm:$0xff]  }
 0x187   :  { %12634 = vst [vmem:[#allocation14_spill] sm:$0xff] %v9906_v2  ;;  %12635 = vst [vmem:[#allocation15_spill] sm:$0xff] %v9908_v43  ;;  %v3750_v51 = vpop.f32.mrb[59].mxu0  ;;  %v4902_v52 = vpop.f32.mrb[59].mxu1 }
 0x189   :  { %3960 = vmatmul.mubr.bf16.gmra.mrb[164].mxu0 %v8568_v26  ;;  %5112 = vmatmul.mubr.bf16.gmra.mrb[164].mxu1 %v8569_v25  ;;  %v8576_v25 = vld [vmem:[%s12619_s0 + $0x2b4] ss:$8 sps:$4 sm:$0xff]  }
 0x18a   :  { %3967 = vmatprep.mubr.bf16.mxu0 %v8570_v44  ;;  %5119 = vmatprep.mubr.bf16.mxu1 %v8572_v9 }
 0x18c   :  { %v9916_v1 = vpop.f32.mrb[60].mxu0  ;;  %v9918_v10 = vpop.f32.mrb[60].mxu1 }
 0x18d   :  { %12636 = vst [vmem:[#allocation16_spill] sm:$0xff] %v9916_v1  ;;  %12637 = vst [vmem:[#allocation17_spill] sm:$0xff] %v9918_v10  ;;  %v3755_v2 = vpop.f32.mrb[61].mxu0  ;;  %v4907_v43 = vpop.f32.mrb[61].mxu1  ;;  %v8580_v10 = vld [vmem:[%s12619_s0 + $0x2b0] ss:$8 sps:$4 sm:$0xff]  }
 0x18e   :  { %v9926_v51 = vpop.f32.mrb[62].mxu0  ;;  %v9928_v26 = vpop.f32.mrb[62].mxu1  ;;  %v8578_v2 = vld [vmem:[%s12619_s0 + $0xbb4] ss:$8 sps:$4 sm:$0xff]   ;;  %v8581_v1 = vld [vmem:[%s12619_s0 + $0xbb0] ss:$8 sps:$4 sm:$0xff]  }
 0x18f   :  { %12638 = vst [vmem:[#allocation18_spill] sm:$0xff] %v9926_v51  ;;  %12639 = vst [vmem:[#allocation19_spill] sm:$0xff] %v9928_v26  ;;  %v3758_v43 = vpop.f32.mrb[63].mxu0  ;;  %v4910_v44 = vpop.f32.mrb[63].mxu1 }
 0x191   :  { %3968 = vmatmul.mubr.bf16.gmra.mrb[168].mxu0 %v8574_v28  ;;  %5120 = vmatmul.mubr.bf16.gmra.mrb[168].mxu1 %v8575_v27  ;;  %v8582_v27 = vld [vmem:[%s12619_s0 + $0x2c4] ss:$8 sps:$4 sm:$0xff]  }
 0x192   :  { %3975 = vmatprep.mubr.bf16.mxu0 %v8576_v25  ;;  %5127 = vmatprep.mubr.bf16.mxu1 %v8578_v2 }
 0x194   :  { %v9936_v9 = vpop.f32.mrb[64].mxu0  ;;  %v9938_v52 = vpop.f32.mrb[64].mxu1 }
 0x195   :  { %12640 = vst [vmem:[#allocation20_spill] sm:$0xff] %v9936_v9  ;;  %12641 = vst [vmem:[#allocation21_spill] sm:$0xff] %v9938_v52  ;;  %v3763_v51 = vpop.f32.mrb[65].mxu0  ;;  %v4915_v26 = vpop.f32.mrb[65].mxu1  ;;  %v8586_v52 = vld [vmem:[%s12619_s0 + $0x2c0] ss:$8 sps:$4 sm:$0xff]  }
 0x196   :  { %v9946_v43 = vpop.f32.mrb[66].mxu0  ;;  %v9948_v28 = vpop.f32.mrb[66].mxu1  ;;  %v8584_v51 = vld [vmem:[%s12619_s0 + $0xbc4] ss:$8 sps:$4 sm:$0xff]   ;;  %v8587_v9 = vld [vmem:[%s12619_s0 + $0xbc0] ss:$8 sps:$4 sm:$0xff]  }
 0x197   :  { %12642 = vst [vmem:[#allocation22_spill] sm:$0xff] %v9946_v43  ;;  %12643 = vst [vmem:[#allocation23_spill] sm:$0xff] %v9948_v28  ;;  %v3766_v26 = vpop.f32.mrb[67].mxu0  ;;  %v4918_v25 = vpop.f32.mrb[67].mxu1 }
 0x199   :  { %3976 = vmatmul.mubr.bf16.gmra.mrb[172].mxu0 %v8580_v10  ;;  %5128 = vmatmul.mubr.bf16.gmra.mrb[172].mxu1 %v8581_v1  ;;  %v8588_v1 = vld [vmem:[%s12619_s0 + $0x2d4] ss:$8 sps:$4 sm:$0xff]  }
 0x19a   :  { %3983 = vmatprep.mubr.bf16.mxu0 %v8582_v27  ;;  %5135 = vmatprep.mubr.bf16.mxu1 %v8584_v51 }
 0x19c   :  { %v9956_v2 = vpop.f32.mrb[68].mxu0  ;;  %v9958_v44 = vpop.f32.mrb[68].mxu1 }
 0x19d   :  { %12644 = vst [vmem:[#allocation24_spill] sm:$0xff] %v9956_v2  ;;  %12645 = vst [vmem:[#allocation25_spill] sm:$0xff] %v9958_v44  ;;  %v3771_v43 = vpop.f32.mrb[69].mxu0  ;;  %v4923_v28 = vpop.f32.mrb[69].mxu1  ;;  %v8592_v44 = vld [vmem:[%s12619_s0 + $0x2d0] ss:$8 sps:$4 sm:$0xff]  }
 0x19e   :  { %v9966_v26 = vpop.f32.mrb[70].mxu0  ;;  %v9968_v10 = vpop.f32.mrb[70].mxu1  ;;  %v8590_v43 = vld [vmem:[%s12619_s0 + $0xbd4] ss:$8 sps:$4 sm:$0xff]   ;;  %v8593_v2 = vld [vmem:[%s12619_s0 + $0xbd0] ss:$8 sps:$4 sm:$0xff]  }
 0x19f   :  { %12646 = vst [vmem:[#allocation26_spill] sm:$0xff] %v9966_v26  ;;  %12647 = vst [vmem:[#allocation27_spill] sm:$0xff] %v9968_v10  ;;  %v3774_v28 = vpop.f32.mrb[71].mxu0  ;;  %v4926_v27 = vpop.f32.mrb[71].mxu1 }
 0x1a1   :  { %3984 = vmatmul.mubr.bf16.gmra.mrb[176].mxu0 %v8586_v52  ;;  %5136 = vmatmul.mubr.bf16.gmra.mrb[176].mxu1 %v8587_v9  ;;  %v8594_v9 = vld [vmem:[%s12619_s0 + $0x2e4] ss:$8 sps:$4 sm:$0xff]  }
 0x1a2   :  { %3991 = vmatprep.mubr.bf16.mxu0 %v8588_v1  ;;  %5143 = vmatprep.mubr.bf16.mxu1 %v8590_v43 }
 0x1a4   :  { %v9976_v51 = vpop.f32.mrb[72].mxu0  ;;  %v9978_v25 = vpop.f32.mrb[72].mxu1 }
 0x1a5   :  { %12648 = vst [vmem:[#allocation28_spill] sm:$0xff] %v9976_v51  ;;  %12649 = vst [vmem:[#allocation29_spill] sm:$0xff] %v9978_v25  ;;  %v3779_v26 = vpop.f32.mrb[73].mxu0  ;;  %v4931_v10 = vpop.f32.mrb[73].mxu1  ;;  %v8598_v25 = vld [vmem:[%s12619_s0 + $0x2e0] ss:$8 sps:$4 sm:$0xff]  }
 0x1a6   :  { %v9986_v28 = vpop.f32.mrb[74].mxu0  ;;  %v9988_v52 = vpop.f32.mrb[74].mxu1  ;;  %v8596_v26 = vld [vmem:[%s12619_s0 + $0xbe4] ss:$8 sps:$4 sm:$0xff]   ;;  %v8599_v51 = vld [vmem:[%s12619_s0 + $0xbe0] ss:$8 sps:$4 sm:$0xff]  }
 0x1a7   :  { %12650 = vst [vmem:[#allocation30_spill] sm:$0xff] %v9986_v28  ;;  %12651 = vst [vmem:[#allocation31_spill] sm:$0xff] %v9988_v52  ;;  %v3782_v10 = vpop.f32.mrb[75].mxu0  ;;  %v4934_v1 = vpop.f32.mrb[75].mxu1 }
 0x1a9   :  { %3992 = vmatmul.mubr.bf16.gmra.mrb[180].mxu0 %v8592_v44  ;;  %5144 = vmatmul.mubr.bf16.gmra.mrb[180].mxu1 %v8593_v2  ;;  %v8600_v2 = vld [vmem:[%s12619_s0 + $0x2f4] ss:$8 sps:$4 sm:$0xff]  }
 0x1aa   :  { %3999 = vmatprep.mubr.bf16.mxu0 %v8594_v9  ;;  %5151 = vmatprep.mubr.bf16.mxu1 %v8596_v26 }
 0x1ac   :  { %v9996_v43 = vpop.f32.mrb[76].mxu0  ;;  %v9998_v27 = vpop.f32.mrb[76].mxu1 }
 0x1ad   :  { %12652 = vst [vmem:[#allocation32_spill] sm:$0xff] %v9996_v43  ;;  %12653 = vst [vmem:[#allocation33_spill] sm:$0xff] %v9998_v27  ;;  %v3787_v28 = vpop.f32.mrb[77].mxu0  ;;  %v4939_v52 = vpop.f32.mrb[77].mxu1  ;;  %v8604_v27 = vld [vmem:[%s12619_s0 + $0x2f0] ss:$8 sps:$4 sm:$0xff]  }
 0x1ae   :  { %v10006_v10 = vpop.f32.mrb[78].mxu0  ;;  %v10008_v44 = vpop.f32.mrb[78].mxu1  ;;  %v8602_v28 = vld [vmem:[%s12619_s0 + $0xbf4] ss:$8 sps:$4 sm:$0xff]   ;;  %v8605_v43 = vld [vmem:[%s12619_s0 + $0xbf0] ss:$8 sps:$4 sm:$0xff]  }
 0x1af   :  { %12654 = vst [vmem:[#allocation34_spill] sm:$0xff] %v10006_v10  ;;  %12655 = vst [vmem:[#allocation35_spill] sm:$0xff] %v10008_v44  ;;  %v3790_v52 = vpop.f32.mrb[79].mxu0  ;;  %v4942_v9 = vpop.f32.mrb[79].mxu1 }
 0x1b1   :  { %4000 = vmatmul.mubr.bf16.gmra.mrb[184].mxu0 %v8598_v25  ;;  %5152 = vmatmul.mubr.bf16.gmra.mrb[184].mxu1 %v8599_v51  ;;  %v8606_v51 = vld [vmem:[%s12619_s0 + $0x304] ss:$8 sps:$4 sm:$0xff]  }
 0x1b2   :  { %4007 = vmatprep.mubr.bf16.mxu0 %v8600_v2  ;;  %5159 = vmatprep.mubr.bf16.mxu1 %v8602_v28 }
 0x1b4   :  { %v10016_v26 = vpop.f32.mrb[80].mxu0  ;;  %v10018_v1 = vpop.f32.mrb[80].mxu1 }
 0x1b5   :  { %12656 = vst [vmem:[#allocation36_spill] sm:$0xff] %v10016_v26  ;;  %12657 = vst [vmem:[#allocation37_spill] sm:$0xff] %v10018_v1  ;;  %v3795_v10 = vpop.f32.mrb[81].mxu0  ;;  %v4947_v44 = vpop.f32.mrb[81].mxu1  ;;  %v8610_v1 = vld [vmem:[%s12619_s0 + $0x300] ss:$8 sps:$4 sm:$0xff]  }
 0x1b6   :  { %v10026_v52 = vpop.f32.mrb[82].mxu0  ;;  %v10028_v25 = vpop.f32.mrb[82].mxu1  ;;  %v8608_v10 = vld [vmem:[%s12619_s0 + $0xc04] ss:$8 sps:$4 sm:$0xff]   ;;  %v8611_v26 = vld [vmem:[%s12619_s0 + $0xc00] ss:$8 sps:$4 sm:$0xff]  }
 0x1b7   :  { %12658 = vst [vmem:[#allocation38_spill] sm:$0xff] %v10026_v52  ;;  %12659 = vst [vmem:[#allocation39_spill] sm:$0xff] %v10028_v25  ;;  %v3798_v44 = vpop.f32.mrb[83].mxu0  ;;  %v4950_v2 = vpop.f32.mrb[83].mxu1 }
 0x1b9   :  { %4008 = vmatmul.mubr.bf16.gmra.mrb[188].mxu0 %v8604_v27  ;;  %5160 = vmatmul.mubr.bf16.gmra.mrb[188].mxu1 %v8605_v43  ;;  %v8612_v43 = vld [vmem:[%s12619_s0 + $0x314] ss:$8 sps:$4 sm:$0xff]  }
 0x1ba   :  { %4015 = vmatprep.mubr.bf16.mxu0 %v8606_v51  ;;  %5167 = vmatprep.mubr.bf16.mxu1 %v8608_v10 }
 0x1bc   :  { %v10036_v28 = vpop.f32.mrb[84].mxu0  ;;  %v10038_v9 = vpop.f32.mrb[84].mxu1 }
 0x1bd   :  { %12660 = vst [vmem:[#allocation40_spill] sm:$0xff] %v10036_v28  ;;  %12661 = vst [vmem:[#allocation41_spill] sm:$0xff] %v10038_v9  ;;  %v3803_v52 = vpop.f32.mrb[85].mxu0  ;;  %v4955_v25 = vpop.f32.mrb[85].mxu1  ;;  %v8616_v9 = vld [vmem:[%s12619_s0 + $0x310] ss:$8 sps:$4 sm:$0xff]  }
 0x1be   :  { %v10046_v44 = vpop.f32.mrb[86].mxu0  ;;  %v10048_v27 = vpop.f32.mrb[86].mxu1  ;;  %v8614_v52 = vld [vmem:[%s12619_s0 + $0xc14] ss:$8 sps:$4 sm:$0xff]   ;;  %v8617_v28 = vld [vmem:[%s12619_s0 + $0xc10] ss:$8 sps:$4 sm:$0xff]  }
 0x1bf   :  { %12662 = vst [vmem:[#allocation42_spill] sm:$0xff] %v10046_v44  ;;  %12663 = vst [vmem:[#allocation43_spill] sm:$0xff] %v10048_v27  ;;  %v3806_v25 = vpop.f32.mrb[87].mxu0  ;;  %v4958_v51 = vpop.f32.mrb[87].mxu1 }
 0x1c1   :  { %4016 = vmatmul.mubr.bf16.gmra.mrb[192].mxu0 %v8610_v1  ;;  %5168 = vmatmul.mubr.bf16.gmra.mrb[192].mxu1 %v8611_v26  ;;  %v8618_v26 = vld [vmem:[%s12619_s0 + $0x324] ss:$8 sps:$4 sm:$0xff]  }
 0x1c2   :  { %4023 = vmatprep.mubr.bf16.mxu0 %v8612_v43  ;;  %5175 = vmatprep.mubr.bf16.mxu1 %v8614_v52 }
 0x1c4   :  { %v10056_v10 = vpop.f32.mrb[88].mxu0  ;;  %v10058_v2 = vpop.f32.mrb[88].mxu1 }
 0x1c5   :  { %12664 = vst [vmem:[#allocation44_spill] sm:$0xff] %v10056_v10  ;;  %12665 = vst [vmem:[#allocation45_spill] sm:$0xff] %v10058_v2  ;;  %v3811_v44 = vpop.f32.mrb[89].mxu0  ;;  %v4963_v27 = vpop.f32.mrb[89].mxu1  ;;  %v8622_v2 = vld [vmem:[%s12619_s0 + $0x320] ss:$8 sps:$4 sm:$0xff]  }
 0x1c6   :  { %v10066_v25 = vpop.f32.mrb[90].mxu0  ;;  %v10068_v1 = vpop.f32.mrb[90].mxu1  ;;  %v8620_v44 = vld [vmem:[%s12619_s0 + $0xc24] ss:$8 sps:$4 sm:$0xff]   ;;  %v8623_v10 = vld [vmem:[%s12619_s0 + $0xc20] ss:$8 sps:$4 sm:$0xff]  }
 0x1c7   :  { %12666 = vst [vmem:[#allocation46_spill] sm:$0xff] %v10066_v25  ;;  %12667 = vst [vmem:[#allocation47_spill] sm:$0xff] %v10068_v1  ;;  %v3814_v27 = vpop.f32.mrb[91].mxu0  ;;  %v4966_v43 = vpop.f32.mrb[91].mxu1 }
 0x1c9   :  { %4024 = vmatmul.mubr.bf16.gmra.mrb[196].mxu0 %v8616_v9  ;;  %5176 = vmatmul.mubr.bf16.gmra.mrb[196].mxu1 %v8617_v28  ;;  %v8624_v28 = vld [vmem:[%s12619_s0 + $0x334] ss:$8 sps:$4 sm:$0xff]  }
 0x1ca   :  { %4031 = vmatprep.mubr.bf16.mxu0 %v8618_v26  ;;  %5183 = vmatprep.mubr.bf16.mxu1 %v8620_v44 }
 0x1cc   :  { %v10076_v52 = vpop.f32.mrb[92].mxu0  ;;  %v10078_v51 = vpop.f32.mrb[92].mxu1 }
 0x1cd   :  { %12668 = vst [vmem:[#allocation48_spill] sm:$0xff] %v10076_v52  ;;  %12669 = vst [vmem:[#allocation49_spill] sm:$0xff] %v10078_v51  ;;  %v3819_v25 = vpop.f32.mrb[93].mxu0  ;;  %v4971_v1 = vpop.f32.mrb[93].mxu1  ;;  %v8628_v51 = vld [vmem:[%s12619_s0 + $0x330] ss:$8 sps:$4 sm:$0xff]  }
 0x1ce   :  { %v10086_v27 = vpop.f32.mrb[94].mxu0  ;;  %v10088_v9 = vpop.f32.mrb[94].mxu1  ;;  %v8626_v25 = vld [vmem:[%s12619_s0 + $0xc34] ss:$8 sps:$4 sm:$0xff]   ;;  %v8629_v52 = vld [vmem:[%s12619_s0 + $0xc30] ss:$8 sps:$4 sm:$0xff]  }
 0x1cf   :  { %12670 = vst [vmem:[#allocation50_spill] sm:$0xff] %v10086_v27  ;;  %12671 = vst [vmem:[#allocation51_spill] sm:$0xff] %v10088_v9  ;;  %v3822_v1 = vpop.f32.mrb[95].mxu0  ;;  %v4974_v26 = vpop.f32.mrb[95].mxu1 }
 0x1d1   :  { %4032 = vmatmul.mubr.bf16.gmra.mrb[200].mxu0 %v8622_v2  ;;  %5184 = vmatmul.mubr.bf16.gmra.mrb[200].mxu1 %v8623_v10  ;;  %v8630_v10 = vld [vmem:[%s12619_s0 + $0x344] ss:$8 sps:$4 sm:$0xff]  }
 0x1d2   :  { %4039 = vmatprep.mubr.bf16.mxu0 %v8624_v28  ;;  %5191 = vmatprep.mubr.bf16.mxu1 %v8626_v25 }
 0x1d4   :  { %v10096_v44 = vpop.f32.mrb[96].mxu0  ;;  %v10098_v43 = vpop.f32.mrb[96].mxu1 }
 0x1d5   :  { %12672 = vst [vmem:[#allocation52_spill] sm:$0xff] %v10096_v44  ;;  %12673 = vst [vmem:[#allocation53_spill] sm:$0xff] %v10098_v43  ;;  %v3827_v27 = vpop.f32.mrb[97].mxu0  ;;  %v4979_v9 = vpop.f32.mrb[97].mxu1  ;;  %v8634_v43 = vld [vmem:[%s12619_s0 + $0x340] ss:$8 sps:$4 sm:$0xff]  }
 0x1d6   :  { %v10106_v1 = vpop.f32.mrb[98].mxu0  ;;  %v10108_v2 = vpop.f32.mrb[98].mxu1  ;;  %v8632_v27 = vld [vmem:[%s12619_s0 + $0xc44] ss:$8 sps:$4 sm:$0xff]   ;;  %v8635_v44 = vld [vmem:[%s12619_s0 + $0xc40] ss:$8 sps:$4 sm:$0xff]  }
 0x1d7   :  { %12674 = vst [vmem:[#allocation54_spill] sm:$0xff] %v10106_v1  ;;  %12675 = vst [vmem:[#allocation55_spill] sm:$0xff] %v10108_v2  ;;  %v3830_v9 = vpop.f32.mrb[99].mxu0  ;;  %v4982_v28 = vpop.f32.mrb[99].mxu1 }
 0x1d9   :  { %4040 = vmatmul.mubr.bf16.gmra.mrb[204].mxu0 %v8628_v51  ;;  %5192 = vmatmul.mubr.bf16.gmra.mrb[204].mxu1 %v8629_v52  ;;  %v8636_v52 = vld [vmem:[%s12619_s0 + $0x354] ss:$8 sps:$4 sm:$0xff]  }
 0x1da   :  { %4047 = vmatprep.mubr.bf16.mxu0 %v8630_v10  ;;  %5199 = vmatprep.mubr.bf16.mxu1 %v8632_v27 }
 0x1dc   :  { %v10116_v25 = vpop.f32.mrb[100].mxu0  ;;  %v10118_v26 = vpop.f32.mrb[100].mxu1 }
 0x1dd   :  { %12676 = vst [vmem:[#allocation56_spill] sm:$0xff] %v10116_v25  ;;  %12677 = vst [vmem:[#allocation57_spill] sm:$0xff] %v10118_v26  ;;  %v3835_v1 = vpop.f32.mrb[101].mxu0  ;;  %v4987_v2 = vpop.f32.mrb[101].mxu1  ;;  %v8640_v26 = vld [vmem:[%s12619_s0 + $0x350] ss:$8 sps:$4 sm:$0xff]  }
 0x1de   :  { %v10126_v9 = vpop.f32.mrb[102].mxu0  ;;  %v10128_v51 = vpop.f32.mrb[102].mxu1  ;;  %v8638_v1 = vld [vmem:[%s12619_s0 + $0xc54] ss:$8 sps:$4 sm:$0xff]   ;;  %v8641_v25 = vld [vmem:[%s12619_s0 + $0xc50] ss:$8 sps:$4 sm:$0xff]  }
 0x1df   :  { %12678 = vst [vmem:[#allocation58_spill] sm:$0xff] %v10126_v9  ;;  %12679 = vst [vmem:[#allocation59_spill] sm:$0xff] %v10128_v51  ;;  %v3838_v2 = vpop.f32.mrb[103].mxu0  ;;  %v4990_v10 = vpop.f32.mrb[103].mxu1 }
 0x1e1   :  { %4048 = vmatmul.mubr.bf16.gmra.mrb[208].mxu0 %v8634_v43  ;;  %5200 = vmatmul.mubr.bf16.gmra.mrb[208].mxu1 %v8635_v44  ;;  %v8642_v44 = vld [vmem:[%s12619_s0 + $0x364] ss:$8 sps:$4 sm:$0xff]  }
 0x1e2   :  { %4055 = vmatprep.mubr.bf16.mxu0 %v8636_v52  ;;  %5207 = vmatprep.mubr.bf16.mxu1 %v8638_v1 }
 0x1e4   :  { %v10136_v27 = vpop.f32.mrb[104].mxu0  ;;  %v10138_v28 = vpop.f32.mrb[104].mxu1 }
 0x1e5   :  { %12680 = vst [vmem:[#allocation60_spill] sm:$0xff] %v10136_v27  ;;  %12681 = vst [vmem:[#allocation61_spill] sm:$0xff] %v10138_v28  ;;  %v3843_v9 = vpop.f32.mrb[105].mxu0  ;;  %v4995_v51 = vpop.f32.mrb[105].mxu1  ;;  %v8646_v28 = vld [vmem:[%s12619_s0 + $0x360] ss:$8 sps:$4 sm:$0xff]  }
 0x1e6   :  { %v10146_v2 = vpop.f32.mrb[106].mxu0  ;;  %v10148_v43 = vpop.f32.mrb[106].mxu1  ;;  %v8644_v9 = vld [vmem:[%s12619_s0 + $0xc64] ss:$8 sps:$4 sm:$0xff]   ;;  %v8647_v27 = vld [vmem:[%s12619_s0 + $0xc60] ss:$8 sps:$4 sm:$0xff]  }
 0x1e7   :  { %12682 = vst [vmem:[#allocation62_spill] sm:$0xff] %v10146_v2  ;;  %12683 = vst [vmem:[#allocation63_spill] sm:$0xff] %v10148_v43  ;;  %v3846_v51 = vpop.f32.mrb[107].mxu0  ;;  %v4998_v52 = vpop.f32.mrb[107].mxu1 }
 0x1e9   :  { %4056 = vmatmul.mubr.bf16.gmra.mrb[212].mxu0 %v8640_v26  ;;  %5208 = vmatmul.mubr.bf16.gmra.mrb[212].mxu1 %v8641_v25  ;;  %v8648_v25 = vld [vmem:[%s12619_s0 + $0x374] ss:$8 sps:$4 sm:$0xff]  }
 0x1ea   :  { %4063 = vmatprep.mubr.bf16.mxu0 %v8642_v44  ;;  %5215 = vmatprep.mubr.bf16.mxu1 %v8644_v9 }
 0x1ec   :  { %v10156_v1 = vpop.f32.mrb[108].mxu0  ;;  %v10158_v10 = vpop.f32.mrb[108].mxu1 }
 0x1ed   :  { %12684 = vst [vmem:[#allocation64_spill] sm:$0xff] %v10156_v1  ;;  %12685 = vst [vmem:[#allocation65_spill] sm:$0xff] %v10158_v10  ;;  %v3851_v2 = vpop.f32.mrb[109].mxu0  ;;  %v5003_v43 = vpop.f32.mrb[109].mxu1  ;;  %v8652_v10 = vld [vmem:[%s12619_s0 + $0x370] ss:$8 sps:$4 sm:$0xff]  }
 0x1ee   :  { %v10166_v51 = vpop.f32.mrb[110].mxu0  ;;  %v10168_v26 = vpop.f32.mrb[110].mxu1  ;;  %v8650_v2 = vld [vmem:[%s12619_s0 + $0xc74] ss:$8 sps:$4 sm:$0xff]   ;;  %v8653_v1 = vld [vmem:[%s12619_s0 + $0xc70] ss:$8 sps:$4 sm:$0xff]  }
 0x1ef   :  { %12686 = vst [vmem:[#allocation66_spill] sm:$0xff] %v10166_v51  ;;  %12687 = vst [vmem:[#allocation67_spill] sm:$0xff] %v10168_v26  ;;  %v3854_v43 = vpop.f32.mrb[111].mxu0  ;;  %v5006_v44 = vpop.f32.mrb[111].mxu1 }
 0x1f1   :  { %4064 = vmatmul.mubr.bf16.gmra.mrb[216].mxu0 %v8646_v28  ;;  %5216 = vmatmul.mubr.bf16.gmra.mrb[216].mxu1 %v8647_v27  ;;  %v8654_v27 = vld [vmem:[%s12619_s0 + $0x384] ss:$8 sps:$4 sm:$0xff]  }
 0x1f2   :  { %4071 = vmatprep.mubr.bf16.mxu0 %v8648_v25  ;;  %5223 = vmatprep.mubr.bf16.mxu1 %v8650_v2 }
 0x1f4   :  { %v10176_v9 = vpop.f32.mrb[112].mxu0  ;;  %v10178_v52 = vpop.f32.mrb[112].mxu1 }
 0x1f5   :  { %12688 = vst [vmem:[#allocation68_spill] sm:$0xff] %v10176_v9  ;;  %12689 = vst [vmem:[#allocation69_spill] sm:$0xff] %v10178_v52  ;;  %v3859_v51 = vpop.f32.mrb[113].mxu0  ;;  %v5011_v26 = vpop.f32.mrb[113].mxu1  ;;  %v8658_v52 = vld [vmem:[%s12619_s0 + $0x380] ss:$8 sps:$4 sm:$0xff]  }
 0x1f6   :  { %v10186_v43 = vpop.f32.mrb[114].mxu0  ;;  %v10188_v28 = vpop.f32.mrb[114].mxu1  ;;  %v8656_v51 = vld [vmem:[%s12619_s0 + $0xc84] ss:$8 sps:$4 sm:$0xff]   ;;  %v8659_v9 = vld [vmem:[%s12619_s0 + $0xc80] ss:$8 sps:$4 sm:$0xff]  }
 0x1f7   :  { %12690 = vst [vmem:[#allocation70_spill] sm:$0xff] %v10186_v43  ;;  %12691 = vst [vmem:[#allocation71_spill] sm:$0xff] %v10188_v28  ;;  %v3862_v26 = vpop.f32.mrb[115].mxu0  ;;  %v5014_v25 = vpop.f32.mrb[115].mxu1 }
 0x1f9   :  { %4072 = vmatmul.mubr.bf16.gmra.mrb[220].mxu0 %v8652_v10  ;;  %5224 = vmatmul.mubr.bf16.gmra.mrb[220].mxu1 %v8653_v1  ;;  %v8660_v1 = vld [vmem:[%s12619_s0 + $0x394] ss:$8 sps:$4 sm:$0xff]  }
 0x1fa   :  { %4079 = vmatprep.mubr.bf16.mxu0 %v8654_v27  ;;  %5231 = vmatprep.mubr.bf16.mxu1 %v8656_v51 }
 0x1fc   :  { %v10196_v2 = vpop.f32.mrb[116].mxu0  ;;  %v10198_v44 = vpop.f32.mrb[116].mxu1 }
 0x1fd   :  { %12692 = vst [vmem:[#allocation72_spill] sm:$0xff] %v10196_v2  ;;  %12693 = vst [vmem:[#allocation73_spill] sm:$0xff] %v10198_v44  ;;  %v3867_v43 = vpop.f32.mrb[117].mxu0  ;;  %v5019_v28 = vpop.f32.mrb[117].mxu1  ;;  %v8664_v44 = vld [vmem:[%s12619_s0 + $0x390] ss:$8 sps:$4 sm:$0xff]  }
 0x1fe   :  { %v10206_v26 = vpop.f32.mrb[118].mxu0  ;;  %v10208_v10 = vpop.f32.mrb[118].mxu1  ;;  %v8662_v43 = vld [vmem:[%s12619_s0 + $0xc94] ss:$8 sps:$4 sm:$0xff]   ;;  %v8665_v2 = vld [vmem:[%s12619_s0 + $0xc90] ss:$8 sps:$4 sm:$0xff]  }
 0x1ff   :  { %12694 = vst [vmem:[#allocation74_spill] sm:$0xff] %v10206_v26  ;;  %12695 = vst [vmem:[#allocation75_spill] sm:$0xff] %v10208_v10  ;;  %v3870_v28 = vpop.f32.mrb[119].mxu0  ;;  %v5022_v27 = vpop.f32.mrb[119].mxu1 }
 0x201   :  { %4080 = vmatmul.mubr.bf16.gmra.mrb[224].mxu0 %v8658_v52  ;;  %5232 = vmatmul.mubr.bf16.gmra.mrb[224].mxu1 %v8659_v9  ;;  %v8666_v9 = vld [vmem:[%s12619_s0 + $0x3a4] ss:$8 sps:$4 sm:$0xff]  }
 0x202   :  { %4087 = vmatprep.mubr.bf16.mxu0 %v8660_v1  ;;  %5239 = vmatprep.mubr.bf16.mxu1 %v8662_v43 }
 0x204   :  { %v10216_v51 = vpop.f32.mrb[120].mxu0  ;;  %v10218_v25 = vpop.f32.mrb[120].mxu1 }
 0x205   :  { %12696 = vst [vmem:[#allocation76_spill] sm:$0xff] %v10216_v51  ;;  %12697 = vst [vmem:[#allocation77_spill] sm:$0xff] %v10218_v25  ;;  %v3875_v26 = vpop.f32.mrb[121].mxu0  ;;  %v5027_v10 = vpop.f32.mrb[121].mxu1  ;;  %v8670_v25 = vld [vmem:[%s12619_s0 + $0x3a0] ss:$8 sps:$4 sm:$0xff]  }
 0x206   :  { %v10226_v28 = vpop.f32.mrb[122].mxu0  ;;  %v10228_v52 = vpop.f32.mrb[122].mxu1  ;;  %v8668_v26 = vld [vmem:[%s12619_s0 + $0xca4] ss:$8 sps:$4 sm:$0xff]   ;;  %v8671_v51 = vld [vmem:[%s12619_s0 + $0xca0] ss:$8 sps:$4 sm:$0xff]  }
 0x207   :  { %12698 = vst [vmem:[#allocation78_spill] sm:$0xff] %v10226_v28  ;;  %12699 = vst [vmem:[#allocation79_spill] sm:$0xff] %v10228_v52  ;;  %v3878_v10 = vpop.f32.mrb[123].mxu0  ;;  %v5030_v1 = vpop.f32.mrb[123].mxu1 }
 0x209   :  { %4088 = vmatmul.mubr.bf16.gmra.mrb[228].mxu0 %v8664_v44  ;;  %5240 = vmatmul.mubr.bf16.gmra.mrb[228].mxu1 %v8665_v2  ;;  %v8672_v2 = vld [vmem:[%s12619_s0 + $0x3b4] ss:$8 sps:$4 sm:$0xff]  }
 0x20a   :  { %4095 = vmatprep.mubr.bf16.mxu0 %v8666_v9  ;;  %5247 = vmatprep.mubr.bf16.mxu1 %v8668_v26 }
 0x20c   :  { %v10236_v43 = vpop.f32.mrb[124].mxu0  ;;  %v10238_v27 = vpop.f32.mrb[124].mxu1 }
 0x20d   :  { %12700 = vst [vmem:[#allocation80_spill] sm:$0xff] %v10236_v43  ;;  %12701 = vst [vmem:[#allocation81_spill] sm:$0xff] %v10238_v27  ;;  %v3883_v28 = vpop.f32.mrb[125].mxu0  ;;  %v5035_v52 = vpop.f32.mrb[125].mxu1  ;;  %v8676_v27 = vld [vmem:[%s12619_s0 + $0x3b0] ss:$8 sps:$4 sm:$0xff]  }
 0x20e   :  { %v10246_v10 = vpop.f32.mrb[126].mxu0  ;;  %v10248_v44 = vpop.f32.mrb[126].mxu1  ;;  %v8674_v28 = vld [vmem:[%s12619_s0 + $0xcb4] ss:$8 sps:$4 sm:$0xff]   ;;  %v8677_v43 = vld [vmem:[%s12619_s0 + $0xcb0] ss:$8 sps:$4 sm:$0xff]  }
 0x20f   :  { %12702 = vst [vmem:[#allocation82_spill] sm:$0xff] %v10246_v10  ;;  %12703 = vst [vmem:[#allocation83_spill] sm:$0xff] %v10248_v44  ;;  %v3886_v52 = vpop.f32.mrb[127].mxu0  ;;  %v5038_v9 = vpop.f32.mrb[127].mxu1 }
 0x211   :  { %4096 = vmatmul.mubr.bf16.gmra.mrb[232].mxu0 %v8670_v25  ;;  %5248 = vmatmul.mubr.bf16.gmra.mrb[232].mxu1 %v8671_v51  ;;  %v8678_v51 = vld [vmem:[%s12619_s0 + $0x3c4] ss:$8 sps:$4 sm:$0xff]  }
 0x212   :  { %4103 = vmatprep.mubr.bf16.mxu0 %v8672_v2  ;;  %5255 = vmatprep.mubr.bf16.mxu1 %v8674_v28 }
 0x214   :  { %v10256_v26 = vpop.f32.mrb[128].mxu0  ;;  %v10258_v1 = vpop.f32.mrb[128].mxu1 }
 0x215   :  { %12704 = vst [vmem:[#allocation84_spill] sm:$0xff] %v10256_v26  ;;  %12705 = vst [vmem:[#allocation85_spill] sm:$0xff] %v10258_v1  ;;  %v3891_v10 = vpop.f32.mrb[129].mxu0  ;;  %v5043_v44 = vpop.f32.mrb[129].mxu1  ;;  %v8682_v1 = vld [vmem:[%s12619_s0 + $0x3c0] ss:$8 sps:$4 sm:$0xff]  }
 0x216   :  { %v10266_v52 = vpop.f32.mrb[130].mxu0  ;;  %v10268_v25 = vpop.f32.mrb[130].mxu1  ;;  %v8680_v10 = vld [vmem:[%s12619_s0 + $0xcc4] ss:$8 sps:$4 sm:$0xff]   ;;  %v8683_v26 = vld [vmem:[%s12619_s0 + $0xcc0] ss:$8 sps:$4 sm:$0xff]  }
 0x217   :  { %12706 = vst [vmem:[#allocation86_spill] sm:$0xff] %v10266_v52  ;;  %12707 = vst [vmem:[#allocation87_spill] sm:$0xff] %v10268_v25  ;;  %v3894_v44 = vpop.f32.mrb[131].mxu0  ;;  %v5046_v2 = vpop.f32.mrb[131].mxu1 }
 0x219   :  { %4104 = vmatmul.mubr.bf16.gmra.mrb[236].mxu0 %v8676_v27  ;;  %5256 = vmatmul.mubr.bf16.gmra.mrb[236].mxu1 %v8677_v43  ;;  %v8684_v43 = vld [vmem:[%s12619_s0 + $0x3d4] ss:$8 sps:$4 sm:$0xff]  }
 0x21a   :  { %4111 = vmatprep.mubr.bf16.mxu0 %v8678_v51  ;;  %5263 = vmatprep.mubr.bf16.mxu1 %v8680_v10 }
 0x21c   :  { %v10276_v28 = vpop.f32.mrb[132].mxu0  ;;  %v10278_v9 = vpop.f32.mrb[132].mxu1 }
 0x21d   :  { %12708 = vst [vmem:[#allocation88_spill] sm:$0xff] %v10276_v28  ;;  %12709 = vst [vmem:[#allocation89_spill] sm:$0xff] %v10278_v9  ;;  %v3899_v52 = vpop.f32.mrb[133].mxu0  ;;  %v5051_v25 = vpop.f32.mrb[133].mxu1  ;;  %v8688_v9 = vld [vmem:[%s12619_s0 + $0x3d0] ss:$8 sps:$4 sm:$0xff]  }
 0x21e   :  { %v10286_v44 = vpop.f32.mrb[134].mxu0  ;;  %v10288_v27 = vpop.f32.mrb[134].mxu1  ;;  %v8686_v52 = vld [vmem:[%s12619_s0 + $0xcd4] ss:$8 sps:$4 sm:$0xff]   ;;  %v8689_v28 = vld [vmem:[%s12619_s0 + $0xcd0] ss:$8 sps:$4 sm:$0xff]  }
 0x21f   :  { %12710 = vst [vmem:[#allocation90_spill] sm:$0xff] %v10286_v44  ;;  %12711 = vst [vmem:[#allocation91_spill] sm:$0xff] %v10288_v27  ;;  %v3902_v25 = vpop.f32.mrb[135].mxu0  ;;  %v5054_v51 = vpop.f32.mrb[135].mxu1 }
 0x221   :  { %4112 = vmatmul.mubr.bf16.gmra.mrb[240].mxu0 %v8682_v1  ;;  %5264 = vmatmul.mubr.bf16.gmra.mrb[240].mxu1 %v8683_v26  ;;  %v8690_v26 = vld [vmem:[%s12619_s0 + $0x3e4] ss:$8 sps:$4 sm:$0xff]  }
 0x222   :  { %4119 = vmatprep.mubr.bf16.mxu0 %v8684_v43  ;;  %5271 = vmatprep.mubr.bf16.mxu1 %v8686_v52 }
 0x224   :  { %v10296_v10 = vpop.f32.mrb[136].mxu0  ;;  %v10298_v2 = vpop.f32.mrb[136].mxu1 }
 0x225   :  { %12712 = vst [vmem:[#allocation92_spill] sm:$0xff] %v10296_v10  ;;  %12713 = vst [vmem:[#allocation93_spill] sm:$0xff] %v10298_v2  ;;  %v3907_v44 = vpop.f32.mrb[137].mxu0  ;;  %v5059_v27 = vpop.f32.mrb[137].mxu1  ;;  %v8694_v2 = vld [vmem:[%s12619_s0 + $0x3e0] ss:$8 sps:$4 sm:$0xff]  }
 0x226   :  { %v10306_v25 = vpop.f32.mrb[138].mxu0  ;;  %v10308_v1 = vpop.f32.mrb[138].mxu1  ;;  %v8692_v44 = vld [vmem:[%s12619_s0 + $0xce4] ss:$8 sps:$4 sm:$0xff]   ;;  %v8695_v10 = vld [vmem:[%s12619_s0 + $0xce0] ss:$8 sps:$4 sm:$0xff]  }
 0x227   :  { %12714 = vst [vmem:[#allocation94_spill] sm:$0xff] %v10306_v25  ;;  %12715 = vst [vmem:[#allocation95_spill] sm:$0xff] %v10308_v1  ;;  %v3910_v27 = vpop.f32.mrb[139].mxu0  ;;  %v5062_v43 = vpop.f32.mrb[139].mxu1 }
 0x229   :  { %4120 = vmatmul.mubr.bf16.gmra.mrb[244].mxu0 %v8688_v9  ;;  %5272 = vmatmul.mubr.bf16.gmra.mrb[244].mxu1 %v8689_v28  ;;  %v8696_v28 = vld [vmem:[%s12619_s0 + $0x3f4] ss:$8 sps:$4 sm:$0xff]  }
 0x22a   :  { %4127 = vmatprep.mubr.bf16.mxu0 %v8690_v26  ;;  %5279 = vmatprep.mubr.bf16.mxu1 %v8692_v44 }
 0x22c   :  { %v10316_v52 = vpop.f32.mrb[140].mxu0  ;;  %v10318_v51 = vpop.f32.mrb[140].mxu1 }
 0x22d   :  { %12716 = vst [vmem:[#allocation96_spill] sm:$0xff] %v10316_v52  ;;  %12717 = vst [vmem:[#allocation97_spill] sm:$0xff] %v10318_v51  ;;  %v3915_v25 = vpop.f32.mrb[141].mxu0  ;;  %v5067_v1 = vpop.f32.mrb[141].mxu1  ;;  %v8700_v51 = vld [vmem:[%s12619_s0 + $0x3f0] ss:$8 sps:$4 sm:$0xff]  }
 0x22e   :  { %v10326_v27 = vpop.f32.mrb[142].mxu0  ;;  %v10328_v9 = vpop.f32.mrb[142].mxu1  ;;  %v8698_v25 = vld [vmem:[%s12619_s0 + $0xcf4] ss:$8 sps:$4 sm:$0xff]   ;;  %v8701_v52 = vld [vmem:[%s12619_s0 + $0xcf0] ss:$8 sps:$4 sm:$0xff]  }
 0x22f   :  { %12718 = vst [vmem:[#allocation98_spill] sm:$0xff] %v10326_v27  ;;  %12719 = vst [vmem:[#allocation99_spill] sm:$0xff] %v10328_v9  ;;  %v3918_v1 = vpop.f32.mrb[143].mxu0  ;;  %v5070_v26 = vpop.f32.mrb[143].mxu1 }
 0x231   :  { %4128 = vmatmul.mubr.bf16.gmra.mrb[248].mxu0 %v8694_v2  ;;  %5280 = vmatmul.mubr.bf16.gmra.mrb[248].mxu1 %v8695_v10  ;;  %v8704_v10 = vld [vmem:[%s12619_s0 + $0x404] ss:$8 sps:$4 sm:$0xff]  }
 0x232   :  { %4135 = vmatprep.mubr.bf16.mxu0 %v8696_v28  ;;  %5287 = vmatprep.mubr.bf16.mxu1 %v8698_v25 }
 0x234   :  { %v10336_v44 = vpop.f32.mrb[144].mxu0  ;;  %v10338_v43 = vpop.f32.mrb[144].mxu1 }
 0x235   :  { %12720 = vst [vmem:[#allocation100_spill] sm:$0xff] %v10336_v44  ;;  %12721 = vst [vmem:[#allocation101_spill] sm:$0xff] %v10338_v43  ;;  %v3923_v27 = vpop.f32.mrb[145].mxu0  ;;  %v5075_v9 = vpop.f32.mrb[145].mxu1  ;;  %v8702_v43 = vld [vmem:[%s12619_s0 + $0x400] ss:$8 sps:$4 sm:$0xff]  }
 0x236   :  { %v10346_v1 = vpop.f32.mrb[146].mxu0  ;;  %v10348_v2 = vpop.f32.mrb[146].mxu1  ;;  %v8707_v27 = vld [vmem:[%s12619_s0 + $0xd04] ss:$8 sps:$4 sm:$0xff]   ;;  %v8705_v44 = vld [vmem:[%s12619_s0 + $0xd00] ss:$8 sps:$4 sm:$0xff]  }
 0x237   :  { %12722 = vst [vmem:[#allocation102_spill] sm:$0xff] %v10346_v1  ;;  %12723 = vst [vmem:[#allocation103_spill] sm:$0xff] %v10348_v2  ;;  %v3926_v9 = vpop.f32.mrb[147].mxu0  ;;  %v5078_v28 = vpop.f32.mrb[147].mxu1 }
 0x239   :  { %4136 = vmatmul.mubr.bf16.gmra.mrb[252].mxu0 %v8700_v51  ;;  %5288 = vmatmul.mubr.bf16.gmra.mrb[252].mxu1 %v8701_v52  ;;  %v8710_v52 = vld [vmem:[%s12619_s0 + $0x414] ss:$8 sps:$4 sm:$0xff]  }
 0x23a   :  { %4143 = vmatprep.mubr.bf16.mxu0 %v8704_v10  ;;  %5295 = vmatprep.mubr.bf16.mxu1 %v8707_v27 }
 0x23c   :  { %v10356_v25 = vpop.f32.mrb[148].mxu0  ;;  %v10358_v26 = vpop.f32.mrb[148].mxu1 }
 0x23d   :  { %12724 = vst [vmem:[#allocation104_spill] sm:$0xff] %v10356_v25  ;;  %12725 = vst [vmem:[#allocation105_spill] sm:$0xff] %v10358_v26  ;;  %v3931_v1 = vpop.f32.mrb[149].mxu0  ;;  %v5083_v2 = vpop.f32.mrb[149].mxu1  ;;  %v8708_v26 = vld [vmem:[%s12619_s0 + $0x410] ss:$8 sps:$4 sm:$0xff]  }
 0x23e   :  { %v10366_v9 = vpop.f32.mrb[150].mxu0  ;;  %v10368_v51 = vpop.f32.mrb[150].mxu1  ;;  %v8713_v1 = vld [vmem:[%s12619_s0 + $0xd14] ss:$8 sps:$4 sm:$0xff]   ;;  %v8711_v25 = vld [vmem:[%s12619_s0 + $0xd10] ss:$8 sps:$4 sm:$0xff]  }
 0x23f   :  { %12726 = vst [vmem:[#allocation106_spill] sm:$0xff] %v10366_v9  ;;  %12727 = vst [vmem:[#allocation107_spill] sm:$0xff] %v10368_v51  ;;  %v3934_v2 = vpop.f32.mrb[151].mxu0  ;;  %v5086_v10 = vpop.f32.mrb[151].mxu1 }
 0x241   :  { %4144 = vmatmul.mubr.bf16.gmra.mrb[0].mxu0 %v8702_v43  ;;  %5296 = vmatmul.mubr.bf16.gmra.mrb[0].mxu1 %v8705_v44  ;;  %v8716_v44 = vld [vmem:[%s12619_s0 + $0x424] ss:$8 sps:$4 sm:$0xff]  }
 0x242   :  { %4151 = vmatprep.mubr.bf16.mxu0 %v8710_v52  ;;  %5303 = vmatprep.mubr.bf16.mxu1 %v8713_v1 }
 0x244   :  { %v10376_v27 = vpop.f32.mrb[152].mxu0  ;;  %v10378_v28 = vpop.f32.mrb[152].mxu1 }
 0x245   :  { %12728 = vst [vmem:[#allocation108_spill] sm:$0xff] %v10376_v27  ;;  %12729 = vst [vmem:[#allocation109_spill] sm:$0xff] %v10378_v28  ;;  %v3939_v9 = vpop.f32.mrb[153].mxu0  ;;  %v5091_v51 = vpop.f32.mrb[153].mxu1  ;;  %v8714_v28 = vld [vmem:[%s12619_s0 + $0x420] ss:$8 sps:$4 sm:$0xff]  }
 0x246   :  { %v10386_v2 = vpop.f32.mrb[154].mxu0  ;;  %v10388_v43 = vpop.f32.mrb[154].mxu1  ;;  %v8719_v9 = vld [vmem:[%s12619_s0 + $0xd24] ss:$8 sps:$4 sm:$0xff]   ;;  %v8717_v27 = vld [vmem:[%s12619_s0 + $0xd20] ss:$8 sps:$4 sm:$0xff]  }
 0x247   :  { %12730 = vst [vmem:[#allocation110_spill] sm:$0xff] %v10386_v2  ;;  %12731 = vst [vmem:[#allocation111_spill] sm:$0xff] %v10388_v43  ;;  %v3942_v51 = vpop.f32.mrb[155].mxu0  ;;  %v5094_v52 = vpop.f32.mrb[155].mxu1 }
 0x249   :  { %4152 = vmatmul.mubr.bf16.gmra.mrb[4].mxu0 %v8708_v26  ;;  %5304 = vmatmul.mubr.bf16.gmra.mrb[4].mxu1 %v8711_v25  ;;  %v8722_v25 = vld [vmem:[%s12619_s0 + $0x434] ss:$8 sps:$4 sm:$0xff]  }
 0x24a   :  { %4159 = vmatprep.mubr.bf16.mxu0 %v8716_v44  ;;  %5311 = vmatprep.mubr.bf16.mxu1 %v8719_v9 }
 0x24c   :  { %v10396_v1 = vpop.f32.mrb[156].mxu0  ;;  %v10398_v10 = vpop.f32.mrb[156].mxu1 }
 0x24d   :  { %12732 = vst [vmem:[#allocation112_spill] sm:$0xff] %v10396_v1  ;;  %12733 = vst [vmem:[#allocation113_spill] sm:$0xff] %v10398_v10  ;;  %v3947_v2 = vpop.f32.mrb[157].mxu0  ;;  %v5099_v43 = vpop.f32.mrb[157].mxu1  ;;  %v8720_v10 = vld [vmem:[%s12619_s0 + $0x430] ss:$8 sps:$4 sm:$0xff]  }
 0x24e   :  { %v10406_v51 = vpop.f32.mrb[158].mxu0  ;;  %v10408_v26 = vpop.f32.mrb[158].mxu1  ;;  %v8725_v2 = vld [vmem:[%s12619_s0 + $0xd34] ss:$8 sps:$4 sm:$0xff]   ;;  %v8723_v1 = vld [vmem:[%s12619_s0 + $0xd30] ss:$8 sps:$4 sm:$0xff]  }
 0x24f   :  { %12734 = vst [vmem:[#allocation114_spill] sm:$0xff] %v10406_v51  ;;  %12735 = vst [vmem:[#allocation115_spill] sm:$0xff] %v10408_v26  ;;  %v3950_v43 = vpop.f32.mrb[159].mxu0  ;;  %v5102_v44 = vpop.f32.mrb[159].mxu1 }
 0x251   :  { %4160 = vmatmul.mubr.bf16.gmra.mrb[8].mxu0 %v8714_v28  ;;  %5312 = vmatmul.mubr.bf16.gmra.mrb[8].mxu1 %v8717_v27  ;;  %v8728_v27 = vld [vmem:[%s12619_s0 + $0x444] ss:$8 sps:$4 sm:$0xff]  }
 0x252   :  { %4167 = vmatprep.mubr.bf16.mxu0 %v8722_v25  ;;  %5319 = vmatprep.mubr.bf16.mxu1 %v8725_v2 }
 0x254   :  { %v10416_v9 = vpop.f32.mrb[160].mxu0  ;;  %v10418_v52 = vpop.f32.mrb[160].mxu1 }
 0x255   :  { %12736 = vst [vmem:[#allocation116_spill] sm:$0xff] %v10416_v9  ;;  %12737 = vst [vmem:[#allocation117_spill] sm:$0xff] %v10418_v52  ;;  %v3955_v51 = vpop.f32.mrb[161].mxu0  ;;  %v5107_v26 = vpop.f32.mrb[161].mxu1  ;;  %v8726_v52 = vld [vmem:[%s12619_s0 + $0x440] ss:$8 sps:$4 sm:$0xff]  }
 0x256   :  { %v10426_v43 = vpop.f32.mrb[162].mxu0  ;;  %v10428_v28 = vpop.f32.mrb[162].mxu1  ;;  %v8731_v51 = vld [vmem:[%s12619_s0 + $0xd44] ss:$8 sps:$4 sm:$0xff]   ;;  %v8729_v9 = vld [vmem:[%s12619_s0 + $0xd40] ss:$8 sps:$4 sm:$0xff]  }
 0x257   :  { %12738 = vst [vmem:[#allocation118_spill] sm:$0xff] %v10426_v43  ;;  %12739 = vst [vmem:[#allocation119_spill] sm:$0xff] %v10428_v28  ;;  %v3958_v26 = vpop.f32.mrb[163].mxu0  ;;  %v5110_v25 = vpop.f32.mrb[163].mxu1 }
 0x259   :  { %4168 = vmatmul.mubr.bf16.gmra.mrb[12].mxu0 %v8720_v10  ;;  %5320 = vmatmul.mubr.bf16.gmra.mrb[12].mxu1 %v8723_v1  ;;  %v8734_v1 = vld [vmem:[%s12619_s0 + $0x454] ss:$8 sps:$4 sm:$0xff]  }
 0x25a   :  { %4175 = vmatprep.mubr.bf16.mxu0 %v8728_v27  ;;  %5327 = vmatprep.mubr.bf16.mxu1 %v8731_v51 }
 0x25c   :  { %v10436_v2 = vpop.f32.mrb[164].mxu0  ;;  %v10438_v44 = vpop.f32.mrb[164].mxu1 }
 0x25d   :  { %12740 = vst [vmem:[#allocation120_spill] sm:$0xff] %v10436_v2  ;;  %12741 = vst [vmem:[#allocation121_spill] sm:$0xff] %v10438_v44  ;;  %v3963_v43 = vpop.f32.mrb[165].mxu0  ;;  %v5115_v28 = vpop.f32.mrb[165].mxu1  ;;  %v8732_v44 = vld [vmem:[%s12619_s0 + $0x450] ss:$8 sps:$4 sm:$0xff]  }
 0x25e   :  { %v10446_v26 = vpop.f32.mrb[166].mxu0  ;;  %v10448_v10 = vpop.f32.mrb[166].mxu1  ;;  %v8737_v43 = vld [vmem:[%s12619_s0 + $0xd54] ss:$8 sps:$4 sm:$0xff]   ;;  %v8735_v2 = vld [vmem:[%s12619_s0 + $0xd50] ss:$8 sps:$4 sm:$0xff]  }
 0x25f   :  { %12742 = vst [vmem:[#allocation122_spill] sm:$0xff] %v10446_v26  ;;  %12743 = vst [vmem:[#allocation123_spill] sm:$0xff] %v10448_v10  ;;  %v3966_v28 = vpop.f32.mrb[167].mxu0  ;;  %v5118_v27 = vpop.f32.mrb[167].mxu1 }
 0x261   :  { %4176 = vmatmul.mubr.bf16.gmra.mrb[16].mxu0 %v8726_v52  ;;  %5328 = vmatmul.mubr.bf16.gmra.mrb[16].mxu1 %v8729_v9  ;;  %v8740_v9 = vld [vmem:[%s12619_s0 + $0x464] ss:$8 sps:$4 sm:$0xff]  }
 0x262   :  { %4183 = vmatprep.mubr.bf16.mxu0 %v8734_v1  ;;  %5335 = vmatprep.mubr.bf16.mxu1 %v8737_v43 }
 0x264   :  { %v10456_v51 = vpop.f32.mrb[168].mxu0  ;;  %v10458_v25 = vpop.f32.mrb[168].mxu1 }
 0x265   :  { %12744 = vst [vmem:[#allocation124_spill] sm:$0xff] %v10456_v51  ;;  %12745 = vst [vmem:[#allocation125_spill] sm:$0xff] %v10458_v25  ;;  %v3971_v26 = vpop.f32.mrb[169].mxu0  ;;  %v5123_v10 = vpop.f32.mrb[169].mxu1  ;;  %v8738_v25 = vld [vmem:[%s12619_s0 + $0x460] ss:$8 sps:$4 sm:$0xff]  }
 0x266   :  { %v10466_v28 = vpop.f32.mrb[170].mxu0  ;;  %v10468_v52 = vpop.f32.mrb[170].mxu1  ;;  %v8743_v26 = vld [vmem:[%s12619_s0 + $0xd64] ss:$8 sps:$4 sm:$0xff]   ;;  %v8741_v51 = vld [vmem:[%s12619_s0 + $0xd60] ss:$8 sps:$4 sm:$0xff]  }
 0x267   :  { %12746 = vst [vmem:[#allocation126_spill] sm:$0xff] %v10466_v28  ;;  %12747 = vst [vmem:[#allocation127_spill] sm:$0xff] %v10468_v52  ;;  %v3974_v10 = vpop.f32.mrb[171].mxu0  ;;  %v5126_v1 = vpop.f32.mrb[171].mxu1 }
 0x269   :  { %4184 = vmatmul.mubr.bf16.gmra.mrb[20].mxu0 %v8732_v44  ;;  %5336 = vmatmul.mubr.bf16.gmra.mrb[20].mxu1 %v8735_v2  ;;  %v8746_v2 = vld [vmem:[%s12619_s0 + $0x474] ss:$8 sps:$4 sm:$0xff]  }
 0x26a   :  { %4191 = vmatprep.mubr.bf16.mxu0 %v8740_v9  ;;  %5343 = vmatprep.mubr.bf16.mxu1 %v8743_v26 }
 0x26c   :  { %v10476_v43 = vpop.f32.mrb[172].mxu0  ;;  %v10478_v27 = vpop.f32.mrb[172].mxu1 }
 0x26d   :  { %12748 = vst [vmem:[#allocation128_spill] sm:$0xff] %v10476_v43  ;;  %12749 = vst [vmem:[#allocation129_spill] sm:$0xff] %v10478_v27  ;;  %v3979_v28 = vpop.f32.mrb[173].mxu0  ;;  %v5131_v52 = vpop.f32.mrb[173].mxu1  ;;  %v8744_v27 = vld [vmem:[%s12619_s0 + $0x470] ss:$8 sps:$4 sm:$0xff]  }
 0x26e   :  { %v10486_v10 = vpop.f32.mrb[174].mxu0  ;;  %v10488_v44 = vpop.f32.mrb[174].mxu1  ;;  %v8749_v28 = vld [vmem:[%s12619_s0 + $0xd74] ss:$8 sps:$4 sm:$0xff]   ;;  %v8747_v43 = vld [vmem:[%s12619_s0 + $0xd70] ss:$8 sps:$4 sm:$0xff]  }
 0x26f   :  { %12750 = vst [vmem:[#allocation130_spill] sm:$0xff] %v10486_v10  ;;  %12751 = vst [vmem:[#allocation131_spill] sm:$0xff] %v10488_v44  ;;  %v3982_v52 = vpop.f32.mrb[175].mxu0  ;;  %v5134_v9 = vpop.f32.mrb[175].mxu1 }
 0x271   :  { %4192 = vmatmul.mubr.bf16.gmra.mrb[24].mxu0 %v8738_v25  ;;  %5344 = vmatmul.mubr.bf16.gmra.mrb[24].mxu1 %v8741_v51  ;;  %v8752_v51 = vld [vmem:[%s12619_s0 + $0x484] ss:$8 sps:$4 sm:$0xff]  }
 0x272   :  { %4199 = vmatprep.mubr.bf16.mxu0 %v8746_v2  ;;  %5351 = vmatprep.mubr.bf16.mxu1 %v8749_v28 }
 0x274   :  { %v10496_v26 = vpop.f32.mrb[176].mxu0  ;;  %v10498_v1 = vpop.f32.mrb[176].mxu1 }
 0x275   :  { %12752 = vst [vmem:[#allocation132_spill] sm:$0xff] %v10496_v26  ;;  %12753 = vst [vmem:[#allocation133_spill] sm:$0xff] %v10498_v1  ;;  %v3987_v10 = vpop.f32.mrb[177].mxu0  ;;  %v5139_v44 = vpop.f32.mrb[177].mxu1  ;;  %v8750_v1 = vld [vmem:[%s12619_s0 + $0x480] ss:$8 sps:$4 sm:$0xff]  }
 0x276   :  { %v10506_v52 = vpop.f32.mrb[178].mxu0  ;;  %v10508_v25 = vpop.f32.mrb[178].mxu1  ;;  %v8755_v10 = vld [vmem:[%s12619_s0 + $0xd84] ss:$8 sps:$4 sm:$0xff]   ;;  %v8753_v26 = vld [vmem:[%s12619_s0 + $0xd80] ss:$8 sps:$4 sm:$0xff]  }
 0x277   :  { %12754 = vst [vmem:[#allocation134_spill] sm:$0xff] %v10506_v52  ;;  %12755 = vst [vmem:[#allocation135_spill] sm:$0xff] %v10508_v25  ;;  %v3990_v44 = vpop.f32.mrb[179].mxu0  ;;  %v5142_v2 = vpop.f32.mrb[179].mxu1 }
 0x279   :  { %4200 = vmatmul.mubr.bf16.gmra.mrb[28].mxu0 %v8744_v27  ;;  %5352 = vmatmul.mubr.bf16.gmra.mrb[28].mxu1 %v8747_v43  ;;  %v8758_v43 = vld [vmem:[%s12619_s0 + $0x494] ss:$8 sps:$4 sm:$0xff]  }
 0x27a   :  { %4207 = vmatprep.mubr.bf16.mxu0 %v8752_v51  ;;  %5359 = vmatprep.mubr.bf16.mxu1 %v8755_v10 }
 0x27c   :  { %v10516_v28 = vpop.f32.mrb[180].mxu0  ;;  %v10518_v9 = vpop.f32.mrb[180].mxu1 }
 0x27d   :  { %12756 = vst [vmem:[#allocation136_spill] sm:$0xff] %v10516_v28  ;;  %12757 = vst [vmem:[#allocation137_spill] sm:$0xff] %v10518_v9  ;;  %v3995_v52 = vpop.f32.mrb[181].mxu0  ;;  %v5147_v25 = vpop.f32.mrb[181].mxu1  ;;  %v8756_v9 = vld [vmem:[%s12619_s0 + $0x490] ss:$8 sps:$4 sm:$0xff]  }
 0x27e   :  { %v10526_v44 = vpop.f32.mrb[182].mxu0  ;;  %v10528_v27 = vpop.f32.mrb[182].mxu1  ;;  %v8761_v52 = vld [vmem:[%s12619_s0 + $0xd94] ss:$8 sps:$4 sm:$0xff]   ;;  %v8759_v28 = vld [vmem:[%s12619_s0 + $0xd90] ss:$8 sps:$4 sm:$0xff]  }
 0x27f   :  { %12758 = vst [vmem:[#allocation138_spill] sm:$0xff] %v10526_v44  ;;  %12759 = vst [vmem:[#allocation139_spill] sm:$0xff] %v10528_v27  ;;  %v3998_v25 = vpop.f32.mrb[183].mxu0  ;;  %v5150_v51 = vpop.f32.mrb[183].mxu1 }
 0x281   :  { %4208 = vmatmul.mubr.bf16.gmra.mrb[32].mxu0 %v8750_v1  ;;  %5360 = vmatmul.mubr.bf16.gmra.mrb[32].mxu1 %v8753_v26  ;;  %v8764_v26 = vld [vmem:[%s12619_s0 + $0x4a4] ss:$8 sps:$4 sm:$0xff]  }
 0x282   :  { %4215 = vmatprep.mubr.bf16.mxu0 %v8758_v43  ;;  %5367 = vmatprep.mubr.bf16.mxu1 %v8761_v52 }
 0x284   :  { %v10536_v10 = vpop.f32.mrb[184].mxu0  ;;  %v10538_v2 = vpop.f32.mrb[184].mxu1 }
 0x285   :  { %12760 = vst [vmem:[#allocation140_spill] sm:$0xff] %v10536_v10  ;;  %12761 = vst [vmem:[#allocation141_spill] sm:$0xff] %v10538_v2  ;;  %v4003_v44 = vpop.f32.mrb[185].mxu0  ;;  %v5155_v27 = vpop.f32.mrb[185].mxu1  ;;  %v8762_v2 = vld [vmem:[%s12619_s0 + $0x4a0] ss:$8 sps:$4 sm:$0xff]  }
 0x286   :  { %v10546_v25 = vpop.f32.mrb[186].mxu0  ;;  %v10548_v1 = vpop.f32.mrb[186].mxu1  ;;  %v8767_v44 = vld [vmem:[%s12619_s0 + $0xda4] ss:$8 sps:$4 sm:$0xff]   ;;  %v8765_v10 = vld [vmem:[%s12619_s0 + $0xda0] ss:$8 sps:$4 sm:$0xff]  }
 0x287   :  { %12762 = vst [vmem:[#allocation142_spill] sm:$0xff] %v10546_v25  ;;  %12763 = vst [vmem:[#allocation143_spill] sm:$0xff] %v10548_v1  ;;  %v4006_v27 = vpop.f32.mrb[187].mxu0  ;;  %v5158_v43 = vpop.f32.mrb[187].mxu1 }
 0x289   :  { %4216 = vmatmul.mubr.bf16.gmra.mrb[36].mxu0 %v8756_v9  ;;  %5368 = vmatmul.mubr.bf16.gmra.mrb[36].mxu1 %v8759_v28  ;;  %v8770_v28 = vld [vmem:[%s12619_s0 + $0x4b4] ss:$8 sps:$4 sm:$0xff]  }
 0x28a   :  { %4223 = vmatprep.mubr.bf16.mxu0 %v8764_v26  ;;  %5375 = vmatprep.mubr.bf16.mxu1 %v8767_v44 }
 0x28c   :  { %v10556_v52 = vpop.f32.mrb[188].mxu0  ;;  %v10558_v51 = vpop.f32.mrb[188].mxu1 }
 0x28d   :  { %12764 = vst [vmem:[#allocation144_spill] sm:$0xff] %v10556_v52  ;;  %12765 = vst [vmem:[#allocation145_spill] sm:$0xff] %v10558_v51  ;;  %v4011_v25 = vpop.f32.mrb[189].mxu0  ;;  %v5163_v1 = vpop.f32.mrb[189].mxu1  ;;  %v8768_v51 = vld [vmem:[%s12619_s0 + $0x4b0] ss:$8 sps:$4 sm:$0xff]  }
 0x28e   :  { %v10566_v27 = vpop.f32.mrb[190].mxu0  ;;  %v10568_v9 = vpop.f32.mrb[190].mxu1  ;;  %v8773_v25 = vld [vmem:[%s12619_s0 + $0xdb4] ss:$8 sps:$4 sm:$0xff]   ;;  %v8771_v52 = vld [vmem:[%s12619_s0 + $0xdb0] ss:$8 sps:$4 sm:$0xff]  }
 0x28f   :  { %12766 = vst [vmem:[#allocation146_spill] sm:$0xff] %v10566_v27  ;;  %12767 = vst [vmem:[#allocation147_spill] sm:$0xff] %v10568_v9  ;;  %v4014_v1 = vpop.f32.mrb[191].mxu0  ;;  %v5166_v26 = vpop.f32.mrb[191].mxu1 }
 0x291   :  { %4224 = vmatmul.mubr.bf16.gmra.mrb[40].mxu0 %v8762_v2  ;;  %5376 = vmatmul.mubr.bf16.gmra.mrb[40].mxu1 %v8765_v10  ;;  %v8776_v10 = vld [vmem:[%s12619_s0 + $0x4c4] ss:$8 sps:$4 sm:$0xff]  }
 0x292   :  { %4231 = vmatprep.mubr.bf16.mxu0 %v8770_v28  ;;  %5383 = vmatprep.mubr.bf16.mxu1 %v8773_v25 }
 0x294   :  { %v10576_v44 = vpop.f32.mrb[192].mxu0  ;;  %v10578_v43 = vpop.f32.mrb[192].mxu1 }
 0x295   :  { %12768 = vst [vmem:[#allocation148_spill] sm:$0xff] %v10576_v44  ;;  %12769 = vst [vmem:[#allocation149_spill] sm:$0xff] %v10578_v43  ;;  %v4019_v27 = vpop.f32.mrb[193].mxu0  ;;  %v5171_v9 = vpop.f32.mrb[193].mxu1  ;;  %v8774_v43 = vld [vmem:[%s12619_s0 + $0x4c0] ss:$8 sps:$4 sm:$0xff]  }
 0x296   :  { %v10586_v1 = vpop.f32.mrb[194].mxu0  ;;  %v10588_v2 = vpop.f32.mrb[194].mxu1  ;;  %v8779_v27 = vld [vmem:[%s12619_s0 + $0xdc4] ss:$8 sps:$4 sm:$0xff]   ;;  %v8777_v44 = vld [vmem:[%s12619_s0 + $0xdc0] ss:$8 sps:$4 sm:$0xff]  }
 0x297   :  { %12770 = vst [vmem:[#allocation150_spill] sm:$0xff] %v10586_v1  ;;  %12771 = vst [vmem:[#allocation151_spill] sm:$0xff] %v10588_v2  ;;  %v4022_v9 = vpop.f32.mrb[195].mxu0  ;;  %v5174_v28 = vpop.f32.mrb[195].mxu1 }
 0x299   :  { %4232 = vmatmul.mubr.bf16.gmra.mrb[44].mxu0 %v8768_v51  ;;  %5384 = vmatmul.mubr.bf16.gmra.mrb[44].mxu1 %v8771_v52  ;;  %v8782_v52 = vld [vmem:[%s12619_s0 + $0x4d4] ss:$8 sps:$4 sm:$0xff]  }
 0x29a   :  { %4239 = vmatprep.mubr.bf16.mxu0 %v8776_v10  ;;  %5391 = vmatprep.mubr.bf16.mxu1 %v8779_v27 }
 0x29c   :  { %v10596_v25 = vpop.f32.mrb[196].mxu0  ;;  %v10598_v26 = vpop.f32.mrb[196].mxu1 }
 0x29d   :  { %12772 = vst [vmem:[#allocation152_spill] sm:$0xff] %v10596_v25  ;;  %12773 = vst [vmem:[#allocation153_spill] sm:$0xff] %v10598_v26  ;;  %v4027_v1 = vpop.f32.mrb[197].mxu0  ;;  %v5179_v2 = vpop.f32.mrb[197].mxu1  ;;  %v8780_v26 = vld [vmem:[%s12619_s0 + $0x4d0] ss:$8 sps:$4 sm:$0xff]  }
 0x29e   :  { %v10606_v9 = vpop.f32.mrb[198].mxu0  ;;  %v10608_v51 = vpop.f32.mrb[198].mxu1  ;;  %v8785_v1 = vld [vmem:[%s12619_s0 + $0xdd4] ss:$8 sps:$4 sm:$0xff]   ;;  %v8783_v25 = vld [vmem:[%s12619_s0 + $0xdd0] ss:$8 sps:$4 sm:$0xff]  }
 0x29f   :  { %12774 = vst [vmem:[#allocation154_spill] sm:$0xff] %v10606_v9  ;;  %12775 = vst [vmem:[#allocation155_spill] sm:$0xff] %v10608_v51  ;;  %v4030_v2 = vpop.f32.mrb[199].mxu0  ;;  %v5182_v10 = vpop.f32.mrb[199].mxu1 }
 0x2a1   :  { %4240 = vmatmul.mubr.bf16.gmra.mrb[48].mxu0 %v8774_v43  ;;  %5392 = vmatmul.mubr.bf16.gmra.mrb[48].mxu1 %v8777_v44  ;;  %v8788_v44 = vld [vmem:[%s12619_s0 + $0x4e4] ss:$8 sps:$4 sm:$0xff]  }
 0x2a2   :  { %4247 = vmatprep.mubr.bf16.mxu0 %v8782_v52  ;;  %5399 = vmatprep.mubr.bf16.mxu1 %v8785_v1 }
 0x2a4   :  { %v10616_v27 = vpop.f32.mrb[200].mxu0  ;;  %v10618_v28 = vpop.f32.mrb[200].mxu1 }
 0x2a5   :  { %12776 = vst [vmem:[#allocation156_spill] sm:$0xff] %v10616_v27  ;;  %12777 = vst [vmem:[#allocation157_spill] sm:$0xff] %v10618_v28  ;;  %v4035_v9 = vpop.f32.mrb[201].mxu0  ;;  %v5187_v51 = vpop.f32.mrb[201].mxu1  ;;  %v8786_v28 = vld [vmem:[%s12619_s0 + $0x4e0] ss:$8 sps:$4 sm:$0xff]  }
 0x2a6   :  { %v10626_v2 = vpop.f32.mrb[202].mxu0  ;;  %v10628_v43 = vpop.f32.mrb[202].mxu1  ;;  %v8791_v9 = vld [vmem:[%s12619_s0 + $0xde4] ss:$8 sps:$4 sm:$0xff]   ;;  %v8789_v27 = vld [vmem:[%s12619_s0 + $0xde0] ss:$8 sps:$4 sm:$0xff]  }
 0x2a7   :  { %12778 = vst [vmem:[#allocation158_spill] sm:$0xff] %v10626_v2  ;;  %12779 = vst [vmem:[#allocation159_spill] sm:$0xff] %v10628_v43  ;;  %v4038_v51 = vpop.f32.mrb[203].mxu0  ;;  %v5190_v52 = vpop.f32.mrb[203].mxu1 }
 0x2a9   :  { %4248 = vmatmul.mubr.bf16.gmra.mrb[52].mxu0 %v8780_v26  ;;  %5400 = vmatmul.mubr.bf16.gmra.mrb[52].mxu1 %v8783_v25  ;;  %v8794_v25 = vld [vmem:[%s12619_s0 + $0x4f4] ss:$8 sps:$4 sm:$0xff]  }
 0x2aa   :  { %4255 = vmatprep.mubr.bf16.mxu0 %v8788_v44  ;;  %5407 = vmatprep.mubr.bf16.mxu1 %v8791_v9 }
 0x2ac   :  { %v10636_v1 = vpop.f32.mrb[204].mxu0  ;;  %v10638_v10 = vpop.f32.mrb[204].mxu1 }
 0x2ad   :  { %12780 = vst [vmem:[#allocation160_spill] sm:$0xff] %v10636_v1  ;;  %12781 = vst [vmem:[#allocation161_spill] sm:$0xff] %v10638_v10  ;;  %v4043_v2 = vpop.f32.mrb[205].mxu0  ;;  %v5195_v43 = vpop.f32.mrb[205].mxu1  ;;  %v8792_v10 = vld [vmem:[%s12619_s0 + $0x4f0] ss:$8 sps:$4 sm:$0xff]  }
 0x2ae   :  { %v10646_v51 = vpop.f32.mrb[206].mxu0  ;;  %v10648_v26 = vpop.f32.mrb[206].mxu1  ;;  %v8797_v2 = vld [vmem:[%s12619_s0 + $0xdf4] ss:$8 sps:$4 sm:$0xff]   ;;  %v8795_v1 = vld [vmem:[%s12619_s0 + $0xdf0] ss:$8 sps:$4 sm:$0xff]  }
 0x2af   :  { %12782 = vst [vmem:[#allocation162_spill] sm:$0xff] %v10646_v51  ;;  %12783 = vst [vmem:[#allocation163_spill] sm:$0xff] %v10648_v26  ;;  %v4046_v43 = vpop.f32.mrb[207].mxu0  ;;  %v5198_v44 = vpop.f32.mrb[207].mxu1 }
 0x2b1   :  { %4256 = vmatmul.mubr.bf16.gmra.mrb[56].mxu0 %v8786_v28  ;;  %5408 = vmatmul.mubr.bf16.gmra.mrb[56].mxu1 %v8789_v27  ;;  %v8800_v27 = vld [vmem:[%s12619_s0 + $0x504] ss:$8 sps:$4 sm:$0xff]  }
 0x2b2   :  { %4263 = vmatprep.mubr.bf16.mxu0 %v8794_v25  ;;  %5415 = vmatprep.mubr.bf16.mxu1 %v8797_v2 }
 0x2b4   :  { %v10656_v9 = vpop.f32.mrb[208].mxu0  ;;  %v10658_v52 = vpop.f32.mrb[208].mxu1 }
 0x2b5   :  { %12784 = vst [vmem:[#allocation164_spill] sm:$0xff] %v10656_v9  ;;  %12785 = vst [vmem:[#allocation165_spill] sm:$0xff] %v10658_v52  ;;  %v4051_v51 = vpop.f32.mrb[209].mxu0  ;;  %v5203_v26 = vpop.f32.mrb[209].mxu1  ;;  %v8798_v52 = vld [vmem:[%s12619_s0 + $0x500] ss:$8 sps:$4 sm:$0xff]  }
 0x2b6   :  { %v10666_v43 = vpop.f32.mrb[210].mxu0  ;;  %v10668_v28 = vpop.f32.mrb[210].mxu1  ;;  %v8803_v51 = vld [vmem:[%s12619_s0 + $0xe04] ss:$8 sps:$4 sm:$0xff]   ;;  %v8801_v9 = vld [vmem:[%s12619_s0 + $0xe00] ss:$8 sps:$4 sm:$0xff]  }
 0x2b7   :  { %12786 = vst [vmem:[#allocation166_spill] sm:$0xff] %v10666_v43  ;;  %12787 = vst [vmem:[#allocation167_spill] sm:$0xff] %v10668_v28  ;;  %v4054_v26 = vpop.f32.mrb[211].mxu0  ;;  %v5206_v25 = vpop.f32.mrb[211].mxu1 }
 0x2b9   :  { %4264 = vmatmul.mubr.bf16.gmra.mrb[60].mxu0 %v8792_v10  ;;  %5416 = vmatmul.mubr.bf16.gmra.mrb[60].mxu1 %v8795_v1  ;;  %v8806_v1 = vld [vmem:[%s12619_s0 + $0x514] ss:$8 sps:$4 sm:$0xff]  }
 0x2ba   :  { %4271 = vmatprep.mubr.bf16.mxu0 %v8800_v27  ;;  %5423 = vmatprep.mubr.bf16.mxu1 %v8803_v51 }
 0x2bc   :  { %v10676_v2 = vpop.f32.mrb[212].mxu0  ;;  %v10678_v44 = vpop.f32.mrb[212].mxu1 }
 0x2bd   :  { %12788 = vst [vmem:[#allocation168_spill] sm:$0xff] %v10676_v2  ;;  %12789 = vst [vmem:[#allocation169_spill] sm:$0xff] %v10678_v44  ;;  %v4059_v43 = vpop.f32.mrb[213].mxu0  ;;  %v5211_v28 = vpop.f32.mrb[213].mxu1  ;;  %v8804_v44 = vld [vmem:[%s12619_s0 + $0x510] ss:$8 sps:$4 sm:$0xff]  }
 0x2be   :  { %v10686_v26 = vpop.f32.mrb[214].mxu0  ;;  %v10688_v10 = vpop.f32.mrb[214].mxu1  ;;  %v8809_v43 = vld [vmem:[%s12619_s0 + $0xe14] ss:$8 sps:$4 sm:$0xff]   ;;  %v8807_v2 = vld [vmem:[%s12619_s0 + $0xe10] ss:$8 sps:$4 sm:$0xff]  }
 0x2bf   :  { %12790 = vst [vmem:[#allocation170_spill] sm:$0xff] %v10686_v26  ;;  %12791 = vst [vmem:[#allocation171_spill] sm:$0xff] %v10688_v10  ;;  %v4062_v28 = vpop.f32.mrb[215].mxu0  ;;  %v5214_v27 = vpop.f32.mrb[215].mxu1 }
 0x2c1   :  { %4272 = vmatmul.mubr.bf16.gmra.mrb[64].mxu0 %v8798_v52  ;;  %5424 = vmatmul.mubr.bf16.gmra.mrb[64].mxu1 %v8801_v9  ;;  %v8812_v9 = vld [vmem:[%s12619_s0 + $0x524] ss:$8 sps:$4 sm:$0xff]  }
 0x2c2   :  { %4279 = vmatprep.mubr.bf16.mxu0 %v8806_v1  ;;  %5431 = vmatprep.mubr.bf16.mxu1 %v8809_v43 }
 0x2c4   :  { %v10696_v51 = vpop.f32.mrb[216].mxu0  ;;  %v10698_v25 = vpop.f32.mrb[216].mxu1 }
 0x2c5   :  { %12792 = vst [vmem:[#allocation172_spill] sm:$0xff] %v10696_v51  ;;  %12793 = vst [vmem:[#allocation173_spill] sm:$0xff] %v10698_v25  ;;  %v4067_v26 = vpop.f32.mrb[217].mxu0  ;;  %v5219_v10 = vpop.f32.mrb[217].mxu1  ;;  %v8810_v25 = vld [vmem:[%s12619_s0 + $0x520] ss:$8 sps:$4 sm:$0xff]  }
 0x2c6   :  { %v10706_v28 = vpop.f32.mrb[218].mxu0  ;;  %v10708_v52 = vpop.f32.mrb[218].mxu1  ;;  %v8815_v26 = vld [vmem:[%s12619_s0 + $0xe24] ss:$8 sps:$4 sm:$0xff]   ;;  %v8813_v51 = vld [vmem:[%s12619_s0 + $0xe20] ss:$8 sps:$4 sm:$0xff]  }
 0x2c7   :  { %12794 = vst [vmem:[#allocation174_spill] sm:$0xff] %v10706_v28  ;;  %12795 = vst [vmem:[#allocation175_spill] sm:$0xff] %v10708_v52  ;;  %v4070_v10 = vpop.f32.mrb[219].mxu0  ;;  %v5222_v1 = vpop.f32.mrb[219].mxu1 }
 0x2c9   :  { %4280 = vmatmul.mubr.bf16.gmra.mrb[68].mxu0 %v8804_v44  ;;  %5432 = vmatmul.mubr.bf16.gmra.mrb[68].mxu1 %v8807_v2  ;;  %v8818_v2 = vld [vmem:[%s12619_s0 + $0x534] ss:$8 sps:$4 sm:$0xff]  }
 0x2ca   :  { %4287 = vmatprep.mubr.bf16.mxu0 %v8812_v9  ;;  %5439 = vmatprep.mubr.bf16.mxu1 %v8815_v26 }
 0x2cc   :  { %v10716_v43 = vpop.f32.mrb[220].mxu0  ;;  %v10718_v27 = vpop.f32.mrb[220].mxu1 }
 0x2cd   :  { %12796 = vst [vmem:[#allocation176_spill] sm:$0xff] %v10716_v43  ;;  %12797 = vst [vmem:[#allocation177_spill] sm:$0xff] %v10718_v27  ;;  %v4075_v28 = vpop.f32.mrb[221].mxu0  ;;  %v5227_v52 = vpop.f32.mrb[221].mxu1  ;;  %v8816_v27 = vld [vmem:[%s12619_s0 + $0x530] ss:$8 sps:$4 sm:$0xff]  }
 0x2ce   :  { %v10726_v10 = vpop.f32.mrb[222].mxu0  ;;  %v10728_v44 = vpop.f32.mrb[222].mxu1  ;;  %v8821_v28 = vld [vmem:[%s12619_s0 + $0xe34] ss:$8 sps:$4 sm:$0xff]   ;;  %v8819_v43 = vld [vmem:[%s12619_s0 + $0xe30] ss:$8 sps:$4 sm:$0xff]  }
 0x2cf   :  { %12798 = vst [vmem:[#allocation178_spill] sm:$0xff] %v10726_v10  ;;  %12799 = vst [vmem:[#allocation179_spill] sm:$0xff] %v10728_v44  ;;  %v4078_v52 = vpop.f32.mrb[223].mxu0  ;;  %v5230_v9 = vpop.f32.mrb[223].mxu1 }
 0x2d1   :  { %4288 = vmatmul.mubr.bf16.gmra.mrb[72].mxu0 %v8810_v25  ;;  %5440 = vmatmul.mubr.bf16.gmra.mrb[72].mxu1 %v8813_v51  ;;  %v8824_v51 = vld [vmem:[%s12619_s0 + $0x544] ss:$8 sps:$4 sm:$0xff]  }
 0x2d2   :  { %4295 = vmatprep.mubr.bf16.mxu0 %v8818_v2  ;;  %5447 = vmatprep.mubr.bf16.mxu1 %v8821_v28 }
 0x2d4   :  { %v10736_v26 = vpop.f32.mrb[224].mxu0  ;;  %v10738_v1 = vpop.f32.mrb[224].mxu1 }
 0x2d5   :  { %12800 = vst [vmem:[#allocation180_spill] sm:$0xff] %v10736_v26  ;;  %12801 = vst [vmem:[#allocation181_spill] sm:$0xff] %v10738_v1  ;;  %v4083_v10 = vpop.f32.mrb[225].mxu0  ;;  %v5235_v44 = vpop.f32.mrb[225].mxu1  ;;  %v8822_v1 = vld [vmem:[%s12619_s0 + $0x540] ss:$8 sps:$4 sm:$0xff]  }
 0x2d6   :  { %v10746_v52 = vpop.f32.mrb[226].mxu0  ;;  %v10748_v25 = vpop.f32.mrb[226].mxu1  ;;  %v8827_v10 = vld [vmem:[%s12619_s0 + $0xe44] ss:$8 sps:$4 sm:$0xff]   ;;  %v8825_v26 = vld [vmem:[%s12619_s0 + $0xe40] ss:$8 sps:$4 sm:$0xff]  }
 0x2d7   :  { %12802 = vst [vmem:[#allocation182_spill] sm:$0xff] %v10746_v52  ;;  %12803 = vst [vmem:[#allocation183_spill] sm:$0xff] %v10748_v25  ;;  %v4086_v44 = vpop.f32.mrb[227].mxu0  ;;  %v5238_v2 = vpop.f32.mrb[227].mxu1 }
 0x2d9   :  { %4296 = vmatmul.mubr.bf16.gmra.mrb[76].mxu0 %v8816_v27  ;;  %5448 = vmatmul.mubr.bf16.gmra.mrb[76].mxu1 %v8819_v43  ;;  %v8830_v43 = vld [vmem:[%s12619_s0 + $0x554] ss:$8 sps:$4 sm:$0xff]  }
 0x2da   :  { %4303 = vmatprep.mubr.bf16.mxu0 %v8824_v51  ;;  %5455 = vmatprep.mubr.bf16.mxu1 %v8827_v10 }
 0x2dc   :  { %v10756_v28 = vpop.f32.mrb[228].mxu0  ;;  %v10758_v9 = vpop.f32.mrb[228].mxu1 }
 0x2dd   :  { %12804 = vst [vmem:[#allocation184_spill] sm:$0xff] %v10756_v28  ;;  %12805 = vst [vmem:[#allocation185_spill] sm:$0xff] %v10758_v9  ;;  %v4091_v52 = vpop.f32.mrb[229].mxu0  ;;  %v5243_v25 = vpop.f32.mrb[229].mxu1  ;;  %v8828_v9 = vld [vmem:[%s12619_s0 + $0x550] ss:$8 sps:$4 sm:$0xff]  }
 0x2de   :  { %v10766_v44 = vpop.f32.mrb[230].mxu0  ;;  %v10768_v27 = vpop.f32.mrb[230].mxu1  ;;  %v8833_v52 = vld [vmem:[%s12619_s0 + $0xe54] ss:$8 sps:$4 sm:$0xff]   ;;  %v8831_v28 = vld [vmem:[%s12619_s0 + $0xe50] ss:$8 sps:$4 sm:$0xff]  }
 0x2df   :  { %12806 = vst [vmem:[#allocation186_spill] sm:$0xff] %v10766_v44  ;;  %12807 = vst [vmem:[#allocation187_spill] sm:$0xff] %v10768_v27  ;;  %v4094_v25 = vpop.f32.mrb[231].mxu0  ;;  %v5246_v51 = vpop.f32.mrb[231].mxu1 }
 0x2e1   :  { %4304 = vmatmul.mubr.bf16.gmra.mrb[80].mxu0 %v8822_v1  ;;  %5456 = vmatmul.mubr.bf16.gmra.mrb[80].mxu1 %v8825_v26  ;;  %v8836_v26 = vld [vmem:[%s12619_s0 + $0x564] ss:$8 sps:$4 sm:$0xff]  }
 0x2e2   :  { %4311 = vmatprep.mubr.bf16.mxu0 %v8830_v43  ;;  %5463 = vmatprep.mubr.bf16.mxu1 %v8833_v52 }
 0x2e4   :  { %v10776_v10 = vpop.f32.mrb[232].mxu0  ;;  %v10778_v2 = vpop.f32.mrb[232].mxu1 }
 0x2e5   :  { %12808 = vst [vmem:[#allocation188_spill] sm:$0xff] %v10776_v10  ;;  %12809 = vst [vmem:[#allocation189_spill] sm:$0xff] %v10778_v2  ;;  %v4099_v44 = vpop.f32.mrb[233].mxu0  ;;  %v5251_v27 = vpop.f32.mrb[233].mxu1  ;;  %v8834_v2 = vld [vmem:[%s12619_s0 + $0x560] ss:$8 sps:$4 sm:$0xff]  }
 0x2e6   :  { %v10786_v25 = vpop.f32.mrb[234].mxu0  ;;  %v10788_v1 = vpop.f32.mrb[234].mxu1  ;;  %v8839_v44 = vld [vmem:[%s12619_s0 + $0xe64] ss:$8 sps:$4 sm:$0xff]   ;;  %v8837_v10 = vld [vmem:[%s12619_s0 + $0xe60] ss:$8 sps:$4 sm:$0xff]  }
 0x2e7   :  { %12810 = vst [vmem:[#allocation190_spill] sm:$0xff] %v10786_v25  ;;  %12811 = vst [vmem:[#allocation191_spill] sm:$0xff] %v10788_v1  ;;  %v4102_v27 = vpop.f32.mrb[235].mxu0  ;;  %v5254_v43 = vpop.f32.mrb[235].mxu1 }
 0x2e9   :  { %4312 = vmatmul.mubr.bf16.gmra.mrb[84].mxu0 %v8828_v9  ;;  %5464 = vmatmul.mubr.bf16.gmra.mrb[84].mxu1 %v8831_v28  ;;  %v8842_v28 = vld [vmem:[%s12619_s0 + $0x574] ss:$8 sps:$4 sm:$0xff]  }
 0x2ea   :  { %4319 = vmatprep.mubr.bf16.mxu0 %v8836_v26  ;;  %5471 = vmatprep.mubr.bf16.mxu1 %v8839_v44 }
 0x2ec   :  { %v10796_v52 = vpop.f32.mrb[236].mxu0  ;;  %v10798_v51 = vpop.f32.mrb[236].mxu1 }
 0x2ed   :  { %12812 = vst [vmem:[#allocation192_spill] sm:$0xff] %v10796_v52  ;;  %12813 = vst [vmem:[#allocation193_spill] sm:$0xff] %v10798_v51  ;;  %v4107_v25 = vpop.f32.mrb[237].mxu0  ;;  %v5259_v1 = vpop.f32.mrb[237].mxu1  ;;  %v8840_v51 = vld [vmem:[%s12619_s0 + $0x570] ss:$8 sps:$4 sm:$0xff]  }
 0x2ee   :  { %v10806_v27 = vpop.f32.mrb[238].mxu0  ;;  %v10808_v9 = vpop.f32.mrb[238].mxu1  ;;  %v8845_v25 = vld [vmem:[%s12619_s0 + $0xe74] ss:$8 sps:$4 sm:$0xff]   ;;  %v8843_v52 = vld [vmem:[%s12619_s0 + $0xe70] ss:$8 sps:$4 sm:$0xff]  }
 0x2ef   :  { %12814 = vst [vmem:[#allocation194_spill] sm:$0xff] %v10806_v27  ;;  %12815 = vst [vmem:[#allocation195_spill] sm:$0xff] %v10808_v9  ;;  %v4110_v1 = vpop.f32.mrb[239].mxu0  ;;  %v5262_v26 = vpop.f32.mrb[239].mxu1 }
 0x2f1   :  { %4320 = vmatmul.mubr.bf16.gmra.mrb[88].mxu0 %v8834_v2  ;;  %5472 = vmatmul.mubr.bf16.gmra.mrb[88].mxu1 %v8837_v10  ;;  %v8848_v10 = vld [vmem:[%s12619_s0 + $0x584] ss:$8 sps:$4 sm:$0xff]  }
 0x2f2   :  { %4327 = vmatprep.mubr.bf16.mxu0 %v8842_v28  ;;  %5479 = vmatprep.mubr.bf16.mxu1 %v8845_v25 }
 0x2f4   :  { %v10816_v44 = vpop.f32.mrb[240].mxu0  ;;  %v10818_v43 = vpop.f32.mrb[240].mxu1 }
 0x2f5   :  { %12816 = vst [vmem:[#allocation196_spill] sm:$0xff] %v10816_v44  ;;  %12817 = vst [vmem:[#allocation197_spill] sm:$0xff] %v10818_v43  ;;  %v4115_v27 = vpop.f32.mrb[241].mxu0  ;;  %v5267_v9 = vpop.f32.mrb[241].mxu1  ;;  %v8846_v43 = vld [vmem:[%s12619_s0 + $0x580] ss:$8 sps:$4 sm:$0xff]  }
 0x2f6   :  { %v10826_v1 = vpop.f32.mrb[242].mxu0  ;;  %v10828_v2 = vpop.f32.mrb[242].mxu1  ;;  %v8851_v27 = vld [vmem:[%s12619_s0 + $0xe84] ss:$8 sps:$4 sm:$0xff]   ;;  %v8849_v44 = vld [vmem:[%s12619_s0 + $0xe80] ss:$8 sps:$4 sm:$0xff]  }
 0x2f7   :  { %12818 = vst [vmem:[#allocation198_spill] sm:$0xff] %v10826_v1  ;;  %12819 = vst [vmem:[#allocation199_spill] sm:$0xff] %v10828_v2  ;;  %v4118_v9 = vpop.f32.mrb[243].mxu0  ;;  %v5270_v28 = vpop.f32.mrb[243].mxu1 }
 0x2f9   :  { %4328 = vmatmul.mubr.bf16.gmra.mrb[92].mxu0 %v8840_v51  ;;  %5480 = vmatmul.mubr.bf16.gmra.mrb[92].mxu1 %v8843_v52  ;;  %v8854_v52 = vld [vmem:[%s12619_s0 + $0x594] ss:$8 sps:$4 sm:$0xff]  }
 0x2fa   :  { %4335 = vmatprep.mubr.bf16.mxu0 %v8848_v10  ;;  %5487 = vmatprep.mubr.bf16.mxu1 %v8851_v27 }
 0x2fc   :  { %v10836_v25 = vpop.f32.mrb[244].mxu0  ;;  %v10838_v26 = vpop.f32.mrb[244].mxu1 }
 0x2fd   :  { %12820 = vst [vmem:[#allocation200_spill] sm:$0xff] %v10836_v25  ;;  %12821 = vst [vmem:[#allocation201_spill] sm:$0xff] %v10838_v26  ;;  %v4123_v1 = vpop.f32.mrb[245].mxu0  ;;  %v5275_v2 = vpop.f32.mrb[245].mxu1  ;;  %v8852_v26 = vld [vmem:[%s12619_s0 + $0x590] ss:$8 sps:$4 sm:$0xff]  }
 0x2fe   :  { %v10846_v9 = vpop.f32.mrb[246].mxu0  ;;  %v10848_v51 = vpop.f32.mrb[246].mxu1  ;;  %v8857_v1 = vld [vmem:[%s12619_s0 + $0xe94] ss:$8 sps:$4 sm:$0xff]   ;;  %v8855_v25 = vld [vmem:[%s12619_s0 + $0xe90] ss:$8 sps:$4 sm:$0xff]  }
 0x2ff   :  { %12822 = vst [vmem:[#allocation202_spill] sm:$0xff] %v10846_v9  ;;  %12823 = vst [vmem:[#allocation203_spill] sm:$0xff] %v10848_v51  ;;  %v4126_v2 = vpop.f32.mrb[247].mxu0  ;;  %v5278_v10 = vpop.f32.mrb[247].mxu1 }
 0x301   :  { %4336 = vmatmul.mubr.bf16.gmra.mrb[96].mxu0 %v8846_v43  ;;  %5488 = vmatmul.mubr.bf16.gmra.mrb[96].mxu1 %v8849_v44  ;;  %v8860_v44 = vld [vmem:[%s12619_s0 + $0x5a4] ss:$8 sps:$4 sm:$0xff]  }
 0x302   :  { %4343 = vmatprep.mubr.bf16.mxu0 %v8854_v52  ;;  %5495 = vmatprep.mubr.bf16.mxu1 %v8857_v1 }
 0x304   :  { %v10856_v27 = vpop.f32.mrb[248].mxu0  ;;  %v10858_v28 = vpop.f32.mrb[248].mxu1 }
 0x305   :  { %12824 = vst [vmem:[#allocation204_spill] sm:$0xff] %v10856_v27  ;;  %12825 = vst [vmem:[#allocation205_spill] sm:$0xff] %v10858_v28  ;;  %v4131_v9 = vpop.f32.mrb[249].mxu0  ;;  %v5283_v51 = vpop.f32.mrb[249].mxu1  ;;  %v8858_v28 = vld [vmem:[%s12619_s0 + $0x5a0] ss:$8 sps:$4 sm:$0xff]  }
 0x306   :  { %v10866_v2 = vpop.f32.mrb[250].mxu0  ;;  %v10868_v43 = vpop.f32.mrb[250].mxu1  ;;  %v8863_v9 = vld [vmem:[%s12619_s0 + $0xea4] ss:$8 sps:$4 sm:$0xff]   ;;  %v8861_v27 = vld [vmem:[%s12619_s0 + $0xea0] ss:$8 sps:$4 sm:$0xff]  }
 0x307   :  { %12826 = vst [vmem:[#allocation206_spill] sm:$0xff] %v10866_v2  ;;  %12827 = vst [vmem:[#allocation207_spill] sm:$0xff] %v10868_v43  ;;  %v4134_v51 = vpop.f32.mrb[251].mxu0  ;;  %v5286_v52 = vpop.f32.mrb[251].mxu1 }
 0x309   :  { %4344 = vmatmul.mubr.bf16.gmra.mrb[100].mxu0 %v8852_v26  ;;  %5496 = vmatmul.mubr.bf16.gmra.mrb[100].mxu1 %v8855_v25  ;;  %v8866_v25 = vld [vmem:[%s12619_s0 + $0x5b4] ss:$8 sps:$4 sm:$0xff]  }
 0x30a   :  { %4351 = vmatprep.mubr.bf16.mxu0 %v8860_v44  ;;  %5503 = vmatprep.mubr.bf16.mxu1 %v8863_v9 }
 0x30c   :  { %v10876_v1 = vpop.f32.mrb[252].mxu0  ;;  %v10878_v10 = vpop.f32.mrb[252].mxu1 }
 0x30d   :  { %12828 = vst [vmem:[#allocation208_spill] sm:$0xff] %v10876_v1  ;;  %12829 = vst [vmem:[#allocation209_spill] sm:$0xff] %v10878_v10  ;;  %v4139_v2 = vpop.f32.mrb[253].mxu0  ;;  %v5291_v43 = vpop.f32.mrb[253].mxu1  ;;  %v8864_v10 = vld [vmem:[%s12619_s0 + $0x5b0] ss:$8 sps:$4 sm:$0xff]  }
 0x30e   :  { %v10886_v51 = vpop.f32.mrb[254].mxu0  ;;  %v10888_v26 = vpop.f32.mrb[254].mxu1  ;;  %v8869_v2 = vld [vmem:[%s12619_s0 + $0xeb4] ss:$8 sps:$4 sm:$0xff]   ;;  %v8867_v1 = vld [vmem:[%s12619_s0 + $0xeb0] ss:$8 sps:$4 sm:$0xff]  }
 0x30f   :  { %12830 = vst [vmem:[#allocation210_spill] sm:$0xff] %v10886_v51  ;;  %12831 = vst [vmem:[#allocation211_spill] sm:$0xff] %v10888_v26  ;;  %v4142_v43 = vpop.f32.mrb[255].mxu0  ;;  %v5294_v44 = vpop.f32.mrb[255].mxu1 }
 0x311   :  { %4352 = vmatmul.mubr.bf16.gmra.mrb[104].mxu0 %v8858_v28  ;;  %5504 = vmatmul.mubr.bf16.gmra.mrb[104].mxu1 %v8861_v27  ;;  %v8872_v27 = vld [vmem:[%s12619_s0 + $0x5c4] ss:$8 sps:$4 sm:$0xff]  }
 0x312   :  { %4359 = vmatprep.mubr.bf16.mxu0 %v8866_v25  ;;  %5511 = vmatprep.mubr.bf16.mxu1 %v8869_v2 }
 0x314   :  { %v10896_v9 = vpop.f32.mrb[0].mxu0  ;;  %v10898_v52 = vpop.f32.mrb[0].mxu1 }
 0x315   :  { %12832 = vst [vmem:[#allocation212_spill] sm:$0xff] %v10896_v9  ;;  %12833 = vst [vmem:[#allocation213_spill] sm:$0xff] %v10898_v52  ;;  %v4147_v51 = vpop.f32.mrb[1].mxu0  ;;  %v5299_v26 = vpop.f32.mrb[1].mxu1  ;;  %v8870_v52 = vld [vmem:[%s12619_s0 + $0x5c0] ss:$8 sps:$4 sm:$0xff]  }
 0x316   :  { %v10906_v43 = vpop.f32.mrb[2].mxu0  ;;  %v10908_v28 = vpop.f32.mrb[2].mxu1  ;;  %v8875_v51 = vld [vmem:[%s12619_s0 + $0xec4] ss:$8 sps:$4 sm:$0xff]   ;;  %v8873_v9 = vld [vmem:[%s12619_s0 + $0xec0] ss:$8 sps:$4 sm:$0xff]  }
 0x317   :  { %12834 = vst [vmem:[#allocation214_spill] sm:$0xff] %v10906_v43  ;;  %12835 = vst [vmem:[#allocation215_spill] sm:$0xff] %v10908_v28  ;;  %v4150_v26 = vpop.f32.mrb[3].mxu0  ;;  %v5302_v25 = vpop.f32.mrb[3].mxu1 }
 0x319   :  { %4360 = vmatmul.mubr.bf16.gmra.mrb[108].mxu0 %v8864_v10  ;;  %5512 = vmatmul.mubr.bf16.gmra.mrb[108].mxu1 %v8867_v1  ;;  %v8878_v1 = vld [vmem:[%s12619_s0 + $0x5d4] ss:$8 sps:$4 sm:$0xff]  }
 0x31a   :  { %4367 = vmatprep.mubr.bf16.mxu0 %v8872_v27  ;;  %5519 = vmatprep.mubr.bf16.mxu1 %v8875_v51 }
 0x31c   :  { %v10916_v2 = vpop.f32.mrb[4].mxu0  ;;  %v10918_v44 = vpop.f32.mrb[4].mxu1 }
 0x31d   :  { %12836 = vst [vmem:[#allocation216_spill] sm:$0xff] %v10916_v2  ;;  %12837 = vst [vmem:[#allocation217_spill] sm:$0xff] %v10918_v44  ;;  %v4155_v43 = vpop.f32.mrb[5].mxu0  ;;  %v5307_v28 = vpop.f32.mrb[5].mxu1  ;;  %v8876_v44 = vld [vmem:[%s12619_s0 + $0x5d0] ss:$8 sps:$4 sm:$0xff]  }
 0x31e   :  { %v10926_v26 = vpop.f32.mrb[6].mxu0  ;;  %v10928_v10 = vpop.f32.mrb[6].mxu1  ;;  %v8881_v43 = vld [vmem:[%s12619_s0 + $0xed4] ss:$8 sps:$4 sm:$0xff]   ;;  %v8879_v2 = vld [vmem:[%s12619_s0 + $0xed0] ss:$8 sps:$4 sm:$0xff]  }
 0x31f   :  { %12838 = vst [vmem:[#allocation218_spill] sm:$0xff] %v10926_v26  ;;  %12839 = vst [vmem:[#allocation219_spill] sm:$0xff] %v10928_v10  ;;  %v4158_v28 = vpop.f32.mrb[7].mxu0  ;;  %v5310_v27 = vpop.f32.mrb[7].mxu1 }
 0x321   :  { %4368 = vmatmul.mubr.bf16.gmra.mrb[112].mxu0 %v8870_v52  ;;  %5520 = vmatmul.mubr.bf16.gmra.mrb[112].mxu1 %v8873_v9  ;;  %v8884_v9 = vld [vmem:[%s12619_s0 + $0x5e4] ss:$8 sps:$4 sm:$0xff]  }
 0x322   :  { %4375 = vmatprep.mubr.bf16.mxu0 %v8878_v1  ;;  %5527 = vmatprep.mubr.bf16.mxu1 %v8881_v43 }
 0x324   :  { %v10936_v51 = vpop.f32.mrb[8].mxu0  ;;  %v10938_v25 = vpop.f32.mrb[8].mxu1 }
 0x325   :  { %12840 = vst [vmem:[#allocation220_spill] sm:$0xff] %v10936_v51  ;;  %12841 = vst [vmem:[#allocation221_spill] sm:$0xff] %v10938_v25  ;;  %v4163_v26 = vpop.f32.mrb[9].mxu0  ;;  %v5315_v10 = vpop.f32.mrb[9].mxu1  ;;  %v8882_v25 = vld [vmem:[%s12619_s0 + $0x5e0] ss:$8 sps:$4 sm:$0xff]  }
 0x326   :  { %v10946_v28 = vpop.f32.mrb[10].mxu0  ;;  %v10948_v52 = vpop.f32.mrb[10].mxu1  ;;  %v8887_v26 = vld [vmem:[%s12619_s0 + $0xee4] ss:$8 sps:$4 sm:$0xff]   ;;  %v8885_v51 = vld [vmem:[%s12619_s0 + $0xee0] ss:$8 sps:$4 sm:$0xff]  }
 0x327   :  { %12842 = vst [vmem:[#allocation222_spill] sm:$0xff] %v10946_v28  ;;  %12843 = vst [vmem:[#allocation223_spill] sm:$0xff] %v10948_v52  ;;  %v4166_v10 = vpop.f32.mrb[11].mxu0  ;;  %v5318_v1 = vpop.f32.mrb[11].mxu1 }
 0x329   :  { %4376 = vmatmul.mubr.bf16.gmra.mrb[116].mxu0 %v8876_v44  ;;  %5528 = vmatmul.mubr.bf16.gmra.mrb[116].mxu1 %v8879_v2  ;;  %v8890_v2 = vld [vmem:[%s12619_s0 + $0x5f4] ss:$8 sps:$4 sm:$0xff]  }
 0x32a   :  { %4383 = vmatprep.mubr.bf16.mxu0 %v8884_v9  ;;  %5535 = vmatprep.mubr.bf16.mxu1 %v8887_v26 }
 0x32c   :  { %v10956_v43 = vpop.f32.mrb[12].mxu0  ;;  %v10958_v27 = vpop.f32.mrb[12].mxu1 }
 0x32d   :  { %12844 = vst [vmem:[#allocation224_spill] sm:$0xff] %v10956_v43  ;;  %12845 = vst [vmem:[#allocation225_spill] sm:$0xff] %v10958_v27  ;;  %v4171_v28 = vpop.f32.mrb[13].mxu0  ;;  %v5323_v52 = vpop.f32.mrb[13].mxu1  ;;  %v8888_v27 = vld [vmem:[%s12619_s0 + $0x5f0] ss:$8 sps:$4 sm:$0xff]  }
 0x32e   :  { %v10966_v10 = vpop.f32.mrb[14].mxu0  ;;  %v10968_v44 = vpop.f32.mrb[14].mxu1  ;;  %v8893_v28 = vld [vmem:[%s12619_s0 + $0xef4] ss:$8 sps:$4 sm:$0xff]   ;;  %v8891_v43 = vld [vmem:[%s12619_s0 + $0xef0] ss:$8 sps:$4 sm:$0xff]  }
 0x32f   :  { %12846 = vst [vmem:[#allocation226_spill] sm:$0xff] %v10966_v10  ;;  %12847 = vst [vmem:[#allocation227_spill] sm:$0xff] %v10968_v44  ;;  %v4174_v52 = vpop.f32.mrb[15].mxu0  ;;  %v5326_v9 = vpop.f32.mrb[15].mxu1 }
 0x331   :  { %4384 = vmatmul.mubr.bf16.gmra.mrb[120].mxu0 %v8882_v25  ;;  %5536 = vmatmul.mubr.bf16.gmra.mrb[120].mxu1 %v8885_v51  ;;  %v8896_v51 = vld [vmem:[%s12619_s0 + $0x604] ss:$8 sps:$4 sm:$0xff]  }
 0x332   :  { %4391 = vmatprep.mubr.bf16.mxu0 %v8890_v2  ;;  %5543 = vmatprep.mubr.bf16.mxu1 %v8893_v28 }
 0x334   :  { %v10976_v26 = vpop.f32.mrb[16].mxu0  ;;  %v10978_v1 = vpop.f32.mrb[16].mxu1 }
 0x335   :  { %12848 = vst [vmem:[#allocation228_spill] sm:$0xff] %v10976_v26  ;;  %12849 = vst [vmem:[#allocation229_spill] sm:$0xff] %v10978_v1  ;;  %v4179_v10 = vpop.f32.mrb[17].mxu0  ;;  %v5331_v44 = vpop.f32.mrb[17].mxu1  ;;  %v8894_v1 = vld [vmem:[%s12619_s0 + $0x600] ss:$8 sps:$4 sm:$0xff]  }
 0x336   :  { %v10986_v52 = vpop.f32.mrb[18].mxu0  ;;  %v10988_v25 = vpop.f32.mrb[18].mxu1  ;;  %v8899_v10 = vld [vmem:[%s12619_s0 + $0xf04] ss:$8 sps:$4 sm:$0xff]   ;;  %v8897_v26 = vld [vmem:[%s12619_s0 + $0xf00] ss:$8 sps:$4 sm:$0xff]  }
 0x337   :  { %12850 = vst [vmem:[#allocation230_spill] sm:$0xff] %v10986_v52  ;;  %12851 = vst [vmem:[#allocation231_spill] sm:$0xff] %v10988_v25  ;;  %v4182_v44 = vpop.f32.mrb[19].mxu0  ;;  %v5334_v2 = vpop.f32.mrb[19].mxu1 }
 0x339   :  { %4392 = vmatmul.mubr.bf16.gmra.mrb[124].mxu0 %v8888_v27  ;;  %5544 = vmatmul.mubr.bf16.gmra.mrb[124].mxu1 %v8891_v43  ;;  %v8902_v43 = vld [vmem:[%s12619_s0 + $0x614] ss:$8 sps:$4 sm:$0xff]  }
 0x33a   :  { %4399 = vmatprep.mubr.bf16.mxu0 %v8896_v51  ;;  %5551 = vmatprep.mubr.bf16.mxu1 %v8899_v10 }
 0x33c   :  { %v10996_v28 = vpop.f32.mrb[20].mxu0  ;;  %v10998_v9 = vpop.f32.mrb[20].mxu1 }
 0x33d   :  { %12852 = vst [vmem:[#allocation232_spill] sm:$0xff] %v10996_v28  ;;  %12853 = vst [vmem:[#allocation233_spill] sm:$0xff] %v10998_v9  ;;  %v4187_v52 = vpop.f32.mrb[21].mxu0  ;;  %v5339_v25 = vpop.f32.mrb[21].mxu1  ;;  %v8900_v9 = vld [vmem:[%s12619_s0 + $0x610] ss:$8 sps:$4 sm:$0xff]  }
 0x33e   :  { %v11006_v44 = vpop.f32.mrb[22].mxu0  ;;  %v11008_v27 = vpop.f32.mrb[22].mxu1  ;;  %v8905_v52 = vld [vmem:[%s12619_s0 + $0xf14] ss:$8 sps:$4 sm:$0xff]   ;;  %v8903_v28 = vld [vmem:[%s12619_s0 + $0xf10] ss:$8 sps:$4 sm:$0xff]  }
 0x33f   :  { %12854 = vst [vmem:[#allocation234_spill] sm:$0xff] %v11006_v44  ;;  %12855 = vst [vmem:[#allocation235_spill] sm:$0xff] %v11008_v27  ;;  %v4190_v25 = vpop.f32.mrb[23].mxu0  ;;  %v5342_v51 = vpop.f32.mrb[23].mxu1 }
 0x341   :  { %4400 = vmatmul.mubr.bf16.gmra.mrb[128].mxu0 %v8894_v1  ;;  %5552 = vmatmul.mubr.bf16.gmra.mrb[128].mxu1 %v8897_v26  ;;  %v8908_v26 = vld [vmem:[%s12619_s0 + $0x624] ss:$8 sps:$4 sm:$0xff]  }
 0x342   :  { %4407 = vmatprep.mubr.bf16.mxu0 %v8902_v43  ;;  %5559 = vmatprep.mubr.bf16.mxu1 %v8905_v52 }
 0x344   :  { %v11016_v10 = vpop.f32.mrb[24].mxu0  ;;  %v11018_v2 = vpop.f32.mrb[24].mxu1 }
 0x345   :  { %12856 = vst [vmem:[#allocation236_spill] sm:$0xff] %v11016_v10  ;;  %12857 = vst [vmem:[#allocation237_spill] sm:$0xff] %v11018_v2  ;;  %v4195_v44 = vpop.f32.mrb[25].mxu0  ;;  %v5347_v27 = vpop.f32.mrb[25].mxu1  ;;  %v8906_v2 = vld [vmem:[%s12619_s0 + $0x620] ss:$8 sps:$4 sm:$0xff]  }
 0x346   :  { %v11026_v25 = vpop.f32.mrb[26].mxu0  ;;  %v11028_v1 = vpop.f32.mrb[26].mxu1  ;;  %v8911_v44 = vld [vmem:[%s12619_s0 + $0xf24] ss:$8 sps:$4 sm:$0xff]   ;;  %v8909_v10 = vld [vmem:[%s12619_s0 + $0xf20] ss:$8 sps:$4 sm:$0xff]  }
 0x347   :  { %12858 = vst [vmem:[#allocation238_spill] sm:$0xff] %v11026_v25  ;;  %12859 = vst [vmem:[#allocation239_spill] sm:$0xff] %v11028_v1  ;;  %v4198_v27 = vpop.f32.mrb[27].mxu0  ;;  %v5350_v43 = vpop.f32.mrb[27].mxu1 }
 0x349   :  { %4408 = vmatmul.mubr.bf16.gmra.mrb[132].mxu0 %v8900_v9  ;;  %5560 = vmatmul.mubr.bf16.gmra.mrb[132].mxu1 %v8903_v28  ;;  %v8914_v28 = vld [vmem:[%s12619_s0 + $0x634] ss:$8 sps:$4 sm:$0xff]  }
 0x34a   :  { %4415 = vmatprep.mubr.bf16.mxu0 %v8908_v26  ;;  %5567 = vmatprep.mubr.bf16.mxu1 %v8911_v44 }
 0x34c   :  { %v11036_v52 = vpop.f32.mrb[28].mxu0  ;;  %v11038_v51 = vpop.f32.mrb[28].mxu1 }
 0x34d   :  { %12860 = vst [vmem:[#allocation240_spill] sm:$0xff] %v11036_v52  ;;  %12861 = vst [vmem:[#allocation241_spill] sm:$0xff] %v11038_v51  ;;  %v4203_v25 = vpop.f32.mrb[29].mxu0  ;;  %v5355_v1 = vpop.f32.mrb[29].mxu1 }
 0x34e   :  { %v11046_v27 = vpop.f32.mrb[30].mxu0  ;;  %v11048_v9 = vpop.f32.mrb[30].mxu1  ;;  %v8917_v25 = vld [vmem:[%s12619_s0 + $0xf34] ss:$8 sps:$4 sm:$0xff]  }
 0x34f   :  { %12862 = vst [vmem:[#allocation242_spill] sm:$0xff] %v11046_v27  ;;  %12863 = vst [vmem:[#allocation243_spill] sm:$0xff] %v11048_v9  ;;  %v4206_v1 = vpop.f32.mrb[31].mxu0  ;;  %v5358_v26 = vpop.f32.mrb[31].mxu1  ;;  %v11059_v9 = vld [vmem:[%s12620_s2] ss:$0 sm:$0xff] }
 0x350   :  { %v8920_v1 = vld [vmem:[%s12619_s0 + $0x644] ss:$8 sps:$4 sm:$0xff]  }
 0x351   :  { %4416 = vmatmul.mubr.bf16.gmra.mrb[136].mxu0 %v8906_v2  ;;  %5568 = vmatmul.mubr.bf16.gmra.mrb[136].mxu1 %v8909_v10  ;;  %v8912_v2 = vld [vmem:[%s12619_s0 + $0x630] ss:$8 sps:$4 sm:$0xff]  }
 0x352   :  { %4423 = vmatprep.mubr.bf16.mxu0 %v8914_v28  ;;  %5575 = vmatprep.mubr.bf16.mxu1 %v8917_v25  ;;  %v8915_v10 = vld [vmem:[%s12619_s0 + $0xf30] ss:$8 sps:$4 sm:$0xff]  }
 0x354   :  { %v4209_v44 = vpop.f32.mrb[32].mxu0  ;;  %v5361_v43 = vpop.f32.mrb[32].mxu1 }
 0x355   :  { %v5936_v27 = vmax.f32 %v9616_v63, %v4209_v44  ;;  %v6080_v51 = vmax.f32 %v9618_v0, %v5361_v43  ;;  %v4211_v52 = vpop.f32.mrb[33].mxu0  ;;  %v5363_v56 = vpop.f32.mrb[33].mxu1  ;;  %v8923_v63 = vld [vmem:[%s12619_s0 + $0xf44] ss:$8 sps:$4 sm:$0xff]  }
 0x356   :  { %v4212_v28 = vpop.f32.mrb[34].mxu0  ;;  %v5364_v25 = vpop.f32.mrb[34].mxu1 }
 0x357   :  { %v6224_v0 = vmax.f32 %v5936_v27, %v6080_v51  ;;  %v5937_v56 = vmax.f32 %v9626_v5, %v4212_v28  ;;  %v6081_v52 = vmax.f32 %v9628_v6, %v5364_v25  ;;  %v4214_v26 = vpop.f32.mrb[35].mxu0  ;;  %v5366_v44 = vpop.f32.mrb[35].mxu1  ;;  %v8918_v5 = vld [vmem:[%s12619_s0 + $0x640] ss:$8 sps:$4 sm:$0xff]  }
 0x358   :  { %v8921_v25 = vld [vmem:[%s12619_s0 + $0xf40] ss:$8 sps:$4 sm:$0xff]  }
 0x359   :  { %v6375_v43 = vadd.f32 %v11059_v9, %v6224_v0  ;;  %v6225_v55 = vmax.f32 %v5937_v56, %v6081_v52  ;;  %4424 = vmatmul.mubr.bf16.gmra.mrb[140].mxu0 %v8912_v2  ;;  %5576 = vmatmul.mubr.bf16.gmra.mrb[140].mxu1 %v8915_v10 }
 0x35a   :  { %4431 = vmatprep.mubr.bf16.mxu0 %v8920_v1  ;;  %5583 = vmatprep.mubr.bf16.mxu1 %v8923_v63  ;;  %v8926_v63 = vld [vmem:[%s12619_s0 + $0x654] ss:$8 sps:$4 sm:$0xff]  }
 0x35b   :  { %v6519_v38 = vmax.f32 %v6375_v43, 0.0  ;;  %v6376_v37 = vadd.f32 %v11059_v9, %v6225_v55 }
 0x35c   :  { %v4217_v16 = vpop.f32.mrb[36].mxu0  ;;  %v5369_v15 = vpop.f32.mrb[36].mxu1 }
 0x35d   :  { %v8125_v6 = vpack.c.bf16 %v6519_v38, %v6519_v38  ;;  %v6520_v51 = vmax.f32 %v6376_v37, 0.0  ;;  %v5938_v27 = vmax.f32 %v9636_v11, %v4217_v16  ;;  %v6082_v28 = vmax.f32 %v9638_v12, %v5369_v15  ;;  %v4219_v2 = vpop.f32.mrb[37].mxu0  ;;  %v5371_v10 = vpop.f32.mrb[37].mxu1  ;;  %v8929_v37 = vld [vmem:[%s12619_s0 + $0xf54] ss:$8 sps:$4 sm:$0xff]  }
 0x35e   :  { %v4220_v55 = vpop.f32.mrb[38].mxu0  ;;  %v5372_v1 = vpop.f32.mrb[38].mxu1  ;;  %v8927_v10 = vld [vmem:[%s12619_s0 + $0xf50] ss:$8 sps:$4 sm:$0xff]  }
 0x35f   :  { %7240 = vst.msk [vmem:[%s12621_s3] sm:$0xf] %vm7239_vm0, %v8125_v6  ;;  %v8126_v11 = vpack.c.bf16 %v6520_v51, %v6520_v51  ;;  %v6226_v12 = vmax.f32 %v5938_v27, %v6082_v28  ;;  %v5939_v15 = vmax.f32 %v9646_v17, %v4220_v55  ;;  %v6083_v16 = vmax.f32 %v9648_v18, %v5372_v1  ;;  %v4222_v38 = vpop.f32.mrb[39].mxu0  ;;  %v5374_v0 = vpop.f32.mrb[39].mxu1  ;;  %v8924_v18 = vld [vmem:[%s12619_s0 + $0x650] ss:$8 sps:$4 sm:$0xff]  }
 0x360   :  { %v8932_v1 = vld [vmem:[%s12619_s0 + $0x664] ss:$8 sps:$4 sm:$0xff]  }
 0x361   :  { %7241 = vst.msk [vmem:[%s12621_s3 + $0x4] sm:$0xf] %vm7239_vm0, %v8126_v11  ;;  %v6377_v56 = vadd.f32 %v11059_v9, %v6226_v12  ;;  %v6227_v52 = vmax.f32 %v5939_v15, %v6083_v16  ;;  %4432 = vmatmul.mubr.bf16.gmra.mrb[144].mxu0 %v8918_v5  ;;  %5584 = vmatmul.mubr.bf16.gmra.mrb[144].mxu1 %v8921_v25 }
 0x362   :  { %4439 = vmatprep.mubr.bf16.mxu0 %v8926_v63  ;;  %5591 = vmatprep.mubr.bf16.mxu1 %v8929_v37  ;;  %v8935_v63 = vld [vmem:[%s12619_s0 + $0xf64] ss:$8 sps:$4 sm:$0xff]  }
 0x363   :  { %v6521_v26 = vmax.f32 %v6377_v56, 0.0  ;;  %v6378_v44 = vadd.f32 %v11059_v9, %v6227_v52 }
 0x364   :  { %v4225_v17 = vpop.f32.mrb[40].mxu0  ;;  %v5377_v43 = vpop.f32.mrb[40].mxu1 }
 0x365   :  { %v8127_v6 = vpack.c.bf16 %v6521_v26, %v6521_v26  ;;  %v6522_v51 = vmax.f32 %v6378_v44, 0.0  ;;  %v5940_v27 = vmax.f32 %v9656_v23, %v4225_v17  ;;  %v6084_v28 = vmax.f32 %v9658_v24, %v5377_v43  ;;  %v4227_v2 = vpop.f32.mrb[41].mxu0  ;;  %v5379_v5 = vpop.f32.mrb[41].mxu1 }
 0x366   :  { %v4228_v25 = vpop.f32.mrb[42].mxu0  ;;  %v5380_v55 = vpop.f32.mrb[42].mxu1  ;;  %v8938_v2 = vld [vmem:[%s12619_s0 + $0x674] ss:$8 sps:$4 sm:$0xff]  }
 0x367   :  { %7242 = vst.msk [vmem:[%s12621_s3 + $0x8] sm:$0xf] %vm7239_vm0, %v8127_v6  ;;  %v8128_v23 = vpack.c.bf16 %v6522_v51, %v6522_v51  ;;  %v6228_v24 = vmax.f32 %v5940_v27, %v6084_v28  ;;  %v5941_v37 = vmax.f32 %v9666_v29, %v4228_v25  ;;  %v6085_v11 = vmax.f32 %v9668_v30, %v5380_v55  ;;  %v4230_v12 = vpop.f32.mrb[43].mxu0  ;;  %v5382_v15 = vpop.f32.mrb[43].mxu1  ;;  %v8930_v30 = vld [vmem:[%s12619_s0 + $0x660] ss:$8 sps:$4 sm:$0xff]  }
 0x368   :  { %v8933_v51 = vld [vmem:[%s12619_s0 + $0xf60] ss:$8 sps:$4 sm:$0xff]   ;;  %v8941_v5 = vld [vmem:[%s12619_s0 + $0xf74] ss:$8 sps:$4 sm:$0xff]  }
 0x369   :  { %7243 = vst.msk [vmem:[%s12621_s3 + $0xc] sm:$0xf] %vm7239_vm0, %v8128_v23  ;;  %v6379_v16 = vadd.f32 %v11059_v9, %v6228_v24  ;;  %v6229_v38 = vmax.f32 %v5941_v37, %v6085_v11  ;;  %4440 = vmatmul.mubr.bf16.gmra.mrb[148].mxu0 %v8924_v18  ;;  %5592 = vmatmul.mubr.bf16.gmra.mrb[148].mxu1 %v8927_v10 }
 0x36a   :  { %4447 = vmatprep.mubr.bf16.mxu0 %v8932_v1  ;;  %5599 = vmatprep.mubr.bf16.mxu1 %v8935_v63 }
 0x36b   :  { %v6523_v0 = vmax.f32 %v6379_v16, 0.0  ;;  %v6380_v56 = vadd.f32 %v11059_v9, %v6229_v38 }
 0x36c   :  { %v4233_v29 = vpop.f32.mrb[44].mxu0  ;;  %v5385_v52 = vpop.f32.mrb[44].mxu1 }
 0x36d   :  { %v8129_v26 = vpack.c.bf16 %v6523_v0, %v6523_v0  ;;  %v6524_v44 = vmax.f32 %v6380_v56, 0.0  ;;  %v5942_v17 = vmax.f32 %v9676_v35, %v4233_v29  ;;  %v6086_v43 = vmax.f32 %v9678_v36, %v5385_v52  ;;  %v4235_v6 = vpop.f32.mrb[45].mxu0  ;;  %v5387_v18 = vpop.f32.mrb[45].mxu1  ;;  %v8939_v29 = vld [vmem:[%s12619_s0 + $0xf70] ss:$8 sps:$4 sm:$0xff]  }
 0x36e   :  { %v4236_v27 = vpop.f32.mrb[46].mxu0  ;;  %v5388_v28 = vpop.f32.mrb[46].mxu1 }
 0x36f   :  { %7244 = vst.msk [vmem:[%s12621_s3 + $0x10] sm:$0xf] %vm7239_vm0, %v8129_v26  ;;  %v8130_v35 = vpack.c.bf16 %v6524_v44, %v6524_v44  ;;  %v6230_v36 = vmax.f32 %v5942_v17, %v6086_v43  ;;  %v5943_v10 = vmax.f32 %v9686_v41, %v4236_v27  ;;  %v6087_v25 = vmax.f32 %v9688_v42, %v5388_v28  ;;  %v4238_v55 = vpop.f32.mrb[47].mxu0  ;;  %v5390_v1 = vpop.f32.mrb[47].mxu1  ;;  %v8936_v42 = vld [vmem:[%s12619_s0 + $0x670] ss:$8 sps:$4 sm:$0xff]  }
 0x370   :  { %v8944_v26 = vld [vmem:[%s12619_s0 + $0x684] ss:$8 sps:$4 sm:$0xff]  }
 0x371   :  { %7245 = vst.msk [vmem:[%s12621_s3 + $0x14] sm:$0xf] %vm7239_vm0, %v8130_v35  ;;  %v6381_v63 = vadd.f32 %v11059_v9, %v6230_v36  ;;  %v6231_v23 = vmax.f32 %v5943_v10, %v6087_v25  ;;  %4448 = vmatmul.mubr.bf16.gmra.mrb[152].mxu0 %v8930_v30  ;;  %5600 = vmatmul.mubr.bf16.gmra.mrb[152].mxu1 %v8933_v51  ;;  %v8947_v44 = vld [vmem:[%s12619_s0 + $0xf84] ss:$8 sps:$4 sm:$0xff]  }
 0x372   :  { %4455 = vmatprep.mubr.bf16.mxu0 %v8938_v2  ;;  %5607 = vmatprep.mubr.bf16.mxu1 %v8941_v5 }
 0x373   :  { %v6525_v24 = vmax.f32 %v6381_v63, 0.0  ;;  %v6382_v37 = vadd.f32 %v11059_v9, %v6231_v23  ;;  %v8945_v63 = vld [vmem:[%s12619_s0 + $0xf80] ss:$8 sps:$4 sm:$0xff]  }
 0x374   :  { %v4241_v41 = vpop.f32.mrb[48].mxu0  ;;  %v5393_v11 = vpop.f32.mrb[48].mxu1 }
 0x375   :  { %v8131_v12 = vpack.c.bf16 %v6525_v24, %v6525_v24  ;;  %v6526_v15 = vmax.f32 %v6382_v37, 0.0  ;;  %v5944_v16 = vmax.f32 %v9696_v47, %v4241_v41  ;;  %v6088_v38 = vmax.f32 %v9698_v48, %v5393_v11  ;;  %v4243_v0 = vpop.f32.mrb[49].mxu0  ;;  %v5395_v56 = vpop.f32.mrb[49].mxu1  ;;  %v8950_v37 = vld [vmem:[%s12619_s0 + $0x694] ss:$8 sps:$4 sm:$0xff]  }
 0x376   :  { %v4244_v52 = vpop.f32.mrb[50].mxu0  ;;  %v5396_v30 = vpop.f32.mrb[50].mxu1  ;;  %v8953_v41 = vld [vmem:[%s12619_s0 + $0xf94] ss:$8 sps:$4 sm:$0xff]  }
 0x377   :  { %7246 = vst.msk [vmem:[%s12621_s3 + $0x18] sm:$0xf] %vm7239_vm0, %v8131_v12  ;;  %v8132_v47 = vpack.c.bf16 %v6526_v15, %v6526_v15  ;;  %v6232_v48 = vmax.f32 %v5944_v16, %v6088_v38  ;;  %v5945_v17 = vmax.f32 %v9706_v53, %v4244_v52  ;;  %v6089_v43 = vmax.f32 %v9708_v54, %v5396_v30  ;;  %v4246_v6 = vpop.f32.mrb[51].mxu0  ;;  %v5398_v18 = vpop.f32.mrb[51].mxu1  ;;  %v8942_v54 = vld [vmem:[%s12619_s0 + $0x680] ss:$8 sps:$4 sm:$0xff]  }
 0x378   :  { %v8956_v18 = vld [vmem:[%s12619_s0 + $0x6a4] ss:$8 sps:$4 sm:$0xff]  }
 0x379   :  { %7247 = vst.msk [vmem:[%s12621_s3 + $0x1c] sm:$0xf] %vm7239_vm0, %v8132_v47  ;;  %v6383_v51 = vadd.f32 %v11059_v9, %v6232_v48  ;;  %v6233_v27 = vmax.f32 %v5945_v17, %v6089_v43  ;;  %4456 = vmatmul.mubr.bf16.gmra.mrb[156].mxu0 %v8936_v42  ;;  %5608 = vmatmul.mubr.bf16.gmra.mrb[156].mxu1 %v8939_v29  ;;  %v8951_v17 = vld [vmem:[%s12619_s0 + $0xf90] ss:$8 sps:$4 sm:$0xff]  }
 0x37a   :  { %4463 = vmatprep.mubr.bf16.mxu0 %v8944_v26  ;;  %5615 = vmatprep.mubr.bf16.mxu1 %v8947_v44 }
 0x37b   :  { %v6527_v28 = vmax.f32 %v6383_v51, 0.0  ;;  %v6384_v2 = vadd.f32 %v11059_v9, %v6233_v27  ;;  %v8959_v51 = vld [vmem:[%s12619_s0 + $0xfa4] ss:$8 sps:$4 sm:$0xff]  }
 0x37c   :  { %v4249_v53 = vpop.f32.mrb[52].mxu0  ;;  %v5401_v5 = vpop.f32.mrb[52].mxu1 }
 0x37d   :  { %v8133_v35 = vpack.c.bf16 %v6527_v28, %v6527_v28  ;;  %v6528_v36 = vmax.f32 %v6384_v2, 0.0  ;;  %v5946_v10 = vmax.f32 %v9716_v59, %v4249_v53  ;;  %v6090_v25 = vmax.f32 %v9718_v60, %v5401_v5  ;;  %v4251_v55 = vpop.f32.mrb[53].mxu0  ;;  %v5403_v1 = vpop.f32.mrb[53].mxu1 }
 0x37e   :  { %v4252_v23 = vpop.f32.mrb[54].mxu0  ;;  %v5404_v24 = vpop.f32.mrb[54].mxu1 }
 0x37f   :  { %7248 = vst.msk [vmem:[%s12621_s3 + $0x20] sm:$0xf] %vm7239_vm0, %v8133_v35  ;;  %v8134_v59 = vpack.c.bf16 %v6528_v36, %v6528_v36  ;;  %v6234_v60 = vmax.f32 %v5946_v10, %v6090_v25  ;;  %v5947_v11 = vmax.f32 %v9726_v3, %v4252_v23  ;;  %v6091_v42 = vmax.f32 %v9728_v4, %v5404_v24  ;;  %v4254_v12 = vpop.f32.mrb[55].mxu0  ;;  %v5406_v15 = vpop.f32.mrb[55].mxu1  ;;  %v8948_v4 = vld [vmem:[%s12619_s0 + $0x690] ss:$8 sps:$4 sm:$0xff]  }
 0x381   :  { %7249 = vst.msk [vmem:[%s12621_s3 + $0x24] sm:$0xf] %vm7239_vm0, %v8134_v59  ;;  %v6385_v16 = vadd.f32 %v11059_v9, %v6234_v60  ;;  %v6235_v38 = vmax.f32 %v5947_v11, %v6091_v42  ;;  %4464 = vmatmul.mubr.bf16.gmra.mrb[160].mxu0 %v8942_v54  ;;  %5616 = vmatmul.mubr.bf16.gmra.mrb[160].mxu1 %v8945_v63  ;;  %v8962_v60 = vld [vmem:[%s12619_s0 + $0x6b4] ss:$8 sps:$4 sm:$0xff]  }
 0x382   :  { %4471 = vmatprep.mubr.bf16.mxu0 %v8950_v37  ;;  %5623 = vmatprep.mubr.bf16.mxu1 %v8953_v41  ;;  %v8957_v37 = vld [vmem:[%s12619_s0 + $0xfa0] ss:$8 sps:$4 sm:$0xff]   ;;  %v8965_v11 = vld [vmem:[%s12619_s0 + $0xfb4] ss:$8 sps:$4 sm:$0xff]  }
 0x383   :  { %v6529_v0 = vmax.f32 %v6385_v16, 0.0  ;;  %v6386_v56 = vadd.f32 %v11059_v9, %v6235_v38 }
 0x384   :  { %v4257_v3 = vpop.f32.mrb[56].mxu0  ;;  %v5409_v29 = vpop.f32.mrb[56].mxu1 }
 0x385   :  { %v8135_v52 = vpack.c.bf16 %v6529_v0, %v6529_v0  ;;  %v6530_v30 = vmax.f32 %v6386_v56, 0.0  ;;  %v5948_v26 = vmax.f32 %v9736_v13, %v4257_v3  ;;  %v6092_v44 = vmax.f32 %v9738_v14, %v5409_v29  ;;  %v4259_v47 = vpop.f32.mrb[57].mxu0  ;;  %v5411_v48 = vpop.f32.mrb[57].mxu1 }
 0x386   :  { %v4260_v43 = vpop.f32.mrb[58].mxu0  ;;  %v5412_v6 = vpop.f32.mrb[58].mxu1  ;;  %v8963_v48 = vld [vmem:[%s12619_s0 + $0xfb0] ss:$8 sps:$4 sm:$0xff]  }
 0x387   :  { %7250 = vst.msk [vmem:[%s12621_s3 + $0x28] sm:$0xf] %vm7239_vm0, %v8135_v52  ;;  %v8136_v13 = vpack.c.bf16 %v6530_v30, %v6530_v30  ;;  %v6236_v14 = vmax.f32 %v5948_v26, %v6092_v44  ;;  %v5949_v27 = vmax.f32 %v9746_v21, %v4260_v43  ;;  %v6093_v28 = vmax.f32 %v9748_v22, %v5412_v6  ;;  %v4262_v2 = vpop.f32.mrb[59].mxu0  ;;  %v5414_v53 = vpop.f32.mrb[59].mxu1  ;;  %v8954_v22 = vld [vmem:[%s12619_s0 + $0x6a0] ss:$8 sps:$4 sm:$0xff]  }
 0x388   :  { %v8968_v6 = vld [vmem:[%s12619_s0 + $0x6c4] ss:$8 sps:$4 sm:$0xff]  }
 0x389   :  { %7251 = vst.msk [vmem:[%s12621_s3 + $0x2c] sm:$0xf] %vm7239_vm0, %v8136_v13  ;;  %v6387_v5 = vadd.f32 %v11059_v9, %v6236_v14  ;;  %v6237_v54 = vmax.f32 %v5949_v27, %v6093_v28  ;;  %4472 = vmatmul.mubr.bf16.gmra.mrb[164].mxu0 %v8948_v4  ;;  %5624 = vmatmul.mubr.bf16.gmra.mrb[164].mxu1 %v8951_v17 }
 0x38a   :  { %4479 = vmatprep.mubr.bf16.mxu0 %v8956_v18  ;;  %5631 = vmatprep.mubr.bf16.mxu1 %v8959_v51  ;;  %v8971_v18 = vld [vmem:[%s12619_s0 + $0xfc4] ss:$8 sps:$4 sm:$0xff]  }
 0x38b   :  { %v6531_v35 = vmax.f32 %v6387_v5, 0.0  ;;  %v6388_v36 = vadd.f32 %v11059_v9, %v6237_v54 }
 0x38c   :  { %v4265_v21 = vpop.f32.mrb[60].mxu0  ;;  %v5417_v10 = vpop.f32.mrb[60].mxu1 }
 0x38d   :  { %v8137_v25 = vpack.c.bf16 %v6531_v35, %v6531_v35  ;;  %v6532_v55 = vmax.f32 %v6388_v36, 0.0  ;;  %v5950_v1 = vmax.f32 %v9756_v31, %v4265_v21  ;;  %v6094_v63 = vmax.f32 %v9758_v32, %v5417_v10  ;;  %v4267_v23 = vpop.f32.mrb[61].mxu0  ;;  %v5419_v24 = vpop.f32.mrb[61].mxu1 }
 0x38e   :  { %v4268_v41 = vpop.f32.mrb[62].mxu0  ;;  %v5420_v59 = vpop.f32.mrb[62].mxu1  ;;  %v8974_v23 = vld [vmem:[%s12619_s0 + $0x6d4] ss:$8 sps:$4 sm:$0xff]  }
 0x38f   :  { %7252 = vst.msk [vmem:[%s12621_s3 + $0x30] sm:$0xf] %vm7239_vm0, %v8137_v25  ;;  %v8138_v31 = vpack.c.bf16 %v6532_v55, %v6532_v55  ;;  %v6238_v32 = vmax.f32 %v5950_v1, %v6094_v63  ;;  %v5951_v42 = vmax.f32 %v9766_v39, %v4268_v41  ;;  %v6095_v12 = vmax.f32 %v9768_v40, %v5420_v59  ;;  %v4270_v15 = vpop.f32.mrb[63].mxu0  ;;  %v5422_v16 = vpop.f32.mrb[63].mxu1  ;;  %v8960_v40 = vld [vmem:[%s12619_s0 + $0x6b0] ss:$8 sps:$4 sm:$0xff]  }
 0x390   :  { %v8969_v55 = vld [vmem:[%s12619_s0 + $0xfc0] ss:$8 sps:$4 sm:$0xff]   ;;  %v8977_v24 = vld [vmem:[%s12619_s0 + $0xfd4] ss:$8 sps:$4 sm:$0xff]  }
 0x391   :  { %7253 = vst.msk [vmem:[%s12621_s3 + $0x34] sm:$0xf] %vm7239_vm0, %v8138_v31  ;;  %v6389_v38 = vadd.f32 %v11059_v9, %v6238_v32  ;;  %v6239_v0 = vmax.f32 %v5951_v42, %v6095_v12  ;;  %4480 = vmatmul.mubr.bf16.gmra.mrb[168].mxu0 %v8954_v22  ;;  %5632 = vmatmul.mubr.bf16.gmra.mrb[168].mxu1 %v8957_v37 }
 0x392   :  { %4487 = vmatprep.mubr.bf16.mxu0 %v8962_v60  ;;  %5639 = vmatprep.mubr.bf16.mxu1 %v8965_v11 }
 0x393   :  { %v6533_v56 = vmax.f32 %v6389_v38, 0.0  ;;  %v6390_v3 = vadd.f32 %v11059_v9, %v6239_v0 }
 0x394   :  { %v4273_v39 = vpop.f32.mrb[64].mxu0  ;;  %v5425_v29 = vpop.f32.mrb[64].mxu1 }
 0x395   :  { %v8139_v4 = vpack.c.bf16 %v6533_v56, %v6533_v56  ;;  %v6534_v52 = vmax.f32 %v6390_v3, 0.0  ;;  %v5952_v30 = vmax.f32 %v9776_v49, %v4273_v39  ;;  %v6096_v26 = vmax.f32 %v9778_v50, %v5425_v29  ;;  %v4275_v44 = vpop.f32.mrb[65].mxu0  ;;  %v5427_v47 = vpop.f32.mrb[65].mxu1  ;;  %v8975_v39 = vld [vmem:[%s12619_s0 + $0xfd0] ss:$8 sps:$4 sm:$0xff]  }
 0x396   :  { %v4276_v17 = vpop.f32.mrb[66].mxu0  ;;  %v5428_v43 = vpop.f32.mrb[66].mxu1 }
 0x397   :  { %7254 = vst.msk [vmem:[%s12621_s3 + $0x38] sm:$0xf] %vm7239_vm0, %v8139_v4  ;;  %v8140_v49 = vpack.c.bf16 %v6534_v52, %v6534_v52  ;;  %v6240_v50 = vmax.f32 %v5952_v30, %v6096_v26  ;;  %v5953_v51 = vmax.f32 %v9786_v57, %v4276_v17  ;;  %v6097_v13 = vmax.f32 %v9788_v58, %v5428_v43  ;;  %v4278_v14 = vpop.f32.mrb[67].mxu0  ;;  %v5430_v27 = vpop.f32.mrb[67].mxu1  ;;  %v8966_v58 = vld [vmem:[%s12619_s0 + $0x6c0] ss:$8 sps:$4 sm:$0xff]  }
 0x398   :  { %v8980_v4 = vld [vmem:[%s12619_s0 + $0x6e4] ss:$8 sps:$4 sm:$0xff]  }
 0x399   :  { %7255 = vst.msk [vmem:[%s12621_s3 + $0x3c] sm:$0xf] %vm7239_vm0, %v8140_v49  ;;  %v6391_v28 = vadd.f32 %v11059_v9, %v6240_v50  ;;  %v6241_v2 = vmax.f32 %v5953_v51, %v6097_v13  ;;  %4488 = vmatmul.mubr.bf16.gmra.mrb[172].mxu0 %v8960_v40  ;;  %5640 = vmatmul.mubr.bf16.gmra.mrb[172].mxu1 %v8963_v48  ;;  %v8983_v52 = vld [vmem:[%s12619_s0 + $0xfe4] ss:$8 sps:$4 sm:$0xff]  }
 0x39a   :  { %4495 = vmatprep.mubr.bf16.mxu0 %v8968_v6  ;;  %5647 = vmatprep.mubr.bf16.mxu1 %v8971_v18 }
 0x39b   :  { %v6535_v53 = vmax.f32 %v6391_v28, 0.0  ;;  %v6392_v5 = vadd.f32 %v11059_v9, %v6241_v2  ;;  %v8981_v28 = vld [vmem:[%s12619_s0 + $0xfe0] ss:$8 sps:$4 sm:$0xff]  }
 0x39c   :  { %v4281_v57 = vpop.f32.mrb[68].mxu0  ;;  %v5433_v54 = vpop.f32.mrb[68].mxu1 }
 0x39d   :  { %v8141_v35 = vpack.c.bf16 %v6535_v53, %v6535_v53  ;;  %v6536_v36 = vmax.f32 %v6392_v5, 0.0  ;;  %v5954_v21 = vmax.f32 %v9796_v7, %v4281_v57  ;;  %v6098_v10 = vmax.f32 %v9798_v8, %v5433_v54  ;;  %v4283_v22 = vpop.f32.mrb[69].mxu0  ;;  %v5435_v25 = vpop.f32.mrb[69].mxu1  ;;  %v8986_v5 = vld [vmem:[%s12619_s0 + $0x6f4] ss:$8 sps:$4 sm:$0xff]   ;;  %v12864_v54 = vld [vmem:[#allocation2_spill] sm:$0xff] }
 0x39e   :  { %v4284_v1 = vpop.f32.mrb[70].mxu0  ;;  %v5436_v63 = vpop.f32.mrb[70].mxu1  ;;  %v8989_v57 = vld [vmem:[%s12619_s0 + $0xff4] ss:$8 sps:$4 sm:$0xff]  }
 0x39f   :  { %7256 = vst.msk [vmem:[%s12621_s3 + $0x40] sm:$0xf] %vm7239_vm0, %v8141_v35  ;;  %v8142_v7 = vpack.c.bf16 %v6536_v36, %v6536_v36  ;;  %v6242_v8 = vmax.f32 %v5954_v21, %v6098_v10  ;;  %v5955_v37 = vmax.f32 %v9806_v19, %v4284_v1  ;;  %v6099_v41 = vmax.f32 %v9808_v20, %v5436_v63  ;;  %v4286_v59 = vpop.f32.mrb[71].mxu0  ;;  %v5438_v60 = vpop.f32.mrb[71].mxu1  ;;  %v8972_v20 = vld [vmem:[%s12619_s0 + $0x6d0] ss:$8 sps:$4 sm:$0xff]  }
 0x3a0   :  { %v12865_v35 = vld [vmem:[#allocation3_spill] sm:$0xff]  ;;  %v12867_v59 = vld [vmem:[#allocation5_spill] sm:$0xff] }
 0x3a1   :  { %7257 = vst.msk [vmem:[%s12621_s3 + $0x44] sm:$0xf] %vm7239_vm0, %v8142_v7  ;;  %v6393_v11 = vadd.f32 %v11059_v9, %v6242_v8  ;;  %v6243_v31 = vmax.f32 %v5955_v37, %v6099_v41  ;;  %4496 = vmatmul.mubr.bf16.gmra.mrb[176].mxu0 %v8966_v58  ;;  %5648 = vmatmul.mubr.bf16.gmra.mrb[176].mxu1 %v8969_v55  ;;  %v12866_v37 = vld [vmem:[#allocation4_spill] sm:$0xff] }
 0x3a2   :  { %4503 = vmatprep.mubr.bf16.mxu0 %v8974_v23  ;;  %5655 = vmatprep.mubr.bf16.mxu1 %v8977_v24  ;;  %v8984_v24 = vld [vmem:[%s12619_s0 + $0x6f0] ss:$8 sps:$4 sm:$0xff]  }
 0x3a3   :  { %v6537_v32 = vmax.f32 %v6393_v11, 0.0  ;;  %v6394_v42 = vadd.f32 %v11059_v9, %v6243_v31 }
 0x3a4   :  { %v4289_v19 = vpop.f32.mrb[72].mxu0  ;;  %v5441_v12 = vpop.f32.mrb[72].mxu1 }
 0x3a5   :  { %v8143_v15 = vpack.c.bf16 %v6537_v32, %v6537_v32  ;;  %v6538_v16 = vmax.f32 %v6394_v42, 0.0  ;;  %v5956_v38 = vmax.f32 %v9816_v33, %v4289_v19  ;;  %v6100_v0 = vmax.f32 %v9818_v34, %v5441_v12  ;;  %v4291_v56 = vpop.f32.mrb[73].mxu0  ;;  %v5443_v3 = vpop.f32.mrb[73].mxu1  ;;  %v8987_v32 = vld [vmem:[%s12619_s0 + $0xff0] ss:$8 sps:$4 sm:$0xff]  }
 0x3a6   :  { %v4292_v29 = vpop.f32.mrb[74].mxu0  ;;  %v5444_v40 = vpop.f32.mrb[74].mxu1  ;;  %v8992_v12 = vld [vmem:[%s12619_s0 + $0x704] ss:$8 sps:$4 sm:$0xff]  }
 0x3a7   :  { %7258 = vst.msk [vmem:[%s12621_s3 + $0x48] sm:$0xf] %vm7239_vm0, %v8143_v15  ;;  %v8144_v33 = vpack.c.bf16 %v6538_v16, %v6538_v16  ;;  %v6244_v34 = vmax.f32 %v5956_v38, %v6100_v0  ;;  %v5957_v30 = vmax.f32 %v9826_v45, %v4292_v29  ;;  %v6101_v26 = vmax.f32 %v9828_v46, %v5444_v40  ;;  %v4294_v44 = vpop.f32.mrb[75].mxu0  ;;  %v5446_v47 = vpop.f32.mrb[75].mxu1  ;;  %v8978_v46 = vld [vmem:[%s12619_s0 + $0x6e0] ss:$8 sps:$4 sm:$0xff]  }
 0x3a8   :  { %v12868_v38 = vld [vmem:[#allocation6_spill] sm:$0xff]  ;;  %v12869_v56 = vld [vmem:[#allocation7_spill] sm:$0xff] }
 0x3a9   :  { %7259 = vst.msk [vmem:[%s12621_s3 + $0x4c] sm:$0xf] %vm7239_vm0, %v8144_v33  ;;  %v6395_v48 = vadd.f32 %v11059_v9, %v6244_v34  ;;  %v6245_v17 = vmax.f32 %v5957_v30, %v6101_v26  ;;  %4504 = vmatmul.mubr.bf16.gmra.mrb[180].mxu0 %v8972_v20  ;;  %5656 = vmatmul.mubr.bf16.gmra.mrb[180].mxu1 %v8975_v39  ;;  %v8995_v20 = vld [vmem:[%s12619_s0 + $0x1004] ss:$8 sps:$4 sm:$0xff]   ;;  %v8990_v26 = vld [vmem:[%s12619_s0 + $0x700] ss:$8 sps:$4 sm:$0xff]  }
 0x3aa   :  { %4511 = vmatprep.mubr.bf16.mxu0 %v8980_v4  ;;  %5663 = vmatprep.mubr.bf16.mxu1 %v8983_v52 }
 0x3ab   :  { %v6539_v43 = vmax.f32 %v6395_v48, 0.0  ;;  %v6396_v6 = vadd.f32 %v11059_v9, %v6245_v17  ;;  %v12870_v48 = vld [vmem:[#allocation8_spill] sm:$0xff] }
 0x3ac   :  { %v4297_v45 = vpop.f32.mrb[76].mxu0  ;;  %v5449_v18 = vpop.f32.mrb[76].mxu1 }
 0x3ad   :  { %v8145_v49 = vpack.c.bf16 %v6539_v43, %v6539_v43  ;;  %v6540_v50 = vmax.f32 %v6396_v6, 0.0  ;;  %v5958_v51 = vmax.f32 %v9836_v61, %v4297_v45  ;;  %v6102_v13 = vmax.f32 %v9838_v62, %v5449_v18  ;;  %v4299_v14 = vpop.f32.mrb[77].mxu0  ;;  %v5451_v27 = vpop.f32.mrb[77].mxu1  ;;  %v12871_v43 = vld [vmem:[#allocation9_spill] sm:$0xff] }
 0x3ae   :  { %v4300_v2 = vpop.f32.mrb[78].mxu0  ;;  %v5452_v53 = vpop.f32.mrb[78].mxu1 }
 0x3af   :  { %7260 = vst.msk [vmem:[%s12621_s3 + $0x50] sm:$0xf] %vm7239_vm0, %v8145_v49  ;;  %v8146_v61 = vpack.c.bf16 %v6540_v50, %v6540_v50  ;;  %v6246_v62 = vmax.f32 %v5958_v51, %v6102_v13  ;;  %v5959_v58 = vmax.f32 %v12864_v54, %v4300_v2  ;;  %v6103_v36 = vmax.f32 %v12865_v35, %v5452_v53  ;;  %v4302_v21 = vpop.f32.mrb[79].mxu0  ;;  %v5454_v10 = vpop.f32.mrb[79].mxu1  ;;  %v8998_v51 = vld [vmem:[%s12619_s0 + $0x714] ss:$8 sps:$4 sm:$0xff]  }
 0x3b0   :  { %v9001_v13 = vld [vmem:[%s12619_s0 + $0x1014] ss:$8 sps:$4 sm:$0xff]   ;;  %v12873_v53 = vld [vmem:[#allocation11_spill] sm:$0xff]  ;;  %v8996_v10 = vld [vmem:[%s12619_s0 + $0x710] ss:$8 sps:$4 sm:$0xff]  }
 0x3b1   :  { %7261 = vst.msk [vmem:[%s12621_s3 + $0x54] sm:$0xf] %vm7239_vm0, %v8146_v61  ;;  %v6397_v22 = vadd.f32 %v11059_v9, %v6246_v62  ;;  %v6247_v25 = vmax.f32 %v5959_v58, %v6103_v36  ;;  %4512 = vmatmul.mubr.bf16.gmra.mrb[184].mxu0 %v8978_v46  ;;  %5664 = vmatmul.mubr.bf16.gmra.mrb[184].mxu1 %v8981_v28  ;;  %v8993_v46 = vld [vmem:[%s12619_s0 + $0x1000] ss:$8 sps:$4 sm:$0xff]  }
 0x3b2   :  { %4519 = vmatprep.mubr.bf16.mxu0 %v8986_v5  ;;  %5671 = vmatprep.mubr.bf16.mxu1 %v8989_v57  ;;  %v12872_v28 = vld [vmem:[#allocation10_spill] sm:$0xff] }
 0x3b3   :  { %v6541_v55 = vmax.f32 %v6397_v22, 0.0  ;;  %v6398_v1 = vadd.f32 %v11059_v9, %v6247_v25 }
 0x3b4   :  { %v4305_v63 = vpop.f32.mrb[80].mxu0  ;;  %v5457_v23 = vpop.f32.mrb[80].mxu1 }
 0x3b5   :  { %v8147_v7 = vpack.c.bf16 %v6541_v55, %v6541_v55  ;;  %v6542_v8 = vmax.f32 %v6398_v1, 0.0  ;;  %v5960_v41 = vmax.f32 %v12866_v37, %v4305_v63  ;;  %v6104_v60 = vmax.f32 %v12867_v59, %v5457_v23  ;;  %v4307_v11 = vpop.f32.mrb[81].mxu0  ;;  %v5459_v31 = vpop.f32.mrb[81].mxu1  ;;  %v12874_v55 = vld [vmem:[#allocation12_spill] sm:$0xff]  ;;  %v12875_v63 = vld [vmem:[#allocation13_spill] sm:$0xff] }
 0x3b6   :  { %v4308_v42 = vpop.f32.mrb[82].mxu0  ;;  %v5460_v19 = vpop.f32.mrb[82].mxu1  ;;  %v9004_v59 = vld [vmem:[%s12619_s0 + $0x724] ss:$8 sps:$4 sm:$0xff]  }
 0x3b7   :  { %7262 = vst.msk [vmem:[%s12621_s3 + $0x58] sm:$0xf] %vm7239_vm0, %v8147_v7  ;;  %v8148_v15 = vpack.c.bf16 %v6542_v8, %v6542_v8  ;;  %v6248_v16 = vmax.f32 %v5960_v41, %v6104_v60  ;;  %v5961_v0 = vmax.f32 %v12868_v38, %v4308_v42  ;;  %v6105_v3 = vmax.f32 %v12869_v56, %v5460_v19  ;;  %v4310_v39 = vpop.f32.mrb[83].mxu0  ;;  %v5462_v29 = vpop.f32.mrb[83].mxu1  ;;  %v8999_v8 = vld [vmem:[%s12619_s0 + $0x1010] ss:$8 sps:$4 sm:$0xff]  }
 0x3b8   :  { %v9007_v60 = vld [vmem:[%s12619_s0 + $0x1024] ss:$8 sps:$4 sm:$0xff]   ;;  %v9002_v29 = vld [vmem:[%s12619_s0 + $0x720] ss:$8 sps:$4 sm:$0xff]  }
 0x3b9   :  { %7263 = vst.msk [vmem:[%s12621_s3 + $0x5c] sm:$0xf] %vm7239_vm0, %v8148_v15  ;;  %v6399_v40 = vadd.f32 %v11059_v9, %v6248_v16  ;;  %v6249_v4 = vmax.f32 %v5961_v0, %v6105_v3  ;;  %4520 = vmatmul.mubr.bf16.gmra.mrb[188].mxu0 %v8984_v24  ;;  %5672 = vmatmul.mubr.bf16.gmra.mrb[188].mxu1 %v8987_v32  ;;  %v12876_v32 = vld [vmem:[#allocation14_spill] sm:$0xff]  ;;  %v12877_v19 = vld [vmem:[#allocation15_spill] sm:$0xff] }
 0x3ba   :  { %4527 = vmatprep.mubr.bf16.mxu0 %v8992_v12  ;;  %5679 = vmatprep.mubr.bf16.mxu1 %v8995_v20 }
 0x3bb   :  { %v6543_v52 = vmax.f32 %v6399_v40, 0.0  ;;  %v6400_v33 = vadd.f32 %v11059_v9, %v6249_v4 }
 0x3bc   :  { %v4313_v34 = vpop.f32.mrb[84].mxu0  ;;  %v5465_v30 = vpop.f32.mrb[84].mxu1 }
 0x3bd   :  { %v8149_v44 = vpack.c.bf16 %v6543_v52, %v6543_v52  ;;  %v6544_v47 = vmax.f32 %v6400_v33, 0.0  ;;  %v5962_v17 = vmax.f32 %v12870_v48, %v4313_v34  ;;  %v6106_v6 = vmax.f32 %v12871_v43, %v5465_v30  ;;  %v4315_v45 = vpop.f32.mrb[85].mxu0  ;;  %v5467_v18 = vpop.f32.mrb[85].mxu1  ;;  %v12878_v52 = vld [vmem:[#allocation16_spill] sm:$0xff]  ;;  %v12879_v34 = vld [vmem:[#allocation17_spill] sm:$0xff] }
 0x3be   :  { %v4316_v49 = vpop.f32.mrb[86].mxu0  ;;  %v5468_v50 = vpop.f32.mrb[86].mxu1  ;;  %v9010_v43 = vld [vmem:[%s12619_s0 + $0x734] ss:$8 sps:$4 sm:$0xff]  }
 0x3bf   :  { %7264 = vst.msk [vmem:[%s12621_s3 + $0x60] sm:$0xf] %vm7239_vm0, %v8149_v44  ;;  %v8150_v14 = vpack.c.bf16 %v6544_v47, %v6544_v47  ;;  %v6250_v27 = vmax.f32 %v5962_v17, %v6106_v6  ;;  %v5963_v2 = vmax.f32 %v12872_v28, %v4316_v49  ;;  %v6107_v5 = vmax.f32 %v12873_v53, %v5468_v50  ;;  %v4318_v57 = vpop.f32.mrb[87].mxu0  ;;  %v5470_v61 = vpop.f32.mrb[87].mxu1  ;;  %v9005_v47 = vld [vmem:[%s12619_s0 + $0x1020] ss:$8 sps:$4 sm:$0xff]  }
 0x3c0   :  { %v9013_v6 = vld [vmem:[%s12619_s0 + $0x1034] ss:$8 sps:$4 sm:$0xff]   ;;  %v12881_v50 = vld [vmem:[#allocation19_spill] sm:$0xff]  ;;  %v9008_v61 = vld [vmem:[%s12619_s0 + $0x730] ss:$8 sps:$4 sm:$0xff]  }
 0x3c1   :  { %7265 = vst.msk [vmem:[%s12621_s3 + $0x64] sm:$0xf] %vm7239_vm0, %v8150_v14  ;;  %v6401_v62 = vadd.f32 %v11059_v9, %v6250_v27  ;;  %v6251_v54 = vmax.f32 %v5963_v2, %v6107_v5  ;;  %4528 = vmatmul.mubr.bf16.gmra.mrb[192].mxu0 %v8990_v26  ;;  %5680 = vmatmul.mubr.bf16.gmra.mrb[192].mxu1 %v8993_v46  ;;  %v12880_v46 = vld [vmem:[#allocation18_spill] sm:$0xff] }
 0x3c2   :  { %4535 = vmatprep.mubr.bf16.mxu0 %v8998_v51  ;;  %5687 = vmatprep.mubr.bf16.mxu1 %v9001_v13 }
 0x3c3   :  { %v6545_v58 = vmax.f32 %v6401_v62, 0.0  ;;  %v6402_v35 = vadd.f32 %v11059_v9, %v6251_v54 }
 0x3c4   :  { %v4321_v36 = vpop.f32.mrb[88].mxu0  ;;  %v5473_v21 = vpop.f32.mrb[88].mxu1 }
 0x3c5   :  { %v8151_v22 = vpack.c.bf16 %v6545_v58, %v6545_v58  ;;  %v6546_v25 = vmax.f32 %v6402_v35, 0.0  ;;  %v5964_v1 = vmax.f32 %v12874_v55, %v4321_v36  ;;  %v6108_v23 = vmax.f32 %v12875_v63, %v5473_v21  ;;  %v4323_v24 = vpop.f32.mrb[89].mxu0  ;;  %v5475_v7 = vpop.f32.mrb[89].mxu1  ;;  %v12882_v58 = vld [vmem:[#allocation20_spill] sm:$0xff]  ;;  %v12883_v36 = vld [vmem:[#allocation21_spill] sm:$0xff] }
 0x3c6   :  { %v4324_v37 = vpop.f32.mrb[90].mxu0  ;;  %v5476_v41 = vpop.f32.mrb[90].mxu1  ;;  %v9016_v63 = vld [vmem:[%s12619_s0 + $0x744] ss:$8 sps:$4 sm:$0xff]  }
 0x3c7   :  { %7266 = vst.msk [vmem:[%s12621_s3 + $0x68] sm:$0xf] %vm7239_vm0, %v8151_v22  ;;  %v8152_v11 = vpack.c.bf16 %v6546_v25, %v6546_v25  ;;  %v6252_v31 = vmax.f32 %v5964_v1, %v6108_v23  ;;  %v5965_v42 = vmax.f32 %v12876_v32, %v4324_v37  ;;  %v6109_v12 = vmax.f32 %v12877_v19, %v5476_v41  ;;  %v4326_v20 = vpop.f32.mrb[91].mxu0  ;;  %v5478_v15 = vpop.f32.mrb[91].mxu1  ;;  %v9011_v25 = vld [vmem:[%s12619_s0 + $0x1030] ss:$8 sps:$4 sm:$0xff]  }
 0x3c8   :  { %v9019_v23 = vld [vmem:[%s12619_s0 + $0x1044] ss:$8 sps:$4 sm:$0xff]   ;;  %v9014_v15 = vld [vmem:[%s12619_s0 + $0x740] ss:$8 sps:$4 sm:$0xff]  }
 0x3c9   :  { %7267 = vst.msk [vmem:[%s12621_s3 + $0x6c] sm:$0xf] %vm7239_vm0, %v8152_v11  ;;  %v6403_v16 = vadd.f32 %v11059_v9, %v6252_v31  ;;  %v6253_v38 = vmax.f32 %v5965_v42, %v6109_v12  ;;  %4536 = vmatmul.mubr.bf16.gmra.mrb[196].mxu0 %v8996_v10  ;;  %5688 = vmatmul.mubr.bf16.gmra.mrb[196].mxu1 %v8999_v8  ;;  %v12884_v8 = vld [vmem:[#allocation22_spill] sm:$0xff]  ;;  %v12885_v41 = vld [vmem:[#allocation23_spill] sm:$0xff] }
 0x3ca   :  { %4543 = vmatprep.mubr.bf16.mxu0 %v9004_v59  ;;  %5695 = vmatprep.mubr.bf16.mxu1 %v9007_v60 }
 0x3cb   :  { %v6547_v0 = vmax.f32 %v6403_v16, 0.0  ;;  %v6404_v56 = vadd.f32 %v11059_v9, %v6253_v38 }
 0x3cc   :  { %v4329_v3 = vpop.f32.mrb[92].mxu0  ;;  %v5481_v39 = vpop.f32.mrb[92].mxu1 }
 0x3cd   :  { %v8153_v40 = vpack.c.bf16 %v6547_v0, %v6547_v0  ;;  %v6548_v4 = vmax.f32 %v6404_v56, 0.0  ;;  %v5966_v33 = vmax.f32 %v12878_v52, %v4329_v3  ;;  %v6110_v30 = vmax.f32 %v12879_v34, %v5481_v39  ;;  %v4331_v26 = vpop.f32.mrb[93].mxu0  ;;  %v5483_v44 = vpop.f32.mrb[93].mxu1  ;;  %v12886_v0 = vld [vmem:[#allocation24_spill] sm:$0xff]  ;;  %v12887_v3 = vld [vmem:[#allocation25_spill] sm:$0xff] }
 0x3ce   :  { %v4332_v48 = vpop.f32.mrb[94].mxu0  ;;  %v5484_v17 = vpop.f32.mrb[94].mxu1  ;;  %v9025_v34 = vld [vmem:[%s12619_s0 + $0x1054] ss:$8 sps:$4 sm:$0xff]   ;;  %v12888_v44 = vld [vmem:[#allocation26_spill] sm:$0xff] }
 0x3cf   :  { %7268 = vst.msk [vmem:[%s12621_s3 + $0x70] sm:$0xf] %vm7239_vm0, %v8153_v40  ;;  %v8154_v45 = vpack.c.bf16 %v6548_v4, %v6548_v4  ;;  %v6254_v18 = vmax.f32 %v5966_v33, %v6110_v30  ;;  %v5967_v49 = vmax.f32 %v12880_v46, %v4332_v48  ;;  %v6111_v51 = vmax.f32 %v12881_v50, %v5484_v17  ;;  %v4334_v13 = vpop.f32.mrb[95].mxu0  ;;  %v5486_v14 = vpop.f32.mrb[95].mxu1  ;;  %v9017_v4 = vld [vmem:[%s12619_s0 + $0x1040] ss:$8 sps:$4 sm:$0xff]  }
 0x3d0   :  { %v9022_v33 = vld [vmem:[%s12619_s0 + $0x754] ss:$8 sps:$4 sm:$0xff]   ;;  %v12889_v48 = vld [vmem:[#allocation27_spill] sm:$0xff]  ;;  %v9020_v14 = vld [vmem:[%s12619_s0 + $0x750] ss:$8 sps:$4 sm:$0xff]  }
 0x3d1   :  { %7269 = vst.msk [vmem:[%s12621_s3 + $0x74] sm:$0xf] %vm7239_vm0, %v8154_v45  ;;  %v6405_v27 = vadd.f32 %v11059_v9, %v6254_v18  ;;  %v6255_v28 = vmax.f32 %v5967_v49, %v6111_v51  ;;  %4544 = vmatmul.mubr.bf16.gmra.mrb[200].mxu0 %v9002_v29  ;;  %5696 = vmatmul.mubr.bf16.gmra.mrb[200].mxu1 %v9005_v47  ;;  %v11522_v45 = vld [vmem:[%s12620_s2] ss:$0 sm:$0xff] }
 0x3d2   :  { %4551 = vmatprep.mubr.bf16.mxu0 %v9010_v43  ;;  %5703 = vmatprep.mubr.bf16.mxu1 %v9013_v6 }
 0x3d3   :  { %v6549_v2 = vmax.f32 %v6405_v27, 0.0  ;;  %v6406_v53 = vadd.f32 %v11059_v9, %v6255_v28 }
 0x3d4   :  { %v4337_v5 = vpop.f32.mrb[96].mxu0  ;;  %v5489_v57 = vpop.f32.mrb[96].mxu1 }
 0x3d5   :  { %v8155_v62 = vpack.c.bf16 %v6549_v2, %v6549_v2  ;;  %v6550_v54 = vmax.f32 %v6406_v53, 0.0  ;;  %v5968_v35 = vmax.f32 %v12882_v58, %v4337_v5  ;;  %v6112_v21 = vmax.f32 %v12883_v36, %v5489_v57  ;;  %v4339_v10 = vpop.f32.mrb[97].mxu0  ;;  %v5491_v22 = vpop.f32.mrb[97].mxu1  ;;  %v12890_v2 = vld [vmem:[#allocation28_spill] sm:$0xff]  ;;  %v12891_v5 = vld [vmem:[#allocation29_spill] sm:$0xff] }
 0x3d6   :  { %v4340_v55 = vpop.f32.mrb[98].mxu0  ;;  %v5492_v1 = vpop.f32.mrb[98].mxu1  ;;  %v9028_v36 = vld [vmem:[%s12619_s0 + $0x764] ss:$8 sps:$4 sm:$0xff]  }
 0x3d7   :  { %7270 = vst.msk [vmem:[%s12621_s3 + $0x78] sm:$0xf] %vm7239_vm0, %v8155_v62  ;;  %v8156_v24 = vpack.c.bf16 %v6550_v54, %v6550_v54  ;;  %v6256_v7 = vmax.f32 %v5968_v35, %v6112_v21  ;;  %v5969_v37 = vmax.f32 %v12884_v8, %v4340_v55  ;;  %v6113_v59 = vmax.f32 %v12885_v41, %v5492_v1  ;;  %v4342_v60 = vpop.f32.mrb[99].mxu0  ;;  %v5494_v11 = vpop.f32.mrb[99].mxu1  ;;  %v9023_v54 = vld [vmem:[%s12619_s0 + $0x1050] ss:$8 sps:$4 sm:$0xff]  }
 0x3d8   :  { %v9031_v21 = vld [vmem:[%s12619_s0 + $0x1064] ss:$8 sps:$4 sm:$0xff]   ;;  %v9026_v11 = vld [vmem:[%s12619_s0 + $0x760] ss:$8 sps:$4 sm:$0xff]  }
 0x3d9   :  { %7271 = vst.msk [vmem:[%s12621_s3 + $0x7c] sm:$0xf] %vm7239_vm0, %v8156_v24  ;;  %v6407_v31 = vadd.f32 %v11059_v9, %v6256_v7  ;;  %v6257_v32 = vmax.f32 %v5969_v37, %v6113_v59  ;;  %4552 = vmatmul.mubr.bf16.gmra.mrb[204].mxu0 %v9008_v61  ;;  %5704 = vmatmul.mubr.bf16.gmra.mrb[204].mxu1 %v9011_v25  ;;  %v12892_v25 = vld [vmem:[#allocation30_spill] sm:$0xff]  ;;  %v12893_v1 = vld [vmem:[#allocation31_spill] sm:$0xff] }
 0x3da   :  { %4559 = vmatprep.mubr.bf16.mxu0 %v9016_v63  ;;  %5711 = vmatprep.mubr.bf16.mxu1 %v9019_v23 }
 0x3db   :  { %v6551_v42 = vmax.f32 %v6407_v31, 0.0  ;;  %v6408_v19 = vadd.f32 %v11059_v9, %v6257_v32 }
 0x3dc   :  { %v4345_v12 = vpop.f32.mrb[100].mxu0  ;;  %v5497_v20 = vpop.f32.mrb[100].mxu1 }
 0x3dd   :  { %v8157_v16 = vpack.c.bf16 %v6551_v42, %v6551_v42  ;;  %v6552_v38 = vmax.f32 %v6408_v19, 0.0  ;;  %v5970_v56 = vmax.f32 %v12886_v0, %v4345_v12  ;;  %v6114_v39 = vmax.f32 %v12887_v3, %v5497_v20  ;;  %v4347_v29 = vpop.f32.mrb[101].mxu0  ;;  %v5499_v40 = vpop.f32.mrb[101].mxu1  ;;  %v12894_v42 = vld [vmem:[#allocation32_spill] sm:$0xff]  ;;  %v12895_v12 = vld [vmem:[#allocation33_spill] sm:$0xff] }
 0x3de   :  { %v4348_v52 = vpop.f32.mrb[102].mxu0  ;;  %v5500_v9 = vpop.f32.mrb[102].mxu1  ;;  %v9034_v3 = vld [vmem:[%s12619_s0 + $0x774] ss:$8 sps:$4 sm:$0xff]  }
 0x3df   :  { %7272 = vst.msk [vmem:[%s12621_s3 + $0x80] sm:$0xf] %vm7239_vm0, %v8157_v16  ;;  %v8158_v30 = vpack.c.bf16 %v6552_v38, %v6552_v38  ;;  %v6258_v26 = vmax.f32 %v5970_v56, %v6114_v39  ;;  %v5971_v47 = vmax.f32 %v12888_v44, %v4348_v52  ;;  %v6115_v17 = vmax.f32 %v12889_v48, %v5500_v9  ;;  %v4350_v43 = vpop.f32.mrb[103].mxu0  ;;  %v5502_v6 = vpop.f32.mrb[103].mxu1  ;;  %v9029_v38 = vld [vmem:[%s12619_s0 + $0x1060] ss:$8 sps:$4 sm:$0xff]  }
 0x3e0   :  { %v9037_v39 = vld [vmem:[%s12619_s0 + $0x1074] ss:$8 sps:$4 sm:$0xff]   ;;  %v12897_v9 = vld [vmem:[#allocation35_spill] sm:$0xff]  ;;  %v9032_v6 = vld [vmem:[%s12619_s0 + $0x770] ss:$8 sps:$4 sm:$0xff]  }
 0x3e1   :  { %7273 = vst.msk [vmem:[%s12621_s3 + $0x84] sm:$0xf] %vm7239_vm0, %v8158_v30  ;;  %v6409_v18 = vadd.f32 %v11522_v45, %v6258_v26  ;;  %v6259_v46 = vmax.f32 %v5971_v47, %v6115_v17  ;;  %4560 = vmatmul.mubr.bf16.gmra.mrb[208].mxu0 %v9014_v15  ;;  %5712 = vmatmul.mubr.bf16.gmra.mrb[208].mxu1 %v9017_v4  ;;  %v12896_v4 = vld [vmem:[#allocation34_spill] sm:$0xff] }
 0x3e2   :  { %4567 = vmatprep.mubr.bf16.mxu0 %v9022_v33  ;;  %5719 = vmatprep.mubr.bf16.mxu1 %v9025_v34 }
 0x3e3   :  { %v6553_v49 = vmax.f32 %v6409_v18, 0.0  ;;  %v6410_v50 = vadd.f32 %v11522_v45, %v6259_v46 }
 0x3e4   :  { %v4353_v51 = vpop.f32.mrb[104].mxu0  ;;  %v5505_v13 = vpop.f32.mrb[104].mxu1 }
 0x3e5   :  { %v8159_v27 = vpack.c.bf16 %v6553_v49, %v6553_v49  ;;  %v6554_v28 = vmax.f32 %v6410_v50, 0.0  ;;  %v5972_v53 = vmax.f32 %v12890_v2, %v4353_v51  ;;  %v6116_v57 = vmax.f32 %v12891_v5, %v5505_v13  ;;  %v4355_v61 = vpop.f32.mrb[105].mxu0  ;;  %v5507_v62 = vpop.f32.mrb[105].mxu1  ;;  %v12898_v49 = vld [vmem:[#allocation36_spill] sm:$0xff]  ;;  %v12899_v51 = vld [vmem:[#allocation37_spill] sm:$0xff] }
 0x3e6   :  { %v4356_v58 = vpop.f32.mrb[106].mxu0  ;;  %v5508_v35 = vpop.f32.mrb[106].mxu1  ;;  %v9040_v5 = vld [vmem:[%s12619_s0 + $0x784] ss:$8 sps:$4 sm:$0xff]  }
 0x3e7   :  { %7274 = vst.msk [vmem:[%s12621_s3 + $0x88] sm:$0xf] %vm7239_vm0, %v8159_v27  ;;  %v8160_v10 = vpack.c.bf16 %v6554_v28, %v6554_v28  ;;  %v6260_v22 = vmax.f32 %v5972_v53, %v6116_v57  ;;  %v5973_v55 = vmax.f32 %v12892_v25, %v4356_v58  ;;  %v6117_v63 = vmax.f32 %v12893_v1, %v5508_v35  ;;  %v4358_v23 = vpop.f32.mrb[107].mxu0  ;;  %v5510_v24 = vpop.f32.mrb[107].mxu1  ;;  %v9035_v28 = vld [vmem:[%s12619_s0 + $0x1070] ss:$8 sps:$4 sm:$0xff]  }
 0x3e8   :  { %v9043_v57 = vld [vmem:[%s12619_s0 + $0x1084] ss:$8 sps:$4 sm:$0xff]   ;;  %v9038_v24 = vld [vmem:[%s12619_s0 + $0x780] ss:$8 sps:$4 sm:$0xff]  }
 0x3e9   :  { %7275 = vst.msk [vmem:[%s12621_s3 + $0x8c] sm:$0xf] %vm7239_vm0, %v8160_v10  ;;  %v6411_v7 = vadd.f32 %v11522_v45, %v6260_v22  ;;  %v6261_v8 = vmax.f32 %v5973_v55, %v6117_v63  ;;  %4568 = vmatmul.mubr.bf16.gmra.mrb[212].mxu0 %v9020_v14  ;;  %5720 = vmatmul.mubr.bf16.gmra.mrb[212].mxu1 %v9023_v54  ;;  %v12900_v54 = vld [vmem:[#allocation38_spill] sm:$0xff]  ;;  %v12901_v35 = vld [vmem:[#allocation39_spill] sm:$0xff] }
 0x3ea   :  { %4575 = vmatprep.mubr.bf16.mxu0 %v9028_v36  ;;  %5727 = vmatprep.mubr.bf16.mxu1 %v9031_v21 }
 0x3eb   :  { %v6555_v37 = vmax.f32 %v6411_v7, 0.0  ;;  %v6412_v41 = vadd.f32 %v11522_v45, %v6261_v8 }
 0x3ec   :  { %v4361_v59 = vpop.f32.mrb[108].mxu0  ;;  %v5513_v60 = vpop.f32.mrb[108].mxu1 }
 0x3ed   :  { %v8161_v31 = vpack.c.bf16 %v6555_v37, %v6555_v37  ;;  %v6556_v32 = vmax.f32 %v6412_v41, 0.0  ;;  %v5974_v19 = vmax.f32 %v12894_v42, %v4361_v59  ;;  %v6118_v20 = vmax.f32 %v12895_v12, %v5513_v60  ;;  %v4363_v15 = vpop.f32.mrb[109].mxu0  ;;  %v5515_v16 = vpop.f32.mrb[109].mxu1  ;;  %v12902_v37 = vld [vmem:[#allocation40_spill] sm:$0xff]  ;;  %v12903_v59 = vld [vmem:[#allocation41_spill] sm:$0xff] }
 0x3ee   :  { %v4364_v0 = vpop.f32.mrb[110].mxu0  ;;  %v5516_v56 = vpop.f32.mrb[110].mxu1  ;;  %v9046_v12 = vld [vmem:[%s12619_s0 + $0x794] ss:$8 sps:$4 sm:$0xff]  }
 0x3ef   :  { %7276 = vst.msk [vmem:[%s12621_s3 + $0x90] sm:$0xf] %vm7239_vm0, %v8161_v31  ;;  %v8162_v29 = vpack.c.bf16 %v6556_v32, %v6556_v32  ;;  %v6262_v40 = vmax.f32 %v5974_v19, %v6118_v20  ;;  %v5975_v52 = vmax.f32 %v12896_v4, %v4364_v0  ;;  %v6119_v33 = vmax.f32 %v12897_v9, %v5516_v56  ;;  %v4366_v34 = vpop.f32.mrb[111].mxu0  ;;  %v5518_v30 = vpop.f32.mrb[111].mxu1  ;;  %v9041_v32 = vld [vmem:[%s12619_s0 + $0x1080] ss:$8 sps:$4 sm:$0xff]  }
 0x3f0   :  { %v9049_v20 = vld [vmem:[%s12619_s0 + $0x1094] ss:$8 sps:$4 sm:$0xff]   ;;  %v12905_v56 = vld [vmem:[#allocation43_spill] sm:$0xff]  ;;  %v9044_v30 = vld [vmem:[%s12619_s0 + $0x790] ss:$8 sps:$4 sm:$0xff]  }
 0x3f1   :  { %7277 = vst.msk [vmem:[%s12621_s3 + $0x94] sm:$0xf] %vm7239_vm0, %v8162_v29  ;;  %v6413_v26 = vadd.f32 %v11522_v45, %v6262_v40  ;;  %v6263_v44 = vmax.f32 %v5975_v52, %v6119_v33  ;;  %4576 = vmatmul.mubr.bf16.gmra.mrb[216].mxu0 %v9026_v11  ;;  %5728 = vmatmul.mubr.bf16.gmra.mrb[216].mxu1 %v9029_v38  ;;  %v12904_v38 = vld [vmem:[#allocation42_spill] sm:$0xff] }
 0x3f2   :  { %4583 = vmatprep.mubr.bf16.mxu0 %v9034_v3  ;;  %5735 = vmatprep.mubr.bf16.mxu1 %v9037_v39 }
 0x3f3   :  { %v6557_v47 = vmax.f32 %v6413_v26, 0.0  ;;  %v6414_v48 = vadd.f32 %v11522_v45, %v6263_v44 }
 0x3f4   :  { %v4369_v17 = vpop.f32.mrb[112].mxu0  ;;  %v5521_v43 = vpop.f32.mrb[112].mxu1 }
 0x3f5   :  { %v8163_v18 = vpack.c.bf16 %v6557_v47, %v6557_v47  ;;  %v6558_v46 = vmax.f32 %v6414_v48, 0.0  ;;  %v5976_v50 = vmax.f32 %v12898_v49, %v4369_v17  ;;  %v6120_v13 = vmax.f32 %v12899_v51, %v5521_v43  ;;  %v4371_v14 = vpop.f32.mrb[113].mxu0  ;;  %v5523_v27 = vpop.f32.mrb[113].mxu1  ;;  %v12906_v47 = vld [vmem:[#allocation44_spill] sm:$0xff]  ;;  %v12907_v17 = vld [vmem:[#allocation45_spill] sm:$0xff] }
 0x3f6   :  { %v4372_v2 = vpop.f32.mrb[114].mxu0  ;;  %v5524_v53 = vpop.f32.mrb[114].mxu1  ;;  %v9052_v51 = vld [vmem:[%s12619_s0 + $0x7a4] ss:$8 sps:$4 sm:$0xff]  }
 0x3f7   :  { %7278 = vst.msk [vmem:[%s12621_s3 + $0x98] sm:$0xf] %vm7239_vm0, %v8163_v18  ;;  %v8164_v61 = vpack.c.bf16 %v6558_v46, %v6558_v46  ;;  %v6264_v62 = vmax.f32 %v5976_v50, %v6120_v13  ;;  %v5977_v58 = vmax.f32 %v12900_v54, %v4372_v2  ;;  %v6121_v36 = vmax.f32 %v12901_v35, %v5524_v53  ;;  %v4374_v21 = vpop.f32.mrb[115].mxu0  ;;  %v5526_v10 = vpop.f32.mrb[115].mxu1  ;;  %v9047_v46 = vld [vmem:[%s12619_s0 + $0x1090] ss:$8 sps:$4 sm:$0xff]  }
 0x3f8   :  { %v9055_v13 = vld [vmem:[%s12619_s0 + $0x10a4] ss:$8 sps:$4 sm:$0xff]   ;;  %v9050_v10 = vld [vmem:[%s12619_s0 + $0x7a0] ss:$8 sps:$4 sm:$0xff]  }
 0x3f9   :  { %7279 = vst.msk [vmem:[%s12621_s3 + $0x9c] sm:$0xf] %vm7239_vm0, %v8164_v61  ;;  %v6415_v22 = vadd.f32 %v11522_v45, %v6264_v62  ;;  %v6265_v25 = vmax.f32 %v5977_v58, %v6121_v36  ;;  %4584 = vmatmul.mubr.bf16.gmra.mrb[220].mxu0 %v9032_v6  ;;  %5736 = vmatmul.mubr.bf16.gmra.mrb[220].mxu1 %v9035_v28  ;;  %v12908_v28 = vld [vmem:[#allocation46_spill] sm:$0xff]  ;;  %v12909_v53 = vld [vmem:[#allocation47_spill] sm:$0xff] }
 0x3fa   :  { %4591 = vmatprep.mubr.bf16.mxu0 %v9040_v5  ;;  %5743 = vmatprep.mubr.bf16.mxu1 %v9043_v57 }
 0x3fb   :  { %v6559_v55 = vmax.f32 %v6415_v22, 0.0  ;;  %v6416_v1 = vadd.f32 %v11522_v45, %v6265_v25 }
 0x3fc   :  { %v4377_v63 = vpop.f32.mrb[116].mxu0  ;;  %v5529_v23 = vpop.f32.mrb[116].mxu1 }
 0x3fd   :  { %v8165_v7 = vpack.c.bf16 %v6559_v55, %v6559_v55  ;;  %v6560_v8 = vmax.f32 %v6416_v1, 0.0  ;;  %v5978_v41 = vmax.f32 %v12902_v37, %v4377_v63  ;;  %v6122_v60 = vmax.f32 %v12903_v59, %v5529_v23  ;;  %v4379_v11 = vpop.f32.mrb[117].mxu0  ;;  %v5531_v31 = vpop.f32.mrb[117].mxu1  ;;  %v12910_v55 = vld [vmem:[#allocation48_spill] sm:$0xff]  ;;  %v12911_v63 = vld [vmem:[#allocation49_spill] sm:$0xff] }
 0x3fe   :  { %v4380_v42 = vpop.f32.mrb[118].mxu0  ;;  %v5532_v19 = vpop.f32.mrb[118].mxu1  ;;  %v9058_v59 = vld [vmem:[%s12619_s0 + $0x7b4] ss:$8 sps:$4 sm:$0xff]  }
 0x3ff   :  { %7280 = vst.msk [vmem:[%s12621_s3 + $0xa0] sm:$0xf] %vm7239_vm0, %v8165_v7  ;;  %v8166_v15 = vpack.c.bf16 %v6560_v8, %v6560_v8  ;;  %v6266_v16 = vmax.f32 %v5978_v41, %v6122_v60  ;;  %v5979_v0 = vmax.f32 %v12904_v38, %v4380_v42  ;;  %v6123_v3 = vmax.f32 %v12905_v56, %v5532_v19  ;;  %v4382_v39 = vpop.f32.mrb[119].mxu0  ;;  %v5534_v29 = vpop.f32.mrb[119].mxu1  ;;  %v9053_v8 = vld [vmem:[%s12619_s0 + $0x10a0] ss:$8 sps:$4 sm:$0xff]  }
 0x400   :  { %v9061_v60 = vld [vmem:[%s12619_s0 + $0x10b4] ss:$8 sps:$4 sm:$0xff]   ;;  %v12913_v19 = vld [vmem:[#allocation51_spill] sm:$0xff]  ;;  %v9056_v29 = vld [vmem:[%s12619_s0 + $0x7b0] ss:$8 sps:$4 sm:$0xff]  }
 0x401   :  { %7281 = vst.msk [vmem:[%s12621_s3 + $0xa4] sm:$0xf] %vm7239_vm0, %v8166_v15  ;;  %v6417_v40 = vadd.f32 %v11522_v45, %v6266_v16  ;;  %v6267_v4 = vmax.f32 %v5979_v0, %v6123_v3  ;;  %4592 = vmatmul.mubr.bf16.gmra.mrb[224].mxu0 %v9038_v24  ;;  %5744 = vmatmul.mubr.bf16.gmra.mrb[224].mxu1 %v9041_v32  ;;  %v12912_v32 = vld [vmem:[#allocation50_spill] sm:$0xff] }
 0x402   :  { %4599 = vmatprep.mubr.bf16.mxu0 %v9046_v12  ;;  %5751 = vmatprep.mubr.bf16.mxu1 %v9049_v20 }
 0x403   :  { %v6561_v52 = vmax.f32 %v6417_v40, 0.0  ;;  %v6418_v9 = vadd.f32 %v11522_v45, %v6267_v4 }
 0x404   :  { %v4385_v33 = vpop.f32.mrb[120].mxu0  ;;  %v5537_v34 = vpop.f32.mrb[120].mxu1 }
 0x405   :  { %v8167_v26 = vpack.c.bf16 %v6561_v52, %v6561_v52  ;;  %v6562_v44 = vmax.f32 %v6418_v9, 0.0  ;;  %v5980_v48 = vmax.f32 %v12906_v47, %v4385_v33  ;;  %v6124_v43 = vmax.f32 %v12907_v17, %v5537_v34  ;;  %v4387_v6 = vpop.f32.mrb[121].mxu0  ;;  %v5539_v18 = vpop.f32.mrb[121].mxu1  ;;  %v12914_v52 = vld [vmem:[#allocation52_spill] sm:$0xff]  ;;  %v12915_v33 = vld [vmem:[#allocation53_spill] sm:$0xff] }
 0x406   :  { %v4388_v49 = vpop.f32.mrb[122].mxu0  ;;  %v5540_v50 = vpop.f32.mrb[122].mxu1  ;;  %v9064_v17 = vld [vmem:[%s12619_s0 + $0x7c4] ss:$8 sps:$4 sm:$0xff]  }
 0x407   :  { %7282 = vst.msk [vmem:[%s12621_s3 + $0xa8] sm:$0xf] %vm7239_vm0, %v8167_v26  ;;  %v8168_v14 = vpack.c.bf16 %v6562_v44, %v6562_v44  ;;  %v6268_v27 = vmax.f32 %v5980_v48, %v6124_v43  ;;  %v5981_v2 = vmax.f32 %v12908_v28, %v4388_v49  ;;  %v6125_v5 = vmax.f32 %v12909_v53, %v5540_v50  ;;  %v4390_v57 = vpop.f32.mrb[123].mxu0  ;;  %v5542_v61 = vpop.f32.mrb[123].mxu1  ;;  %v9059_v44 = vld [vmem:[%s12619_s0 + $0x10b0] ss:$8 sps:$4 sm:$0xff]  }
 0x408   :  { %v9067_v43 = vld [vmem:[%s12619_s0 + $0x10c4] ss:$8 sps:$4 sm:$0xff]   ;;  %v9062_v61 = vld [vmem:[%s12619_s0 + $0x7c0] ss:$8 sps:$4 sm:$0xff]  }
 0x409   :  { %7283 = vst.msk [vmem:[%s12621_s3 + $0xac] sm:$0xf] %vm7239_vm0, %v8168_v14  ;;  %v6419_v62 = vadd.f32 %v11522_v45, %v6268_v27  ;;  %v6269_v54 = vmax.f32 %v5981_v2, %v6125_v5  ;;  %4600 = vmatmul.mubr.bf16.gmra.mrb[228].mxu0 %v9044_v30  ;;  %5752 = vmatmul.mubr.bf16.gmra.mrb[228].mxu1 %v9047_v46  ;;  %v12916_v46 = vld [vmem:[#allocation54_spill] sm:$0xff]  ;;  %v12917_v50 = vld [vmem:[#allocation55_spill] sm:$0xff] }
 0x40a   :  { %4607 = vmatprep.mubr.bf16.mxu0 %v9052_v51  ;;  %5759 = vmatprep.mubr.bf16.mxu1 %v9055_v13 }
 0x40b   :  { %v6563_v58 = vmax.f32 %v6419_v62, 0.0  ;;  %v6420_v35 = vadd.f32 %v11522_v45, %v6269_v54 }
 0x40c   :  { %v4393_v36 = vpop.f32.mrb[124].mxu0  ;;  %v5545_v21 = vpop.f32.mrb[124].mxu1 }
 0x40d   :  { %v8169_v22 = vpack.c.bf16 %v6563_v58, %v6563_v58  ;;  %v6564_v25 = vmax.f32 %v6420_v35, 0.0  ;;  %v5982_v1 = vmax.f32 %v12910_v55, %v4393_v36  ;;  %v6126_v23 = vmax.f32 %v12911_v63, %v5545_v21  ;;  %v4395_v24 = vpop.f32.mrb[125].mxu0  ;;  %v5547_v7 = vpop.f32.mrb[125].mxu1  ;;  %v12918_v58 = vld [vmem:[#allocation56_spill] sm:$0xff]  ;;  %v12919_v36 = vld [vmem:[#allocation57_spill] sm:$0xff] }
 0x40e   :  { %v4396_v37 = vpop.f32.mrb[126].mxu0  ;;  %v5548_v41 = vpop.f32.mrb[126].mxu1  ;;  %v9070_v63 = vld [vmem:[%s12619_s0 + $0x7d4] ss:$8 sps:$4 sm:$0xff]  }
 0x40f   :  { %7284 = vst.msk [vmem:[%s12621_s3 + $0xb0] sm:$0xf] %vm7239_vm0, %v8169_v22  ;;  %v8170_v11 = vpack.c.bf16 %v6564_v25, %v6564_v25  ;;  %v6270_v31 = vmax.f32 %v5982_v1, %v6126_v23  ;;  %v5983_v42 = vmax.f32 %v12912_v32, %v4396_v37  ;;  %v6127_v12 = vmax.f32 %v12913_v19, %v5548_v41  ;;  %v4398_v20 = vpop.f32.mrb[127].mxu0  ;;  %v5550_v15 = vpop.f32.mrb[127].mxu1  ;;  %v9065_v25 = vld [vmem:[%s12619_s0 + $0x10c0] ss:$8 sps:$4 sm:$0xff]  }
 0x410   :  { %v9073_v23 = vld [vmem:[%s12619_s0 + $0x10d4] ss:$8 sps:$4 sm:$0xff]   ;;  %v12921_v41 = vld [vmem:[#allocation59_spill] sm:$0xff]  ;;  %v9068_v15 = vld [vmem:[%s12619_s0 + $0x7d0] ss:$8 sps:$4 sm:$0xff]  }
 0x411   :  { %7285 = vst.msk [vmem:[%s12621_s3 + $0xb4] sm:$0xf] %vm7239_vm0, %v8170_v11  ;;  %v6421_v16 = vadd.f32 %v11522_v45, %v6270_v31  ;;  %v6271_v38 = vmax.f32 %v5983_v42, %v6127_v12  ;;  %4608 = vmatmul.mubr.bf16.gmra.mrb[232].mxu0 %v9050_v10  ;;  %5760 = vmatmul.mubr.bf16.gmra.mrb[232].mxu1 %v9053_v8  ;;  %v12920_v8 = vld [vmem:[#allocation58_spill] sm:$0xff] }
 0x412   :  { %4615 = vmatprep.mubr.bf16.mxu0 %v9058_v59  ;;  %5767 = vmatprep.mubr.bf16.mxu1 %v9061_v60 }
 0x413   :  { %v6565_v0 = vmax.f32 %v6421_v16, 0.0  ;;  %v6422_v56 = vadd.f32 %v11522_v45, %v6271_v38 }
 0x414   :  { %v4401_v3 = vpop.f32.mrb[128].mxu0  ;;  %v5553_v39 = vpop.f32.mrb[128].mxu1 }
 0x415   :  { %v8171_v40 = vpack.c.bf16 %v6565_v0, %v6565_v0  ;;  %v6566_v4 = vmax.f32 %v6422_v56, 0.0  ;;  %v5984_v9 = vmax.f32 %v12914_v52, %v4401_v3  ;;  %v6128_v34 = vmax.f32 %v12915_v33, %v5553_v39  ;;  %v4403_v30 = vpop.f32.mrb[129].mxu0  ;;  %v5555_v26 = vpop.f32.mrb[129].mxu1  ;;  %v12922_v0 = vld [vmem:[#allocation60_spill] sm:$0xff]  ;;  %v12923_v3 = vld [vmem:[#allocation61_spill] sm:$0xff] }
 0x416   :  { %v4404_v47 = vpop.f32.mrb[130].mxu0  ;;  %v5556_v48 = vpop.f32.mrb[130].mxu1  ;;  %v9076_v33 = vld [vmem:[%s12619_s0 + $0x7e4] ss:$8 sps:$4 sm:$0xff]  }
 0x417   :  { %7286 = vst.msk [vmem:[%s12621_s3 + $0xb8] sm:$0xf] %vm7239_vm0, %v8171_v40  ;;  %v8172_v6 = vpack.c.bf16 %v6566_v4, %v6566_v4  ;;  %v6272_v18 = vmax.f32 %v5984_v9, %v6128_v34  ;;  %v5985_v49 = vmax.f32 %v12916_v46, %v4404_v47  ;;  %v6129_v51 = vmax.f32 %v12917_v50, %v5556_v48  ;;  %v4406_v13 = vpop.f32.mrb[131].mxu0  ;;  %v5558_v14 = vpop.f32.mrb[131].mxu1  ;;  %v9071_v4 = vld [vmem:[%s12619_s0 + $0x10d0] ss:$8 sps:$4 sm:$0xff]  }
 0x418   :  { %v9079_v34 = vld [vmem:[%s12619_s0 + $0x10e4] ss:$8 sps:$4 sm:$0xff]   ;;  %v9074_v14 = vld [vmem:[%s12619_s0 + $0x7e0] ss:$8 sps:$4 sm:$0xff]  }
 0x419   :  { %7287 = vst.msk [vmem:[%s12621_s3 + $0xbc] sm:$0xf] %vm7239_vm0, %v8172_v6  ;;  %v6423_v27 = vadd.f32 %v11522_v45, %v6272_v18  ;;  %v6273_v28 = vmax.f32 %v5985_v49, %v6129_v51  ;;  %4616 = vmatmul.mubr.bf16.gmra.mrb[236].mxu0 %v9056_v29  ;;  %5768 = vmatmul.mubr.bf16.gmra.mrb[236].mxu1 %v9059_v44  ;;  %v12924_v44 = vld [vmem:[#allocation62_spill] sm:$0xff]  ;;  %v12925_v48 = vld [vmem:[#allocation63_spill] sm:$0xff] }
 0x41a   :  { %4623 = vmatprep.mubr.bf16.mxu0 %v9064_v17  ;;  %5775 = vmatprep.mubr.bf16.mxu1 %v9067_v43 }
 0x41b   :  { %v6567_v2 = vmax.f32 %v6423_v27, 0.0  ;;  %v6424_v53 = vadd.f32 %v11522_v45, %v6273_v28 }
 0x41c   :  { %v4409_v5 = vpop.f32.mrb[132].mxu0  ;;  %v5561_v57 = vpop.f32.mrb[132].mxu1 }
 0x41d   :  { %v8173_v62 = vpack.c.bf16 %v6567_v2, %v6567_v2  ;;  %v6568_v54 = vmax.f32 %v6424_v53, 0.0  ;;  %v5986_v35 = vmax.f32 %v12918_v58, %v4409_v5  ;;  %v6130_v21 = vmax.f32 %v12919_v36, %v5561_v57  ;;  %v4411_v10 = vpop.f32.mrb[133].mxu0  ;;  %v5563_v22 = vpop.f32.mrb[133].mxu1  ;;  %v12926_v2 = vld [vmem:[#allocation64_spill] sm:$0xff]  ;;  %v12927_v5 = vld [vmem:[#allocation65_spill] sm:$0xff] }
 0x41e   :  { %v4412_v55 = vpop.f32.mrb[134].mxu0  ;;  %v5564_v1 = vpop.f32.mrb[134].mxu1  ;;  %v9082_v36 = vld [vmem:[%s12619_s0 + $0x7f4] ss:$8 sps:$4 sm:$0xff]  }
 0x41f   :  { %7288 = vst.msk [vmem:[%s12621_s3 + $0xc0] sm:$0xf] %vm7239_vm0, %v8173_v62  ;;  %v8174_v24 = vpack.c.bf16 %v6568_v54, %v6568_v54  ;;  %v6274_v7 = vmax.f32 %v5986_v35, %v6130_v21  ;;  %v5987_v37 = vmax.f32 %v12920_v8, %v4412_v55  ;;  %v6131_v59 = vmax.f32 %v12921_v41, %v5564_v1  ;;  %v4414_v60 = vpop.f32.mrb[135].mxu0  ;;  %v5566_v11 = vpop.f32.mrb[135].mxu1  ;;  %v9077_v54 = vld [vmem:[%s12619_s0 + $0x10e0] ss:$8 sps:$4 sm:$0xff]  }
 0x420   :  { %v9085_v21 = vld [vmem:[%s12619_s0 + $0x10f4] ss:$8 sps:$4 sm:$0xff]   ;;  %v12929_v1 = vld [vmem:[#allocation67_spill] sm:$0xff]  ;;  %v9080_v11 = vld [vmem:[%s12619_s0 + $0x7f0] ss:$8 sps:$4 sm:$0xff]  }
 0x421   :  { %7289 = vst.msk [vmem:[%s12621_s3 + $0xc4] sm:$0xf] %vm7239_vm0, %v8174_v24  ;;  %v6425_v31 = vadd.f32 %v11522_v45, %v6274_v7  ;;  %v6275_v32 = vmax.f32 %v5987_v37, %v6131_v59  ;;  %4624 = vmatmul.mubr.bf16.gmra.mrb[240].mxu0 %v9062_v61  ;;  %5776 = vmatmul.mubr.bf16.gmra.mrb[240].mxu1 %v9065_v25  ;;  %v12928_v25 = vld [vmem:[#allocation66_spill] sm:$0xff] }
 0x422   :  { %4631 = vmatprep.mubr.bf16.mxu0 %v9070_v63  ;;  %5783 = vmatprep.mubr.bf16.mxu1 %v9073_v23 }
 0x423   :  { %v6569_v42 = vmax.f32 %v6425_v31, 0.0  ;;  %v6426_v19 = vadd.f32 %v11522_v45, %v6275_v32 }
 0x424   :  { %v4417_v12 = vpop.f32.mrb[136].mxu0  ;;  %v5569_v20 = vpop.f32.mrb[136].mxu1 }
 0x425   :  { %v8175_v16 = vpack.c.bf16 %v6569_v42, %v6569_v42  ;;  %v6570_v38 = vmax.f32 %v6426_v19, 0.0  ;;  %v5988_v56 = vmax.f32 %v12922_v0, %v4417_v12  ;;  %v6132_v39 = vmax.f32 %v12923_v3, %v5569_v20  ;;  %v4419_v29 = vpop.f32.mrb[137].mxu0  ;;  %v5571_v40 = vpop.f32.mrb[137].mxu1  ;;  %v12930_v42 = vld [vmem:[#allocation68_spill] sm:$0xff]  ;;  %v12931_v12 = vld [vmem:[#allocation69_spill] sm:$0xff] }
 0x426   :  { %v4420_v52 = vpop.f32.mrb[138].mxu0  ;;  %v5572_v9 = vpop.f32.mrb[138].mxu1  ;;  %v9088_v3 = vld [vmem:[%s12619_s0 + $0x804] ss:$8 sps:$4 sm:$0xff]  }
 0x427   :  { %7290 = vst.msk [vmem:[%s12621_s3 + $0xc8] sm:$0xf] %vm7239_vm0, %v8175_v16  ;;  %v8176_v30 = vpack.c.bf16 %v6570_v38, %v6570_v38  ;;  %v6276_v26 = vmax.f32 %v5988_v56, %v6132_v39  ;;  %v5989_v47 = vmax.f32 %v12924_v44, %v4420_v52  ;;  %v6133_v17 = vmax.f32 %v12925_v48, %v5572_v9  ;;  %v4422_v43 = vpop.f32.mrb[139].mxu0  ;;  %v5574_v6 = vpop.f32.mrb[139].mxu1  ;;  %v9083_v38 = vld [vmem:[%s12619_s0 + $0x10f0] ss:$8 sps:$4 sm:$0xff]  }
 0x428   :  { %v9091_v39 = vld [vmem:[%s12619_s0 + $0x1104] ss:$8 sps:$4 sm:$0xff]   ;;  %v9086_v6 = vld [vmem:[%s12619_s0 + $0x800] ss:$8 sps:$4 sm:$0xff]  }
 0x429   :  { %7291 = vst.msk [vmem:[%s12621_s3 + $0xcc] sm:$0xf] %vm7239_vm0, %v8176_v30  ;;  %v6427_v18 = vadd.f32 %v11522_v45, %v6276_v26  ;;  %v6277_v46 = vmax.f32 %v5989_v47, %v6133_v17  ;;  %4632 = vmatmul.mubr.bf16.gmra.mrb[244].mxu0 %v9068_v15  ;;  %5784 = vmatmul.mubr.bf16.gmra.mrb[244].mxu1 %v9071_v4  ;;  %v12932_v4 = vld [vmem:[#allocation70_spill] sm:$0xff]  ;;  %v12933_v9 = vld [vmem:[#allocation71_spill] sm:$0xff] }
 0x42a   :  { %4639 = vmatprep.mubr.bf16.mxu0 %v9076_v33  ;;  %5791 = vmatprep.mubr.bf16.mxu1 %v9079_v34 }
 0x42b   :  { %v6571_v49 = vmax.f32 %v6427_v18, 0.0  ;;  %v6428_v50 = vadd.f32 %v11522_v45, %v6277_v46 }
 0x42c   :  { %v4425_v51 = vpop.f32.mrb[140].mxu0  ;;  %v5577_v13 = vpop.f32.mrb[140].mxu1 }
 0x42d   :  { %v8177_v27 = vpack.c.bf16 %v6571_v49, %v6571_v49  ;;  %v6572_v28 = vmax.f32 %v6428_v50, 0.0  ;;  %v5990_v53 = vmax.f32 %v12926_v2, %v4425_v51  ;;  %v6134_v57 = vmax.f32 %v12927_v5, %v5577_v13  ;;  %v4427_v61 = vpop.f32.mrb[141].mxu0  ;;  %v5579_v62 = vpop.f32.mrb[141].mxu1  ;;  %v12934_v49 = vld [vmem:[#allocation72_spill] sm:$0xff]  ;;  %v12935_v51 = vld [vmem:[#allocation73_spill] sm:$0xff] }
 0x42e   :  { %v4428_v58 = vpop.f32.mrb[142].mxu0  ;;  %v5580_v35 = vpop.f32.mrb[142].mxu1  ;;  %v9094_v5 = vld [vmem:[%s12619_s0 + $0x814] ss:$8 sps:$4 sm:$0xff]  }
 0x42f   :  { %7292 = vst.msk [vmem:[%s12621_s3 + $0xd0] sm:$0xf] %vm7239_vm0, %v8177_v27  ;;  %v8178_v10 = vpack.c.bf16 %v6572_v28, %v6572_v28  ;;  %v6278_v22 = vmax.f32 %v5990_v53, %v6134_v57  ;;  %v5991_v55 = vmax.f32 %v12928_v25, %v4428_v58  ;;  %v6135_v63 = vmax.f32 %v12929_v1, %v5580_v35  ;;  %v4430_v23 = vpop.f32.mrb[143].mxu0  ;;  %v5582_v24 = vpop.f32.mrb[143].mxu1  ;;  %v9089_v28 = vld [vmem:[%s12619_s0 + $0x1100] ss:$8 sps:$4 sm:$0xff]  }
 0x430   :  { %v9097_v57 = vld [vmem:[%s12619_s0 + $0x1114] ss:$8 sps:$4 sm:$0xff]   ;;  %v12937_v35 = vld [vmem:[#allocation75_spill] sm:$0xff]  ;;  %v9092_v24 = vld [vmem:[%s12619_s0 + $0x810] ss:$8 sps:$4 sm:$0xff]  }
 0x431   :  { %7293 = vst.msk [vmem:[%s12621_s3 + $0xd4] sm:$0xf] %vm7239_vm0, %v8178_v10  ;;  %v6429_v7 = vadd.f32 %v11522_v45, %v6278_v22  ;;  %v6279_v8 = vmax.f32 %v5991_v55, %v6135_v63  ;;  %4640 = vmatmul.mubr.bf16.gmra.mrb[248].mxu0 %v9074_v14  ;;  %5792 = vmatmul.mubr.bf16.gmra.mrb[248].mxu1 %v9077_v54  ;;  %v12936_v54 = vld [vmem:[#allocation74_spill] sm:$0xff] }
 0x432   :  { %4647 = vmatprep.mubr.bf16.mxu0 %v9082_v36  ;;  %5799 = vmatprep.mubr.bf16.mxu1 %v9085_v21 }
 0x433   :  { %v6573_v37 = vmax.f32 %v6429_v7, 0.0  ;;  %v6430_v41 = vadd.f32 %v11522_v45, %v6279_v8 }
 0x434   :  { %v4433_v59 = vpop.f32.mrb[144].mxu0  ;;  %v5585_v60 = vpop.f32.mrb[144].mxu1 }
 0x435   :  { %v8179_v31 = vpack.c.bf16 %v6573_v37, %v6573_v37  ;;  %v6574_v32 = vmax.f32 %v6430_v41, 0.0  ;;  %v5992_v19 = vmax.f32 %v12930_v42, %v4433_v59  ;;  %v6136_v20 = vmax.f32 %v12931_v12, %v5585_v60  ;;  %v4435_v15 = vpop.f32.mrb[145].mxu0  ;;  %v5587_v16 = vpop.f32.mrb[145].mxu1  ;;  %v12938_v37 = vld [vmem:[#allocation76_spill] sm:$0xff]  ;;  %v12939_v59 = vld [vmem:[#allocation77_spill] sm:$0xff] }
 0x436   :  { %v4436_v0 = vpop.f32.mrb[146].mxu0  ;;  %v5588_v56 = vpop.f32.mrb[146].mxu1  ;;  %v9100_v12 = vld [vmem:[%s12619_s0 + $0x824] ss:$8 sps:$4 sm:$0xff]  }
 0x437   :  { %7294 = vst.msk [vmem:[%s12621_s3 + $0xd8] sm:$0xf] %vm7239_vm0, %v8179_v31  ;;  %v8180_v29 = vpack.c.bf16 %v6574_v32, %v6574_v32  ;;  %v6280_v40 = vmax.f32 %v5992_v19, %v6136_v20  ;;  %v5993_v52 = vmax.f32 %v12932_v4, %v4436_v0  ;;  %v6137_v33 = vmax.f32 %v12933_v9, %v5588_v56  ;;  %v4438_v34 = vpop.f32.mrb[147].mxu0  ;;  %v5590_v30 = vpop.f32.mrb[147].mxu1  ;;  %v9095_v32 = vld [vmem:[%s12619_s0 + $0x1110] ss:$8 sps:$4 sm:$0xff]  }
 0x438   :  { %v9103_v20 = vld [vmem:[%s12619_s0 + $0x1124] ss:$8 sps:$4 sm:$0xff]   ;;  %v9098_v30 = vld [vmem:[%s12619_s0 + $0x820] ss:$8 sps:$4 sm:$0xff]  }
 0x439   :  { %7295 = vst.msk [vmem:[%s12621_s3 + $0xdc] sm:$0xf] %vm7239_vm0, %v8180_v29  ;;  %v6431_v26 = vadd.f32 %v11522_v45, %v6280_v40  ;;  %v6281_v44 = vmax.f32 %v5993_v52, %v6137_v33  ;;  %4648 = vmatmul.mubr.bf16.gmra.mrb[252].mxu0 %v9080_v11  ;;  %5800 = vmatmul.mubr.bf16.gmra.mrb[252].mxu1 %v9083_v38  ;;  %v12940_v38 = vld [vmem:[#allocation78_spill] sm:$0xff]  ;;  %v12941_v56 = vld [vmem:[#allocation79_spill] sm:$0xff] }
 0x43a   :  { %4655 = vmatprep.mubr.bf16.mxu0 %v9088_v3  ;;  %5807 = vmatprep.mubr.bf16.mxu1 %v9091_v39 }
 0x43b   :  { %v6575_v47 = vmax.f32 %v6431_v26, 0.0  ;;  %v6432_v48 = vadd.f32 %v11522_v45, %v6281_v44 }
 0x43c   :  { %v4441_v17 = vpop.f32.mrb[148].mxu0  ;;  %v5593_v43 = vpop.f32.mrb[148].mxu1 }
 0x43d   :  { %v8181_v18 = vpack.c.bf16 %v6575_v47, %v6575_v47  ;;  %v6576_v46 = vmax.f32 %v6432_v48, 0.0  ;;  %v5994_v50 = vmax.f32 %v12934_v49, %v4441_v17  ;;  %v6138_v13 = vmax.f32 %v12935_v51, %v5593_v43  ;;  %v4443_v14 = vpop.f32.mrb[149].mxu0  ;;  %v5595_v27 = vpop.f32.mrb[149].mxu1  ;;  %v12942_v47 = vld [vmem:[#allocation80_spill] sm:$0xff]  ;;  %v12943_v17 = vld [vmem:[#allocation81_spill] sm:$0xff] }
 0x43e   :  { %v4444_v2 = vpop.f32.mrb[150].mxu0  ;;  %v5596_v53 = vpop.f32.mrb[150].mxu1  ;;  %v9106_v51 = vld [vmem:[%s12619_s0 + $0x834] ss:$8 sps:$4 sm:$0xff]  }
 0x43f   :  { %7296 = vst.msk [vmem:[%s12621_s3 + $0xe0] sm:$0xf] %vm7239_vm0, %v8181_v18  ;;  %v8182_v61 = vpack.c.bf16 %v6576_v46, %v6576_v46  ;;  %v6282_v62 = vmax.f32 %v5994_v50, %v6138_v13  ;;  %v5995_v58 = vmax.f32 %v12936_v54, %v4444_v2  ;;  %v6139_v36 = vmax.f32 %v12937_v35, %v5596_v53  ;;  %v4446_v21 = vpop.f32.mrb[151].mxu0  ;;  %v5598_v10 = vpop.f32.mrb[151].mxu1  ;;  %v9101_v46 = vld [vmem:[%s12619_s0 + $0x1120] ss:$8 sps:$4 sm:$0xff]  }
 0x440   :  { %v9109_v13 = vld [vmem:[%s12619_s0 + $0x1134] ss:$8 sps:$4 sm:$0xff]   ;;  %v12945_v53 = vld [vmem:[#allocation83_spill] sm:$0xff]  ;;  %v9104_v10 = vld [vmem:[%s12619_s0 + $0x830] ss:$8 sps:$4 sm:$0xff]  }
 0x441   :  { %7297 = vst.msk [vmem:[%s12621_s3 + $0xe4] sm:$0xf] %vm7239_vm0, %v8182_v61  ;;  %v6433_v22 = vadd.f32 %v11522_v45, %v6282_v62  ;;  %v6283_v25 = vmax.f32 %v5995_v58, %v6139_v36  ;;  %4656 = vmatmul.mubr.bf16.gmra.mrb[0].mxu0 %v9086_v6  ;;  %5808 = vmatmul.mubr.bf16.gmra.mrb[0].mxu1 %v9089_v28  ;;  %v12944_v28 = vld [vmem:[#allocation82_spill] sm:$0xff] }
 0x442   :  { %4663 = vmatprep.mubr.bf16.mxu0 %v9094_v5  ;;  %5815 = vmatprep.mubr.bf16.mxu1 %v9097_v57 }
 0x443   :  { %v6577_v55 = vmax.f32 %v6433_v22, 0.0  ;;  %v6434_v1 = vadd.f32 %v11522_v45, %v6283_v25 }
 0x444   :  { %v4449_v63 = vpop.f32.mrb[152].mxu0  ;;  %v5601_v23 = vpop.f32.mrb[152].mxu1 }
 0x445   :  { %v8183_v7 = vpack.c.bf16 %v6577_v55, %v6577_v55  ;;  %v6578_v8 = vmax.f32 %v6434_v1, 0.0  ;;  %v5996_v41 = vmax.f32 %v12938_v37, %v4449_v63  ;;  %v6140_v60 = vmax.f32 %v12939_v59, %v5601_v23  ;;  %v4451_v11 = vpop.f32.mrb[153].mxu0  ;;  %v5603_v31 = vpop.f32.mrb[153].mxu1  ;;  %v12946_v55 = vld [vmem:[#allocation84_spill] sm:$0xff]  ;;  %v12947_v63 = vld [vmem:[#allocation85_spill] sm:$0xff] }
 0x446   :  { %v4452_v42 = vpop.f32.mrb[154].mxu0  ;;  %v5604_v19 = vpop.f32.mrb[154].mxu1  ;;  %v9112_v59 = vld [vmem:[%s12619_s0 + $0x844] ss:$8 sps:$4 sm:$0xff]  }
 0x447   :  { %7298 = vst.msk [vmem:[%s12621_s3 + $0xe8] sm:$0xf] %vm7239_vm0, %v8183_v7  ;;  %v8184_v15 = vpack.c.bf16 %v6578_v8, %v6578_v8  ;;  %v6284_v16 = vmax.f32 %v5996_v41, %v6140_v60  ;;  %v5997_v0 = vmax.f32 %v12940_v38, %v4452_v42  ;;  %v6141_v3 = vmax.f32 %v12941_v56, %v5604_v19  ;;  %v4454_v39 = vpop.f32.mrb[155].mxu0  ;;  %v5606_v29 = vpop.f32.mrb[155].mxu1  ;;  %v9107_v8 = vld [vmem:[%s12619_s0 + $0x1130] ss:$8 sps:$4 sm:$0xff]  }
 0x448   :  { %v9115_v60 = vld [vmem:[%s12619_s0 + $0x1144] ss:$8 sps:$4 sm:$0xff]   ;;  %v9110_v29 = vld [vmem:[%s12619_s0 + $0x840] ss:$8 sps:$4 sm:$0xff]  }
 0x449   :  { %7299 = vst.msk [vmem:[%s12621_s3 + $0xec] sm:$0xf] %vm7239_vm0, %v8184_v15  ;;  %v6435_v40 = vadd.f32 %v11522_v45, %v6284_v16  ;;  %v6285_v4 = vmax.f32 %v5997_v0, %v6141_v3  ;;  %4664 = vmatmul.mubr.bf16.gmra.mrb[4].mxu0 %v9092_v24  ;;  %5816 = vmatmul.mubr.bf16.gmra.mrb[4].mxu1 %v9095_v32  ;;  %v12948_v32 = vld [vmem:[#allocation86_spill] sm:$0xff]  ;;  %v12949_v19 = vld [vmem:[#allocation87_spill] sm:$0xff] }
 0x44a   :  { %4671 = vmatprep.mubr.bf16.mxu0 %v9100_v12  ;;  %5823 = vmatprep.mubr.bf16.mxu1 %v9103_v20 }
 0x44b   :  { %v6579_v52 = vmax.f32 %v6435_v40, 0.0  ;;  %v6436_v9 = vadd.f32 %v11522_v45, %v6285_v4 }
 0x44c   :  { %v4457_v33 = vpop.f32.mrb[156].mxu0  ;;  %v5609_v34 = vpop.f32.mrb[156].mxu1 }
 0x44d   :  { %v8185_v26 = vpack.c.bf16 %v6579_v52, %v6579_v52  ;;  %v6580_v44 = vmax.f32 %v6436_v9, 0.0  ;;  %v5998_v48 = vmax.f32 %v12942_v47, %v4457_v33  ;;  %v6142_v43 = vmax.f32 %v12943_v17, %v5609_v34  ;;  %v4459_v6 = vpop.f32.mrb[157].mxu0  ;;  %v5611_v18 = vpop.f32.mrb[157].mxu1  ;;  %v12950_v52 = vld [vmem:[#allocation88_spill] sm:$0xff]  ;;  %v12951_v33 = vld [vmem:[#allocation89_spill] sm:$0xff] }
 0x44e   :  { %v4460_v49 = vpop.f32.mrb[158].mxu0  ;;  %v5612_v50 = vpop.f32.mrb[158].mxu1  ;;  %v9118_v17 = vld [vmem:[%s12619_s0 + $0x854] ss:$8 sps:$4 sm:$0xff]  }
 0x44f   :  { %7300 = vst.msk [vmem:[%s12621_s3 + $0xf0] sm:$0xf] %vm7239_vm0, %v8185_v26  ;;  %v8186_v14 = vpack.c.bf16 %v6580_v44, %v6580_v44  ;;  %v6286_v27 = vmax.f32 %v5998_v48, %v6142_v43  ;;  %v5999_v2 = vmax.f32 %v12944_v28, %v4460_v49  ;;  %v6143_v5 = vmax.f32 %v12945_v53, %v5612_v50  ;;  %v4462_v57 = vpop.f32.mrb[159].mxu0  ;;  %v5614_v61 = vpop.f32.mrb[159].mxu1  ;;  %v9113_v44 = vld [vmem:[%s12619_s0 + $0x1140] ss:$8 sps:$4 sm:$0xff]  }
 0x450   :  { %v9121_v43 = vld [vmem:[%s12619_s0 + $0x1154] ss:$8 sps:$4 sm:$0xff]   ;;  %v12953_v50 = vld [vmem:[#allocation91_spill] sm:$0xff]  ;;  %v9116_v61 = vld [vmem:[%s12619_s0 + $0x850] ss:$8 sps:$4 sm:$0xff]  }
 0x451   :  { %7301 = vst.msk [vmem:[%s12621_s3 + $0xf4] sm:$0xf] %vm7239_vm0, %v8186_v14  ;;  %v6437_v62 = vadd.f32 %v11522_v45, %v6286_v27  ;;  %v6287_v54 = vmax.f32 %v5999_v2, %v6143_v5  ;;  %4672 = vmatmul.mubr.bf16.gmra.mrb[8].mxu0 %v9098_v30  ;;  %5824 = vmatmul.mubr.bf16.gmra.mrb[8].mxu1 %v9101_v46  ;;  %v12952_v46 = vld [vmem:[#allocation90_spill] sm:$0xff] }
 0x452   :  { %4679 = vmatprep.mubr.bf16.mxu0 %v9106_v51  ;;  %5831 = vmatprep.mubr.bf16.mxu1 %v9109_v13 }
 0x453   :  { %v6581_v58 = vmax.f32 %v6437_v62, 0.0  ;;  %v6438_v35 = vadd.f32 %v11522_v45, %v6287_v54 }
 0x454   :  { %v4465_v36 = vpop.f32.mrb[160].mxu0  ;;  %v5617_v21 = vpop.f32.mrb[160].mxu1 }
 0x455   :  { %v8187_v22 = vpack.c.bf16 %v6581_v58, %v6581_v58  ;;  %v6582_v25 = vmax.f32 %v6438_v35, 0.0  ;;  %v6000_v1 = vmax.f32 %v12946_v55, %v4465_v36  ;;  %v6144_v23 = vmax.f32 %v12947_v63, %v5617_v21  ;;  %v4467_v24 = vpop.f32.mrb[161].mxu0  ;;  %v5619_v7 = vpop.f32.mrb[161].mxu1  ;;  %v12954_v58 = vld [vmem:[#allocation92_spill] sm:$0xff]  ;;  %v12955_v36 = vld [vmem:[#allocation93_spill] sm:$0xff] }
 0x456   :  { %v4468_v37 = vpop.f32.mrb[162].mxu0  ;;  %v5620_v41 = vpop.f32.mrb[162].mxu1  ;;  %v9124_v63 = vld [vmem:[%s12619_s0 + $0x864] ss:$8 sps:$4 sm:$0xff]  }
 0x457   :  { %7302 = vst.msk [vmem:[%s12621_s3 + $0xf8] sm:$0xf] %vm7239_vm0, %v8187_v22  ;;  %v8188_v11 = vpack.c.bf16 %v6582_v25, %v6582_v25  ;;  %v6288_v31 = vmax.f32 %v6000_v1, %v6144_v23  ;;  %v6001_v42 = vmax.f32 %v12948_v32, %v4468_v37  ;;  %v6145_v12 = vmax.f32 %v12949_v19, %v5620_v41  ;;  %v4470_v20 = vpop.f32.mrb[163].mxu0  ;;  %v5622_v15 = vpop.f32.mrb[163].mxu1  ;;  %v9119_v25 = vld [vmem:[%s12619_s0 + $0x1150] ss:$8 sps:$4 sm:$0xff]  }
 0x458   :  { %v9127_v23 = vld [vmem:[%s12619_s0 + $0x1164] ss:$8 sps:$4 sm:$0xff]   ;;  %v11970_v19 = vld [vmem:[%s12620_s2] ss:$0 sm:$0xff] }
 0x459   :  { %7303 = vst.msk [vmem:[%s12621_s3 + $0xfc] sm:$0xf] %vm7239_vm0, %v8188_v11  ;;  %v6439_v16 = vadd.f32 %v11522_v45, %v6288_v31  ;;  %v6289_v38 = vmax.f32 %v6001_v42, %v6145_v12  ;;  %4680 = vmatmul.mubr.bf16.gmra.mrb[12].mxu0 %v9104_v10  ;;  %5832 = vmatmul.mubr.bf16.gmra.mrb[12].mxu1 %v9107_v8  ;;  %v12956_v8 = vld [vmem:[#allocation94_spill] sm:$0xff]  ;;  %v12957_v41 = vld [vmem:[#allocation95_spill] sm:$0xff] }
 0x45a   :  { %4687 = vmatprep.mubr.bf16.mxu0 %v9112_v59  ;;  %5839 = vmatprep.mubr.bf16.mxu1 %v9115_v60 }
 0x45b   :  { %v6583_v0 = vmax.f32 %v6439_v16, 0.0  ;;  %v6440_v56 = vadd.f32 %v11522_v45, %v6289_v38  ;;  %v9122_v16 = vld [vmem:[%s12619_s0 + $0x860] ss:$8 sps:$4 sm:$0xff]  }
 0x45c   :  { %v4473_v3 = vpop.f32.mrb[164].mxu0  ;;  %v5625_v39 = vpop.f32.mrb[164].mxu1 }
 0x45d   :  { %v8189_v40 = vpack.c.bf16 %v6583_v0, %v6583_v0  ;;  %v6584_v4 = vmax.f32 %v6440_v56, 0.0  ;;  %v6002_v9 = vmax.f32 %v12950_v52, %v4473_v3  ;;  %v6146_v34 = vmax.f32 %v12951_v33, %v5625_v39  ;;  %v4475_v30 = vpop.f32.mrb[165].mxu0  ;;  %v5627_v26 = vpop.f32.mrb[165].mxu1  ;;  %v12958_v0 = vld [vmem:[#allocation96_spill] sm:$0xff]  ;;  %v12959_v3 = vld [vmem:[#allocation97_spill] sm:$0xff] }
 0x45e   :  { %v4476_v47 = vpop.f32.mrb[166].mxu0  ;;  %v5628_v48 = vpop.f32.mrb[166].mxu1  ;;  %v9130_v33 = vld [vmem:[%s12619_s0 + $0x874] ss:$8 sps:$4 sm:$0xff]  }
 0x45f   :  { %7304 = vst.msk [vmem:[%s12621_s3 + $0x100] sm:$0xf] %vm7239_vm0, %v8189_v40  ;;  %v8190_v6 = vpack.c.bf16 %v6584_v4, %v6584_v4  ;;  %v6290_v18 = vmax.f32 %v6002_v9, %v6146_v34  ;;  %v6003_v49 = vmax.f32 %v12952_v46, %v4476_v47  ;;  %v6147_v51 = vmax.f32 %v12953_v50, %v5628_v48  ;;  %v4478_v13 = vpop.f32.mrb[167].mxu0  ;;  %v5630_v14 = vpop.f32.mrb[167].mxu1  ;;  %v9125_v4 = vld [vmem:[%s12619_s0 + $0x1160] ss:$8 sps:$4 sm:$0xff]  }
 0x460   :  { %v9133_v34 = vld [vmem:[%s12619_s0 + $0x1174] ss:$8 sps:$4 sm:$0xff]   ;;  %v12961_v48 = vld [vmem:[#allocation99_spill] sm:$0xff]  ;;  %v9128_v14 = vld [vmem:[%s12619_s0 + $0x870] ss:$8 sps:$4 sm:$0xff]  }
 0x461   :  { %7305 = vst.msk [vmem:[%s12621_s3 + $0x104] sm:$0xf] %vm7239_vm0, %v8190_v6  ;;  %v6441_v27 = vadd.f32 %v11522_v45, %v6290_v18  ;;  %v6291_v28 = vmax.f32 %v6003_v49, %v6147_v51  ;;  %4688 = vmatmul.mubr.bf16.gmra.mrb[16].mxu0 %v9110_v29  ;;  %5840 = vmatmul.mubr.bf16.gmra.mrb[16].mxu1 %v9113_v44  ;;  %v12960_v44 = vld [vmem:[#allocation98_spill] sm:$0xff] }
 0x462   :  { %4695 = vmatprep.mubr.bf16.mxu0 %v9118_v17  ;;  %5847 = vmatprep.mubr.bf16.mxu1 %v9121_v43 }
 0x463   :  { %v6585_v2 = vmax.f32 %v6441_v27, 0.0  ;;  %v6442_v53 = vadd.f32 %v11522_v45, %v6291_v28 }
 0x464   :  { %v4481_v5 = vpop.f32.mrb[168].mxu0  ;;  %v5633_v57 = vpop.f32.mrb[168].mxu1 }
 0x465   :  { %v8191_v62 = vpack.c.bf16 %v6585_v2, %v6585_v2  ;;  %v6586_v54 = vmax.f32 %v6442_v53, 0.0  ;;  %v6004_v35 = vmax.f32 %v12954_v58, %v4481_v5  ;;  %v6148_v21 = vmax.f32 %v12955_v36, %v5633_v57  ;;  %v4483_v10 = vpop.f32.mrb[169].mxu0  ;;  %v5635_v22 = vpop.f32.mrb[169].mxu1  ;;  %v12962_v2 = vld [vmem:[#allocation100_spill] sm:$0xff]  ;;  %v12963_v5 = vld [vmem:[#allocation101_spill] sm:$0xff] }
 0x466   :  { %v4484_v55 = vpop.f32.mrb[170].mxu0  ;;  %v5636_v1 = vpop.f32.mrb[170].mxu1  ;;  %v9136_v36 = vld [vmem:[%s12619_s0 + $0x884] ss:$8 sps:$4 sm:$0xff]  }
 0x467   :  { %7306 = vst.msk [vmem:[%s12621_s3 + $0x108] sm:$0xf] %vm7239_vm0, %v8191_v62  ;;  %v8192_v24 = vpack.c.bf16 %v6586_v54, %v6586_v54  ;;  %v6292_v7 = vmax.f32 %v6004_v35, %v6148_v21  ;;  %v6005_v37 = vmax.f32 %v12956_v8, %v4484_v55  ;;  %v6149_v59 = vmax.f32 %v12957_v41, %v5636_v1  ;;  %v4486_v60 = vpop.f32.mrb[171].mxu0  ;;  %v5638_v11 = vpop.f32.mrb[171].mxu1  ;;  %v9131_v54 = vld [vmem:[%s12619_s0 + $0x1170] ss:$8 sps:$4 sm:$0xff]  }
 0x468   :  { %v9139_v21 = vld [vmem:[%s12619_s0 + $0x1184] ss:$8 sps:$4 sm:$0xff]   ;;  %v9134_v11 = vld [vmem:[%s12619_s0 + $0x880] ss:$8 sps:$4 sm:$0xff]  }
 0x469   :  { %7307 = vst.msk [vmem:[%s12621_s3 + $0x10c] sm:$0xf] %vm7239_vm0, %v8192_v24  ;;  %v6443_v31 = vadd.f32 %v11522_v45, %v6292_v7  ;;  %v6293_v32 = vmax.f32 %v6005_v37, %v6149_v59  ;;  %4696 = vmatmul.mubr.bf16.gmra.mrb[20].mxu0 %v9116_v61  ;;  %5848 = vmatmul.mubr.bf16.gmra.mrb[20].mxu1 %v9119_v25  ;;  %v12964_v25 = vld [vmem:[#allocation102_spill] sm:$0xff]  ;;  %v12965_v1 = vld [vmem:[#allocation103_spill] sm:$0xff] }
 0x46a   :  { %4703 = vmatprep.mubr.bf16.mxu0 %v9124_v63  ;;  %5855 = vmatprep.mubr.bf16.mxu1 %v9127_v23 }
 0x46b   :  { %v6587_v42 = vmax.f32 %v6443_v31, 0.0  ;;  %v6444_v12 = vadd.f32 %v11970_v19, %v6293_v32 }
 0x46c   :  { %v4489_v20 = vpop.f32.mrb[172].mxu0  ;;  %v5641_v15 = vpop.f32.mrb[172].mxu1 }
 0x46d   :  { %v8193_v45 = vpack.c.bf16 %v6587_v42, %v6587_v42  ;;  %v6588_v38 = vmax.f32 %v6444_v12, 0.0  ;;  %v6006_v56 = vmax.f32 %v12958_v0, %v4489_v20  ;;  %v6150_v39 = vmax.f32 %v12959_v3, %v5641_v15  ;;  %v4491_v29 = vpop.f32.mrb[173].mxu0  ;;  %v5643_v40 = vpop.f32.mrb[173].mxu1  ;;  %v12966_v42 = vld [vmem:[#allocation104_spill] sm:$0xff]  ;;  %v12967_v20 = vld [vmem:[#allocation105_spill] sm:$0xff] }
 0x46e   :  { %v4492_v52 = vpop.f32.mrb[174].mxu0  ;;  %v5644_v9 = vpop.f32.mrb[174].mxu1  ;;  %v9142_v3 = vld [vmem:[%s12619_s0 + $0x894] ss:$8 sps:$4 sm:$0xff]  }
 0x46f   :  { %7308 = vst.msk [vmem:[%s12621_s3 + $0x110] sm:$0xf] %vm7239_vm0, %v8193_v45  ;;  %v8194_v30 = vpack.c.bf16 %v6588_v38, %v6588_v38  ;;  %v6294_v26 = vmax.f32 %v6006_v56, %v6150_v39  ;;  %v6007_v47 = vmax.f32 %v12960_v44, %v4492_v52  ;;  %v6151_v17 = vmax.f32 %v12961_v48, %v5644_v9  ;;  %v4494_v43 = vpop.f32.mrb[175].mxu0  ;;  %v5646_v6 = vpop.f32.mrb[175].mxu1  ;;  %v9137_v38 = vld [vmem:[%s12619_s0 + $0x1180] ss:$8 sps:$4 sm:$0xff]  }
 0x470   :  { %v9145_v39 = vld [vmem:[%s12619_s0 + $0x1194] ss:$8 sps:$4 sm:$0xff]   ;;  %v12969_v9 = vld [vmem:[#allocation107_spill] sm:$0xff]  ;;  %v9140_v6 = vld [vmem:[%s12619_s0 + $0x890] ss:$8 sps:$4 sm:$0xff]  }
 0x471   :  { %7309 = vst.msk [vmem:[%s12621_s3 + $0x114] sm:$0xf] %vm7239_vm0, %v8194_v30  ;;  %v6445_v18 = vadd.f32 %v11970_v19, %v6294_v26  ;;  %v6295_v46 = vmax.f32 %v6007_v47, %v6151_v17  ;;  %4704 = vmatmul.mubr.bf16.gmra.mrb[24].mxu0 %v9122_v16  ;;  %5856 = vmatmul.mubr.bf16.gmra.mrb[24].mxu1 %v9125_v4  ;;  %v12968_v4 = vld [vmem:[#allocation106_spill] sm:$0xff] }
 0x472   :  { %4711 = vmatprep.mubr.bf16.mxu0 %v9130_v33  ;;  %5863 = vmatprep.mubr.bf16.mxu1 %v9133_v34 }
 0x473   :  { %v6589_v49 = vmax.f32 %v6445_v18, 0.0  ;;  %v6446_v50 = vadd.f32 %v11970_v19, %v6295_v46 }
 0x474   :  { %v4497_v51 = vpop.f32.mrb[176].mxu0  ;;  %v5649_v13 = vpop.f32.mrb[176].mxu1 }
 0x475   :  { %v8195_v27 = vpack.c.bf16 %v6589_v49, %v6589_v49  ;;  %v6590_v28 = vmax.f32 %v6446_v50, 0.0  ;;  %v6008_v53 = vmax.f32 %v12962_v2, %v4497_v51  ;;  %v6152_v57 = vmax.f32 %v12963_v5, %v5649_v13  ;;  %v4499_v61 = vpop.f32.mrb[177].mxu0  ;;  %v5651_v62 = vpop.f32.mrb[177].mxu1  ;;  %v12970_v49 = vld [vmem:[#allocation108_spill] sm:$0xff]  ;;  %v12971_v51 = vld [vmem:[#allocation109_spill] sm:$0xff] }
 0x476   :  { %v4500_v58 = vpop.f32.mrb[178].mxu0  ;;  %v5652_v35 = vpop.f32.mrb[178].mxu1  ;;  %v9148_v5 = vld [vmem:[%s12619_s0 + $0x8a4] ss:$8 sps:$4 sm:$0xff]  }
 0x477   :  { %7310 = vst.msk [vmem:[%s12621_s3 + $0x118] sm:$0xf] %vm7239_vm0, %v8195_v27  ;;  %v8196_v10 = vpack.c.bf16 %v6590_v28, %v6590_v28  ;;  %v6296_v22 = vmax.f32 %v6008_v53, %v6152_v57  ;;  %v6009_v55 = vmax.f32 %v12964_v25, %v4500_v58  ;;  %v6153_v63 = vmax.f32 %v12965_v1, %v5652_v35  ;;  %v4502_v23 = vpop.f32.mrb[179].mxu0  ;;  %v5654_v24 = vpop.f32.mrb[179].mxu1  ;;  %v9143_v28 = vld [vmem:[%s12619_s0 + $0x1190] ss:$8 sps:$4 sm:$0xff]  }
 0x478   :  { %v9151_v57 = vld [vmem:[%s12619_s0 + $0x11a4] ss:$8 sps:$4 sm:$0xff]   ;;  %v9146_v24 = vld [vmem:[%s12619_s0 + $0x8a0] ss:$8 sps:$4 sm:$0xff]  }
 0x479   :  { %7311 = vst.msk [vmem:[%s12621_s3 + $0x11c] sm:$0xf] %vm7239_vm0, %v8196_v10  ;;  %v6447_v7 = vadd.f32 %v11970_v19, %v6296_v22  ;;  %v6297_v8 = vmax.f32 %v6009_v55, %v6153_v63  ;;  %4712 = vmatmul.mubr.bf16.gmra.mrb[28].mxu0 %v9128_v14  ;;  %5864 = vmatmul.mubr.bf16.gmra.mrb[28].mxu1 %v9131_v54  ;;  %v12972_v54 = vld [vmem:[#allocation110_spill] sm:$0xff]  ;;  %v12973_v35 = vld [vmem:[#allocation111_spill] sm:$0xff] }
 0x47a   :  { %4719 = vmatprep.mubr.bf16.mxu0 %v9136_v36  ;;  %5871 = vmatprep.mubr.bf16.mxu1 %v9139_v21 }
 0x47b   :  { %v6591_v37 = vmax.f32 %v6447_v7, 0.0  ;;  %v6448_v41 = vadd.f32 %v11970_v19, %v6297_v8 }
 0x47c   :  { %v4505_v59 = vpop.f32.mrb[180].mxu0  ;;  %v5657_v60 = vpop.f32.mrb[180].mxu1 }
 0x47d   :  { %v8197_v31 = vpack.c.bf16 %v6591_v37, %v6591_v37  ;;  %v6592_v32 = vmax.f32 %v6448_v41, 0.0  ;;  %v6010_v12 = vmax.f32 %v12966_v42, %v4505_v59  ;;  %v6154_v15 = vmax.f32 %v12967_v20, %v5657_v60  ;;  %v4507_v16 = vpop.f32.mrb[181].mxu0  ;;  %v5659_v45 = vpop.f32.mrb[181].mxu1  ;;  %v12974_v37 = vld [vmem:[#allocation112_spill] sm:$0xff]  ;;  %v12975_v59 = vld [vmem:[#allocation113_spill] sm:$0xff] }
 0x47e   :  { %v4508_v0 = vpop.f32.mrb[182].mxu0  ;;  %v5660_v56 = vpop.f32.mrb[182].mxu1  ;;  %v9154_v20 = vld [vmem:[%s12619_s0 + $0x8b4] ss:$8 sps:$4 sm:$0xff]  }
 0x47f   :  { %7312 = vst.msk [vmem:[%s12621_s3 + $0x120] sm:$0xf] %vm7239_vm0, %v8197_v31  ;;  %v8198_v29 = vpack.c.bf16 %v6592_v32, %v6592_v32  ;;  %v6298_v40 = vmax.f32 %v6010_v12, %v6154_v15  ;;  %v6011_v52 = vmax.f32 %v12968_v4, %v4508_v0  ;;  %v6155_v33 = vmax.f32 %v12969_v9, %v5660_v56  ;;  %v4510_v34 = vpop.f32.mrb[183].mxu0  ;;  %v5662_v30 = vpop.f32.mrb[183].mxu1  ;;  %v9149_v32 = vld [vmem:[%s12619_s0 + $0x11a0] ss:$8 sps:$4 sm:$0xff]  }
 0x480   :  { %v9157_v15 = vld [vmem:[%s12619_s0 + $0x11b4] ss:$8 sps:$4 sm:$0xff]   ;;  %v12977_v56 = vld [vmem:[#allocation115_spill] sm:$0xff]  ;;  %v9152_v30 = vld [vmem:[%s12619_s0 + $0x8b0] ss:$8 sps:$4 sm:$0xff]  }
 0x481   :  { %7313 = vst.msk [vmem:[%s12621_s3 + $0x124] sm:$0xf] %vm7239_vm0, %v8198_v29  ;;  %v6449_v26 = vadd.f32 %v11970_v19, %v6298_v40  ;;  %v6299_v44 = vmax.f32 %v6011_v52, %v6155_v33  ;;  %4720 = vmatmul.mubr.bf16.gmra.mrb[32].mxu0 %v9134_v11  ;;  %5872 = vmatmul.mubr.bf16.gmra.mrb[32].mxu1 %v9137_v38  ;;  %v12976_v38 = vld [vmem:[#allocation114_spill] sm:$0xff] }
 0x482   :  { %4727 = vmatprep.mubr.bf16.mxu0 %v9142_v3  ;;  %5879 = vmatprep.mubr.bf16.mxu1 %v9145_v39 }
 0x483   :  { %v6593_v47 = vmax.f32 %v6449_v26, 0.0  ;;  %v6450_v48 = vadd.f32 %v11970_v19, %v6299_v44 }
 0x484   :  { %v4513_v17 = vpop.f32.mrb[184].mxu0  ;;  %v5665_v43 = vpop.f32.mrb[184].mxu1 }
 0x485   :  { %v8199_v18 = vpack.c.bf16 %v6593_v47, %v6593_v47  ;;  %v6594_v46 = vmax.f32 %v6450_v48, 0.0  ;;  %v6012_v50 = vmax.f32 %v12970_v49, %v4513_v17  ;;  %v6156_v13 = vmax.f32 %v12971_v51, %v5665_v43  ;;  %v4515_v14 = vpop.f32.mrb[185].mxu0  ;;  %v5667_v27 = vpop.f32.mrb[185].mxu1  ;;  %v12978_v47 = vld [vmem:[#allocation116_spill] sm:$0xff]  ;;  %v12979_v17 = vld [vmem:[#allocation117_spill] sm:$0xff] }
 0x486   :  { %v4516_v2 = vpop.f32.mrb[186].mxu0  ;;  %v5668_v53 = vpop.f32.mrb[186].mxu1  ;;  %v9160_v51 = vld [vmem:[%s12619_s0 + $0x8c4] ss:$8 sps:$4 sm:$0xff]  }
 0x487   :  { %7314 = vst.msk [vmem:[%s12621_s3 + $0x128] sm:$0xf] %vm7239_vm0, %v8199_v18  ;;  %v8200_v61 = vpack.c.bf16 %v6594_v46, %v6594_v46  ;;  %v6300_v62 = vmax.f32 %v6012_v50, %v6156_v13  ;;  %v6013_v58 = vmax.f32 %v12972_v54, %v4516_v2  ;;  %v6157_v36 = vmax.f32 %v12973_v35, %v5668_v53  ;;  %v4518_v21 = vpop.f32.mrb[187].mxu0  ;;  %v5670_v10 = vpop.f32.mrb[187].mxu1  ;;  %v9155_v46 = vld [vmem:[%s12619_s0 + $0x11b0] ss:$8 sps:$4 sm:$0xff]  }
 0x488   :  { %v9163_v13 = vld [vmem:[%s12619_s0 + $0x11c4] ss:$8 sps:$4 sm:$0xff]   ;;  %v9158_v10 = vld [vmem:[%s12619_s0 + $0x8c0] ss:$8 sps:$4 sm:$0xff]  }
 0x489   :  { %7315 = vst.msk [vmem:[%s12621_s3 + $0x12c] sm:$0xf] %vm7239_vm0, %v8200_v61  ;;  %v6451_v22 = vadd.f32 %v11970_v19, %v6300_v62  ;;  %v6301_v25 = vmax.f32 %v6013_v58, %v6157_v36  ;;  %4728 = vmatmul.mubr.bf16.gmra.mrb[36].mxu0 %v9140_v6  ;;  %5880 = vmatmul.mubr.bf16.gmra.mrb[36].mxu1 %v9143_v28  ;;  %v12980_v28 = vld [vmem:[#allocation118_spill] sm:$0xff]  ;;  %v12981_v53 = vld [vmem:[#allocation119_spill] sm:$0xff] }
 0x48a   :  { %4735 = vmatprep.mubr.bf16.mxu0 %v9148_v5  ;;  %5887 = vmatprep.mubr.bf16.mxu1 %v9151_v57 }
 0x48b   :  { %v6595_v55 = vmax.f32 %v6451_v22, 0.0  ;;  %v6452_v1 = vadd.f32 %v11970_v19, %v6301_v25 }
 0x48c   :  { %v4521_v63 = vpop.f32.mrb[188].mxu0  ;;  %v5673_v23 = vpop.f32.mrb[188].mxu1 }
 0x48d   :  { %v8201_v7 = vpack.c.bf16 %v6595_v55, %v6595_v55  ;;  %v6596_v8 = vmax.f32 %v6452_v1, 0.0  ;;  %v6014_v41 = vmax.f32 %v12974_v37, %v4521_v63  ;;  %v6158_v60 = vmax.f32 %v12975_v59, %v5673_v23  ;;  %v4523_v11 = vpop.f32.mrb[189].mxu0  ;;  %v5675_v31 = vpop.f32.mrb[189].mxu1  ;;  %v12982_v55 = vld [vmem:[#allocation120_spill] sm:$0xff]  ;;  %v12983_v63 = vld [vmem:[#allocation121_spill] sm:$0xff] }
 0x48e   :  { %v4524_v42 = vpop.f32.mrb[190].mxu0  ;;  %v5676_v12 = vpop.f32.mrb[190].mxu1  ;;  %v9166_v59 = vld [vmem:[%s12619_s0 + $0x8d4] ss:$8 sps:$4 sm:$0xff]  }
 0x48f   :  { %7316 = vst.msk [vmem:[%s12621_s3 + $0x130] sm:$0xf] %vm7239_vm0, %v8201_v7  ;;  %v8202_v16 = vpack.c.bf16 %v6596_v8, %v6596_v8  ;;  %v6302_v45 = vmax.f32 %v6014_v41, %v6158_v60  ;;  %v6015_v0 = vmax.f32 %v12976_v38, %v4524_v42  ;;  %v6159_v3 = vmax.f32 %v12977_v56, %v5676_v12  ;;  %v4526_v39 = vpop.f32.mrb[191].mxu0  ;;  %v5678_v29 = vpop.f32.mrb[191].mxu1  ;;  %v9161_v8 = vld [vmem:[%s12619_s0 + $0x11c0] ss:$8 sps:$4 sm:$0xff]  }
 0x490   :  { %v9169_v60 = vld [vmem:[%s12619_s0 + $0x11d4] ss:$8 sps:$4 sm:$0xff]   ;;  %v12985_v12 = vld [vmem:[#allocation123_spill] sm:$0xff]  ;;  %v9164_v29 = vld [vmem:[%s12619_s0 + $0x8d0] ss:$8 sps:$4 sm:$0xff]  }
 0x491   :  { %7317 = vst.msk [vmem:[%s12621_s3 + $0x134] sm:$0xf] %vm7239_vm0, %v8202_v16  ;;  %v6453_v40 = vadd.f32 %v11970_v19, %v6302_v45  ;;  %v6303_v4 = vmax.f32 %v6015_v0, %v6159_v3  ;;  %4736 = vmatmul.mubr.bf16.gmra.mrb[40].mxu0 %v9146_v24  ;;  %5888 = vmatmul.mubr.bf16.gmra.mrb[40].mxu1 %v9149_v32  ;;  %v12984_v32 = vld [vmem:[#allocation122_spill] sm:$0xff] }
 0x492   :  { %4743 = vmatprep.mubr.bf16.mxu0 %v9154_v20  ;;  %5895 = vmatprep.mubr.bf16.mxu1 %v9157_v15 }
 0x493   :  { %v6597_v52 = vmax.f32 %v6453_v40, 0.0  ;;  %v6454_v9 = vadd.f32 %v11970_v19, %v6303_v4 }
 0x494   :  { %v4529_v33 = vpop.f32.mrb[192].mxu0  ;;  %v5681_v34 = vpop.f32.mrb[192].mxu1 }
 0x495   :  { %v8203_v26 = vpack.c.bf16 %v6597_v52, %v6597_v52  ;;  %v6598_v44 = vmax.f32 %v6454_v9, 0.0  ;;  %v6016_v48 = vmax.f32 %v12978_v47, %v4529_v33  ;;  %v6160_v43 = vmax.f32 %v12979_v17, %v5681_v34  ;;  %v4531_v6 = vpop.f32.mrb[193].mxu0  ;;  %v5683_v18 = vpop.f32.mrb[193].mxu1  ;;  %v12986_v52 = vld [vmem:[#allocation124_spill] sm:$0xff]  ;;  %v12987_v33 = vld [vmem:[#allocation125_spill] sm:$0xff] }
 0x496   :  { %v4532_v49 = vpop.f32.mrb[194].mxu0  ;;  %v5684_v50 = vpop.f32.mrb[194].mxu1  ;;  %v9172_v17 = vld [vmem:[%s12619_s0 + $0x8e4] ss:$8 sps:$4 sm:$0xff]  }
 0x497   :  { %7318 = vst.msk [vmem:[%s12621_s3 + $0x138] sm:$0xf] %vm7239_vm0, %v8203_v26  ;;  %v8204_v14 = vpack.c.bf16 %v6598_v44, %v6598_v44  ;;  %v6304_v27 = vmax.f32 %v6016_v48, %v6160_v43  ;;  %v6017_v2 = vmax.f32 %v12980_v28, %v4532_v49  ;;  %v6161_v5 = vmax.f32 %v12981_v53, %v5684_v50  ;;  %v4534_v57 = vpop.f32.mrb[195].mxu0  ;;  %v5686_v61 = vpop.f32.mrb[195].mxu1  ;;  %v9167_v44 = vld [vmem:[%s12619_s0 + $0x11d0] ss:$8 sps:$4 sm:$0xff]  }
 0x498   :  { %v9175_v43 = vld [vmem:[%s12619_s0 + $0x11e4] ss:$8 sps:$4 sm:$0xff]   ;;  %v9170_v61 = vld [vmem:[%s12619_s0 + $0x8e0] ss:$8 sps:$4 sm:$0xff]  }
 0x499   :  { %7319 = vst.msk [vmem:[%s12621_s3 + $0x13c] sm:$0xf] %vm7239_vm0, %v8204_v14  ;;  %v6455_v62 = vadd.f32 %v11970_v19, %v6304_v27  ;;  %v6305_v54 = vmax.f32 %v6017_v2, %v6161_v5  ;;  %4744 = vmatmul.mubr.bf16.gmra.mrb[44].mxu0 %v9152_v30  ;;  %5896 = vmatmul.mubr.bf16.gmra.mrb[44].mxu1 %v9155_v46  ;;  %v12988_v46 = vld [vmem:[#allocation126_spill] sm:$0xff]  ;;  %v12989_v50 = vld [vmem:[#allocation127_spill] sm:$0xff] }
 0x49a   :  { %4751 = vmatprep.mubr.bf16.mxu0 %v9160_v51  ;;  %5903 = vmatprep.mubr.bf16.mxu1 %v9163_v13 }
 0x49b   :  { %v6599_v58 = vmax.f32 %v6455_v62, 0.0  ;;  %v6456_v35 = vadd.f32 %v11970_v19, %v6305_v54 }
 0x49c   :  { %v4537_v36 = vpop.f32.mrb[196].mxu0  ;;  %v5689_v21 = vpop.f32.mrb[196].mxu1 }
 0x49d   :  { %v8205_v22 = vpack.c.bf16 %v6599_v58, %v6599_v58  ;;  %v6600_v25 = vmax.f32 %v6456_v35, 0.0  ;;  %v6018_v1 = vmax.f32 %v12982_v55, %v4537_v36  ;;  %v6162_v23 = vmax.f32 %v12983_v63, %v5689_v21  ;;  %v4539_v24 = vpop.f32.mrb[197].mxu0  ;;  %v5691_v7 = vpop.f32.mrb[197].mxu1  ;;  %v12990_v58 = vld [vmem:[#allocation128_spill] sm:$0xff]  ;;  %v12991_v36 = vld [vmem:[#allocation129_spill] sm:$0xff] }
 0x49e   :  { %v4540_v37 = vpop.f32.mrb[198].mxu0  ;;  %v5692_v41 = vpop.f32.mrb[198].mxu1  ;;  %v9178_v63 = vld [vmem:[%s12619_s0 + $0x8f4] ss:$8 sps:$4 sm:$0xff]  }
 0x49f   :  { %7320 = vst.msk [vmem:[%s12621_s3 + $0x140] sm:$0xf] %vm7239_vm0, %v8205_v22  ;;  %v8206_v11 = vpack.c.bf16 %v6600_v25, %v6600_v25  ;;  %v6306_v31 = vmax.f32 %v6018_v1, %v6162_v23  ;;  %v6019_v42 = vmax.f32 %v12984_v32, %v4540_v37  ;;  %v6163_v20 = vmax.f32 %v12985_v12, %v5692_v41  ;;  %v4542_v15 = vpop.f32.mrb[199].mxu0  ;;  %v5694_v16 = vpop.f32.mrb[199].mxu1  ;;  %v9173_v25 = vld [vmem:[%s12619_s0 + $0x11e0] ss:$8 sps:$4 sm:$0xff]  }
 0x4a0   :  { %v9181_v23 = vld [vmem:[%s12619_s0 + $0x11f4] ss:$8 sps:$4 sm:$0xff]   ;;  %v12993_v41 = vld [vmem:[#allocation131_spill] sm:$0xff]  ;;  %v9176_v16 = vld [vmem:[%s12619_s0 + $0x8f0] ss:$8 sps:$4 sm:$0xff]  }
 0x4a1   :  { %7321 = vst.msk [vmem:[%s12621_s3 + $0x144] sm:$0xf] %vm7239_vm0, %v8206_v11  ;;  %v6457_v45 = vadd.f32 %v11970_v19, %v6306_v31  ;;  %v6307_v38 = vmax.f32 %v6019_v42, %v6163_v20  ;;  %4752 = vmatmul.mubr.bf16.gmra.mrb[48].mxu0 %v9158_v10  ;;  %5904 = vmatmul.mubr.bf16.gmra.mrb[48].mxu1 %v9161_v8  ;;  %v12992_v8 = vld [vmem:[#allocation130_spill] sm:$0xff] }
 0x4a2   :  { %4759 = vmatprep.mubr.bf16.mxu0 %v9166_v59  ;;  %5911 = vmatprep.mubr.bf16.mxu1 %v9169_v60 }
 0x4a3   :  { %v6601_v0 = vmax.f32 %v6457_v45, 0.0  ;;  %v6458_v56 = vadd.f32 %v11970_v19, %v6307_v38 }
 0x4a4   :  { %v4545_v3 = vpop.f32.mrb[200].mxu0  ;;  %v5697_v39 = vpop.f32.mrb[200].mxu1 }
 0x4a5   :  { %v8207_v40 = vpack.c.bf16 %v6601_v0, %v6601_v0  ;;  %v6602_v4 = vmax.f32 %v6458_v56, 0.0  ;;  %v6020_v9 = vmax.f32 %v12986_v52, %v4545_v3  ;;  %v6164_v34 = vmax.f32 %v12987_v33, %v5697_v39  ;;  %v4547_v30 = vpop.f32.mrb[201].mxu0  ;;  %v5699_v26 = vpop.f32.mrb[201].mxu1  ;;  %v12994_v0 = vld [vmem:[#allocation132_spill] sm:$0xff]  ;;  %v12995_v3 = vld [vmem:[#allocation133_spill] sm:$0xff] }
 0x4a6   :  { %v4548_v47 = vpop.f32.mrb[202].mxu0  ;;  %v5700_v48 = vpop.f32.mrb[202].mxu1  ;;  %v12996_v30 = vld [vmem:[#allocation134_spill] sm:$0xff] }
 0x4a7   :  { %7322 = vst.msk [vmem:[%s12621_s3 + $0x148] sm:$0xf] %vm7239_vm0, %v8207_v40  ;;  %v8208_v6 = vpack.c.bf16 %v6602_v4, %v6602_v4  ;;  %v6308_v18 = vmax.f32 %v6020_v9, %v6164_v34  ;;  %v6021_v49 = vmax.f32 %v12988_v46, %v4548_v47  ;;  %v6165_v51 = vmax.f32 %v12989_v50, %v5700_v48  ;;  %v4550_v13 = vpop.f32.mrb[203].mxu0  ;;  %v5702_v14 = vpop.f32.mrb[203].mxu1  ;;  %v9179_v4 = vld [vmem:[%s12619_s0 + $0x11f0] ss:$8 sps:$4 sm:$0xff]  }
 0x4a8   :  { %v12998_v14 = vld [vmem:[#allocation136_spill] sm:$0xff] }
 0x4a9   :  { %7323 = vst.msk [vmem:[%s12621_s3 + $0x14c] sm:$0xf] %vm7239_vm0, %v8208_v6  ;;  %v6459_v27 = vadd.f32 %v11970_v19, %v6308_v18  ;;  %v6309_v28 = vmax.f32 %v6021_v49, %v6165_v51  ;;  %4760 = vmatmul.mubr.bf16.gmra.mrb[52].mxu0 %v9164_v29  ;;  %5912 = vmatmul.mubr.bf16.gmra.mrb[52].mxu1 %v9167_v44  ;;  %v12997_v44 = vld [vmem:[#allocation135_spill] sm:$0xff] }
 0x4aa   :  { %4767 = vmatprep.mubr.bf16.mxu0 %v9172_v17  ;;  %5919 = vmatprep.mubr.bf16.mxu1 %v9175_v43 }
 0x4ab   :  { %v6603_v2 = vmax.f32 %v6459_v27, 0.0  ;;  %v6460_v53 = vadd.f32 %v11970_v19, %v6309_v28  ;;  %v12999_v28 = vld [vmem:[#allocation137_spill] sm:$0xff] }
 0x4ac   :  { %v4553_v5 = vpop.f32.mrb[204].mxu0  ;;  %v5705_v57 = vpop.f32.mrb[204].mxu1 }
 0x4ad   :  { %v8209_v62 = vpack.c.bf16 %v6603_v2, %v6603_v2  ;;  %v6604_v54 = vmax.f32 %v6460_v53, 0.0  ;;  %v6022_v35 = vmax.f32 %v12990_v58, %v4553_v5  ;;  %v6166_v21 = vmax.f32 %v12991_v36, %v5705_v57  ;;  %v4555_v10 = vpop.f32.mrb[205].mxu0  ;;  %v5707_v22 = vpop.f32.mrb[205].mxu1  ;;  %v13000_v58 = vld [vmem:[#allocation138_spill] sm:$0xff]  ;;  %v13001_v36 = vld [vmem:[#allocation139_spill] sm:$0xff] }
 0x4ae   :  { %v4556_v55 = vpop.f32.mrb[206].mxu0  ;;  %v5708_v1 = vpop.f32.mrb[206].mxu1 }
 0x4af   :  { %7324 = vst.msk [vmem:[%s12621_s3 + $0x150] sm:$0xf] %vm7239_vm0, %v8209_v62  ;;  %v8210_v24 = vpack.c.bf16 %v6604_v54, %v6604_v54  ;;  %v6310_v7 = vmax.f32 %v6022_v35, %v6166_v21  ;;  %v6023_v37 = vmax.f32 %v12992_v8, %v4556_v55  ;;  %v6167_v59 = vmax.f32 %v12993_v41, %v5708_v1  ;;  %v4558_v60 = vpop.f32.mrb[207].mxu0  ;;  %v5710_v11 = vpop.f32.mrb[207].mxu1 }
 0x4b1   :  { %7325 = vst.msk [vmem:[%s12621_s3 + $0x154] sm:$0xf] %vm7239_vm0, %v8210_v24  ;;  %v6461_v31 = vadd.f32 %v11970_v19, %v6310_v7  ;;  %v6311_v32 = vmax.f32 %v6023_v37, %v6167_v59  ;;  %4768 = vmatmul.mubr.bf16.gmra.mrb[56].mxu0 %v9170_v61  ;;  %5920 = vmatmul.mubr.bf16.gmra.mrb[56].mxu1 %v9173_v25  ;;  %v13002_v37 = vld [vmem:[#allocation140_spill] sm:$0xff]  ;;  %v13003_v59 = vld [vmem:[#allocation141_spill] sm:$0xff] }
 0x4b2   :  { %4775 = vmatprep.mubr.bf16.mxu0 %v9178_v63  ;;  %5927 = vmatprep.mubr.bf16.mxu1 %v9181_v23 }
 0x4b3   :  { %v6605_v42 = vmax.f32 %v6461_v31, 0.0  ;;  %v6462_v12 = vadd.f32 %v11970_v19, %v6311_v32 }
 0x4b4   :  { %v4561_v20 = vpop.f32.mrb[208].mxu0  ;;  %v5713_v15 = vpop.f32.mrb[208].mxu1 }
 0x4b5   :  { %v8211_v45 = vpack.c.bf16 %v6605_v42, %v6605_v42  ;;  %v6606_v38 = vmax.f32 %v6462_v12, 0.0  ;;  %v6024_v56 = vmax.f32 %v12994_v0, %v4561_v20  ;;  %v6168_v39 = vmax.f32 %v12995_v3, %v5713_v15  ;;  %v4563_v29 = vpop.f32.mrb[209].mxu0  ;;  %v5715_v40 = vpop.f32.mrb[209].mxu1  ;;  %v13004_v15 = vld [vmem:[#allocation142_spill] sm:$0xff] }
 0x4b6   :  { %v4564_v52 = vpop.f32.mrb[210].mxu0  ;;  %v5716_v9 = vpop.f32.mrb[210].mxu1 }
 0x4b7   :  { %7326 = vst.msk [vmem:[%s12621_s3 + $0x158] sm:$0xf] %vm7239_vm0, %v8211_v45  ;;  %v8212_v33 = vpack.c.bf16 %v6606_v38, %v6606_v38  ;;  %v6312_v34 = vmax.f32 %v6024_v56, %v6168_v39  ;;  %v6025_v26 = vmax.f32 %v12996_v30, %v4564_v52  ;;  %v6169_v47 = vmax.f32 %v12997_v44, %v5716_v9  ;;  %v4566_v48 = vpop.f32.mrb[211].mxu0  ;;  %v5718_v17 = vpop.f32.mrb[211].mxu1  ;;  %v13005_v45 = vld [vmem:[#allocation143_spill] sm:$0xff] }
 0x4b9   :  { %7327 = vst.msk [vmem:[%s12621_s3 + $0x15c] sm:$0xf] %vm7239_vm0, %v8212_v33  ;;  %v6463_v43 = vadd.f32 %v11970_v19, %v6312_v34  ;;  %v6313_v6 = vmax.f32 %v6025_v26, %v6169_v47  ;;  %4776 = vmatmul.mubr.bf16.gmra.mrb[60].mxu0 %v9176_v16  ;;  %5928 = vmatmul.mubr.bf16.gmra.mrb[60].mxu1 %v9179_v4  ;;  %v13006_v34 = vld [vmem:[#allocation144_spill] sm:$0xff]  ;;  %v13007_v26 = vld [vmem:[#allocation145_spill] sm:$0xff] }
 0x4bb   :  { %v6607_v18 = vmax.f32 %v6463_v43, 0.0  ;;  %v6464_v46 = vadd.f32 %v11970_v19, %v6313_v6 }
 0x4bc   :  { %v4569_v49 = vpop.f32.mrb[212].mxu0  ;;  %v5721_v50 = vpop.f32.mrb[212].mxu1 }
 0x4bd   :  { %v8213_v51 = vpack.c.bf16 %v6607_v18, %v6607_v18  ;;  %v6608_v13 = vmax.f32 %v6464_v46, 0.0  ;;  %v6026_v27 = vmax.f32 %v12998_v14, %v4569_v49  ;;  %v6170_v2 = vmax.f32 %v12999_v28, %v5721_v50  ;;  %v4571_v53 = vpop.f32.mrb[213].mxu0  ;;  %v5723_v5 = vpop.f32.mrb[213].mxu1  ;;  %v13008_v46 = vld [vmem:[#allocation146_spill] sm:$0xff]  ;;  %v13009_v50 = vld [vmem:[#allocation147_spill] sm:$0xff] }
 0x4be   :  { %v4572_v57 = vpop.f32.mrb[214].mxu0  ;;  %v5724_v61 = vpop.f32.mrb[214].mxu1 }
 0x4bf   :  { %7328 = vst.msk [vmem:[%s12621_s3 + $0x160] sm:$0xf] %vm7239_vm0, %v8213_v51  ;;  %v8214_v62 = vpack.c.bf16 %v6608_v13, %v6608_v13  ;;  %v6314_v54 = vmax.f32 %v6026_v27, %v6170_v2  ;;  %v6027_v35 = vmax.f32 %v13000_v58, %v4572_v57  ;;  %v6171_v21 = vmax.f32 %v13001_v36, %v5724_v61  ;;  %v4574_v10 = vpop.f32.mrb[215].mxu0  ;;  %v5726_v22 = vpop.f32.mrb[215].mxu1 }
 0x4c1   :  { %7329 = vst.msk [vmem:[%s12621_s3 + $0x164] sm:$0xf] %vm7239_vm0, %v8214_v62  ;;  %v6465_v25 = vadd.f32 %v11970_v19, %v6314_v54  ;;  %v6315_v55 = vmax.f32 %v6027_v35, %v6171_v21  ;;  %v13010_v54 = vld [vmem:[#allocation148_spill] sm:$0xff]  ;;  %v13011_v35 = vld [vmem:[#allocation149_spill] sm:$0xff] }
 0x4c3   :  { %v6609_v1 = vmax.f32 %v6465_v25, 0.0  ;;  %v6466_v63 = vadd.f32 %v11970_v19, %v6315_v55 }
 0x4c4   :  { %v4577_v23 = vpop.f32.mrb[216].mxu0  ;;  %v5729_v24 = vpop.f32.mrb[216].mxu1 }
 0x4c5   :  { %v8215_v7 = vpack.c.bf16 %v6609_v1, %v6609_v1  ;;  %v6610_v8 = vmax.f32 %v6466_v63, 0.0  ;;  %v6028_v41 = vmax.f32 %v13002_v37, %v4577_v23  ;;  %v6172_v60 = vmax.f32 %v13003_v59, %v5729_v24  ;;  %v4579_v11 = vpop.f32.mrb[217].mxu0  ;;  %v5731_v31 = vpop.f32.mrb[217].mxu1  ;;  %v13012_v63 = vld [vmem:[#allocation150_spill] sm:$0xff]  ;;  %v13013_v24 = vld [vmem:[#allocation151_spill] sm:$0xff] }
 0x4c6   :  { %v4580_v32 = vpop.f32.mrb[218].mxu0  ;;  %v5732_v42 = vpop.f32.mrb[218].mxu1 }
 0x4c7   :  { %7330 = vst.msk [vmem:[%s12621_s3 + $0x168] sm:$0xf] %vm7239_vm0, %v8215_v7  ;;  %v8216_v12 = vpack.c.bf16 %v6610_v8, %v6610_v8  ;;  %v6316_v20 = vmax.f32 %v6028_v41, %v6172_v60  ;;  %v6029_v16 = vmax.f32 %v13004_v15, %v4580_v32  ;;  %v6173_v38 = vmax.f32 %v13005_v45, %v5732_v42  ;;  %v4582_v0 = vpop.f32.mrb[219].mxu0  ;;  %v5734_v56 = vpop.f32.mrb[219].mxu1 }
 0x4c9   :  { %7331 = vst.msk [vmem:[%s12621_s3 + $0x16c] sm:$0xf] %vm7239_vm0, %v8216_v12  ;;  %v6467_v3 = vadd.f32 %v11970_v19, %v6316_v20  ;;  %v6317_v39 = vmax.f32 %v6029_v16, %v6173_v38  ;;  %v13014_v20 = vld [vmem:[#allocation152_spill] sm:$0xff]  ;;  %v13015_v16 = vld [vmem:[#allocation153_spill] sm:$0xff] }
 0x4cb   :  { %v6611_v29 = vmax.f32 %v6467_v3, 0.0  ;;  %v6468_v40 = vadd.f32 %v11970_v19, %v6317_v39 }
 0x4cc   :  { %v4585_v4 = vpop.f32.mrb[220].mxu0  ;;  %v5737_v52 = vpop.f32.mrb[220].mxu1 }
 0x4cd   :  { %v8217_v9 = vpack.c.bf16 %v6611_v29, %v6611_v29  ;;  %v6612_v33 = vmax.f32 %v6468_v40, 0.0  ;;  %v6030_v30 = vmax.f32 %v13006_v34, %v4585_v4  ;;  %v6174_v44 = vmax.f32 %v13007_v26, %v5737_v52  ;;  %v4587_v47 = vpop.f32.mrb[221].mxu0  ;;  %v5739_v48 = vpop.f32.mrb[221].mxu1  ;;  %v13016_v40 = vld [vmem:[#allocation154_spill] sm:$0xff]  ;;  %v13017_v52 = vld [vmem:[#allocation155_spill] sm:$0xff] }
 0x4ce   :  { %v4588_v17 = vpop.f32.mrb[222].mxu0  ;;  %v5740_v43 = vpop.f32.mrb[222].mxu1 }
 0x4cf   :  { %7332 = vst.msk [vmem:[%s12621_s3 + $0x170] sm:$0xf] %vm7239_vm0, %v8217_v9  ;;  %v8218_v6 = vpack.c.bf16 %v6612_v33, %v6612_v33  ;;  %v6318_v18 = vmax.f32 %v6030_v30, %v6174_v44  ;;  %v6031_v49 = vmax.f32 %v13008_v46, %v4588_v17  ;;  %v6175_v51 = vmax.f32 %v13009_v50, %v5740_v43  ;;  %v4590_v13 = vpop.f32.mrb[223].mxu0  ;;  %v5742_v14 = vpop.f32.mrb[223].mxu1 }
 0x4d1   :  { %7333 = vst.msk [vmem:[%s12621_s3 + $0x174] sm:$0xf] %vm7239_vm0, %v8218_v6  ;;  %v6469_v27 = vadd.f32 %v11970_v19, %v6318_v18  ;;  %v6319_v28 = vmax.f32 %v6031_v49, %v6175_v51  ;;  %v13018_v18 = vld [vmem:[#allocation156_spill] sm:$0xff]  ;;  %v13019_v49 = vld [vmem:[#allocation157_spill] sm:$0xff] }
 0x4d3   :  { %v6613_v2 = vmax.f32 %v6469_v27, 0.0  ;;  %v6470_v53 = vadd.f32 %v11970_v19, %v6319_v28 }
 0x4d4   :  { %v4593_v5 = vpop.f32.mrb[224].mxu0  ;;  %v5745_v57 = vpop.f32.mrb[224].mxu1 }
 0x4d5   :  { %v8219_v61 = vpack.c.bf16 %v6613_v2, %v6613_v2  ;;  %v6614_v62 = vmax.f32 %v6470_v53, 0.0  ;;  %v6032_v58 = vmax.f32 %v13010_v54, %v4593_v5  ;;  %v6176_v36 = vmax.f32 %v13011_v35, %v5745_v57  ;;  %v4595_v21 = vpop.f32.mrb[225].mxu0  ;;  %v5747_v10 = vpop.f32.mrb[225].mxu1  ;;  %v13020_v53 = vld [vmem:[#allocation158_spill] sm:$0xff]  ;;  %v13021_v57 = vld [vmem:[#allocation159_spill] sm:$0xff] }
 0x4d6   :  { %v4596_v22 = vpop.f32.mrb[226].mxu0  ;;  %v5748_v25 = vpop.f32.mrb[226].mxu1 }
 0x4d7   :  { %7334 = vst.msk [vmem:[%s12621_s3 + $0x178] sm:$0xf] %vm7239_vm0, %v8219_v61  ;;  %v8220_v55 = vpack.c.bf16 %v6614_v62, %v6614_v62  ;;  %v6320_v1 = vmax.f32 %v6032_v58, %v6176_v36  ;;  %v6033_v23 = vmax.f32 %v13012_v63, %v4596_v22  ;;  %v6177_v7 = vmax.f32 %v13013_v24, %v5748_v25  ;;  %v4598_v8 = vpop.f32.mrb[227].mxu0  ;;  %v5750_v37 = vpop.f32.mrb[227].mxu1 }
 0x4d9   :  { %7335 = vst.msk [vmem:[%s12621_s3 + $0x17c] sm:$0xf] %vm7239_vm0, %v8220_v55  ;;  %v6471_v41 = vadd.f32 %v11970_v19, %v6320_v1  ;;  %v6321_v59 = vmax.f32 %v6033_v23, %v6177_v7  ;;  %v13022_v1 = vld [vmem:[#allocation160_spill] sm:$0xff]  ;;  %v13023_v23 = vld [vmem:[#allocation161_spill] sm:$0xff] }
 0x4db   :  { %v6615_v60 = vmax.f32 %v6471_v41, 0.0  ;;  %v6472_v11 = vadd.f32 %v11970_v19, %v6321_v59 }
 0x4dc   :  { %v4601_v31 = vpop.f32.mrb[228].mxu0  ;;  %v5753_v32 = vpop.f32.mrb[228].mxu1 }
 0x4dd   :  { %v8221_v42 = vpack.c.bf16 %v6615_v60, %v6615_v60  ;;  %v6616_v12 = vmax.f32 %v6472_v11, 0.0  ;;  %v6034_v15 = vmax.f32 %v13014_v20, %v4601_v31  ;;  %v6178_v45 = vmax.f32 %v13015_v16, %v5753_v32  ;;  %v4603_v38 = vpop.f32.mrb[229].mxu0  ;;  %v5755_v0 = vpop.f32.mrb[229].mxu1  ;;  %v13024_v11 = vld [vmem:[#allocation162_spill] sm:$0xff]  ;;  %v13025_v32 = vld [vmem:[#allocation163_spill] sm:$0xff] }
 0x4de   :  { %v4604_v56 = vpop.f32.mrb[230].mxu0  ;;  %v5756_v3 = vpop.f32.mrb[230].mxu1 }
 0x4df   :  { %7336 = vst.msk [vmem:[%s12621_s3 + $0x180] sm:$0xf] %vm7239_vm0, %v8221_v42  ;;  %v8222_v39 = vpack.c.bf16 %v6616_v12, %v6616_v12  ;;  %v6322_v29 = vmax.f32 %v6034_v15, %v6178_v45  ;;  %v6035_v4 = vmax.f32 %v13016_v40, %v4604_v56  ;;  %v6179_v9 = vmax.f32 %v13017_v52, %v5756_v3  ;;  %v4606_v33 = vpop.f32.mrb[231].mxu0  ;;  %v5758_v34 = vpop.f32.mrb[231].mxu1 }
 0x4e1   :  { %7337 = vst.msk [vmem:[%s12621_s3 + $0x184] sm:$0xf] %vm7239_vm0, %v8222_v39  ;;  %v6473_v30 = vadd.f32 %v11970_v19, %v6322_v29  ;;  %v6323_v26 = vmax.f32 %v6035_v4, %v6179_v9  ;;  %v13026_v29 = vld [vmem:[#allocation164_spill] sm:$0xff]  ;;  %v13027_v4 = vld [vmem:[#allocation165_spill] sm:$0xff] }
 0x4e3   :  { %v6617_v44 = vmax.f32 %v6473_v30, 0.0  ;;  %v6474_v47 = vadd.f32 %v11970_v19, %v6323_v26 }
 0x4e4   :  { %v4609_v48 = vpop.f32.mrb[232].mxu0  ;;  %v5761_v17 = vpop.f32.mrb[232].mxu1 }
 0x4e5   :  { %v8223_v43 = vpack.c.bf16 %v6617_v44, %v6617_v44  ;;  %v6618_v6 = vmax.f32 %v6474_v47, 0.0  ;;  %v6036_v46 = vmax.f32 %v13018_v18, %v4609_v48  ;;  %v6180_v50 = vmax.f32 %v13019_v49, %v5761_v17  ;;  %v4611_v51 = vpop.f32.mrb[233].mxu0  ;;  %v5763_v13 = vpop.f32.mrb[233].mxu1  ;;  %v13028_v47 = vld [vmem:[#allocation166_spill] sm:$0xff]  ;;  %v13029_v17 = vld [vmem:[#allocation167_spill] sm:$0xff] }
 0x4e6   :  { %v4612_v14 = vpop.f32.mrb[234].mxu0  ;;  %v5764_v27 = vpop.f32.mrb[234].mxu1 }
 0x4e7   :  { %7338 = vst.msk [vmem:[%s12621_s3 + $0x188] sm:$0xf] %vm7239_vm0, %v8223_v43  ;;  %v8224_v28 = vpack.c.bf16 %v6618_v6, %v6618_v6  ;;  %v6324_v2 = vmax.f32 %v6036_v46, %v6180_v50  ;;  %v6037_v5 = vmax.f32 %v13020_v53, %v4612_v14  ;;  %v6181_v61 = vmax.f32 %v13021_v57, %v5764_v27  ;;  %v4614_v62 = vpop.f32.mrb[235].mxu0  ;;  %v5766_v54 = vpop.f32.mrb[235].mxu1 }
 0x4e9   :  { %7339 = vst.msk [vmem:[%s12621_s3 + $0x18c] sm:$0xf] %vm7239_vm0, %v8224_v28  ;;  %v6475_v58 = vadd.f32 %v11970_v19, %v6324_v2  ;;  %v6325_v35 = vmax.f32 %v6037_v5, %v6181_v61  ;;  %v13030_v2 = vld [vmem:[#allocation168_spill] sm:$0xff]  ;;  %v13031_v5 = vld [vmem:[#allocation169_spill] sm:$0xff] }
 0x4eb   :  { %v6619_v36 = vmax.f32 %v6475_v58, 0.0  ;;  %v6476_v21 = vadd.f32 %v11970_v19, %v6325_v35 }
 0x4ec   :  { %v4617_v10 = vpop.f32.mrb[236].mxu0  ;;  %v5769_v22 = vpop.f32.mrb[236].mxu1 }
 0x4ed   :  { %v8225_v25 = vpack.c.bf16 %v6619_v36, %v6619_v36  ;;  %v6620_v55 = vmax.f32 %v6476_v21, 0.0  ;;  %v6038_v63 = vmax.f32 %v13022_v1, %v4617_v10  ;;  %v6182_v24 = vmax.f32 %v13023_v23, %v5769_v22  ;;  %v4619_v7 = vpop.f32.mrb[237].mxu0  ;;  %v5771_v8 = vpop.f32.mrb[237].mxu1  ;;  %v13032_v21 = vld [vmem:[#allocation170_spill] sm:$0xff]  ;;  %v13033_v22 = vld [vmem:[#allocation171_spill] sm:$0xff] }
 0x4ee   :  { %v4620_v37 = vpop.f32.mrb[238].mxu0  ;;  %v5772_v41 = vpop.f32.mrb[238].mxu1 }
 0x4ef   :  { %7340 = vst.msk [vmem:[%s12621_s3 + $0x190] sm:$0xf] %vm7239_vm0, %v8225_v25  ;;  %v8226_v59 = vpack.c.bf16 %v6620_v55, %v6620_v55  ;;  %v6326_v60 = vmax.f32 %v6038_v63, %v6182_v24  ;;  %v6039_v31 = vmax.f32 %v13024_v11, %v4620_v37  ;;  %v6183_v42 = vmax.f32 %v13025_v32, %v5772_v41  ;;  %v4622_v12 = vpop.f32.mrb[239].mxu0  ;;  %v5774_v20 = vpop.f32.mrb[239].mxu1 }
 0x4f1   :  { %7341 = vst.msk [vmem:[%s12621_s3 + $0x194] sm:$0xf] %vm7239_vm0, %v8226_v59  ;;  %v6477_v15 = vadd.f32 %v11970_v19, %v6326_v60  ;;  %v6327_v16 = vmax.f32 %v6039_v31, %v6183_v42  ;;  %v13034_v60 = vld [vmem:[#allocation172_spill] sm:$0xff]  ;;  %v13035_v31 = vld [vmem:[#allocation173_spill] sm:$0xff] }
 0x4f3   :  { %v6621_v45 = vmax.f32 %v6477_v15, 0.0  ;;  %v6478_v38 = vadd.f32 %v11970_v19, %v6327_v16 }
 0x4f4   :  { %v4625_v0 = vpop.f32.mrb[240].mxu0  ;;  %v5777_v56 = vpop.f32.mrb[240].mxu1 }
 0x4f5   :  { %v8227_v3 = vpack.c.bf16 %v6621_v45, %v6621_v45  ;;  %v6622_v39 = vmax.f32 %v6478_v38, 0.0  ;;  %v6040_v40 = vmax.f32 %v13026_v29, %v4625_v0  ;;  %v6184_v52 = vmax.f32 %v13027_v4, %v5777_v56  ;;  %v4627_v9 = vpop.f32.mrb[241].mxu0  ;;  %v5779_v33 = vpop.f32.mrb[241].mxu1  ;;  %v13037_v0 = vld [vmem:[#allocation175_spill] sm:$0xff]  ;;  %v12368_v29 = vld [vmem:[%s12620_s2] ss:$0 sm:$0xff] }
 0x4f6   :  { %v4628_v34 = vpop.f32.mrb[242].mxu0  ;;  %v5780_v30 = vpop.f32.mrb[242].mxu1 }
 0x4f7   :  { %7342 = vst.msk [vmem:[%s12621_s3 + $0x198] sm:$0xf] %vm7239_vm0, %v8227_v3  ;;  %v8228_v26 = vpack.c.bf16 %v6622_v39, %v6622_v39  ;;  %v6328_v44 = vmax.f32 %v6040_v40, %v6184_v52  ;;  %v6041_v48 = vmax.f32 %v13028_v47, %v4628_v34  ;;  %v6185_v43 = vmax.f32 %v13029_v17, %v5780_v30  ;;  %v4630_v6 = vpop.f32.mrb[243].mxu0  ;;  %v5782_v18 = vpop.f32.mrb[243].mxu1 }
 0x4f9   :  { %7343 = vst.msk [vmem:[%s12621_s3 + $0x19c] sm:$0xf] %vm7239_vm0, %v8228_v26  ;;  %v6479_v46 = vadd.f32 %v11970_v19, %v6328_v44  ;;  %v6329_v49 = vmax.f32 %v6041_v48, %v6185_v43  ;;  %v13038_v44 = vld [vmem:[#allocation176_spill] sm:$0xff]  ;;  %v13039_v48 = vld [vmem:[#allocation177_spill] sm:$0xff] }
 0x4fb   :  { %v6623_v50 = vmax.f32 %v6479_v46, 0.0  ;;  %v6480_v51 = vadd.f32 %v11970_v19, %v6329_v49 }
 0x4fc   :  { %v4633_v13 = vpop.f32.mrb[244].mxu0  ;;  %v5785_v14 = vpop.f32.mrb[244].mxu1 }
 0x4fd   :  { %v8229_v27 = vpack.c.bf16 %v6623_v50, %v6623_v50  ;;  %v6624_v28 = vmax.f32 %v6480_v51, 0.0  ;;  %v6042_v53 = vmax.f32 %v13030_v2, %v4633_v13  ;;  %v6186_v57 = vmax.f32 %v13031_v5, %v5785_v14  ;;  %v4635_v61 = vpop.f32.mrb[245].mxu0  ;;  %v5787_v62 = vpop.f32.mrb[245].mxu1  ;;  %v13040_v51 = vld [vmem:[#allocation178_spill] sm:$0xff]  ;;  %v13041_v14 = vld [vmem:[#allocation179_spill] sm:$0xff] }
 0x4fe   :  { %v4636_v54 = vpop.f32.mrb[246].mxu0  ;;  %v5788_v58 = vpop.f32.mrb[246].mxu1 }
 0x4ff   :  { %7344 = vst.msk [vmem:[%s12621_s3 + $0x1a0] sm:$0xf] %vm7239_vm0, %v8229_v27  ;;  %v8230_v35 = vpack.c.bf16 %v6624_v28, %v6624_v28  ;;  %v6330_v36 = vmax.f32 %v6042_v53, %v6186_v57  ;;  %v6043_v10 = vmax.f32 %v13032_v21, %v4636_v54  ;;  %v6187_v25 = vmax.f32 %v13033_v22, %v5788_v58  ;;  %v4638_v55 = vpop.f32.mrb[247].mxu0  ;;  %v5790_v1 = vpop.f32.mrb[247].mxu1 }
 0x501   :  { %7345 = vst.msk [vmem:[%s12621_s3 + $0x1a4] sm:$0xf] %vm7239_vm0, %v8230_v35  ;;  %v6481_v63 = vadd.f32 %v11970_v19, %v6330_v36  ;;  %v6331_v23 = vmax.f32 %v6043_v10, %v6187_v25  ;;  %v13042_v36 = vld [vmem:[#allocation180_spill] sm:$0xff]  ;;  %v13043_v10 = vld [vmem:[#allocation181_spill] sm:$0xff] }
 0x503   :  { %v6625_v24 = vmax.f32 %v6481_v63, 0.0  ;;  %v6482_v7 = vadd.f32 %v11970_v19, %v6331_v23  ;;  %v13036_v19 = vld [vmem:[#allocation174_spill] sm:$0xff] }
 0x504   :  { %v4641_v8 = vpop.f32.mrb[248].mxu0  ;;  %v5793_v37 = vpop.f32.mrb[248].mxu1 }
 0x505   :  { %v8231_v41 = vpack.c.bf16 %v6625_v24, %v6625_v24  ;;  %v6626_v59 = vmax.f32 %v6482_v7, 0.0  ;;  %v6044_v11 = vmax.f32 %v13034_v60, %v4641_v8  ;;  %v6188_v32 = vmax.f32 %v13035_v31, %v5793_v37  ;;  %v4643_v42 = vpop.f32.mrb[249].mxu0  ;;  %v5795_v12 = vpop.f32.mrb[249].mxu1  ;;  %v13044_v7 = vld [vmem:[#allocation182_spill] sm:$0xff]  ;;  %v13045_v37 = vld [vmem:[#allocation183_spill] sm:$0xff] }
 0x506   :  { %v4644_v20 = vpop.f32.mrb[250].mxu0  ;;  %v5796_v15 = vpop.f32.mrb[250].mxu1 }
 0x507   :  { %7346 = vst.msk [vmem:[%s12621_s3 + $0x1a8] sm:$0xf] %vm7239_vm0, %v8231_v41  ;;  %v8232_v16 = vpack.c.bf16 %v6626_v59, %v6626_v59  ;;  %v6332_v45 = vmax.f32 %v6044_v11, %v6188_v32  ;;  %v6045_v38 = vmax.f32 %v13036_v19, %v4644_v20  ;;  %v6189_v56 = vmax.f32 %v13037_v0, %v5796_v15  ;;  %v4646_v3 = vpop.f32.mrb[251].mxu0  ;;  %v5798_v39 = vpop.f32.mrb[251].mxu1 }
 0x509   :  { %7347 = vst.msk [vmem:[%s12621_s3 + $0x1ac] sm:$0xf] %vm7239_vm0, %v8232_v16  ;;  %v6483_v40 = vadd.f32 %v12368_v29, %v6332_v45  ;;  %v6333_v4 = vmax.f32 %v6045_v38, %v6189_v56  ;;  %v13046_v45 = vld [vmem:[#allocation184_spill] sm:$0xff]  ;;  %v13047_v38 = vld [vmem:[#allocation185_spill] sm:$0xff] }
 0x50b   :  { %v6627_v52 = vmax.f32 %v6483_v40, 0.0  ;;  %v6484_v9 = vadd.f32 %v12368_v29, %v6333_v4 }
 0x50c   :  { %v4649_v33 = vpop.f32.mrb[252].mxu0  ;;  %v5801_v34 = vpop.f32.mrb[252].mxu1 }
 0x50d   :  { %v8233_v30 = vpack.c.bf16 %v6627_v52, %v6627_v52  ;;  %v6628_v26 = vmax.f32 %v6484_v9, 0.0  ;;  %v6046_v47 = vmax.f32 %v13038_v44, %v4649_v33  ;;  %v6190_v17 = vmax.f32 %v13039_v48, %v5801_v34  ;;  %v4651_v43 = vpop.f32.mrb[253].mxu0  ;;  %v5803_v6 = vpop.f32.mrb[253].mxu1  ;;  %v13048_v9 = vld [vmem:[#allocation186_spill] sm:$0xff]  ;;  %v13049_v34 = vld [vmem:[#allocation187_spill] sm:$0xff] }
 0x50e   :  { %v4652_v18 = vpop.f32.mrb[254].mxu0  ;;  %v5804_v46 = vpop.f32.mrb[254].mxu1 }
 0x50f   :  { %7348 = vst.msk [vmem:[%s12621_s3 + $0x1b0] sm:$0xf] %vm7239_vm0, %v8233_v30  ;;  %v8234_v49 = vpack.c.bf16 %v6628_v26, %v6628_v26  ;;  %v6334_v50 = vmax.f32 %v6046_v47, %v6190_v17  ;;  %v6047_v13 = vmax.f32 %v13040_v51, %v4652_v18  ;;  %v6191_v27 = vmax.f32 %v13041_v14, %v5804_v46  ;;  %v4654_v28 = vpop.f32.mrb[255].mxu0  ;;  %v5806_v2 = vpop.f32.mrb[255].mxu1 }
 0x511   :  { %7349 = vst.msk [vmem:[%s12621_s3 + $0x1b4] sm:$0xf] %vm7239_vm0, %v8234_v49  ;;  %v6485_v53 = vadd.f32 %v12368_v29, %v6334_v50  ;;  %v6335_v5 = vmax.f32 %v6047_v13, %v6191_v27  ;;  %v13050_v50 = vld [vmem:[#allocation188_spill] sm:$0xff]  ;;  %v13051_v13 = vld [vmem:[#allocation189_spill] sm:$0xff] }
 0x513   :  { %v6629_v57 = vmax.f32 %v6485_v53, 0.0  ;;  %v6486_v61 = vadd.f32 %v12368_v29, %v6335_v5 }
 0x514   :  { %v4657_v62 = vpop.f32.mrb[0].mxu0  ;;  %v5809_v54 = vpop.f32.mrb[0].mxu1 }
 0x515   :  { %v8235_v58 = vpack.c.bf16 %v6629_v57, %v6629_v57  ;;  %v6630_v35 = vmax.f32 %v6486_v61, 0.0  ;;  %v6048_v21 = vmax.f32 %v13042_v36, %v4657_v62  ;;  %v6192_v22 = vmax.f32 %v13043_v10, %v5809_v54  ;;  %v4659_v25 = vpop.f32.mrb[1].mxu0  ;;  %v5811_v55 = vpop.f32.mrb[1].mxu1  ;;  %v13052_v61 = vld [vmem:[#allocation190_spill] sm:$0xff]  ;;  %v13053_v54 = vld [vmem:[#allocation191_spill] sm:$0xff] }
 0x516   :  { %v4660_v1 = vpop.f32.mrb[2].mxu0  ;;  %v5812_v63 = vpop.f32.mrb[2].mxu1 }
 0x517   :  { %7350 = vst.msk [vmem:[%s12621_s3 + $0x1b8] sm:$0xf] %vm7239_vm0, %v8235_v58  ;;  %v8236_v23 = vpack.c.bf16 %v6630_v35, %v6630_v35  ;;  %v6336_v24 = vmax.f32 %v6048_v21, %v6192_v22  ;;  %v6049_v8 = vmax.f32 %v13044_v7, %v4660_v1  ;;  %v6193_v41 = vmax.f32 %v13045_v37, %v5812_v63  ;;  %v4662_v59 = vpop.f32.mrb[3].mxu0  ;;  %v5814_v60 = vpop.f32.mrb[3].mxu1 }
 0x519   :  { %7351 = vst.msk [vmem:[%s12621_s3 + $0x1bc] sm:$0xf] %vm7239_vm0, %v8236_v23  ;;  %v6487_v11 = vadd.f32 %v12368_v29, %v6336_v24  ;;  %v6337_v31 = vmax.f32 %v6049_v8, %v6193_v41  ;;  %v13054_v24 = vld [vmem:[#allocation192_spill] sm:$0xff]  ;;  %v13055_v8 = vld [vmem:[#allocation193_spill] sm:$0xff] }
 0x51b   :  { %v6631_v32 = vmax.f32 %v6487_v11, 0.0  ;;  %v6488_v42 = vadd.f32 %v12368_v29, %v6337_v31 }
 0x51c   :  { %v4665_v12 = vpop.f32.mrb[4].mxu0  ;;  %v5817_v20 = vpop.f32.mrb[4].mxu1 }
 0x51d   :  { %v8237_v15 = vpack.c.bf16 %v6631_v32, %v6631_v32  ;;  %v6632_v16 = vmax.f32 %v6488_v42, 0.0  ;;  %v6050_v19 = vmax.f32 %v13046_v45, %v4665_v12  ;;  %v6194_v0 = vmax.f32 %v13047_v38, %v5817_v20  ;;  %v4667_v56 = vpop.f32.mrb[5].mxu0  ;;  %v5819_v3 = vpop.f32.mrb[5].mxu1  ;;  %v13056_v42 = vld [vmem:[#allocation194_spill] sm:$0xff]  ;;  %v13057_v20 = vld [vmem:[#allocation195_spill] sm:$0xff] }
 0x51e   :  { %v4668_v39 = vpop.f32.mrb[6].mxu0  ;;  %v5820_v40 = vpop.f32.mrb[6].mxu1 }
 0x51f   :  { %7352 = vst.msk [vmem:[%s12621_s3 + $0x1c0] sm:$0xf] %vm7239_vm0, %v8237_v15  ;;  %v8238_v4 = vpack.c.bf16 %v6632_v16, %v6632_v16  ;;  %v6338_v52 = vmax.f32 %v6050_v19, %v6194_v0  ;;  %v6051_v33 = vmax.f32 %v13048_v9, %v4668_v39  ;;  %v6195_v30 = vmax.f32 %v13049_v34, %v5820_v40  ;;  %v4670_v26 = vpop.f32.mrb[7].mxu0  ;;  %v5822_v44 = vpop.f32.mrb[7].mxu1 }
 0x521   :  { %7353 = vst.msk [vmem:[%s12621_s3 + $0x1c4] sm:$0xf] %vm7239_vm0, %v8238_v4  ;;  %v6489_v47 = vadd.f32 %v12368_v29, %v6338_v52  ;;  %v6339_v48 = vmax.f32 %v6051_v33, %v6195_v30  ;;  %v13058_v52 = vld [vmem:[#allocation196_spill] sm:$0xff]  ;;  %v13059_v33 = vld [vmem:[#allocation197_spill] sm:$0xff] }
 0x523   :  { %v6633_v17 = vmax.f32 %v6489_v47, 0.0  ;;  %v6490_v43 = vadd.f32 %v12368_v29, %v6339_v48 }
 0x524   :  { %v4673_v6 = vpop.f32.mrb[8].mxu0  ;;  %v5825_v18 = vpop.f32.mrb[8].mxu1 }
 0x525   :  { %v8239_v46 = vpack.c.bf16 %v6633_v17, %v6633_v17  ;;  %v6634_v49 = vmax.f32 %v6490_v43, 0.0  ;;  %v6052_v51 = vmax.f32 %v13050_v50, %v4673_v6  ;;  %v6196_v14 = vmax.f32 %v13051_v13, %v5825_v18  ;;  %v4675_v27 = vpop.f32.mrb[9].mxu0  ;;  %v5827_v28 = vpop.f32.mrb[9].mxu1  ;;  %v13060_v43 = vld [vmem:[#allocation198_spill] sm:$0xff]  ;;  %v13061_v18 = vld [vmem:[#allocation199_spill] sm:$0xff] }
 0x526   :  { %v4676_v2 = vpop.f32.mrb[10].mxu0  ;;  %v5828_v53 = vpop.f32.mrb[10].mxu1 }
 0x527   :  { %7354 = vst.msk [vmem:[%s12621_s3 + $0x1c8] sm:$0xf] %vm7239_vm0, %v8239_v46  ;;  %v8240_v5 = vpack.c.bf16 %v6634_v49, %v6634_v49  ;;  %v6340_v57 = vmax.f32 %v6052_v51, %v6196_v14  ;;  %v6053_v62 = vmax.f32 %v13052_v61, %v4676_v2  ;;  %v6197_v58 = vmax.f32 %v13053_v54, %v5828_v53  ;;  %v4678_v35 = vpop.f32.mrb[11].mxu0  ;;  %v5830_v36 = vpop.f32.mrb[11].mxu1 }
 0x529   :  { %7355 = vst.msk [vmem:[%s12621_s3 + $0x1cc] sm:$0xf] %vm7239_vm0, %v8240_v5  ;;  %v6491_v21 = vadd.f32 %v12368_v29, %v6340_v57  ;;  %v6341_v10 = vmax.f32 %v6053_v62, %v6197_v58  ;;  %v13062_v57 = vld [vmem:[#allocation200_spill] sm:$0xff]  ;;  %v13063_v62 = vld [vmem:[#allocation201_spill] sm:$0xff] }
 0x52b   :  { %v6635_v22 = vmax.f32 %v6491_v21, 0.0  ;;  %v6492_v25 = vadd.f32 %v12368_v29, %v6341_v10 }
 0x52c   :  { %v4681_v55 = vpop.f32.mrb[12].mxu0  ;;  %v5833_v1 = vpop.f32.mrb[12].mxu1 }
 0x52d   :  { %v8241_v63 = vpack.c.bf16 %v6635_v22, %v6635_v22  ;;  %v6636_v23 = vmax.f32 %v6492_v25, 0.0  ;;  %v6054_v7 = vmax.f32 %v13054_v24, %v4681_v55  ;;  %v6198_v37 = vmax.f32 %v13055_v8, %v5833_v1  ;;  %v4683_v41 = vpop.f32.mrb[13].mxu0  ;;  %v5835_v59 = vpop.f32.mrb[13].mxu1  ;;  %v13064_v25 = vld [vmem:[#allocation202_spill] sm:$0xff]  ;;  %v13065_v1 = vld [vmem:[#allocation203_spill] sm:$0xff] }
 0x52e   :  { %v4684_v60 = vpop.f32.mrb[14].mxu0  ;;  %v5836_v11 = vpop.f32.mrb[14].mxu1 }
 0x52f   :  { %7356 = vst.msk [vmem:[%s12621_s3 + $0x1d0] sm:$0xf] %vm7239_vm0, %v8241_v63  ;;  %v8242_v31 = vpack.c.bf16 %v6636_v23, %v6636_v23  ;;  %v6342_v32 = vmax.f32 %v6054_v7, %v6198_v37  ;;  %v6055_v12 = vmax.f32 %v13056_v42, %v4684_v60  ;;  %v6199_v15 = vmax.f32 %v13057_v20, %v5836_v11  ;;  %v4686_v16 = vpop.f32.mrb[15].mxu0  ;;  %v5838_v45 = vpop.f32.mrb[15].mxu1 }
 0x531   :  { %7357 = vst.msk [vmem:[%s12621_s3 + $0x1d4] sm:$0xf] %vm7239_vm0, %v8242_v31  ;;  %v6493_v19 = vadd.f32 %v12368_v29, %v6342_v32  ;;  %v6343_v38 = vmax.f32 %v6055_v12, %v6199_v15  ;;  %v13066_v32 = vld [vmem:[#allocation204_spill] sm:$0xff]  ;;  %v13067_v12 = vld [vmem:[#allocation205_spill] sm:$0xff] }
 0x533   :  { %v6637_v0 = vmax.f32 %v6493_v19, 0.0  ;;  %v6494_v56 = vadd.f32 %v12368_v29, %v6343_v38 }
 0x534   :  { %v4689_v3 = vpop.f32.mrb[16].mxu0  ;;  %v5841_v39 = vpop.f32.mrb[16].mxu1 }
 0x535   :  { %v8243_v40 = vpack.c.bf16 %v6637_v0, %v6637_v0  ;;  %v6638_v4 = vmax.f32 %v6494_v56, 0.0  ;;  %v6056_v9 = vmax.f32 %v13058_v52, %v4689_v3  ;;  %v6200_v34 = vmax.f32 %v13059_v33, %v5841_v39  ;;  %v4691_v30 = vpop.f32.mrb[17].mxu0  ;;  %v5843_v26 = vpop.f32.mrb[17].mxu1  ;;  %v13068_v56 = vld [vmem:[#allocation206_spill] sm:$0xff]  ;;  %v13069_v39 = vld [vmem:[#allocation207_spill] sm:$0xff] }
 0x536   :  { %v4692_v44 = vpop.f32.mrb[18].mxu0  ;;  %v5844_v47 = vpop.f32.mrb[18].mxu1 }
 0x537   :  { %7358 = vst.msk [vmem:[%s12621_s3 + $0x1d8] sm:$0xf] %vm7239_vm0, %v8243_v40  ;;  %v8244_v48 = vpack.c.bf16 %v6638_v4, %v6638_v4  ;;  %v6344_v17 = vmax.f32 %v6056_v9, %v6200_v34  ;;  %v6057_v6 = vmax.f32 %v13060_v43, %v4692_v44  ;;  %v6201_v46 = vmax.f32 %v13061_v18, %v5844_v47  ;;  %v4694_v49 = vpop.f32.mrb[19].mxu0  ;;  %v5846_v50 = vpop.f32.mrb[19].mxu1 }
 0x539   :  { %7359 = vst.msk [vmem:[%s12621_s3 + $0x1dc] sm:$0xf] %vm7239_vm0, %v8244_v48  ;;  %v6495_v51 = vadd.f32 %v12368_v29, %v6344_v17  ;;  %v6345_v13 = vmax.f32 %v6057_v6, %v6201_v46  ;;  %v13070_v17 = vld [vmem:[#allocation208_spill] sm:$0xff]  ;;  %v13071_v6 = vld [vmem:[#allocation209_spill] sm:$0xff] }
 0x53b   :  { %v6639_v14 = vmax.f32 %v6495_v51, 0.0  ;;  %v6496_v27 = vadd.f32 %v12368_v29, %v6345_v13 }
 0x53c   :  { %v4697_v28 = vpop.f32.mrb[20].mxu0  ;;  %v5849_v2 = vpop.f32.mrb[20].mxu1 }
 0x53d   :  { %v8245_v53 = vpack.c.bf16 %v6639_v14, %v6639_v14  ;;  %v6640_v5 = vmax.f32 %v6496_v27, 0.0  ;;  %v6058_v61 = vmax.f32 %v13062_v57, %v4697_v28  ;;  %v6202_v54 = vmax.f32 %v13063_v62, %v5849_v2  ;;  %v4699_v58 = vpop.f32.mrb[21].mxu0  ;;  %v5851_v35 = vpop.f32.mrb[21].mxu1  ;;  %v13072_v27 = vld [vmem:[#allocation210_spill] sm:$0xff]  ;;  %v13073_v2 = vld [vmem:[#allocation211_spill] sm:$0xff] }
 0x53e   :  { %v4700_v36 = vpop.f32.mrb[22].mxu0  ;;  %v5852_v21 = vpop.f32.mrb[22].mxu1 }
 0x53f   :  { %7360 = vst.msk [vmem:[%s12621_s3 + $0x1e0] sm:$0xf] %vm7239_vm0, %v8245_v53  ;;  %v8246_v10 = vpack.c.bf16 %v6640_v5, %v6640_v5  ;;  %v6346_v22 = vmax.f32 %v6058_v61, %v6202_v54  ;;  %v6059_v55 = vmax.f32 %v13064_v25, %v4700_v36  ;;  %v6203_v63 = vmax.f32 %v13065_v1, %v5852_v21  ;;  %v4702_v23 = vpop.f32.mrb[23].mxu0  ;;  %v5854_v24 = vpop.f32.mrb[23].mxu1 }
 0x541   :  { %7361 = vst.msk [vmem:[%s12621_s3 + $0x1e4] sm:$0xf] %vm7239_vm0, %v8246_v10  ;;  %v6497_v7 = vadd.f32 %v12368_v29, %v6346_v22  ;;  %v6347_v8 = vmax.f32 %v6059_v55, %v6203_v63  ;;  %v13074_v22 = vld [vmem:[#allocation212_spill] sm:$0xff]  ;;  %v13075_v55 = vld [vmem:[#allocation213_spill] sm:$0xff] }
 0x543   :  { %v6641_v37 = vmax.f32 %v6497_v7, 0.0  ;;  %v6498_v41 = vadd.f32 %v12368_v29, %v6347_v8 }
 0x544   :  { %v4705_v59 = vpop.f32.mrb[24].mxu0  ;;  %v5857_v60 = vpop.f32.mrb[24].mxu1 }
 0x545   :  { %v8247_v11 = vpack.c.bf16 %v6641_v37, %v6641_v37  ;;  %v6642_v31 = vmax.f32 %v6498_v41, 0.0  ;;  %v6060_v42 = vmax.f32 %v13066_v32, %v4705_v59  ;;  %v6204_v20 = vmax.f32 %v13067_v12, %v5857_v60  ;;  %v4707_v15 = vpop.f32.mrb[25].mxu0  ;;  %v5859_v16 = vpop.f32.mrb[25].mxu1  ;;  %v13076_v41 = vld [vmem:[#allocation214_spill] sm:$0xff]  ;;  %v13077_v60 = vld [vmem:[#allocation215_spill] sm:$0xff] }
 0x546   :  { %v4708_v45 = vpop.f32.mrb[26].mxu0  ;;  %v5860_v19 = vpop.f32.mrb[26].mxu1 }
 0x547   :  { %7362 = vst.msk [vmem:[%s12621_s3 + $0x1e8] sm:$0xf] %vm7239_vm0, %v8247_v11  ;;  %v8248_v38 = vpack.c.bf16 %v6642_v31, %v6642_v31  ;;  %v6348_v0 = vmax.f32 %v6060_v42, %v6204_v20  ;;  %v6061_v3 = vmax.f32 %v13068_v56, %v4708_v45  ;;  %v6205_v40 = vmax.f32 %v13069_v39, %v5860_v19  ;;  %v4710_v4 = vpop.f32.mrb[27].mxu0  ;;  %v5862_v52 = vpop.f32.mrb[27].mxu1 }
 0x549   :  { %7363 = vst.msk [vmem:[%s12621_s3 + $0x1ec] sm:$0xf] %vm7239_vm0, %v8248_v38  ;;  %v6499_v9 = vadd.f32 %v12368_v29, %v6348_v0  ;;  %v6349_v33 = vmax.f32 %v6061_v3, %v6205_v40  ;;  %v13078_v0 = vld [vmem:[#allocation216_spill] sm:$0xff]  ;;  %v13079_v3 = vld [vmem:[#allocation217_spill] sm:$0xff] }
 0x54b   :  { %v6643_v34 = vmax.f32 %v6499_v9, 0.0  ;;  %v6500_v30 = vadd.f32 %v12368_v29, %v6349_v33 }
 0x54c   :  { %v4713_v26 = vpop.f32.mrb[28].mxu0  ;;  %v5865_v44 = vpop.f32.mrb[28].mxu1 }
 0x54d   :  { %v8249_v47 = vpack.c.bf16 %v6643_v34, %v6643_v34  ;;  %v6644_v48 = vmax.f32 %v6500_v30, 0.0  ;;  %v6062_v43 = vmax.f32 %v13070_v17, %v4713_v26  ;;  %v6206_v18 = vmax.f32 %v13071_v6, %v5865_v44  ;;  %v4715_v46 = vpop.f32.mrb[29].mxu0  ;;  %v5867_v49 = vpop.f32.mrb[29].mxu1  ;;  %v13080_v30 = vld [vmem:[#allocation218_spill] sm:$0xff]  ;;  %v13081_v44 = vld [vmem:[#allocation219_spill] sm:$0xff] }
 0x54e   :  { %v4716_v50 = vpop.f32.mrb[30].mxu0  ;;  %v5868_v51 = vpop.f32.mrb[30].mxu1 }
 0x54f   :  { %7364 = vst.msk [vmem:[%s12621_s3 + $0x1f0] sm:$0xf] %vm7239_vm0, %v8249_v47  ;;  %v8250_v13 = vpack.c.bf16 %v6644_v48, %v6644_v48  ;;  %v6350_v14 = vmax.f32 %v6062_v43, %v6206_v18  ;;  %v6063_v28 = vmax.f32 %v13072_v27, %v4716_v50  ;;  %v6207_v53 = vmax.f32 %v13073_v2, %v5868_v51  ;;  %v4718_v5 = vpop.f32.mrb[31].mxu0  ;;  %v5870_v57 = vpop.f32.mrb[31].mxu1 }
 0x551   :  { %7365 = vst.msk [vmem:[%s12621_s3 + $0x1f4] sm:$0xf] %vm7239_vm0, %v8250_v13  ;;  %v6501_v61 = vadd.f32 %v12368_v29, %v6350_v14  ;;  %v6351_v62 = vmax.f32 %v6063_v28, %v6207_v53  ;;  %v13082_v14 = vld [vmem:[#allocation220_spill] sm:$0xff]  ;;  %v13083_v28 = vld [vmem:[#allocation221_spill] sm:$0xff] }
 0x553   :  { %v6645_v54 = vmax.f32 %v6501_v61, 0.0  ;;  %v6502_v58 = vadd.f32 %v12368_v29, %v6351_v62 }
 0x554   :  { %v4721_v35 = vpop.f32.mrb[32].mxu0  ;;  %v5873_v36 = vpop.f32.mrb[32].mxu1 }
 0x555   :  { %v8251_v21 = vpack.c.bf16 %v6645_v54, %v6645_v54  ;;  %v6646_v10 = vmax.f32 %v6502_v58, 0.0  ;;  %v6064_v25 = vmax.f32 %v13074_v22, %v4721_v35  ;;  %v6208_v1 = vmax.f32 %v13075_v55, %v5873_v36  ;;  %v4723_v63 = vpop.f32.mrb[33].mxu0  ;;  %v5875_v23 = vpop.f32.mrb[33].mxu1  ;;  %v13084_v58 = vld [vmem:[#allocation222_spill] sm:$0xff]  ;;  %v13085_v36 = vld [vmem:[#allocation223_spill] sm:$0xff] }
 0x556   :  { %v4724_v24 = vpop.f32.mrb[34].mxu0  ;;  %v5876_v7 = vpop.f32.mrb[34].mxu1 }
 0x557   :  { %7366 = vst.msk [vmem:[%s12621_s3 + $0x1f8] sm:$0xf] %vm7239_vm0, %v8251_v21  ;;  %v8252_v8 = vpack.c.bf16 %v6646_v10, %v6646_v10  ;;  %v6352_v37 = vmax.f32 %v6064_v25, %v6208_v1  ;;  %v6065_v59 = vmax.f32 %v13076_v41, %v4724_v24  ;;  %v6209_v11 = vmax.f32 %v13077_v60, %v5876_v7  ;;  %v4726_v31 = vpop.f32.mrb[35].mxu0  ;;  %v5878_v32 = vpop.f32.mrb[35].mxu1 }
 0x559   :  { %7367 = vst.msk [vmem:[%s12621_s3 + $0x1fc] sm:$0xf] %vm7239_vm0, %v8252_v8  ;;  %v6503_v42 = vadd.f32 %v12368_v29, %v6352_v37  ;;  %v6353_v12 = vmax.f32 %v6065_v59, %v6209_v11  ;;  %v13086_v37 = vld [vmem:[#allocation224_spill] sm:$0xff]  ;;  %v13087_v59 = vld [vmem:[#allocation225_spill] sm:$0xff] }
 0x55b   :  { %v6647_v20 = vmax.f32 %v6503_v42, 0.0  ;;  %v6504_v15 = vadd.f32 %v12368_v29, %v6353_v12 }
 0x55c   :  { %v4729_v16 = vpop.f32.mrb[36].mxu0  ;;  %v5881_v45 = vpop.f32.mrb[36].mxu1 }
 0x55d   :  { %v8253_v19 = vpack.c.bf16 %v6647_v20, %v6647_v20  ;;  %v6648_v38 = vmax.f32 %v6504_v15, 0.0  ;;  %v6066_v56 = vmax.f32 %v13078_v0, %v4729_v16  ;;  %v6210_v39 = vmax.f32 %v13079_v3, %v5881_v45  ;;  %v4731_v40 = vpop.f32.mrb[37].mxu0  ;;  %v5883_v4 = vpop.f32.mrb[37].mxu1  ;;  %v13088_v15 = vld [vmem:[#allocation226_spill] sm:$0xff]  ;;  %v13089_v45 = vld [vmem:[#allocation227_spill] sm:$0xff] }
 0x55e   :  { %v4732_v52 = vpop.f32.mrb[38].mxu0  ;;  %v5884_v9 = vpop.f32.mrb[38].mxu1 }
 0x55f   :  { %7368 = vst.msk [vmem:[%s12621_s3 + $0x200] sm:$0xf] %vm7239_vm0, %v8253_v19  ;;  %v8254_v33 = vpack.c.bf16 %v6648_v38, %v6648_v38  ;;  %v6354_v34 = vmax.f32 %v6066_v56, %v6210_v39  ;;  %v6067_v26 = vmax.f32 %v13080_v30, %v4732_v52  ;;  %v6211_v47 = vmax.f32 %v13081_v44, %v5884_v9  ;;  %v4734_v48 = vpop.f32.mrb[39].mxu0  ;;  %v5886_v17 = vpop.f32.mrb[39].mxu1 }
 0x561   :  { %7369 = vst.msk [vmem:[%s12621_s3 + $0x204] sm:$0xf] %vm7239_vm0, %v8254_v33  ;;  %v6505_v43 = vadd.f32 %v12368_v29, %v6354_v34  ;;  %v6355_v6 = vmax.f32 %v6067_v26, %v6211_v47  ;;  %v13090_v34 = vld [vmem:[#allocation228_spill] sm:$0xff]  ;;  %v13091_v26 = vld [vmem:[#allocation229_spill] sm:$0xff] }
 0x563   :  { %v6649_v18 = vmax.f32 %v6505_v43, 0.0  ;;  %v6506_v46 = vadd.f32 %v12368_v29, %v6355_v6 }
 0x564   :  { %v4737_v49 = vpop.f32.mrb[40].mxu0  ;;  %v5889_v50 = vpop.f32.mrb[40].mxu1 }
 0x565   :  { %v8255_v51 = vpack.c.bf16 %v6649_v18, %v6649_v18  ;;  %v6650_v13 = vmax.f32 %v6506_v46, 0.0  ;;  %v6068_v27 = vmax.f32 %v13082_v14, %v4737_v49  ;;  %v6212_v2 = vmax.f32 %v13083_v28, %v5889_v50  ;;  %v4739_v53 = vpop.f32.mrb[41].mxu0  ;;  %v5891_v5 = vpop.f32.mrb[41].mxu1  ;;  %v13092_v46 = vld [vmem:[#allocation230_spill] sm:$0xff]  ;;  %v13093_v50 = vld [vmem:[#allocation231_spill] sm:$0xff] }
 0x566   :  { %v4740_v57 = vpop.f32.mrb[42].mxu0  ;;  %v5892_v61 = vpop.f32.mrb[42].mxu1 }
 0x567   :  { %7370 = vst.msk [vmem:[%s12621_s3 + $0x208] sm:$0xf] %vm7239_vm0, %v8255_v51  ;;  %v8256_v62 = vpack.c.bf16 %v6650_v13, %v6650_v13  ;;  %v6356_v54 = vmax.f32 %v6068_v27, %v6212_v2  ;;  %v6069_v35 = vmax.f32 %v13084_v58, %v4740_v57  ;;  %v6213_v21 = vmax.f32 %v13085_v36, %v5892_v61  ;;  %v4742_v10 = vpop.f32.mrb[43].mxu0  ;;  %v5894_v22 = vpop.f32.mrb[43].mxu1 }
 0x569   :  { %7371 = vst.msk [vmem:[%s12621_s3 + $0x20c] sm:$0xf] %vm7239_vm0, %v8256_v62  ;;  %v6507_v25 = vadd.f32 %v12368_v29, %v6356_v54  ;;  %v6357_v55 = vmax.f32 %v6069_v35, %v6213_v21  ;;  %v13094_v54 = vld [vmem:[#allocation232_spill] sm:$0xff]  ;;  %v13095_v35 = vld [vmem:[#allocation233_spill] sm:$0xff] }
 0x56b   :  { %v6651_v1 = vmax.f32 %v6507_v25, 0.0  ;;  %v6508_v63 = vadd.f32 %v12368_v29, %v6357_v55 }
 0x56c   :  { %v4745_v23 = vpop.f32.mrb[44].mxu0  ;;  %v5897_v24 = vpop.f32.mrb[44].mxu1 }
 0x56d   :  { %v8257_v7 = vpack.c.bf16 %v6651_v1, %v6651_v1  ;;  %v6652_v8 = vmax.f32 %v6508_v63, 0.0  ;;  %v6070_v41 = vmax.f32 %v13086_v37, %v4745_v23  ;;  %v6214_v60 = vmax.f32 %v13087_v59, %v5897_v24  ;;  %v4747_v11 = vpop.f32.mrb[45].mxu0  ;;  %v5899_v31 = vpop.f32.mrb[45].mxu1  ;;  %v13096_v63 = vld [vmem:[#allocation234_spill] sm:$0xff]  ;;  %v13097_v24 = vld [vmem:[#allocation235_spill] sm:$0xff] }
 0x56e   :  { %v4748_v32 = vpop.f32.mrb[46].mxu0  ;;  %v5900_v42 = vpop.f32.mrb[46].mxu1 }
 0x56f   :  { %7372 = vst.msk [vmem:[%s12621_s3 + $0x210] sm:$0xf] %vm7239_vm0, %v8257_v7  ;;  %v8258_v12 = vpack.c.bf16 %v6652_v8, %v6652_v8  ;;  %v6358_v20 = vmax.f32 %v6070_v41, %v6214_v60  ;;  %v6071_v16 = vmax.f32 %v13088_v15, %v4748_v32  ;;  %v6215_v19 = vmax.f32 %v13089_v45, %v5900_v42  ;;  %v4750_v38 = vpop.f32.mrb[47].mxu0  ;;  %v5902_v0 = vpop.f32.mrb[47].mxu1 }
 0x571   :  { %7373 = vst.msk [vmem:[%s12621_s3 + $0x214] sm:$0xf] %vm7239_vm0, %v8258_v12  ;;  %v6509_v56 = vadd.f32 %v12368_v29, %v6358_v20  ;;  %v6359_v3 = vmax.f32 %v6071_v16, %v6215_v19  ;;  %v13098_v20 = vld [vmem:[#allocation236_spill] sm:$0xff]  ;;  %v13099_v16 = vld [vmem:[#allocation237_spill] sm:$0xff] }
 0x573   :  { %v6653_v39 = vmax.f32 %v6509_v56, 0.0  ;;  %v6510_v40 = vadd.f32 %v12368_v29, %v6359_v3 }
 0x574   :  { %v4753_v4 = vpop.f32.mrb[48].mxu0  ;;  %v5905_v52 = vpop.f32.mrb[48].mxu1 }
 0x575   :  { %v8259_v9 = vpack.c.bf16 %v6653_v39, %v6653_v39  ;;  %v6654_v33 = vmax.f32 %v6510_v40, 0.0  ;;  %v6072_v30 = vmax.f32 %v13090_v34, %v4753_v4  ;;  %v6216_v44 = vmax.f32 %v13091_v26, %v5905_v52  ;;  %v4755_v47 = vpop.f32.mrb[49].mxu0  ;;  %v5907_v48 = vpop.f32.mrb[49].mxu1  ;;  %v13100_v40 = vld [vmem:[#allocation238_spill] sm:$0xff]  ;;  %v13101_v52 = vld [vmem:[#allocation239_spill] sm:$0xff] }
 0x576   :  { %v4756_v17 = vpop.f32.mrb[50].mxu0  ;;  %v5908_v43 = vpop.f32.mrb[50].mxu1 }
 0x577   :  { %7374 = vst.msk [vmem:[%s12621_s3 + $0x218] sm:$0xf] %vm7239_vm0, %v8259_v9  ;;  %v8260_v6 = vpack.c.bf16 %v6654_v33, %v6654_v33  ;;  %v6360_v18 = vmax.f32 %v6072_v30, %v6216_v44  ;;  %v6073_v49 = vmax.f32 %v13092_v46, %v4756_v17  ;;  %v6217_v51 = vmax.f32 %v13093_v50, %v5908_v43  ;;  %v4758_v13 = vpop.f32.mrb[51].mxu0  ;;  %v5910_v14 = vpop.f32.mrb[51].mxu1 }
 0x579   :  { %7375 = vst.msk [vmem:[%s12621_s3 + $0x21c] sm:$0xf] %vm7239_vm0, %v8260_v6  ;;  %v6511_v27 = vadd.f32 %v12368_v29, %v6360_v18  ;;  %v6361_v28 = vmax.f32 %v6073_v49, %v6217_v51  ;;  %v13102_v18 = vld [vmem:[#allocation240_spill] sm:$0xff]  ;;  %v13103_v49 = vld [vmem:[#allocation241_spill] sm:$0xff] }
 0x57b   :  { %v6655_v2 = vmax.f32 %v6511_v27, 0.0  ;;  %v6512_v53 = vadd.f32 %v12368_v29, %v6361_v28 }
 0x57c   :  { %v4761_v5 = vpop.f32.mrb[52].mxu0  ;;  %v5913_v57 = vpop.f32.mrb[52].mxu1 }
 0x57d   :  { %v8261_v61 = vpack.c.bf16 %v6655_v2, %v6655_v2  ;;  %v6656_v62 = vmax.f32 %v6512_v53, 0.0  ;;  %v6074_v58 = vmax.f32 %v13094_v54, %v4761_v5  ;;  %v6218_v36 = vmax.f32 %v13095_v35, %v5913_v57  ;;  %v4763_v21 = vpop.f32.mrb[53].mxu0  ;;  %v5915_v10 = vpop.f32.mrb[53].mxu1  ;;  %v13104_v53 = vld [vmem:[#allocation242_spill] sm:$0xff]  ;;  %v13105_v57 = vld [vmem:[#allocation243_spill] sm:$0xff] }
 0x57e   :  { %v4764_v22 = vpop.f32.mrb[54].mxu0  ;;  %v5916_v25 = vpop.f32.mrb[54].mxu1 }
 0x57f   :  { %7376 = vst.msk [vmem:[%s12621_s3 + $0x220] sm:$0xf] %vm7239_vm0, %v8261_v61  ;;  %v8262_v55 = vpack.c.bf16 %v6656_v62, %v6656_v62  ;;  %v6362_v1 = vmax.f32 %v6074_v58, %v6218_v36  ;;  %v6075_v23 = vmax.f32 %v13096_v63, %v4764_v22  ;;  %v6219_v7 = vmax.f32 %v13097_v24, %v5916_v25  ;;  %v4766_v8 = vpop.f32.mrb[55].mxu0  ;;  %v5918_v37 = vpop.f32.mrb[55].mxu1 }
 0x581   :  { %7377 = vst.msk [vmem:[%s12621_s3 + $0x224] sm:$0xf] %vm7239_vm0, %v8262_v55  ;;  %v6513_v41 = vadd.f32 %v12368_v29, %v6362_v1  ;;  %v6363_v59 = vmax.f32 %v6075_v23, %v6219_v7 }
 0x583   :  { %v6657_v60 = vmax.f32 %v6513_v41, 0.0  ;;  %v6514_v11 = vadd.f32 %v12368_v29, %v6363_v59 }
 0x584   :  { %v4769_v31 = vpop.f32.mrb[56].mxu0  ;;  %v5921_v32 = vpop.f32.mrb[56].mxu1 }
 0x585   :  { %v8263_v42 = vpack.c.bf16 %v6657_v60, %v6657_v60  ;;  %v6658_v12 = vmax.f32 %v6514_v11, 0.0  ;;  %v6076_v15 = vmax.f32 %v13098_v20, %v4769_v31  ;;  %v6220_v45 = vmax.f32 %v13099_v16, %v5921_v32  ;;  %v4771_v19 = vpop.f32.mrb[57].mxu0  ;;  %v5923_v38 = vpop.f32.mrb[57].mxu1 }
 0x586   :  { %v4772_v0 = vpop.f32.mrb[58].mxu0  ;;  %v5924_v56 = vpop.f32.mrb[58].mxu1 }
 0x587   :  { %7378 = vst.msk [vmem:[%s12621_s3 + $0x228] sm:$0xf] %vm7239_vm0, %v8263_v42  ;;  %v8264_v3 = vpack.c.bf16 %v6658_v12, %v6658_v12  ;;  %v6364_v39 = vmax.f32 %v6076_v15, %v6220_v45  ;;  %v6077_v4 = vmax.f32 %v13100_v40, %v4772_v0  ;;  %v6221_v9 = vmax.f32 %v13101_v52, %v5924_v56  ;;  %v4774_v33 = vpop.f32.mrb[59].mxu0  ;;  %v5926_v34 = vpop.f32.mrb[59].mxu1 }
 0x589   :  { %7379 = vst.msk [vmem:[%s12621_s3 + $0x22c] sm:$0xf] %vm7239_vm0, %v8264_v3  ;;  %v6515_v30 = vadd.f32 %v12368_v29, %v6364_v39  ;;  %v6365_v26 = vmax.f32 %v6077_v4, %v6221_v9 }
 0x58b   :  { %v6659_v44 = vmax.f32 %v6515_v30, 0.0  ;;  %v6516_v47 = vadd.f32 %v12368_v29, %v6365_v26 }
 0x58c   :  { %v4777_v48 = vpop.f32.mrb[60].mxu0  ;;  %v5929_v17 = vpop.f32.mrb[60].mxu1 }
 0x58d   :  { %v8265_v43 = vpack.c.bf16 %v6659_v44, %v6659_v44  ;;  %v6660_v6 = vmax.f32 %v6516_v47, 0.0  ;;  %v6078_v46 = vmax.f32 %v13102_v18, %v4777_v48  ;;  %v6222_v50 = vmax.f32 %v13103_v49, %v5929_v17  ;;  %v4779_v51 = vpop.f32.mrb[61].mxu0  ;;  %v5931_v13 = vpop.f32.mrb[61].mxu1 }
 0x58e   :  { %v4780_v14 = vpop.f32.mrb[62].mxu0  ;;  %v5932_v27 = vpop.f32.mrb[62].mxu1 }
 0x58f   :  { %7380 = vst.msk [vmem:[%s12621_s3 + $0x230] sm:$0xf] %vm7239_vm0, %v8265_v43  ;;  %v8266_v28 = vpack.c.bf16 %v6660_v6, %v6660_v6  ;;  %v6366_v2 = vmax.f32 %v6078_v46, %v6222_v50  ;;  %v6079_v5 = vmax.f32 %v13104_v53, %v4780_v14  ;;  %v6223_v61 = vmax.f32 %v13105_v57, %v5932_v27  ;;  %v4782_v62 = vpop.f32.mrb[63].mxu0  ;;  %v5934_v54 = vpop.f32.mrb[63].mxu1 }
 0x591   :  { %7381 = vst.msk [vmem:[%s12621_s3 + $0x234] sm:$0xf] %vm7239_vm0, %v8266_v28  ;;  %v6517_v58 = vadd.f32 %v12368_v29, %v6366_v2  ;;  %v6367_v35 = vmax.f32 %v6079_v5, %v6223_v61 }
 0x593   :  { %v6661_v36 = vmax.f32 %v6517_v58, 0.0  ;;  %v6518_v21 = vadd.f32 %v12368_v29, %v6367_v35 }
 0x595   :  { %v8267_v10 = vpack.c.bf16 %v6661_v36, %v6661_v36  ;;  %v6662_v22 = vmax.f32 %v6518_v21, 0.0 }
 0x597   :  { %7382 = vst.msk [vmem:[%s12621_s3 + $0x238] sm:$0xf] %vm7239_vm0, %v8267_v10  ;;  %v8268_v25 = vpack.c.bf16 %v6662_v22, %v6662_v22 }
 0x599   :  { %7383 = vst.msk [vmem:[%s12621_s3 + $0x23c] sm:$0xf] %vm7239_vm0, %v8268_v25 }

// kernel: mynet_forward.3
= control target key start
LH: loop header
LB: loop body
LE: loop exit
PB: predicated region body
PF: predicated region fallthrough
CT: control target
= control target key end

     0   :  { %v4022_v0 = vmov 0   ;;  %vm4024_vm0 = vmmov 0   ;;  %vm1349_vm1 = vcmask 261120   ;;  %vm3109_vm2 = vcmask 80896   ;;  %s5188_s1 = inlined_call_operand.vmem [shape: bf16[256,32], index: 1, kind: input, shape index: {}]   ;;  %s5189_s0 = inlined_call_operand.vmem [shape: bf16[800,256], index: 0, kind: input, shape index: {}]   ;;  %s5190_s3 = inlined_call_operand.vmem [shape: bf16[25,32,128], index: 3, kind: input, shape index: {}]   ;;  %s5191_s2 = inlined_call_operand.vmem [shape: f32[1,32], index: 2, kind: input, shape index: {}]   ;;  %s5192_s5 = inlined_call_operand.vmem [shape: bf16[128,128], index: 5, kind: input, shape index: {}]   ;;  %s5193_s7 = inlined_call_operand.vmem [shape: bf16[128,10], index: 7, kind: input, shape index: {}]   ;;  %s5194_s4 = inlined_call_operand.vmem [shape: f32[1,128], index: 4, kind: input, shape index: {}]   ;;  %s5195_s6 = inlined_call_operand.vmem [shape: f32[1,128], index: 6, kind: input, shape index: {}]   ;;  %s5196_s8 = inlined_call_operand.vmem [shape: f32[1,10], index: 8, kind: input, shape index: {}]   ;;  %s5197_s9 = inlined_call_operand.vmem [shape: f32[8,10], index: 9, kind: output, shape index: {}]  }
   0x1   :  { %761 = vmatprep.subr.bf16.mxu0 %v4022_v0  ;;  %v3790_v1 = vld [vmem:[%s5188_s1] sm:$0xff]   ;;  %3755 = vmatprep.subr.bf16.mxu1 %v4022_v0  ;;  %v3791_v2 = vld [vmem:[%s5188_s1 + $0x8] sm:$0xff]   ;;  %v3792_v3 = vld [vmem:[%s5188_s1 + $0x10] sm:$0xff]  }
   0x2   :  { %762 = vmatpush1.bf16.msra.mxu0 %v3790_v1  ;;  %3771 = vmatpush1.bf16.msra.mxu1 %v3790_v1  ;;  %v3793_v4 = vld [vmem:[%s5188_s1 + $0x18] sm:$0xff]   ;;  %v3794_v5 = vld [vmem:[%s5188_s1 + $0x20] sm:$0xff]   ;;  %v3795_v7 = vld [vmem:[%s5188_s1 + $0x28] sm:$0xff]  }
   0x3   :  { %763 = vmatprep.subr.bf16.mxu0 %v4022_v0  ;;  %3756 = vmatprep.subr.bf16.mxu1 %v4022_v0  ;;  %v3808_v6 = vld [vmem:[%s5189_s0 + $0x4] ss:$8 sps:$4 sm:$0xff]   ;;  %v3796_v8 = vld [vmem:[%s5188_s1 + $0x30] sm:$0xff]   ;;  %v3797_v9 = vld [vmem:[%s5188_s1 + $0x38] sm:$0xff]  }
   0x4   :  { %793 = vmatprep.mubr.bf16.mxu0 %v3808_v6  ;;  %v3798_v10 = vld [vmem:[%s5188_s1 + $0x40] sm:$0xff]   ;;  %v3799_v11 = vld [vmem:[%s5188_s1 + $0x48] sm:$0xff]   ;;  %v3800_v12 = vld [vmem:[%s5188_s1 + $0x50] sm:$0xff]  }
   0x5   :  { %v3801_v13 = vld [vmem:[%s5188_s1 + $0x58] sm:$0xff]   ;;  %v3802_v14 = vld [vmem:[%s5188_s1 + $0x60] sm:$0xff]   ;;  %v3803_v15 = vld [vmem:[%s5188_s1 + $0x68] sm:$0xff]  }
   0x6   :  { %764 = vmatpush1.bf16.msra.mxu0 %v3791_v2  ;;  %3772 = vmatpush1.bf16.msra.mxu1 %v3791_v2  ;;  %v3804_v16 = vld [vmem:[%s5188_s1 + $0x70] sm:$0xff]   ;;  %v3805_v17 = vld [vmem:[%s5188_s1 + $0x78] sm:$0xff]   ;;  %v3806_v18 = vld [vmem:[%s5189_s0] ss:$8 sps:$4 sm:$0xff]  }
   0x7   :  { %765 = vmatprep.subr.bf16.mxu0 %v4022_v0  ;;  %3757 = vmatprep.subr.bf16.mxu1 %v4022_v0  ;;  %v3809_v19 = vld [vmem:[%s5189_s0 + $0x14] ss:$8 sps:$4 sm:$0xff]   ;;  %v3811_v20 = vld [vmem:[%s5189_s0 + $0x10] ss:$8 sps:$4 sm:$0xff]   ;;  %v3812_v21 = vld [vmem:[%s5189_s0 + $0x24] ss:$8 sps:$4 sm:$0xff]  }
   0x8   :  { %v3814_v22 = vld [vmem:[%s5189_s0 + $0x20] ss:$8 sps:$4 sm:$0xff]   ;;  %v3815_v23 = vld [vmem:[%s5189_s0 + $0x34] ss:$8 sps:$4 sm:$0xff]   ;;  %v3817_v24 = vld [vmem:[%s5189_s0 + $0x30] ss:$8 sps:$4 sm:$0xff]  }
   0x9   :  { %v3818_v25 = vld [vmem:[%s5189_s0 + $0x44] ss:$8 sps:$4 sm:$0xff]   ;;  %v3820_v26 = vld [vmem:[%s5189_s0 + $0x40] ss:$8 sps:$4 sm:$0xff]   ;;  %v3821_v27 = vld [vmem:[%s5189_s0 + $0x54] ss:$8 sps:$4 sm:$0xff]  }
   0xa   :  { %766 = vmatpush1.bf16.msra.mxu0 %v3792_v3  ;;  %3773 = vmatpush1.bf16.msra.mxu1 %v3792_v3  ;;  %v3823_v28 = vld [vmem:[%s5189_s0 + $0x50] ss:$8 sps:$4 sm:$0xff]   ;;  %v3824_v29 = vld [vmem:[%s5189_s0 + $0x64] ss:$8 sps:$4 sm:$0xff]   ;;  %v3826_v30 = vld [vmem:[%s5189_s0 + $0x60] ss:$8 sps:$4 sm:$0xff]  }
   0xb   :  { %767 = vmatprep.subr.bf16.mxu0 %v4022_v0  ;;  %3758 = vmatprep.subr.bf16.mxu1 %v4022_v0  ;;  %v3827_v31 = vld [vmem:[%s5189_s0 + $0x74] ss:$8 sps:$4 sm:$0xff]   ;;  %v3829_v32 = vld [vmem:[%s5189_s0 + $0x70] ss:$8 sps:$4 sm:$0xff]   ;;  %v3830_v33 = vld [vmem:[%s5189_s0 + $0x84] ss:$8 sps:$4 sm:$0xff]  }
   0xc   :  { %v3832_v34 = vld [vmem:[%s5189_s0 + $0x80] ss:$8 sps:$4 sm:$0xff]   ;;  %v3833_v35 = vld [vmem:[%s5189_s0 + $0x94] ss:$8 sps:$4 sm:$0xff]   ;;  %v3835_v36 = vld [vmem:[%s5189_s0 + $0x90] ss:$8 sps:$4 sm:$0xff]  }
   0xd   :  { %v3836_v37 = vld [vmem:[%s5189_s0 + $0xa4] ss:$8 sps:$4 sm:$0xff]   ;;  %v3838_v38 = vld [vmem:[%s5189_s0 + $0xa0] ss:$8 sps:$4 sm:$0xff]   ;;  %v3839_v39 = vld [vmem:[%s5189_s0 + $0xb4] ss:$8 sps:$4 sm:$0xff]  }
   0xe   :  { %768 = vmatpush1.bf16.msra.mxu0 %v3793_v4  ;;  %3774 = vmatpush1.bf16.msra.mxu1 %v3793_v4  ;;  %v3841_v40 = vld [vmem:[%s5189_s0 + $0xb0] ss:$8 sps:$4 sm:$0xff]   ;;  %v3842_v41 = vld [vmem:[%s5189_s0 + $0xc4] ss:$8 sps:$4 sm:$0xff]   ;;  %v3844_v42 = vld [vmem:[%s5189_s0 + $0xc0] ss:$8 sps:$4 sm:$0xff]  }
   0xf   :  { %769 = vmatprep.subr.bf16.mxu0 %v4022_v0  ;;  %3759 = vmatprep.subr.bf16.mxu1 %v4022_v0  ;;  %v3845_v43 = vld [vmem:[%s5189_s0 + $0xd4] ss:$8 sps:$4 sm:$0xff]   ;;  %v3847_v44 = vld [vmem:[%s5189_s0 + $0xd0] ss:$8 sps:$4 sm:$0xff]   ;;  %v3848_v45 = vld [vmem:[%s5189_s0 + $0xe4] ss:$8 sps:$4 sm:$0xff]  }
  0x10   :  { %v3898_v46 = vld [vmem:[%s5189_s0 + $0x2a4] ss:$8 sps:$4 sm:$0xff]   ;;  %v3896_v47 = vld [vmem:[%s5189_s0 + $0x2a0] ss:$8 sps:$4 sm:$0xff]   ;;  %v3851_v49 = vld [vmem:[%s5189_s0 + $0xf4] ss:$8 sps:$4 sm:$0xff]  }
  0x11   :  { %1129 = vmatprep.mubr.bf16.mxu1 %v3898_v46  ;;  %v3850_v48 = vld [vmem:[%s5189_s0 + $0xe0] ss:$8 sps:$4 sm:$0xff]   ;;  %v3902_v50 = vld [vmem:[%s5189_s0 + $0x2b4] ss:$8 sps:$4 sm:$0xff]   ;;  %v3904_v51 = vld [vmem:[%s5189_s0 + $0x2b0] ss:$8 sps:$4 sm:$0xff]  }
  0x12   :  { %770 = vmatpush1.bf16.msra.mxu0 %v3794_v5  ;;  %3775 = vmatpush1.bf16.msra.mxu1 %v3794_v5  ;;  %v3853_v52 = vld [vmem:[%s5189_s0 + $0xf0] ss:$8 sps:$4 sm:$0xff]   ;;  %v3854_v53 = vld [vmem:[%s5189_s0 + $0x104] ss:$8 sps:$4 sm:$0xff]   ;;  %v3910_v55 = vld [vmem:[%s5189_s0 + $0x2c0] ss:$8 sps:$4 sm:$0xff]  }
  0x13   :  { %771 = vmatprep.subr.bf16.mxu0 %v4022_v0  ;;  %3760 = vmatprep.subr.bf16.mxu1 %v4022_v0  ;;  %v3908_v54 = vld [vmem:[%s5189_s0 + $0x2c4] ss:$8 sps:$4 sm:$0xff]   ;;  %v3856_v56 = vld [vmem:[%s5189_s0 + $0x100] ss:$8 sps:$4 sm:$0xff]   ;;  %v3857_v57 = vld [vmem:[%s5189_s0 + $0x114] ss:$8 sps:$4 sm:$0xff]  }
  0x14   :  { %v3914_v58 = vld [vmem:[%s5189_s0 + $0x2d4] ss:$8 sps:$4 sm:$0xff]   ;;  %v3916_v59 = vld [vmem:[%s5189_s0 + $0x2d0] ss:$8 sps:$4 sm:$0xff]   ;;  %v3860_v61 = vld [vmem:[%s5189_s0 + $0x124] ss:$8 sps:$4 sm:$0xff]  }
  0x15   :  { %v3859_v60 = vld [vmem:[%s5189_s0 + $0x110] ss:$8 sps:$4 sm:$0xff]   ;;  %v3920_v62 = vld [vmem:[%s5189_s0 + $0x2e4] ss:$8 sps:$4 sm:$0xff]   ;;  %v3922_v63 = vld [vmem:[%s5189_s0 + $0x2e0] ss:$8 sps:$4 sm:$0xff]  }
  0x16   :  { %772 = vmatpush1.bf16.msra.mxu0 %v3795_v7  ;;  %3776 = vmatpush1.bf16.msra.mxu1 %v3795_v7  ;;  %v3863_v1 = vld [vmem:[%s5189_s0 + $0x134] ss:$8 sps:$4 sm:$0xff]   ;;  %v3928_v3 = vld [vmem:[%s5189_s0 + $0x2f0] ss:$8 sps:$4 sm:$0xff]   ;;  %v3866_v5 = vld [vmem:[%s5189_s0 + $0x144] ss:$8 sps:$4 sm:$0xff]  }
  0x17   :  { %773 = vmatprep.subr.bf16.mxu0 %v4022_v0  ;;  %3761 = vmatprep.subr.bf16.mxu1 %v4022_v0  ;;  %v3926_v2 = vld [vmem:[%s5189_s0 + $0x2f4] ss:$8 sps:$4 sm:$0xff]   ;;  %v3865_v4 = vld [vmem:[%s5189_s0 + $0x130] ss:$8 sps:$4 sm:$0xff]   ;;  %v3932_v6 = vld [vmem:[%s5189_s0 + $0x304] ss:$8 sps:$4 sm:$0xff]  }
  0x18   :  { %v3934_v7 = vld [vmem:[%s5189_s0 + $0x300] ss:$8 sps:$4 sm:$0xff]   ;;  %v3905_v46 = vld [vmem:[%s5189_s0 + $0x1f4] ss:$8 sps:$4 sm:$0xff]  }
  0x1a   :  { %774 = vmatpush1.bf16.msra.mxu0 %v3796_v8  ;;  %3777 = vmatpush1.bf16.msra.mxu1 %v3796_v8  ;;  %v3868_v8 = vld [vmem:[%s5189_s0 + $0x140] ss:$8 sps:$4 sm:$0xff]  }
  0x1b   :  { %775 = vmatprep.subr.bf16.mxu0 %v4022_v0  ;;  %3762 = vmatprep.subr.bf16.mxu1 %v4022_v0 }
  0x1e   :  { %776 = vmatpush1.bf16.msra.mxu0 %v3797_v9  ;;  %3778 = vmatpush1.bf16.msra.mxu1 %v3797_v9  ;;  %v3869_v9 = vld [vmem:[%s5189_s0 + $0x154] ss:$8 sps:$4 sm:$0xff]  }
  0x1f   :  { %777 = vmatprep.subr.bf16.mxu0 %v4022_v0  ;;  %3763 = vmatprep.subr.bf16.mxu1 %v4022_v0 }
  0x22   :  { %778 = vmatpush1.bf16.msra.mxu0 %v3798_v10  ;;  %3779 = vmatpush1.bf16.msra.mxu1 %v3798_v10  ;;  %v3938_v10 = vld [vmem:[%s5189_s0 + $0x314] ss:$8 sps:$4 sm:$0xff]  }
  0x23   :  { %779 = vmatprep.subr.bf16.mxu0 %v4022_v0  ;;  %3764 = vmatprep.subr.bf16.mxu1 %v4022_v0 }
  0x26   :  { %780 = vmatpush1.bf16.msra.mxu0 %v3799_v11  ;;  %3780 = vmatpush1.bf16.msra.mxu1 %v3799_v11  ;;  %v3940_v11 = vld [vmem:[%s5189_s0 + $0x310] ss:$8 sps:$4 sm:$0xff]  }
  0x27   :  { %781 = vmatprep.subr.bf16.mxu0 %v4022_v0  ;;  %3765 = vmatprep.subr.bf16.mxu1 %v4022_v0 }
  0x2a   :  { %782 = vmatpush1.bf16.msra.mxu0 %v3800_v12  ;;  %3781 = vmatpush1.bf16.msra.mxu1 %v3800_v12  ;;  %v3871_v12 = vld [vmem:[%s5189_s0 + $0x150] ss:$8 sps:$4 sm:$0xff]  }
  0x2b   :  { %783 = vmatprep.subr.bf16.mxu0 %v4022_v0  ;;  %3766 = vmatprep.subr.bf16.mxu1 %v4022_v0 }
  0x2e   :  { %784 = vmatpush1.bf16.msra.mxu0 %v3801_v13  ;;  %3782 = vmatpush1.bf16.msra.mxu1 %v3801_v13  ;;  %v3872_v13 = vld [vmem:[%s5189_s0 + $0x164] ss:$8 sps:$4 sm:$0xff]  }
  0x2f   :  { %785 = vmatprep.subr.bf16.mxu0 %v4022_v0  ;;  %3767 = vmatprep.subr.bf16.mxu1 %v4022_v0 }
  0x32   :  { %786 = vmatpush1.bf16.msra.mxu0 %v3802_v14  ;;  %3783 = vmatpush1.bf16.msra.mxu1 %v3802_v14  ;;  %v3874_v14 = vld [vmem:[%s5189_s0 + $0x160] ss:$8 sps:$4 sm:$0xff]  }
  0x33   :  { %787 = vmatprep.subr.bf16.mxu0 %v4022_v0  ;;  %3768 = vmatprep.subr.bf16.mxu1 %v4022_v0 }
  0x36   :  { %788 = vmatpush1.bf16.msra.mxu0 %v3803_v15  ;;  %3784 = vmatpush1.bf16.msra.mxu1 %v3803_v15  ;;  %v3875_v15 = vld [vmem:[%s5189_s0 + $0x174] ss:$8 sps:$4 sm:$0xff]  }
  0x37   :  { %789 = vmatprep.subr.bf16.mxu0 %v4022_v0  ;;  %3769 = vmatprep.subr.bf16.mxu1 %v4022_v0 }
  0x3a   :  { %790 = vmatpush1.bf16.msra.mxu0 %v3804_v16  ;;  %3785 = vmatpush1.bf16.msra.mxu1 %v3804_v16  ;;  %v3877_v16 = vld [vmem:[%s5189_s0 + $0x170] ss:$8 sps:$4 sm:$0xff]  }
  0x3b   :  { %791 = vmatprep.subr.bf16.mxu0 %v4022_v0  ;;  %3770 = vmatprep.subr.bf16.mxu1 %v4022_v0  ;;  %v3862_v0 = vld [vmem:[%s5189_s0 + $0x120] ss:$8 sps:$4 sm:$0xff]  }
  0x3e   :  { %792 = vmatpush1.bf16.msra.mxu0 %v3805_v17  ;;  %3786 = vmatpush1.bf16.msra.mxu1 %v3805_v17  ;;  %v3878_v17 = vld [vmem:[%s5189_s0 + $0x184] ss:$8 sps:$4 sm:$0xff]  }
  0x41   :  { %794 = vmatmul.mubr.bf16.vlgmr.msra.gmra.mrb[0].mxu0 %v3806_v18  ;;  %1130 = vmatmul.mubr.bf16.vlgmr.msra.gmra.mrb[0].mxu1 %v3896_v47  ;;  %v3880_v18 = vld [vmem:[%s5189_s0 + $0x180] ss:$8 sps:$4 sm:$0xff]  }
  0x42   :  { %801 = vmatprep.mubr.bf16.mxu0 %v3809_v19  ;;  %1137 = vmatprep.mubr.bf16.mxu1 %v3902_v50  ;;  %v3881_v19 = vld [vmem:[%s5189_s0 + $0x194] ss:$8 sps:$4 sm:$0xff]   ;;  %v3907_v50 = vld [vmem:[%s5189_s0 + $0x1f0] ss:$8 sps:$4 sm:$0xff]  }
  0x49   :  { %802 = vmatmul.mubr.bf16.gmra.mrb[4].mxu0 %v3811_v20  ;;  %1138 = vmatmul.mubr.bf16.gmra.mrb[4].mxu1 %v3904_v51  ;;  %v3883_v20 = vld [vmem:[%s5189_s0 + $0x190] ss:$8 sps:$4 sm:$0xff]  }
  0x4a   :  { %809 = vmatprep.mubr.bf16.mxu0 %v3812_v21  ;;  %1145 = vmatprep.mubr.bf16.mxu1 %v3908_v54  ;;  %v3884_v21 = vld [vmem:[%s5189_s0 + $0x1a4] ss:$8 sps:$4 sm:$0xff]  }
  0x51   :  { %810 = vmatmul.mubr.bf16.gmra.mrb[8].mxu0 %v3814_v22  ;;  %1146 = vmatmul.mubr.bf16.gmra.mrb[8].mxu1 %v3910_v55  ;;  %v3886_v22 = vld [vmem:[%s5189_s0 + $0x1a0] ss:$8 sps:$4 sm:$0xff]  }
  0x52   :  { %817 = vmatprep.mubr.bf16.mxu0 %v3815_v23  ;;  %1153 = vmatprep.mubr.bf16.mxu1 %v3914_v58  ;;  %v3887_v23 = vld [vmem:[%s5189_s0 + $0x1b4] ss:$8 sps:$4 sm:$0xff]  }
  0x53   :  { %v3917_v58 = vld [vmem:[%s5189_s0 + $0x214] ss:$8 sps:$4 sm:$0xff]  }
  0x59   :  { %818 = vmatmul.mubr.bf16.gmra.mrb[12].mxu0 %v3817_v24  ;;  %1154 = vmatmul.mubr.bf16.gmra.mrb[12].mxu1 %v3916_v59 }
  0x5a   :  { %825 = vmatprep.mubr.bf16.mxu0 %v3818_v25  ;;  %1161 = vmatprep.mubr.bf16.mxu1 %v3920_v62  ;;  %v3919_v62 = vld [vmem:[%s5189_s0 + $0x210] ss:$8 sps:$4 sm:$0xff]  }
  0x61   :  { %826 = vmatmul.mubr.bf16.gmra.mrb[16].mxu0 %v3820_v26  ;;  %1162 = vmatmul.mubr.bf16.gmra.mrb[16].mxu1 %v3922_v63  ;;  %v3889_v26 = vld [vmem:[%s5189_s0 + $0x1b0] ss:$8 sps:$4 sm:$0xff]  }
  0x62   :  { %833 = vmatprep.mubr.bf16.mxu0 %v3821_v27  ;;  %1169 = vmatprep.mubr.bf16.mxu1 %v3926_v2 }
  0x69   :  { %834 = vmatmul.mubr.bf16.gmra.mrb[20].mxu0 %v3823_v28  ;;  %1170 = vmatmul.mubr.bf16.gmra.mrb[20].mxu1 %v3928_v3  ;;  %v3890_v28 = vld [vmem:[%s5189_s0 + $0x1c4] ss:$8 sps:$4 sm:$0xff]  }
  0x6a   :  { %841 = vmatprep.mubr.bf16.mxu0 %v3824_v29  ;;  %1177 = vmatprep.mubr.bf16.mxu1 %v3932_v6  ;;  %v3929_v6 = vld [vmem:[%s5189_s0 + $0x234] ss:$8 sps:$4 sm:$0xff]  }
  0x71   :  { %842 = vmatmul.mubr.bf16.gmra.mrb[24].mxu0 %v3826_v30  ;;  %1178 = vmatmul.mubr.bf16.gmra.mrb[24].mxu1 %v3934_v7 }
  0x72   :  { %849 = vmatprep.mubr.bf16.mxu0 %v3827_v31  ;;  %1185 = vmatprep.mubr.bf16.mxu1 %v3938_v10  ;;  %v3931_v10 = vld [vmem:[%s5189_s0 + $0x230] ss:$8 sps:$4 sm:$0xff]  }
  0x79   :  { %850 = vmatmul.mubr.bf16.gmra.mrb[28].mxu0 %v3829_v32  ;;  %1186 = vmatmul.mubr.bf16.gmra.mrb[28].mxu1 %v3940_v11  ;;  %v3892_v32 = vld [vmem:[%s5189_s0 + $0x1c0] ss:$8 sps:$4 sm:$0xff]  }
  0x7a   :  { %857 = vmatprep.mubr.bf16.mxu0 %v3830_v33 }
  0x81   :  { %858 = vmatmul.mubr.bf16.gmra.mrb[32].mxu0 %v3832_v34  ;;  %v3893_v34 = vld [vmem:[%s5189_s0 + $0x1d4] ss:$8 sps:$4 sm:$0xff]  }
  0x82   :  { %865 = vmatprep.mubr.bf16.mxu0 %v3833_v35 }
  0x89   :  { %866 = vmatmul.mubr.bf16.gmra.mrb[36].mxu0 %v3835_v36 }
  0x8a   :  { %873 = vmatprep.mubr.bf16.mxu0 %v3836_v37 }
  0x91   :  { %874 = vmatmul.mubr.bf16.gmra.mrb[40].mxu0 %v3838_v38  ;;  %v3895_v38 = vld [vmem:[%s5189_s0 + $0x1d0] ss:$8 sps:$4 sm:$0xff]  }
  0x92   :  { %881 = vmatprep.mubr.bf16.mxu0 %v3839_v39 }
  0x99   :  { %882 = vmatmul.mubr.bf16.gmra.mrb[44].mxu0 %v3841_v40  ;;  %v3899_v40 = vld [vmem:[%s5189_s0 + $0x1e4] ss:$8 sps:$4 sm:$0xff]  }
  0x9a   :  { %889 = vmatprep.mubr.bf16.mxu0 %v3842_v41 }
  0xa1   :  { %890 = vmatmul.mubr.bf16.gmra.mrb[48].mxu0 %v3844_v42 }
  0xa2   :  { %897 = vmatprep.mubr.bf16.mxu0 %v3845_v43 }
  0xa9   :  { %898 = vmatmul.mubr.bf16.gmra.mrb[52].mxu0 %v3847_v44  ;;  %v3901_v44 = vld [vmem:[%s5189_s0 + $0x1e0] ss:$8 sps:$4 sm:$0xff]  }
  0xaa   :  { %905 = vmatprep.mubr.bf16.mxu0 %v3848_v45 }
  0xb1   :  { %906 = vmatmul.mubr.bf16.gmra.mrb[56].mxu0 %v3850_v48 }
  0xb2   :  { %913 = vmatprep.mubr.bf16.mxu0 %v3851_v49 }
  0xb9   :  { %914 = vmatmul.mubr.bf16.gmra.mrb[60].mxu0 %v3853_v52  ;;  %v3911_v52 = vld [vmem:[%s5189_s0 + $0x204] ss:$8 sps:$4 sm:$0xff]  }
  0xba   :  { %921 = vmatprep.mubr.bf16.mxu0 %v3854_v53 }
  0xc1   :  { %922 = vmatmul.mubr.bf16.gmra.mrb[64].mxu0 %v3856_v56  ;;  %v3913_v56 = vld [vmem:[%s5189_s0 + $0x200] ss:$8 sps:$4 sm:$0xff]  }
  0xc2   :  { %929 = vmatprep.mubr.bf16.mxu0 %v3857_v57 }
  0xc9   :  { %930 = vmatmul.mubr.bf16.gmra.mrb[68].mxu0 %v3859_v60 }
  0xca   :  { %937 = vmatprep.mubr.bf16.mxu0 %v3860_v61 }
  0xd1   :  { %938 = vmatmul.mubr.bf16.gmra.mrb[72].mxu0 %v3862_v0  ;;  %v3923_v0 = vld [vmem:[%s5189_s0 + $0x224] ss:$8 sps:$4 sm:$0xff]  }
  0xd2   :  { %945 = vmatprep.mubr.bf16.mxu0 %v3863_v1 }
  0xd9   :  { %946 = vmatmul.mubr.bf16.gmra.mrb[76].mxu0 %v3865_v4  ;;  %v3925_v4 = vld [vmem:[%s5189_s0 + $0x220] ss:$8 sps:$4 sm:$0xff]  }
  0xda   :  { %953 = vmatprep.mubr.bf16.mxu0 %v3866_v5 }
  0xe1   :  { %954 = vmatmul.mubr.bf16.gmra.mrb[80].mxu0 %v3868_v8 }
  0xe2   :  { %961 = vmatprep.mubr.bf16.mxu0 %v3869_v9 }
  0xe9   :  { %962 = vmatmul.mubr.bf16.gmra.mrb[84].mxu0 %v3871_v12  ;;  %v3935_v12 = vld [vmem:[%s5189_s0 + $0x244] ss:$8 sps:$4 sm:$0xff]  }
  0xea   :  { %969 = vmatprep.mubr.bf16.mxu0 %v3872_v13 }
  0xf1   :  { %970 = vmatmul.mubr.bf16.gmra.mrb[88].mxu0 %v3874_v14 }
  0xf2   :  { %977 = vmatprep.mubr.bf16.mxu0 %v3875_v15 }
  0xf9   :  { %978 = vmatmul.mubr.bf16.gmra.mrb[92].mxu0 %v3877_v16  ;;  %v3937_v16 = vld [vmem:[%s5189_s0 + $0x240] ss:$8 sps:$4 sm:$0xff]  }
  0xfa   :  { %985 = vmatprep.mubr.bf16.mxu0 %v3878_v17 }
 0x101   :  { %986 = vmatmul.mubr.bf16.gmra.mrb[96].mxu0 %v3880_v18  ;;  %v3941_v18 = vld [vmem:[%s5189_s0 + $0x254] ss:$8 sps:$4 sm:$0xff]  }
 0x102   :  { %993 = vmatprep.mubr.bf16.mxu0 %v3881_v19 }
 0x109   :  { %994 = vmatmul.mubr.bf16.gmra.mrb[100].mxu0 %v3883_v20 }
 0x10a   :  { %1001 = vmatprep.mubr.bf16.mxu0 %v3884_v21 }
 0x111   :  { %1002 = vmatmul.mubr.bf16.gmra.mrb[104].mxu0 %v3886_v22  ;;  %v3943_v22 = vld [vmem:[%s5189_s0 + $0x250] ss:$8 sps:$4 sm:$0xff]  }
 0x112   :  { %1009 = vmatprep.mubr.bf16.mxu0 %v3887_v23 }
 0x114   :  { %v4368_v24 = vpop.f32.mrb[0].mxu0 }
 0x115   :  { %v797_v25 = vpop.f32.mrb[1].mxu0 }
 0x116   :  { %v4373_v27 = vpop.f32.mrb[2].mxu0  ;;  %v3944_v25 = vld [vmem:[%s5189_s0 + $0x264] ss:$8 sps:$4 sm:$0xff]  }
 0x117   :  { %5218 = vst [vmem:[#allocation2_spill] sm:$0xff] %v4373_v27  ;;  %v800_v29 = vpop.f32.mrb[3].mxu0 }
 0x119   :  { %1010 = vmatmul.mubr.bf16.gmra.mrb[108].mxu0 %v3889_v26 }
 0x11a   :  { %1017 = vmatprep.mubr.bf16.mxu0 %v3890_v28 }
 0x11c   :  { %v4378_v30 = vpop.f32.mrb[4].mxu0 }
 0x11d   :  { %5219 = vst [vmem:[#allocation3_spill] sm:$0xff] %v4378_v30  ;;  %v805_v31 = vpop.f32.mrb[5].mxu0 }
 0x11e   :  { %v4383_v33 = vpop.f32.mrb[6].mxu0  ;;  %v3946_v31 = vld [vmem:[%s5189_s0 + $0x260] ss:$8 sps:$4 sm:$0xff]  }
 0x11f   :  { %5220 = vst [vmem:[#allocation4_spill] sm:$0xff] %v4383_v33  ;;  %v808_v35 = vpop.f32.mrb[7].mxu0 }
 0x121   :  { %1018 = vmatmul.mubr.bf16.gmra.mrb[112].mxu0 %v3892_v32 }
 0x122   :  { %1025 = vmatprep.mubr.bf16.mxu0 %v3893_v34  ;;  %v3947_v34 = vld [vmem:[%s5189_s0 + $0x274] ss:$8 sps:$4 sm:$0xff]  }
 0x124   :  { %v4388_v36 = vpop.f32.mrb[8].mxu0 }
 0x125   :  { %5221 = vst [vmem:[#allocation5_spill] sm:$0xff] %v4388_v36  ;;  %v813_v37 = vpop.f32.mrb[9].mxu0 }
 0x126   :  { %v4393_v39 = vpop.f32.mrb[10].mxu0 }
 0x127   :  { %5222 = vst [vmem:[#allocation6_spill] sm:$0xff] %v4393_v39  ;;  %v816_v41 = vpop.f32.mrb[11].mxu0 }
 0x129   :  { %1026 = vmatmul.mubr.bf16.gmra.mrb[116].mxu0 %v3895_v38 }
 0x12a   :  { %1033 = vmatprep.mubr.bf16.mxu0 %v3899_v40  ;;  %v3949_v40 = vld [vmem:[%s5189_s0 + $0x270] ss:$8 sps:$4 sm:$0xff]  }
 0x12c   :  { %v4398_v42 = vpop.f32.mrb[12].mxu0 }
 0x12d   :  { %5223 = vst [vmem:[#allocation7_spill] sm:$0xff] %v4398_v42  ;;  %v821_v43 = vpop.f32.mrb[13].mxu0 }
 0x12e   :  { %v4403_v45 = vpop.f32.mrb[14].mxu0  ;;  %v3950_v43 = vld [vmem:[%s5189_s0 + $0x284] ss:$8 sps:$4 sm:$0xff]  }
 0x12f   :  { %5224 = vst [vmem:[#allocation8_spill] sm:$0xff] %v4403_v45  ;;  %v824_v47 = vpop.f32.mrb[15].mxu0 }
 0x131   :  { %1034 = vmatmul.mubr.bf16.gmra.mrb[120].mxu0 %v3901_v44  ;;  %v5235_v44 = vmov 0.0  }
 0x132   :  { %1041 = vmatprep.mubr.bf16.mxu0 %v3905_v46  ;;  %3519 = vmatprep.mubr.msk.bf16.mxu1 %vm4024_vm0, %v5235_v44 }
 0x134   :  { %v4408_v48 = vpop.f32.mrb[16].mxu0 }
 0x135   :  { %5225 = vst [vmem:[#allocation9_spill] sm:$0xff] %v4408_v48  ;;  %v829_v49 = vpop.f32.mrb[17].mxu0 }
 0x136   :  { %v4413_v51 = vpop.f32.mrb[18].mxu0 }
 0x137   :  { %v832_v53 = vpop.f32.mrb[19].mxu0 }
 0x139   :  { %1042 = vmatmul.mubr.bf16.gmra.mrb[124].mxu0 %v3907_v50 }
 0x13a   :  { %1049 = vmatprep.mubr.bf16.mxu0 %v3911_v52  ;;  %v3952_v52 = vld [vmem:[%s5189_s0 + $0x280] ss:$8 sps:$4 sm:$0xff]  }
 0x13c   :  { %v4418_v54 = vpop.f32.mrb[20].mxu0 }
 0x13d   :  { %v837_v55 = vpop.f32.mrb[21].mxu0 }
 0x13e   :  { %v4423_v57 = vpop.f32.mrb[22].mxu0  ;;  %v3953_v55 = vld [vmem:[%s5189_s0 + $0x294] ss:$8 sps:$4 sm:$0xff]  }
 0x13f   :  { %v840_v59 = vpop.f32.mrb[23].mxu0 }
 0x141   :  { %1050 = vmatmul.mubr.bf16.gmra.mrb[128].mxu0 %v3913_v56  ;;  %v4512_v56 = vpop.f32.mrb[0].mxu1 }
 0x142   :  { %1057 = vmatprep.mubr.bf16.mxu0 %v3917_v58 }
 0x144   :  { %v4428_v60 = vpop.f32.mrb[24].mxu0 }
 0x145   :  { %v845_v61 = vpop.f32.mrb[25].mxu0 }
 0x146   :  { %v4433_v63 = vpop.f32.mrb[26].mxu0  ;;  %v1133_v61 = vpop.f32.mrb[1].mxu1 }
 0x147   :  { %v848_v1 = vpop.f32.mrb[27].mxu0  ;;  %v5198_v61 = vmov 0.0  }
 0x148   :  { %3515 = vmatprep.subr.bf16.mxu1 %v5198_v61 }
 0x149   :  { %1058 = vmatmul.mubr.bf16.gmra.mrb[132].mxu0 %v3919_v62 }
 0x14a   :  { %1065 = vmatprep.mubr.bf16.mxu0 %v3923_v0  ;;  %v4518_v0 = vpop.f32.mrb[2].mxu1 }
 0x14c   :  { %v4438_v2 = vpop.f32.mrb[28].mxu0 }
 0x14d   :  { %v853_v3 = vpop.f32.mrb[29].mxu0 }
 0x14e   :  { %v4443_v5 = vpop.f32.mrb[30].mxu0 }
 0x14f   :  { %v856_v7 = vpop.f32.mrb[31].mxu0 }
 0x151   :  { %1066 = vmatmul.mubr.bf16.gmra.mrb[136].mxu0 %v3925_v4  ;;  %v3955_v4 = vld [vmem:[%s5189_s0 + $0x290] ss:$8 sps:$4 sm:$0xff]  }
 0x152   :  { %1073 = vmatprep.mubr.bf16.mxu0 %v3929_v6  ;;  %v1136_v6 = vpop.f32.mrb[3].mxu1 }
 0x154   :  { %v4448_v8 = vpop.f32.mrb[32].mxu0 }
 0x155   :  { %v861_v9 = vpop.f32.mrb[33].mxu0 }
 0x156   :  { %v4453_v11 = vpop.f32.mrb[34].mxu0  ;;  %v4527_v9 = vpop.f32.mrb[4].mxu1 }
 0x157   :  { %v864_v13 = vpop.f32.mrb[35].mxu0 }
 0x158   :  { %v1141_v13 = vpop.f32.mrb[5].mxu1 }
 0x159   :  { %1074 = vmatmul.mubr.bf16.gmra.mrb[140].mxu0 %v3931_v10 }
 0x15a   :  { %1081 = vmatprep.mubr.bf16.mxu0 %v3935_v12 }
 0x15c   :  { %v4458_v14 = vpop.f32.mrb[36].mxu0 }
 0x15d   :  { %v869_v15 = vpop.f32.mrb[37].mxu0 }
 0x15e   :  { %v4463_v17 = vpop.f32.mrb[38].mxu0 }
 0x15f   :  { %v872_v19 = vpop.f32.mrb[39].mxu0 }
 0x161   :  { %1082 = vmatmul.mubr.bf16.gmra.mrb[144].mxu0 %v3937_v16  ;;  %v4533_v16 = vpop.f32.mrb[6].mxu1 }
 0x162   :  { %1089 = vmatprep.mubr.bf16.mxu0 %v3941_v18 }
 0x164   :  { %v4468_v20 = vpop.f32.mrb[40].mxu0 }
 0x165   :  { %v877_v21 = vpop.f32.mrb[41].mxu0 }
 0x166   :  { %v4473_v23 = vpop.f32.mrb[42].mxu0  ;;  %v1144_v21 = vpop.f32.mrb[7].mxu1 }
 0x167   :  { %v880_v26 = vpop.f32.mrb[43].mxu0 }
 0x169   :  { %1090 = vmatmul.mubr.bf16.gmra.mrb[148].mxu0 %v3943_v22 }
 0x16a   :  { %1097 = vmatprep.mubr.bf16.mxu0 %v3944_v25  ;;  %v4539_v25 = vpop.f32.mrb[8].mxu1 }
 0x16c   :  { %v4478_v28 = vpop.f32.mrb[44].mxu0 }
 0x16d   :  { %v885_v29 = vpop.f32.mrb[45].mxu0 }
 0x16e   :  { %v4483_v32 = vpop.f32.mrb[46].mxu0 }
 0x16f   :  { %v888_v35 = vpop.f32.mrb[47].mxu0 }
 0x171   :  { %1098 = vmatmul.mubr.bf16.gmra.mrb[152].mxu0 %v3946_v31  ;;  %v1149_v31 = vpop.f32.mrb[9].mxu1 }
 0x172   :  { %1105 = vmatprep.mubr.bf16.mxu0 %v3947_v34  ;;  %v4545_v35 = vpop.f32.mrb[10].mxu1 }
 0x174   :  { %v4488_v37 = vpop.f32.mrb[48].mxu0 }
 0x175   :  { %v893_v38 = vpop.f32.mrb[49].mxu0 }
 0x176   :  { %v4493_v41 = vpop.f32.mrb[50].mxu0 }
 0x177   :  { %5226 = vst [vmem:[#allocation10_spill] sm:$0xff] %v4493_v41  ;;  %v896_v46 = vpop.f32.mrb[51].mxu0 }
 0x179   :  { %1106 = vmatmul.mubr.bf16.gmra.mrb[156].mxu0 %v3949_v40 }
 0x17a   :  { %1113 = vmatprep.mubr.bf16.mxu0 %v3950_v43  ;;  %v1152_v43 = vpop.f32.mrb[11].mxu1 }
 0x17c   :  { %v4500_v47 = vpop.f32.mrb[52].mxu0 }
 0x17d   :  { %5227 = vst [vmem:[#allocation11_spill] sm:$0xff] %v4500_v47  ;;  %v901_v50 = vpop.f32.mrb[53].mxu0 }
 0x17e   :  { %v4507_v53 = vpop.f32.mrb[54].mxu0  ;;  %v4551_v50 = vpop.f32.mrb[12].mxu1 }
 0x17f   :  { %5228 = vst [vmem:[#allocation12_spill] sm:$0xff] %v4507_v53  ;;  %v904_v59 = vpop.f32.mrb[55].mxu0 }
 0x180   :  { %v1157_v59 = vpop.f32.mrb[13].mxu1 }
 0x181   :  { %1114 = vmatmul.mubr.bf16.gmra.mrb[160].mxu0 %v3952_v52  ;;  %v4562_v6 = vpop.f32.mrb[14].mxu1 }
 0x182   :  { %1121 = vmatprep.mubr.bf16.mxu0 %v3953_v55 }
 0x184   :  { %v4516_v62 = vpop.f32.mrb[56].mxu0 }
 0x185   :  { %5229 = vst [vmem:[#allocation13_spill] sm:$0xff] %v4516_v62  ;;  %v909_v3 = vpop.f32.mrb[57].mxu0 }
 0x186   :  { %v4525_v7 = vpop.f32.mrb[58].mxu0  ;;  %v3956_v3 = vld [vmem:[%s5190_s3 + $0x10] sm:$0xff]  }
 0x187   :  { %5230 = vst [vmem:[#allocation14_spill] sm:$0xff] %v4525_v7  ;;  %v912_v12 = vpop.f32.mrb[59].mxu0  ;;  %3516 = vmatpush3.bf16.msra.mxu1 %v3956_v3 }
 0x188   :  { %3517 = vmatprep.subr.bf16.mxu1 %v5198_v61 }
 0x189   :  { %1122 = vmatmul.mubr.bf16.gmra.mrb[164].mxu0 %v3955_v4 }
 0x18c   :  { %v4531_v15 = vpop.f32.mrb[60].mxu0 }
 0x18d   :  { %5231 = vst [vmem:[#allocation15_spill] sm:$0xff] %v4531_v15  ;;  %v917_v19 = vpop.f32.mrb[61].mxu0 }
 0x18e   :  { %v4537_v22 = vpop.f32.mrb[62].mxu0  ;;  %v1160_v19 = vpop.f32.mrb[15].mxu1 }
 0x18f   :  { %5232 = vst [vmem:[#allocation16_spill] sm:$0xff] %v4537_v22  ;;  %v920_v29 = vpop.f32.mrb[63].mxu0 }
 0x190   :  { %v4568_v29 = vpop.f32.mrb[16].mxu1 }
 0x191   :  { %v1165_v43 = vpop.f32.mrb[17].mxu1 }
 0x192   :  { %v4574_v59 = vpop.f32.mrb[18].mxu1 }
 0x193   :  { %v1168_v38 = vpop.f32.mrb[19].mxu1 }
 0x194   :  { %v4543_v34 = vpop.f32.mrb[64].mxu0  ;;  %v4580_v19 = vpop.f32.mrb[20].mxu1 }
 0x195   :  { %5233 = vst [vmem:[#allocation17_spill] sm:$0xff] %v4543_v34  ;;  %v925_v40 = vpop.f32.mrb[65].mxu0  ;;  %v1173_v10 = vpop.f32.mrb[21].mxu1 }
 0x196   :  { %v4549_v46 = vpop.f32.mrb[66].mxu0  ;;  %v4586_v43 = vpop.f32.mrb[22].mxu1 }
 0x197   :  { %5234 = vst [vmem:[#allocation18_spill] sm:$0xff] %v4549_v46  ;;  %v928_v55 = vpop.f32.mrb[67].mxu0  ;;  %v1176_v49 = vpop.f32.mrb[23].mxu1 }
 0x198   :  { %v4592_v38 = vpop.f32.mrb[24].mxu1 }
 0x199   :  { %v1181_v26 = vpop.f32.mrb[25].mxu1 }
 0x19a   :  { %v4598_v10 = vpop.f32.mrb[26].mxu1  ;;  %v3957_v26 = vld [vmem:[%s5190_s3 + $0x18] sm:$0xff]  }
 0x19b   :  { %v1184_v1 = vpop.f32.mrb[27].mxu1  ;;  %3518 = vmatpush3.bf16.msra.mxu1 %v3957_v26 }
 0x19c   :  { %v4560_v4 = vpop.f32.mrb[68].mxu0  ;;  %v4604_v49 = vpop.f32.mrb[28].mxu1  ;;  %3523 = vmatprep.subr.bf16.mxu1 %v5235_v44 }
 0x19d   :  { %v933_v13 = vpop.f32.mrb[69].mxu0 }
 0x19e   :  { %v4566_v21 = vpop.f32.mrb[70].mxu0 }
 0x19f   :  { %v936_v40 = vpop.f32.mrb[71].mxu0 }
 0x1a4   :  { %v4572_v55 = vpop.f32.mrb[72].mxu0 }
 0x1a5   :  { %v941_v52 = vpop.f32.mrb[73].mxu0 }
 0x1a6   :  { %v4578_v13 = vpop.f32.mrb[74].mxu0 }
 0x1a7   :  { %v944_v18 = vpop.f32.mrb[75].mxu0 }
 0x1ac   :  { %v4584_v40 = vpop.f32.mrb[76].mxu0 }
 0x1ad   :  { %v949_v58 = vpop.f32.mrb[77].mxu0 }
 0x1ae   :  { %v4590_v52 = vpop.f32.mrb[78].mxu0 }
 0x1af   :  { %v952_v3 = vpop.f32.mrb[79].mxu0 }
 0x1b0   :  { %v1189_v3 = vpop.f32.mrb[29].mxu1 }
 0x1b4   :  { %v4596_v18 = vpop.f32.mrb[80].mxu0 }
 0x1b5   :  { %v957_v12 = vpop.f32.mrb[81].mxu0 }
 0x1b6   :  { %v4602_v58 = vpop.f32.mrb[82].mxu0  ;;  %v4614_v12 = vpop.f32.mrb[30].mxu1 }
 0x1b7   :  { %v960_v46 = vpop.f32.mrb[83].mxu0  ;;  %v1192_v34 = vpop.f32.mrb[31].mxu1 }
 0x1bc   :  { %v4612_v48 = vpop.f32.mrb[84].mxu0 }
 0x1bd   :  { %v965_v31 = vpop.f32.mrb[85].mxu0 }
 0x1be   :  { %v4618_v45 = vpop.f32.mrb[86].mxu0 }
 0x1bf   :  { %v968_v61 = vpop.f32.mrb[87].mxu0 }
 0x1c4   :  { %v4622_v22 = vpop.f32.mrb[88].mxu0 }
 0x1c5   :  { %v973_v3 = vpop.f32.mrb[89].mxu0 }
 0x1c6   :  { %v4626_v42 = vpop.f32.mrb[90].mxu0 }
 0x1c7   :  { %v976_v1 = vpop.f32.mrb[91].mxu0 }
 0x1cc   :  { %v4630_v31 = vpop.f32.mrb[92].mxu0 }
 0x1cd   :  { %v981_v39 = vpop.f32.mrb[93].mxu0 }
 0x1ce   :  { %v4634_v46 = vpop.f32.mrb[94].mxu0 }
 0x1cf   :  { %v984_v3 = vpop.f32.mrb[95].mxu0 }
 0x1d4   :  { %v4640_v26 = vpop.f32.mrb[96].mxu0 }
 0x1d5   :  { %v989_v15 = vpop.f32.mrb[97].mxu0 }
 0x1d6   :  { %v4644_v7 = vpop.f32.mrb[98].mxu0 }
 0x1d7   :  { %v992_v34 = vpop.f32.mrb[99].mxu0 }
 0x1dc   :  { %v4648_v36 = vpop.f32.mrb[100].mxu0 }
 0x1dd   :  { %v997_v62 = vpop.f32.mrb[101].mxu0 }
 0x1de   :  { %v4650_v44 = vpop.f32.mrb[102].mxu0 }
 0x1df   :  { %5236 = vst [vmem:[#allocation19_spill] sm:$0xff] %v4650_v44  ;;  %v1000_v33 = vpop.f32.mrb[103].mxu0 }
 0x1e4   :  { %v4652_v61 = vpop.f32.mrb[104].mxu0 }
 0x1e5   :  { %5237 = vst [vmem:[#allocation20_spill] sm:$0xff] %v4652_v61  ;;  %v1005_v3 = vpop.f32.mrb[105].mxu0 }
 0x1e6   :  { %v4654_v53 = vpop.f32.mrb[106].mxu0 }
 0x1e7   :  { %5238 = vst [vmem:[#allocation21_spill] sm:$0xff] %v4654_v53  ;;  %v1008_v30 = vpop.f32.mrb[107].mxu0 }
 0x1e8   :  { %v5243_v30 = vmax.f32 %v4413_v51, %v4560_v4 }
 0x1ec   :  { %v4656_v1 = vpop.f32.mrb[108].mxu0 }
 0x1ed   :  { %v1013_v15 = vpop.f32.mrb[109].mxu0 }
 0x1ee   :  { %v4658_v47 = vpop.f32.mrb[110].mxu0 }
 0x1ef   :  { %5239 = vst [vmem:[#allocation22_spill] sm:$0xff] %v4658_v47  ;;  %v1016_v27 = vpop.f32.mrb[111].mxu0 }
 0x1f4   :  { %v4660_v39 = vpop.f32.mrb[112].mxu0 }
 0x1f5   :  { %5240 = vst [vmem:[#allocation23_spill] sm:$0xff] %v4660_v39  ;;  %v1021_v34 = vpop.f32.mrb[113].mxu0 }
 0x1f6   :  { %v4662_v41 = vpop.f32.mrb[114].mxu0 }
 0x1f7   :  { %5241 = vst [vmem:[#allocation24_spill] sm:$0xff] %v4662_v41  ;;  %v1024_v62 = vpop.f32.mrb[115].mxu0 }
 0x1f8   :  { %v5244_v62 = vmax.f32 %v4418_v54, %v4566_v21 }
 0x1fc   :  { %v4664_v44 = vpop.f32.mrb[116].mxu0 }
 0x1fd   :  { %5242 = vst [vmem:[#allocation25_spill] sm:$0xff] %v4664_v44  ;;  %v1029_v33 = vpop.f32.mrb[117].mxu0 }
 0x1fe   :  { %v1030_v61 = vpop.f32.mrb[118].mxu0 }
 0x1ff   :  { %v1228_v3 = vmax.f32 %v1030_v61, %v4512_v56  ;;  %v1032_v53 = vpop.f32.mrb[119].mxu0 }
 0x200   :  { %v5245_v53 = vmax.f32 %v4423_v57, %v4572_v55 }
 0x201   :  { %v4670_v15 = vmax.f32 %v5243_v30, %v1228_v3  ;;  %v5248_v30 = vmax.f32 %v4438_v2, %v4590_v52 }
 0x204   :  { %v1035_v47 = vpop.f32.mrb[120].mxu0 }
 0x205   :  { %v1229_v27 = vmax.f32 %v1035_v47, %v4518_v0  ;;  %v1037_v39 = vpop.f32.mrb[121].mxu0  ;;  %v5246_v0 = vmax.f32 %v4428_v60, %v4578_v13 }
 0x206   :  { %v1038_v34 = vpop.f32.mrb[122].mxu0 }
 0x207   :  { %v4676_v41 = vmax.f32 %v5244_v62, %v1229_v27  ;;  %v1230_v33 = vmax.f32 %v1038_v34, %v4527_v9  ;;  %v1040_v44 = vpop.f32.mrb[123].mxu0 }
 0x208   :  { %v5247_v44 = vmax.f32 %v4433_v63, %v4584_v40 }
 0x209   :  { %v4682_v56 = vmax.f32 %v5245_v53, %v1230_v33  ;;  %v5250_v33 = vmax.f32 %v4448_v8, %v4602_v58 }
 0x20c   :  { %v1043_v51 = vpop.f32.mrb[124].mxu0 }
 0x20d   :  { %v1231_v4 = vmax.f32 %v1043_v51, %v4533_v16  ;;  %v1045_v61 = vpop.f32.mrb[125].mxu0 }
 0x20e   :  { %v1046_v47 = vpop.f32.mrb[126].mxu0  ;;  %v5252_v61 = vmax.f32 %v4458_v14, %v4618_v45 }
 0x20f   :  { %v4688_v39 = vmax.f32 %v5246_v0, %v1231_v4  ;;  %v1232_v54 = vmax.f32 %v1046_v47, %v4539_v25  ;;  %v1048_v21 = vpop.f32.mrb[127].mxu0  ;;  %v5249_v25 = vmax.f32 %v4443_v5, %v4596_v18 }
 0x210   :  { %v5254_v21 = vmax.f32 %v4468_v20, %v4626_v42 }
 0x211   :  { %v4694_v9 = vmax.f32 %v5247_v44, %v1232_v54 }
 0x214   :  { %v1051_v57 = vpop.f32.mrb[128].mxu0 }
 0x215   :  { %v1233_v55 = vmax.f32 %v1051_v57, %v4545_v35  ;;  %v1053_v3 = vpop.f32.mrb[129].mxu0 }
 0x216   :  { %v1054_v16 = vpop.f32.mrb[130].mxu0  ;;  %v5256_v3 = vmax.f32 %v4478_v28, %v4634_v46 }
 0x217   :  { %v4700_v27 = vmax.f32 %v5248_v30, %v1233_v55  ;;  %v1234_v60 = vmax.f32 %v1054_v16, %v4551_v50  ;;  %v1056_v13 = vpop.f32.mrb[131].mxu0  ;;  %v5251_v50 = vmax.f32 %v4453_v11, %v4612_v48 }
 0x218   :  { %v5258_v13 = vmax.f32 %v4488_v37, %v4644_v7 }
 0x219   :  { %v4706_v34 = vmax.f32 %v5249_v25, %v1234_v60 }
 0x21c   :  { %v1059_v63 = vpop.f32.mrb[132].mxu0 }
 0x21d   :  { %v1235_v40 = vmax.f32 %v1059_v63, %v4562_v6  ;;  %v1061_v62 = vpop.f32.mrb[133].mxu0 }
 0x21e   :  { %v1062_v35 = vpop.f32.mrb[134].mxu0 }
 0x21f   :  { %v4712_v53 = vmax.f32 %v5250_v33, %v1235_v40  ;;  %v1236_v2 = vmax.f32 %v1062_v35, %v4568_v29  ;;  %v1064_v52 = vpop.f32.mrb[135].mxu0  ;;  %v5253_v29 = vmax.f32 %v4463_v17, %v4622_v22 }
 0x221   :  { %v4718_v51 = vmax.f32 %v5251_v50, %v1236_v2  ;;  %v5263_v2 = vld [vmem:[#allocation11_spill] sm:$0xff] }
 0x224   :  { %v1067_v5 = vpop.f32.mrb[136].mxu0 }
 0x225   :  { %v1237_v18 = vmax.f32 %v1067_v5, %v4574_v59  ;;  %v1069_v4 = vpop.f32.mrb[137].mxu0  ;;  %v5265_v5 = vld [vmem:[#allocation20_spill] sm:$0xff] }
 0x226   :  { %v1070_v6 = vpop.f32.mrb[138].mxu0  ;;  %v5267_v4 = vld [vmem:[#allocation12_spill] sm:$0xff] }
 0x227   :  { %v4724_v47 = vmax.f32 %v5252_v61, %v1237_v18  ;;  %v1238_v8 = vmax.f32 %v1070_v6, %v4580_v19  ;;  %v1072_v58 = vpop.f32.mrb[139].mxu0  ;;  %v5255_v19 = vmax.f32 %v4473_v23, %v4630_v31  ;;  %v5266_v18 = vld [vmem:[#allocation3_spill] sm:$0xff] }
 0x228   :  { %v5268_v6 = vmax.f32 %v5266_v18, %v5267_v4  ;;  %v3962_v4 = vld [vmem:[%s5190_s3 + $0x30] sm:$0xff]  }
 0x229   :  { %v4730_v0 = vmax.f32 %v5253_v29, %v1238_v8  ;;  %v3958_v29 = vld [vmem:[%s5190_s3] sm:$0xff]  }
 0x22c   :  { %v1075_v48 = vpop.f32.mrb[140].mxu0 }
 0x22d   :  { %v1239_v11 = vmax.f32 %v1075_v48, %v4586_v43  ;;  %v1077_v54 = vpop.f32.mrb[141].mxu0 }
 0x22e   :  { %v1078_v59 = vpop.f32.mrb[142].mxu0  ;;  %v5269_v54 = vld [vmem:[#allocation21_spill] sm:$0xff] }
 0x22f   :  { %v4736_v44 = vmax.f32 %v5254_v21, %v1239_v11  ;;  %v1240_v45 = vmax.f32 %v1078_v59, %v4592_v38  ;;  %v1080_v14 = vpop.f32.mrb[143].mxu0  ;;  %v5257_v38 = vmax.f32 %v4483_v32, %v4640_v26  ;;  %v5261_v26 = vld [vmem:[#allocation19_spill] sm:$0xff] }
 0x230   :  { %v5270_v14 = vld [vmem:[#allocation4_spill] sm:$0xff] }
 0x231   :  { %v4742_v57 = vmax.f32 %v5255_v19, %v1240_v45  ;;  %v5271_v19 = vld [vmem:[#allocation13_spill] sm:$0xff] }
 0x234   :  { %v1083_v17 = vpop.f32.mrb[144].mxu0 }
 0x235   :  { %v1241_v22 = vmax.f32 %v1083_v17, %v4598_v10  ;;  %v1085_v55 = vpop.f32.mrb[145].mxu0  ;;  %v5272_v17 = vmax.f32 %v5270_v14, %v5271_v19 }
 0x236   :  { %v1086_v43 = vpop.f32.mrb[146].mxu0 }
 0x237   :  { %v4748_v16 = vmax.f32 %v5256_v3, %v1241_v22  ;;  %v1242_v42 = vmax.f32 %v1086_v43, %v4604_v49  ;;  %v1088_v20 = vpop.f32.mrb[147].mxu0  ;;  %v5259_v49 = vld [vmem:[#allocation10_spill] sm:$0xff]  ;;  %v3959_v3 = vld [vmem:[%s5190_s3 + $0x8] sm:$0xff]  }
 0x238   :  { %v5260_v63 = vmax.f32 %v4368_v24, %v5259_v49 }
 0x239   :  { %v4754_v30 = vmax.f32 %v5257_v38, %v1242_v42  ;;  %v5273_v42 = vmov 0.0   ;;  %v5274_v38 = vld [vmem:[#allocation5_spill] sm:$0xff] }
 0x23c   :  { %v1091_v23 = vpop.f32.mrb[148].mxu0 }
 0x23d   :  { %v1243_v31 = vmax.f32 %v1091_v23, %v4614_v12  ;;  %v1093_v60 = vpop.f32.mrb[149].mxu0  ;;  %v5262_v12 = vld [vmem:[#allocation2_spill] sm:$0xff] }
 0x23e   :  { %v1094_v10 = vpop.f32.mrb[150].mxu0  ;;  %v5264_v52 = vmax.f32 %v5262_v12, %v5263_v2  ;;  %v5275_v23 = vld [vmem:[#allocation14_spill] sm:$0xff] }
 0x23f   :  { %v4760_v25 = vmax.f32 %v5258_v13, %v1243_v31  ;;  %v1219_v28 = vmax.f32 %v4648_v36, %v1094_v10  ;;  %v1096_v46 = vpop.f32.mrb[151].mxu0  ;;  %v4774_v36 = vld [vmem:[%s5191_s2] ss:$0 sm:$0xff]  ;;  %v5276_v31 = vmax.f32 %v5274_v38, %v5275_v23 }
 0x240   :  { %v3960_v10 = vld [vmem:[%s5190_s3 + $0x20] sm:$0xff]  }
 0x241   :  { %v1244_v40 = vmax.f32 %v5260_v63, %v1219_v28  ;;  %v5277_v46 = vld [vmem:[#allocation22_spill] sm:$0xff] }
 0x242   :  { %v3964_v38 = vld [vmem:[%s5190_s3 + $0x40] sm:$0xff]  }
 0x243   :  { %v1276_v48 = vadd.f32 %v4774_v36, %v1244_v40 }
 0x244   :  { %v1099_v32 = vpop.f32.mrb[152].mxu0 }
 0x245   :  { %v1220_v62 = vmax.f32 %v5261_v26, %v1099_v32  ;;  %v1101_v35 = vpop.f32.mrb[153].mxu0  ;;  %v1301_v20 = vmax.f32 %v1276_v48, 0.0  ;;  %v5278_v32 = vld [vmem:[#allocation6_spill] sm:$0xff]  ;;  %v5279_v26 = vld [vmem:[#allocation15_spill] sm:$0xff] }
 0x246   :  { %v1102_v33 = vpop.f32.mrb[154].mxu0 }
 0x247   :  { %v1245_v50 = vmax.f32 %v5264_v52, %v1220_v62  ;;  %v1221_v37 = vmax.f32 %v5265_v5, %v1102_v33  ;;  %v1104_v7 = vpop.f32.mrb[155].mxu0  ;;  %v1326_v13 = vpack.c.bf16 %v1301_v20, %v1301_v20  ;;  %v5280_v62 = vmax.f32 %v5278_v32, %v5279_v26  ;;  %v5281_v33 = vld [vmem:[#allocation23_spill] sm:$0xff] }
 0x248   :  { %v3961_v52 = vld [vmem:[%s5190_s3 + $0x28] sm:$0xff]  }
 0x249   :  { %v1277_v24 = vadd.f32 %v4774_v36, %v1245_v50  ;;  %v1246_v61 = vmax.f32 %v5268_v6, %v1221_v37  ;;  %v5282_v5 = vld [vmem:[#allocation7_spill] sm:$0xff]  ;;  %v5283_v37 = vld [vmem:[#allocation16_spill] sm:$0xff] }
 0x24a   :  { %v5284_v7 = vmax.f32 %v5282_v5, %v5283_v37  ;;  %v3969_v26 = vld [vmem:[%s5190_s3 + $0x68] sm:$0xff]  }
 0x24b   :  { %v1302_v8 = vmax.f32 %v1277_v24, 0.0  ;;  %v1278_v28 = vadd.f32 %v4774_v36, %v1246_v61 }
 0x24c   :  { %v1107_v58 = vpop.f32.mrb[156].mxu0 }
 0x24d   :  { %v1331_v11 = vpack.c.bf16 %v1302_v8, %v1302_v8  ;;  %v1222_v59 = vmax.f32 %v5269_v54, %v1107_v58  ;;  %v1109_v21 = vpop.f32.mrb[157].mxu0  ;;  %v1303_v50 = vmax.f32 %v1278_v28, 0.0  ;;  %v5285_v8 = vld [vmem:[#allocation24_spill] sm:$0xff]  ;;  %v5287_v54 = vld [vmem:[#allocation17_spill] sm:$0xff] }
 0x24e   :  { %v1110_v45 = vpop.f32.mrb[158].mxu0 }
 0x24f   :  { %v1247_v22 = vmax.f32 %v5272_v17, %v1222_v59  ;;  %v1223_v55 = vmax.f32 %v4656_v1, %v1110_v45  ;;  %3520 = vmatmul.mubr.msk.bf16.vlgmr.msra.gmra.mrb[32].mxu1 %vm1349_vm1, %v1331_v11  ;;  %v1112_v43 = vpop.f32.mrb[159].mxu0  ;;  %v1448_v6 = vpack.c.bf16 %v1303_v50, %v1303_v50  ;;  %v5286_v11 = vld [vmem:[#allocation8_spill] sm:$0xff]  ;;  %v5289_v45 = vld [vmem:[#allocation25_spill] sm:$0xff]  ;;  %v3972_v50 = vld [vmem:[%s5190_s3 + $0x80] sm:$0xff]  }
 0x250   :  { %3524 = vmatpush3.bf16.msra.mxu1 %v3958_v29  ;;  %3527 = vmatprep.mubr.msk.bf16.mxu1 %vm4024_vm0, %v5273_v42  ;;  %v5288_v59 = vmax.f32 %v5286_v11, %v5287_v54  ;;  %v3963_v17 = vld [vmem:[%s5190_s3 + $0x38] sm:$0xff]   ;;  %v5291_v43 = vld [vmem:[#allocation18_spill] sm:$0xff] }
 0x251   :  { %v1248_v60 = vmax.f32 %v5276_v31, %v1223_v55  ;;  %3525 = vmatprep.subr.bf16.mxu1 %v5273_v42  ;;  %v1279_v61 = vadd.f32 %v4774_v36, %v1247_v22  ;;  %v5290_v55 = vld [vmem:[#allocation9_spill] sm:$0xff] }
 0x253   :  { %v1304_v22 = vmax.f32 %v1279_v61, 0.0  ;;  %v1280_v31 = vadd.f32 %v4774_v36, %v1248_v60  ;;  %v3966_v60 = vld [vmem:[%s5190_s3 + $0x50] sm:$0xff]   ;;  %v3975_v61 = vld [vmem:[%s5190_s3 + $0x98] sm:$0xff]  }
 0x254   :  { %3526 = vmatpush3.bf16.msra.mxu1 %v3959_v3  ;;  %v1115_v1 = vpop.f32.mrb[160].mxu0  ;;  %v5292_v3 = vmax.f32 %v5290_v55, %v5291_v43  ;;  %v1289_v43 = vadd.f32 %v4774_v36, %v4694_v9  ;;  %v3984_v9 = vld [vmem:[%s5190_s3 + $0xe0] sm:$0xff]  }
 0x255   :  { %v1224_v49 = vmax.f32 %v5277_v46, %v1115_v1  ;;  %v1117_v63 = vpop.f32.mrb[161].mxu0  ;;  %3531 = vmatprep.subr.bf16.mxu1 %v5273_v42  ;;  %v1510_v23 = vpack.c.bf16 %v1304_v22, %v1304_v22  ;;  %v3965_v1 = vld [vmem:[%s5190_s3 + $0x48] sm:$0xff]   ;;  %v3967_v46 = vld [vmem:[%s5190_s3 + $0x58] sm:$0xff]  }
 0x256   :  { %v1118_v40 = vpop.f32.mrb[162].mxu0  ;;  %v3968_v63 = vld [vmem:[%s5190_s3 + $0x60] sm:$0xff]  }
 0x257   :  { %v1249_v35 = vmax.f32 %v5280_v62, %v1224_v49  ;;  %v1225_v12 = vmax.f32 %v5281_v33, %v1118_v40  ;;  %3528 = vmatmul.mubr.msk.bf16.vlgmr.msra.gmra.mrb[36].mxu1 %vm1349_vm1, %v1326_v13  ;;  %v1120_v2 = vpop.f32.mrb[163].mxu0 }
 0x258   :  { %3532 = vmatpush3.bf16.msra.mxu1 %v3960_v10  ;;  %3535 = vmatprep.mubr.msk.bf16.mxu1 %vm4024_vm0, %v5273_v42  ;;  %v1305_v10 = vmax.f32 %v1280_v31, 0.0  ;;  %v3971_v2 = vld [vmem:[%s5190_s3 + $0x78] sm:$0xff]   ;;  %v3985_v31 = vld [vmem:[%s5190_s3 + $0xe8] sm:$0xff]  }
 0x259   :  { %v1250_v24 = vmax.f32 %v5284_v7, %v1225_v12  ;;  %3533 = vmatprep.subr.bf16.mxu1 %v5273_v42  ;;  %v1281_v28 = vadd.f32 %v4774_v36, %v1249_v35  ;;  %v3970_v35 = vld [vmem:[%s5190_s3 + $0x70] sm:$0xff]   ;;  %v3973_v7 = vld [vmem:[%s5190_s3 + $0x88] sm:$0xff]  }
 0x25a   :  { %v1572_v13 = vpack.c.bf16 %v1305_v10, %v1305_v10 }
 0x25b   :  { %v1306_v49 = vmax.f32 %v1281_v28, 0.0  ;;  %v1282_v32 = vadd.f32 %v4774_v36, %v1250_v24 }
 0x25c   :  { %3534 = vmatpush3.bf16.msra.mxu1 %v3961_v52  ;;  %v1123_v18 = vpop.f32.mrb[164].mxu0 }
 0x25d   :  { %v1226_v58 = vmax.f32 %v5285_v8, %v1123_v18  ;;  %v1125_v29 = vpop.f32.mrb[165].mxu0  ;;  %3539 = vmatprep.subr.bf16.mxu1 %v5273_v42  ;;  %v1634_v40 = vpack.c.bf16 %v1306_v49, %v1306_v49  ;;  %v1307_v62 = vmax.f32 %v1282_v32, 0.0  ;;  %v3974_v18 = vld [vmem:[%s5190_s3 + $0x90] sm:$0xff]   ;;  %v1292_v49 = vadd.f32 %v4774_v36, %v4712_v53 }
 0x25e   :  { %v1126_v48 = vpop.f32.mrb[166].mxu0  ;;  %v1286_v29 = vadd.f32 %v4774_v36, %v4676_v41  ;;  %v3978_v41 = vld [vmem:[%s5190_s3 + $0xb0] sm:$0xff]  }
 0x25f   :  { %v1251_v21 = vmax.f32 %v5288_v59, %v1226_v58  ;;  %v1227_v14 = vmax.f32 %v5289_v45, %v1126_v48  ;;  %3536 = vmatmul.mubr.msk.bf16.vlgmr.msra.gmra.mrb[40].mxu1 %vm1349_vm1, %v1448_v6  ;;  %v1128_v19 = vpop.f32.mrb[167].mxu0  ;;  %v1696_v33 = vpack.c.bf16 %v1307_v62, %v1307_v62  ;;  %v3977_v48 = vld [vmem:[%s5190_s3 + $0xa8] sm:$0xff]   ;;  %v1287_v59 = vadd.f32 %v4774_v36, %v4682_v56  ;;  %v3980_v56 = vld [vmem:[%s5190_s3 + $0xc0] sm:$0xff]   ;;  %v3990_v53 = vld [vmem:[%s5190_s3 + $0x110] sm:$0xff]  }
 0x260   :  { %3540 = vmatpush3.bf16.msra.mxu1 %v3962_v4  ;;  %3543 = vmatprep.mubr.msk.bf16.mxu1 %vm4024_vm0, %v5273_v42  ;;  %v1285_v4 = vadd.f32 %v4774_v36, %v4670_v15  ;;  %v3976_v15 = vld [vmem:[%s5190_s3 + $0xa0] sm:$0xff]   ;;  %v1311_v11 = vmax.f32 %v1286_v29, 0.0  ;;  %v1288_v19 = vadd.f32 %v4774_v36, %v4688_v39  ;;  %v3982_v39 = vld [vmem:[%s5190_s3 + $0xd0] sm:$0xff]   ;;  %v3991_v62 = vld [vmem:[%s5190_s3 + $0x118] sm:$0xff]  }
 0x261   :  { %v1252_v20 = vmax.f32 %v5292_v3, %v1227_v14  ;;  %3541 = vmatprep.subr.bf16.mxu1 %v5273_v42  ;;  %v1283_v12 = vadd.f32 %v4774_v36, %v1251_v21  ;;  %v3979_v21 = vld [vmem:[%s5190_s3 + $0xb8] sm:$0xff]   ;;  %v1312_v45 = vmax.f32 %v1287_v59, 0.0  ;;  %v1299_v59 = vadd.f32 %v4774_v36, %v4754_v30  ;;  %v4004_v30 = vld [vmem:[%s5190_s3 + $0x180] sm:$0xff]  }
 0x262   :  { %v1310_v8 = vmax.f32 %v1285_v4, 0.0  ;;  %v1944_v54 = vpack.c.bf16 %v1311_v11, %v1311_v11  ;;  %v1313_v22 = vmax.f32 %v1288_v19, 0.0  ;;  %v3983_v3 = vld [vmem:[%s5190_s3 + $0xd8] sm:$0xff]   ;;  %v3997_v4 = vld [vmem:[%s5190_s3 + $0x148] sm:$0xff]  }
 0x263   :  { %v1308_v52 = vmax.f32 %v1283_v12, 0.0  ;;  %v1284_v37 = vadd.f32 %v4774_v36, %v1252_v20  ;;  %v2006_v14 = vpack.c.bf16 %v1312_v45, %v1312_v45  ;;  %v1314_v20 = vmax.f32 %v1289_v43, 0.0  ;;  %v4001_v11 = vld [vmem:[%s5190_s3 + $0x168] sm:$0xff]  }
 0x264   :  { %3542 = vmatpush3.bf16.msra.mxu1 %v3963_v17  ;;  %v1882_v58 = vpack.c.bf16 %v1310_v8, %v1310_v8  ;;  %v3981_v17 = vld [vmem:[%s5190_s3 + $0xc8] sm:$0xff]   ;;  %v2068_v55 = vpack.c.bf16 %v1313_v22, %v1313_v22  ;;  %v1294_v12 = vadd.f32 %v4774_v36, %v4724_v47  ;;  %v3994_v47 = vld [vmem:[%s5190_s3 + $0x130] sm:$0xff]   ;;  %v1297_v8 = vadd.f32 %v4774_v36, %v4742_v57  ;;  %v4000_v57 = vld [vmem:[%s5190_s3 + $0x160] sm:$0xff]  }
 0x265   :  { %3547 = vmatprep.subr.bf16.mxu1 %v5273_v42  ;;  %v1758_v5 = vpack.c.bf16 %v1308_v52, %v1308_v52  ;;  %v1309_v24 = vmax.f32 %v1284_v37, 0.0  ;;  %v3995_v37 = vld [vmem:[%s5190_s3 + $0x138] sm:$0xff]   ;;  %v1324_v45 = vmax.f32 %v1299_v59, 0.0  ;;  %v4005_v19 = vld [vmem:[%s5190_s3 + $0x188] sm:$0xff]  }
 0x266   :  { %v1319_v52 = vmax.f32 %v1294_v12, 0.0 }
 0x267   :  { %3544 = vmatmul.mubr.msk.bf16.vlgmr.msra.gmra.mrb[44].mxu1 %vm1349_vm1, %v1510_v23  ;;  %v1820_v6 = vpack.c.bf16 %v1309_v24, %v1309_v24  ;;  %v1290_v23 = vadd.f32 %v4774_v36, %v4700_v27  ;;  %v3986_v27 = vld [vmem:[%s5190_s3 + $0xf0] sm:$0xff]  }
 0x268   :  { %3548 = vmatpush3.bf16.msra.mxu1 %v3964_v38  ;;  %3551 = vmatprep.mubr.msk.bf16.mxu1 %vm4024_vm0, %v5273_v42  ;;  %v2130_v38 = vpack.c.bf16 %v1314_v20, %v1314_v20 }
 0x269   :  { %3549 = vmatprep.subr.bf16.mxu1 %v5273_v42 }
 0x26c   :  { %3550 = vmatpush3.bf16.msra.mxu1 %v3965_v1  ;;  %v1315_v1 = vmax.f32 %v1290_v23, 0.0 }
 0x26d   :  { %3555 = vmatprep.subr.bf16.mxu1 %v5273_v42 }
 0x26e   :  { %v2192_v10 = vpack.c.bf16 %v1315_v1, %v1315_v1 }
 0x26f   :  { %3552 = vmatmul.mubr.msk.bf16.vlgmr.msra.gmra.mrb[48].mxu1 %vm1349_vm1, %v1572_v13  ;;  %v3987_v13 = vld [vmem:[%s5190_s3 + $0xf8] sm:$0xff]  }
 0x270   :  { %3556 = vmatpush3.bf16.msra.mxu1 %v3966_v60  ;;  %3559 = vmatprep.mubr.msk.bf16.mxu1 %vm4024_vm0, %v5273_v42  ;;  %v1291_v60 = vadd.f32 %v4774_v36, %v4706_v34  ;;  %v3988_v34 = vld [vmem:[%s5190_s3 + $0x100] sm:$0xff]  }
 0x271   :  { %3557 = vmatprep.subr.bf16.mxu1 %v5273_v42 }
 0x272   :  { %v1316_v28 = vmax.f32 %v1291_v60, 0.0 }
 0x274   :  { %3558 = vmatpush3.bf16.msra.mxu1 %v3967_v46  ;;  %v2254_v46 = vpack.c.bf16 %v1316_v28, %v1316_v28 }
 0x275   :  { %3563 = vmatprep.subr.bf16.mxu1 %v5273_v42 }
 0x277   :  { %3560 = vmatmul.mubr.msk.bf16.vlgmr.msra.gmra.mrb[52].mxu1 %vm1349_vm1, %v1634_v40  ;;  %v1317_v40 = vmax.f32 %v1292_v49, 0.0 }
 0x278   :  { %3564 = vmatpush3.bf16.msra.mxu1 %v3968_v63  ;;  %3567 = vmatprep.mubr.msk.bf16.mxu1 %vm4024_vm0, %v5273_v42  ;;  %v3989_v63 = vld [vmem:[%s5190_s3 + $0x108] sm:$0xff]  }
 0x279   :  { %3565 = vmatprep.subr.bf16.mxu1 %v5273_v42  ;;  %v2316_v32 = vpack.c.bf16 %v1317_v40, %v1317_v40 }
 0x27c   :  { %3566 = vmatpush3.bf16.msra.mxu1 %v3969_v26  ;;  %v1293_v26 = vadd.f32 %v4774_v36, %v4718_v51  ;;  %v3992_v51 = vld [vmem:[%s5190_s3 + $0x120] sm:$0xff]  }
 0x27d   :  { %3571 = vmatprep.subr.bf16.mxu1 %v5273_v42 }
 0x27f   :  { %3568 = vmatmul.mubr.msk.bf16.vlgmr.msra.gmra.mrb[56].mxu1 %vm1349_vm1, %v1696_v33 }
 0x280   :  { %3572 = vmatpush3.bf16.msra.mxu1 %v3970_v35  ;;  %3575 = vmatprep.mubr.msk.bf16.mxu1 %vm4024_vm0, %v5273_v42  ;;  %v1318_v35 = vmax.f32 %v1293_v26, 0.0 }
 0x281   :  { %3573 = vmatprep.subr.bf16.mxu1 %v5273_v42 }
 0x282   :  { %v2378_v33 = vpack.c.bf16 %v1318_v35, %v1318_v35 }
 0x284   :  { %3574 = vmatpush3.bf16.msra.mxu1 %v3971_v2  ;;  %v3993_v2 = vld [vmem:[%s5190_s3 + $0x128] sm:$0xff]  }
 0x285   :  { %3579 = vmatprep.subr.bf16.mxu1 %v5273_v42 }
 0x287   :  { %3576 = vmatmul.mubr.msk.bf16.vlgmr.msra.gmra.mrb[60].mxu1 %vm1349_vm1, %v1758_v5  ;;  %v1295_v5 = vadd.f32 %v4774_v36, %v4730_v0  ;;  %v3996_v0 = vld [vmem:[%s5190_s3 + $0x140] sm:$0xff]  }
 0x288   :  { %3580 = vmatpush3.bf16.msra.mxu1 %v3972_v50  ;;  %3583 = vmatprep.mubr.msk.bf16.mxu1 %vm4024_vm0, %v5273_v42  ;;  %v2440_v50 = vpack.c.bf16 %v1319_v52, %v1319_v52 }
 0x289   :  { %3581 = vmatprep.subr.bf16.mxu1 %v5273_v42 }
 0x28c   :  { %3582 = vmatpush3.bf16.msra.mxu1 %v3973_v7  ;;  %v1320_v7 = vmax.f32 %v1295_v5, 0.0 }
 0x28d   :  { %3587 = vmatprep.subr.bf16.mxu1 %v5273_v42 }
 0x28e   :  { %v2502_v24 = vpack.c.bf16 %v1320_v7, %v1320_v7 }
 0x28f   :  { %3584 = vmatmul.mubr.msk.bf16.vlgmr.msra.gmra.mrb[64].mxu1 %vm1349_vm1, %v1820_v6 }
 0x290   :  { %3588 = vmatpush3.bf16.msra.mxu1 %v3974_v18  ;;  %3591 = vmatprep.mubr.msk.bf16.mxu1 %vm4024_vm0, %v5273_v42  ;;  %v1296_v18 = vadd.f32 %v4774_v36, %v4736_v44  ;;  %v3998_v44 = vld [vmem:[%s5190_s3 + $0x150] sm:$0xff]  }
 0x291   :  { %3589 = vmatprep.subr.bf16.mxu1 %v5273_v42 }
 0x292   :  { %v1321_v6 = vmax.f32 %v1296_v18, 0.0  ;;  %v4010_v18 = vld [vmem:[%s5192_s5 + $0x20] sm:$0xff]  }
 0x294   :  { %3590 = vmatpush3.bf16.msra.mxu1 %v3975_v61  ;;  %v2564_v61 = vpack.c.bf16 %v1321_v6, %v1321_v6 }
 0x295   :  { %3595 = vmatprep.subr.bf16.mxu1 %v5273_v42 }
 0x297   :  { %3592 = vmatmul.mubr.msk.bf16.vlgmr.msra.gmra.mrb[68].mxu1 %vm1349_vm1, %v1882_v58  ;;  %v1322_v58 = vmax.f32 %v1297_v8, 0.0  ;;  %v4011_v8 = vld [vmem:[%s5192_s5 + $0x28] sm:$0xff]  }
 0x298   :  { %3596 = vmatpush3.bf16.msra.mxu1 %v3976_v15  ;;  %3599 = vmatprep.mubr.msk.bf16.mxu1 %vm4024_vm0, %v5273_v42  ;;  %v3999_v15 = vld [vmem:[%s5190_s3 + $0x158] sm:$0xff]  }
 0x299   :  { %3597 = vmatprep.subr.bf16.mxu1 %v5273_v42  ;;  %v2626_v29 = vpack.c.bf16 %v1322_v58, %v1322_v58  ;;  %v4012_v58 = vld [vmem:[%s5192_s5 + $0x30] sm:$0xff]  }
 0x29c   :  { %3598 = vmatpush3.bf16.msra.mxu1 %v3977_v48  ;;  %v1298_v48 = vadd.f32 %v4774_v36, %v4748_v16  ;;  %v4002_v16 = vld [vmem:[%s5190_s3 + $0x170] sm:$0xff]  }
 0x29d   :  { %3603 = vmatprep.subr.bf16.mxu1 %v5273_v42 }
 0x29f   :  { %3600 = vmatmul.mubr.msk.bf16.vlgmr.msra.gmra.mrb[72].mxu1 %vm1349_vm1, %v1944_v54 }
 0x2a0   :  { %3604 = vmatpush3.bf16.msra.mxu1 %v3978_v41  ;;  %3607 = vmatprep.mubr.msk.bf16.mxu1 %vm4024_vm0, %v5273_v42  ;;  %v1323_v41 = vmax.f32 %v1298_v48, 0.0 }
 0x2a1   :  { %3605 = vmatprep.subr.bf16.mxu1 %v5273_v42 }
 0x2a2   :  { %v2688_v54 = vpack.c.bf16 %v1323_v41, %v1323_v41  ;;  %v4013_v41 = vld [vmem:[%s5192_s5 + $0x38] sm:$0xff]  }
 0x2a4   :  { %3606 = vmatpush3.bf16.msra.mxu1 %v3979_v21  ;;  %v4003_v21 = vld [vmem:[%s5190_s3 + $0x178] sm:$0xff]  }
 0x2a5   :  { %3611 = vmatprep.subr.bf16.mxu1 %v5273_v42 }
 0x2a7   :  { %3608 = vmatmul.mubr.msk.bf16.vlgmr.msra.gmra.mrb[76].mxu1 %vm1349_vm1, %v2006_v14  ;;  %v1300_v14 = vadd.f32 %v4774_v36, %v4760_v25 }
 0x2a8   :  { %3612 = vmatpush3.bf16.msra.mxu1 %v3980_v56  ;;  %3615 = vmatprep.mubr.msk.bf16.mxu1 %vm4024_vm0, %v5273_v42  ;;  %v2750_v56 = vpack.c.bf16 %v1324_v45, %v1324_v45 }
 0x2a9   :  { %3613 = vmatprep.subr.bf16.mxu1 %v5273_v42 }
 0x2ac   :  { %3614 = vmatpush3.bf16.msra.mxu1 %v3981_v17  ;;  %v1325_v17 = vmax.f32 %v1300_v14, 0.0 }
 0x2ad   :  { %3619 = vmatprep.subr.bf16.mxu1 %v5273_v42 }
 0x2ae   :  { %v2812_v22 = vpack.c.bf16 %v1325_v17, %v1325_v17 }
 0x2af   :  { %3616 = vmatmul.mubr.msk.bf16.vlgmr.msra.gmra.mrb[80].mxu1 %vm1349_vm1, %v2068_v55 }
 0x2b0   :  { %3620 = vmatpush3.bf16.msra.mxu1 %v3982_v39  ;;  %3623 = vmatprep.mubr.msk.bf16.mxu1 %vm4024_vm0, %v5273_v42 }
 0x2b1   :  { %3621 = vmatprep.subr.bf16.mxu1 %v5273_v42 }
 0x2b4   :  { %3622 = vmatpush3.bf16.msra.mxu1 %v3983_v3 }
 0x2b5   :  { %3627 = vmatprep.subr.bf16.mxu1 %v5273_v42 }
 0x2b7   :  { %3624 = vmatmul.mubr.msk.bf16.vlgmr.msra.gmra.mrb[84].mxu1 %vm1349_vm1, %v2130_v38 }
 0x2b8   :  { %3628 = vmatpush3.bf16.msra.mxu1 %v3984_v9  ;;  %3631 = vmatprep.mubr.msk.bf16.mxu1 %vm4024_vm0, %v5273_v42 }
 0x2b9   :  { %3629 = vmatprep.subr.bf16.mxu1 %v5273_v42 }
 0x2bc   :  { %3630 = vmatpush3.bf16.msra.mxu1 %v3985_v31 }
 0x2bd   :  { %3635 = vmatprep.subr.bf16.mxu1 %v5273_v42 }
 0x2bf   :  { %3632 = vmatmul.mubr.msk.bf16.vlgmr.msra.gmra.mrb[88].mxu1 %vm1349_vm1, %v2192_v10 }
 0x2c0   :  { %3636 = vmatpush3.bf16.msra.mxu1 %v3986_v27  ;;  %3639 = vmatprep.mubr.msk.bf16.mxu1 %vm4024_vm0, %v5273_v42 }
 0x2c1   :  { %3637 = vmatprep.subr.bf16.mxu1 %v5273_v42 }
 0x2c4   :  { %3638 = vmatpush3.bf16.msra.mxu1 %v3987_v13 }
 0x2c5   :  { %3643 = vmatprep.subr.bf16.mxu1 %v5273_v42 }
 0x2c7   :  { %3640 = vmatmul.mubr.msk.bf16.vlgmr.msra.gmra.mrb[92].mxu1 %vm1349_vm1, %v2254_v46 }
 0x2c8   :  { %3644 = vmatpush3.bf16.msra.mxu1 %v3988_v34  ;;  %3647 = vmatprep.mubr.msk.bf16.mxu1 %vm4024_vm0, %v5273_v42 }
 0x2c9   :  { %3645 = vmatprep.subr.bf16.mxu1 %v5273_v42 }
 0x2cc   :  { %3646 = vmatpush3.bf16.msra.mxu1 %v3989_v63 }
 0x2cd   :  { %3651 = vmatprep.subr.bf16.mxu1 %v5273_v42 }
 0x2cf   :  { %3648 = vmatmul.mubr.msk.bf16.vlgmr.msra.gmra.mrb[96].mxu1 %vm1349_vm1, %v2316_v32 }
 0x2d0   :  { %3652 = vmatpush3.bf16.msra.mxu1 %v3990_v53  ;;  %3655 = vmatprep.mubr.msk.bf16.mxu1 %vm4024_vm0, %v5273_v42 }
 0x2d1   :  { %3653 = vmatprep.subr.bf16.mxu1 %v5273_v42 }
 0x2d4   :  { %3654 = vmatpush3.bf16.msra.mxu1 %v3991_v62  ;;  %v4006_v62 = vld [vmem:[%s5192_s5] sm:$0xff]  }
 0x2d5   :  { %3659 = vmatprep.subr.bf16.mxu1 %v5273_v42 }
 0x2d7   :  { %3656 = vmatmul.mubr.msk.bf16.vlgmr.msra.gmra.mrb[100].mxu1 %vm1349_vm1, %v2378_v33 }
 0x2d8   :  { %3660 = vmatpush3.bf16.msra.mxu1 %v3992_v51  ;;  %3663 = vmatprep.mubr.msk.bf16.mxu1 %vm4024_vm0, %v5273_v42 }
 0x2d9   :  { %3661 = vmatprep.subr.bf16.mxu1 %v5273_v42 }
 0x2dc   :  { %3662 = vmatpush3.bf16.msra.mxu1 %v3993_v2  ;;  %v4007_v2 = vld [vmem:[%s5192_s5 + $0x8] sm:$0xff]  }
 0x2dd   :  { %3667 = vmatprep.subr.bf16.mxu1 %v5273_v42 }
 0x2df   :  { %3664 = vmatmul.mubr.msk.bf16.vlgmr.msra.gmra.mrb[104].mxu1 %vm1349_vm1, %v2440_v50 }
 0x2e0   :  { %3668 = vmatpush3.bf16.msra.mxu1 %v3994_v47  ;;  %3671 = vmatprep.mubr.msk.bf16.mxu1 %vm4024_vm0, %v5273_v42  ;;  %v4008_v47 = vld [vmem:[%s5192_s5 + $0x10] sm:$0xff]  }
 0x2e1   :  { %3669 = vmatprep.subr.bf16.mxu1 %v5273_v42 }
 0x2e4   :  { %3670 = vmatpush3.bf16.msra.mxu1 %v3995_v37 }
 0x2e5   :  { %3675 = vmatprep.subr.bf16.mxu1 %v5273_v42 }
 0x2e7   :  { %3672 = vmatmul.mubr.msk.bf16.vlgmr.msra.gmra.mrb[108].mxu1 %vm1349_vm1, %v2502_v24 }
 0x2e8   :  { %3676 = vmatpush3.bf16.msra.mxu1 %v3996_v0  ;;  %3679 = vmatprep.mubr.msk.bf16.mxu1 %vm4024_vm0, %v5273_v42  ;;  %v4009_v0 = vld [vmem:[%s5192_s5 + $0x18] sm:$0xff]  }
 0x2e9   :  { %3677 = vmatprep.subr.bf16.mxu1 %v5273_v42 }
 0x2ec   :  { %3678 = vmatpush3.bf16.msra.mxu1 %v3997_v4 }
 0x2ed   :  { %3683 = vmatprep.subr.bf16.mxu1 %v5273_v42 }
 0x2ef   :  { %3680 = vmatmul.mubr.msk.bf16.vlgmr.msra.gmra.mrb[112].mxu1 %vm1349_vm1, %v2564_v61 }
 0x2f0   :  { %3684 = vmatpush3.bf16.msra.mxu1 %v3998_v44  ;;  %3687 = vmatprep.mubr.msk.bf16.mxu1 %vm4024_vm0, %v5273_v42 }
 0x2f1   :  { %3685 = vmatprep.subr.bf16.mxu1 %v5273_v42 }
 0x2f4   :  { %3686 = vmatpush3.bf16.msra.mxu1 %v3999_v15 }
 0x2f5   :  { %3691 = vmatprep.subr.bf16.mxu1 %v5273_v42 }
 0x2f7   :  { %3688 = vmatmul.mubr.msk.bf16.vlgmr.msra.gmra.mrb[116].mxu1 %vm1349_vm1, %v2626_v29 }
 0x2f8   :  { %3692 = vmatpush3.bf16.msra.mxu1 %v4000_v57  ;;  %3695 = vmatprep.mubr.msk.bf16.mxu1 %vm4024_vm0, %v5273_v42 }
 0x2f9   :  { %3693 = vmatprep.subr.bf16.mxu1 %v5273_v42 }
 0x2fc   :  { %3694 = vmatpush3.bf16.msra.mxu1 %v4001_v11 }
 0x2fd   :  { %3699 = vmatprep.subr.bf16.mxu1 %v5273_v42 }
 0x2ff   :  { %3696 = vmatmul.mubr.msk.bf16.vlgmr.msra.gmra.mrb[120].mxu1 %vm1349_vm1, %v2688_v54 }
 0x300   :  { %3700 = vmatpush3.bf16.msra.mxu1 %v4002_v16  ;;  %3703 = vmatprep.mubr.msk.bf16.mxu1 %vm4024_vm0, %v5273_v42 }
 0x301   :  { %3701 = vmatprep.subr.bf16.mxu1 %v5273_v42 }
 0x304   :  { %3702 = vmatpush3.bf16.msra.mxu1 %v4003_v21 }
 0x305   :  { %3707 = vmatprep.subr.bf16.mxu1 %v5273_v42 }
 0x307   :  { %3704 = vmatmul.mubr.msk.bf16.vlgmr.msra.gmra.mrb[124].mxu1 %vm1349_vm1, %v2750_v56 }
 0x308   :  { %3708 = vmatpush3.bf16.msra.mxu1 %v4004_v30  ;;  %3711 = vmatprep.mubr.msk.bf16.mxu1 %vm4024_vm0, %v5273_v42 }
 0x309   :  { %3709 = vmatprep.subr.bf16.mxu1 %v5273_v42 }
 0x30c   :  { %3710 = vmatpush3.bf16.msra.mxu1 %v4005_v19 }
 0x30d   :  { %3715 = vmatprep.subr.bf16.mxu1 %v5273_v42 }
 0x30f   :  { %3712 = vmatmul.mubr.msk.bf16.vlgmr.msra.gmra.mrb[128].mxu1 %vm1349_vm1, %v2812_v22 }
 0x310   :  { %3731 = vmatprep.mubr.msk.bf16.mxu1 %vm4024_vm0, %v5273_v42  ;;  %3716 = vmatpush3.bf16.msra.mxu1 %v4006_v62 }
 0x311   :  { %3717 = vmatprep.subr.bf16.mxu1 %v5273_v42 }
 0x314   :  { %3718 = vmatpush3.bf16.msra.mxu1 %v4007_v2 }
 0x315   :  { %3719 = vmatprep.subr.bf16.mxu1 %v5273_v42 }
 0x318   :  { %3720 = vmatpush3.bf16.msra.mxu1 %v4008_v47 }
 0x319   :  { %3721 = vmatprep.subr.bf16.mxu1 %v5273_v42 }
 0x31c   :  { %3722 = vmatpush3.bf16.msra.mxu1 %v4009_v0 }
 0x31d   :  { %3723 = vmatprep.subr.bf16.mxu1 %v5273_v42 }
 0x320   :  { %3724 = vmatpush3.bf16.msra.mxu1 %v4010_v18 }
 0x321   :  { %3725 = vmatprep.subr.bf16.mxu1 %v5273_v42 }
 0x322   :  { %v1387_v25 = vpop.f32.mrb[32].mxu1 }
 0x323   :  { %v3521_v36 = vpop.f32.mrb[33].mxu1 }
 0x324   :  { %v1390_v39 = vpop.f32.mrb[34].mxu1  ;;  %3726 = vmatpush3.bf16.msra.mxu1 %v4011_v8 }
 0x325   :  { %v3522_v55 = vpop.f32.mrb[35].mxu1  ;;  %3727 = vmatprep.subr.bf16.mxu1 %v5273_v42 }
 0x328   :  { %3728 = vmatpush3.bf16.msra.mxu1 %v4012_v58 }
 0x329   :  { %3729 = vmatprep.subr.bf16.mxu1 %v5273_v42 }
 0x32a   :  { %v1442_v43 = vpop.f32.mrb[36].mxu1 }
 0x32b   :  { %v1443_v3 = vadd.f32 %v1442_v43, %v1387_v25  ;;  %v3529_v20 = vpop.f32.mrb[37].mxu1 }
 0x32c   :  { %v1445_v9 = vpop.f32.mrb[38].mxu1  ;;  %3730 = vmatpush3.bf16.msra.mxu1 %v4013_v41 }
 0x32d   :  { %v3530_v38 = vpop.f32.mrb[39].mxu1  ;;  %3735 = vmatprep.subr.bf16.mxu1 %v5273_v42 }
 0x332   :  { %v1503_v23 = vpop.f32.mrb[40].mxu1 }
 0x333   :  { %v1509_v31 = vadd.f32 %v1503_v23, %v1443_v3  ;;  %v3537_v1 = vpop.f32.mrb[41].mxu1 }
 0x334   :  { %v1506_v27 = vpop.f32.mrb[42].mxu1 }
 0x335   :  { %v3538_v10 = vpop.f32.mrb[43].mxu1 }
 0x33a   :  { %v1565_v60 = vpop.f32.mrb[44].mxu1 }
 0x33b   :  { %v1571_v13 = vadd.f32 %v1565_v60, %v1509_v31  ;;  %v3545_v28 = vpop.f32.mrb[45].mxu1 }
 0x33c   :  { %v1568_v34 = vpop.f32.mrb[46].mxu1 }
 0x33d   :  { %v3546_v46 = vpop.f32.mrb[47].mxu1 }
 0x342   :  { %v1627_v49 = vpop.f32.mrb[48].mxu1 }
 0x343   :  { %v1633_v63 = vadd.f32 %v1627_v49, %v1571_v13  ;;  %v3553_v40 = vpop.f32.mrb[49].mxu1 }
 0x344   :  { %v1630_v53 = vpop.f32.mrb[50].mxu1 }
 0x345   :  { %v3554_v32 = vpop.f32.mrb[51].mxu1 }
 0x34a   :  { %v1689_v26 = vpop.f32.mrb[52].mxu1 }
 0x34b   :  { %v1695_v35 = vadd.f32 %v1689_v26, %v1633_v63  ;;  %v3561_v51 = vpop.f32.mrb[53].mxu1 }
 0x34c   :  { %v1692_v33 = vpop.f32.mrb[54].mxu1 }
 0x34d   :  { %v3562_v12 = vpop.f32.mrb[55].mxu1 }
 0x352   :  { %v1751_v52 = vpop.f32.mrb[56].mxu1 }
 0x353   :  { %v1757_v50 = vadd.f32 %v1751_v52, %v1695_v35  ;;  %v3569_v5 = vpop.f32.mrb[57].mxu1 }
 0x354   :  { %v1754_v37 = vpop.f32.mrb[58].mxu1 }
 0x355   :  { %v3570_v7 = vpop.f32.mrb[59].mxu1 }
 0x35a   :  { %v1813_v24 = vpop.f32.mrb[60].mxu1 }
 0x35b   :  { %v1819_v4 = vadd.f32 %v1813_v24, %v1757_v50  ;;  %v3577_v6 = vpop.f32.mrb[61].mxu1 }
 0x35c   :  { %v1816_v44 = vpop.f32.mrb[62].mxu1 }
 0x35d   :  { %v3578_v61 = vpop.f32.mrb[63].mxu1 }
 0x362   :  { %v1875_v15 = vpop.f32.mrb[64].mxu1 }
 0x363   :  { %v1881_v57 = vadd.f32 %v1875_v15, %v1819_v4  ;;  %v3585_v29 = vpop.f32.mrb[65].mxu1 }
 0x364   :  { %v1878_v48 = vpop.f32.mrb[66].mxu1 }
 0x365   :  { %v3586_v11 = vpop.f32.mrb[67].mxu1 }
 0x36a   :  { %v1937_v16 = vpop.f32.mrb[68].mxu1 }
 0x36b   :  { %v1943_v54 = vadd.f32 %v1937_v16, %v1881_v57  ;;  %v3593_v59 = vpop.f32.mrb[69].mxu1 }
 0x36c   :  { %v1940_v21 = vpop.f32.mrb[70].mxu1 }
 0x36d   :  { %v3594_v45 = vpop.f32.mrb[71].mxu1 }
 0x372   :  { %v1999_v30 = vpop.f32.mrb[72].mxu1 }
 0x373   :  { %v2005_v56 = vadd.f32 %v1999_v30, %v1943_v54  ;;  %v3601_v14 = vpop.f32.mrb[73].mxu1 }
 0x374   :  { %v2002_v19 = vpop.f32.mrb[74].mxu1 }
 0x375   :  { %v3602_v17 = vpop.f32.mrb[75].mxu1 }
 0x37a   :  { %v2061_v22 = vpop.f32.mrb[76].mxu1 }
 0x37b   :  { %v2067_v25 = vadd.f32 %v2061_v22, %v2005_v56  ;;  %v3609_v36 = vpop.f32.mrb[77].mxu1 }
 0x37c   :  { %v2064_v39 = vpop.f32.mrb[78].mxu1 }
 0x37d   :  { %v3610_v55 = vpop.f32.mrb[79].mxu1  ;;  %v3403_v39 = vld [vmem:[%s5194_s4] ss:$0 sm:$0xff] }
 0x382   :  { %v2123_v43 = vpop.f32.mrb[80].mxu1 }
 0x383   :  { %v2129_v3 = vadd.f32 %v2123_v43, %v2067_v25  ;;  %v3617_v20 = vpop.f32.mrb[81].mxu1 }
 0x384   :  { %v2126_v9 = vpop.f32.mrb[82].mxu1 }
 0x385   :  { %v3618_v38 = vpop.f32.mrb[83].mxu1 }
 0x38a   :  { %v2185_v23 = vpop.f32.mrb[84].mxu1 }
 0x38b   :  { %v2191_v31 = vadd.f32 %v2185_v23, %v2129_v3  ;;  %v3625_v1 = vpop.f32.mrb[85].mxu1  ;;  %v4014_v23 = vld [vmem:[%s5193_s7] sm:$0xff]  }
 0x38c   :  { %v2188_v27 = vpop.f32.mrb[86].mxu1  ;;  %v4015_v1 = vld [vmem:[%s5193_s7 + $0x8] sm:$0xff]  }
 0x38d   :  { %v3626_v10 = vpop.f32.mrb[87].mxu1  ;;  %v4016_v27 = vld [vmem:[%s5193_s7 + $0x10] sm:$0xff]  }
 0x38e   :  { %v4017_v10 = vld [vmem:[%s5193_s7 + $0x18] sm:$0xff]  }
 0x392   :  { %v2247_v60 = vpop.f32.mrb[88].mxu1 }
 0x393   :  { %v2253_v13 = vadd.f32 %v2247_v60, %v2191_v31  ;;  %v3633_v28 = vpop.f32.mrb[89].mxu1  ;;  %v4018_v60 = vld [vmem:[%s5193_s7 + $0x20] sm:$0xff]  }
 0x394   :  { %v2250_v34 = vpop.f32.mrb[90].mxu1  ;;  %v4020_v28 = vld [vmem:[%s5193_s7 + $0x30] sm:$0xff]  }
 0x395   :  { %v3634_v46 = vpop.f32.mrb[91].mxu1  ;;  %v4021_v34 = vld [vmem:[%s5193_s7 + $0x38] sm:$0xff]  }
 0x396   :  { %v3404_v46 = vld [vmem:[%s5195_s6] ss:$0 sm:$0xff] }
 0x39a   :  { %v2309_v49 = vpop.f32.mrb[92].mxu1 }
 0x39b   :  { %v2315_v63 = vadd.f32 %v2309_v49, %v2253_v13  ;;  %v3641_v40 = vpop.f32.mrb[93].mxu1  ;;  %v4019_v13 = vld [vmem:[%s5193_s7 + $0x28] sm:$0xff]  }
 0x39c   :  { %v2312_v53 = vpop.f32.mrb[94].mxu1 }
 0x39d   :  { %v3642_v32 = vpop.f32.mrb[95].mxu1 }
 0x3a2   :  { %v2371_v26 = vpop.f32.mrb[96].mxu1 }
 0x3a3   :  { %v2377_v62 = vadd.f32 %v2371_v26, %v2315_v63  ;;  %v3649_v35 = vpop.f32.mrb[97].mxu1 }
 0x3a4   :  { %v2374_v51 = vpop.f32.mrb[98].mxu1 }
 0x3a5   :  { %v3650_v33 = vpop.f32.mrb[99].mxu1 }
 0x3aa   :  { %v2433_v12 = vpop.f32.mrb[100].mxu1 }
 0x3ab   :  { %v2439_v2 = vadd.f32 %v2433_v12, %v2377_v62  ;;  %v3657_v52 = vpop.f32.mrb[101].mxu1 }
 0x3ac   :  { %v2436_v47 = vpop.f32.mrb[102].mxu1 }
 0x3ad   :  { %v3658_v50 = vpop.f32.mrb[103].mxu1 }
 0x3b2   :  { %v2495_v5 = vpop.f32.mrb[104].mxu1 }
 0x3b3   :  { %v2501_v37 = vadd.f32 %v2495_v5, %v2439_v2  ;;  %v3665_v7 = vpop.f32.mrb[105].mxu1 }
 0x3b4   :  { %v2498_v0 = vpop.f32.mrb[106].mxu1 }
 0x3b5   :  { %v3666_v24 = vpop.f32.mrb[107].mxu1 }
 0x3ba   :  { %v2557_v18 = vpop.f32.mrb[108].mxu1 }
 0x3bb   :  { %v2563_v4 = vadd.f32 %v2557_v18, %v2501_v37  ;;  %v3673_v6 = vpop.f32.mrb[109].mxu1 }
 0x3bc   :  { %v2560_v44 = vpop.f32.mrb[110].mxu1 }
 0x3bd   :  { %v3674_v61 = vpop.f32.mrb[111].mxu1 }
 0x3c2   :  { %v2619_v8 = vpop.f32.mrb[112].mxu1 }
 0x3c3   :  { %v2625_v15 = vadd.f32 %v2619_v8, %v2563_v4  ;;  %v3681_v58 = vpop.f32.mrb[113].mxu1 }
 0x3c4   :  { %v2622_v57 = vpop.f32.mrb[114].mxu1 }
 0x3c5   :  { %v3682_v29 = vpop.f32.mrb[115].mxu1 }
 0x3ca   :  { %v2681_v48 = vpop.f32.mrb[116].mxu1 }
 0x3cb   :  { %v2687_v11 = vadd.f32 %v2681_v48, %v2625_v15  ;;  %v3689_v41 = vpop.f32.mrb[117].mxu1 }
 0x3cc   :  { %v2684_v16 = vpop.f32.mrb[118].mxu1 }
 0x3cd   :  { %v3690_v54 = vpop.f32.mrb[119].mxu1 }
 0x3d2   :  { %v2743_v59 = vpop.f32.mrb[120].mxu1 }
 0x3d3   :  { %v2749_v21 = vadd.f32 %v2743_v59, %v2687_v11  ;;  %v3697_v45 = vpop.f32.mrb[121].mxu1 }
 0x3d4   :  { %v2746_v30 = vpop.f32.mrb[122].mxu1 }
 0x3d5   :  { %v3698_v56 = vpop.f32.mrb[123].mxu1 }
 0x3da   :  { %v2805_v14 = vpop.f32.mrb[124].mxu1 }
 0x3db   :  { %v2811_v19 = vadd.f32 %v2805_v14, %v2749_v21  ;;  %v3705_v17 = vpop.f32.mrb[125].mxu1 }
 0x3dc   :  { %v2808_v22 = vpop.f32.mrb[126].mxu1 }
 0x3dd   :  { %v3706_v25 = vpop.f32.mrb[127].mxu1 }
 0x3e2   :  { %v2867_v36 = vpop.f32.mrb[128].mxu1 }
 0x3e3   :  { %v2873_v55 = vadd.f32 %v2867_v36, %v2811_v19  ;;  %v3713_v43 = vpop.f32.mrb[129].mxu1 }
 0x3e4   :  { %v2870_v3 = vpop.f32.mrb[130].mxu1 }
 0x3e5   :  { %v2881_v20 = vadd.f32 %v3403_v39, %v2873_v55  ;;  %v3714_v9 = vpop.f32.mrb[131].mxu1 }
 0x3e7   :  { %v2882_v38 = vmax.f32 %v2881_v20, 0.0 }
 0x3e9   :  { %v2883_v31 = vpack.c.bf16 %v2882_v38, %v2882_v38 }
 0x3eb   :  { %3732 = vmatmul.mubr.bf16.vlgmr.msra.gmra.mrb[132].mxu1 %v2883_v31 }
 0x3ec   :  { %3736 = vmatpush3.bf16.msra.mxu1 %v4014_v23  ;;  %3751 = vmatprep.mubr.msk.bf16.mxu1 %vm4024_vm0, %v5273_v42 }
 0x3ed   :  { %3737 = vmatprep.subr.bf16.mxu1 %v5273_v42 }
 0x3f0   :  { %3738 = vmatpush3.bf16.msra.mxu1 %v4015_v1 }
 0x3f1   :  { %3739 = vmatprep.subr.bf16.mxu1 %v5273_v42 }
 0x3f4   :  { %3740 = vmatpush3.bf16.msra.mxu1 %v4016_v27 }
 0x3f5   :  { %3741 = vmatprep.subr.bf16.mxu1 %v5273_v42 }
 0x3f8   :  { %3742 = vmatpush3.bf16.msra.mxu1 %v4017_v10 }
 0x3f9   :  { %3743 = vmatprep.subr.bf16.mxu1 %v5273_v42 }
 0x3fc   :  { %3744 = vmatpush3.bf16.msra.mxu1 %v4018_v60 }
 0x3fd   :  { %3745 = vmatprep.subr.bf16.mxu1 %v5273_v42 }
 0x400   :  { %3746 = vmatpush3.bf16.msra.mxu1 %v4019_v13 }
 0x401   :  { %3747 = vmatprep.subr.bf16.mxu1 %v5273_v42 }
 0x404   :  { %3748 = vmatpush3.bf16.msra.mxu1 %v4020_v28 }
 0x405   :  { %3749 = vmatprep.subr.bf16.mxu1 %v5273_v42  ;;  %v3413_v42 = vld [vmem:[%s5196_s8] ss:$0 sm:$0xff] }
 0x408   :  { %3750 = vmatpush3.bf16.msra.mxu1 %v4021_v34 }
 0x4be   :  { %v2989_v49 = vpop.f32.mrb[132].mxu1 }
 0x4bf   :  { %v2990_v63 = vadd.f32 %v3404_v46, %v2989_v49  ;;  %v3733_v40 = vpop.f32.mrb[133].mxu1 }
 0x4c0   :  { %v2992_v53 = vpop.f32.mrb[134].mxu1 }
 0x4c1   :  { %v2995_v32 = vmax.f32 %v2990_v63, 0.0  ;;  %v3734_v26 = vpop.f32.mrb[135].mxu1 }
 0x4c3   :  { %v2996_v62 = vpack.c.bf16 %v2995_v32, %v2995_v32 }
 0x4c5   :  { %3752 = vmatmul.mubr.bf16.vlgmr.msra.gmra.mrb[136].mxu1 %v2996_v62 }
 0x598   :  { %v3102_v35 = vpop.f32.mrb[136].mxu1 }
 0x599   :  { %v3103_v51 = vadd.f32 %v3413_v42, %v3102_v35  ;;  %v3753_v33 = vpop.f32.mrb[137].mxu1 }
 0x59a   :  { %v3105_v12 = vpop.f32.mrb[138].mxu1 }
 0x59b   :  { %v3108_v2 = vmax.f32 %v3103_v51, 0.0  ;;  %v3754_v52 = vpop.f32.mrb[139].mxu1 }
 0x59d   :  { %3110 = vst.msk [vmem:[%s5197_s9] sm:$0xff] %vm3109_vm2, %v3108_v2 }

</bundles_post_ra>
